<compile_context>
chip_gen: v7x
topology: tpu7x:2x2x1
jax: 0.10.0
libtpu: 0.0.40
codegen_flags: <defaults>
</compile_context>

<pallas_src>
import functools
import math

import jax
import jax.numpy as jnp
from jax.experimental import pallas as pl
from jax.experimental.pallas import tpu as pltpu


# ----------------------------------------------------------------------------
# Fused encoder-stack + projection kernel.  grid = (batch, layer); the running
# activation lives in the VMEM scratch `xbuf_ref` across the layer axis.
# ----------------------------------------------------------------------------
def _encoder_stack_kernel(lens_ref,
                          x_ref, wqkv_ref, bqkv_ref, ow_ref, ob_ref,
                          rk_ref, rv_ref, g1_ref, be1_ref,
                          w1_ref, cb1_ref, w2_ref, cb2_ref, g2_ref, be2_ref,
                          posemb_ref, wp_ref, bp_ref,
                          o_ref, xbuf_ref,
                          *, n_heads, window, ksize):
    b = pl.program_id(0)
    l = pl.program_id(1)
    n_layers = pl.num_programs(1)
    T, H = xbuf_ref.shape
    kc = H // n_heads
    nrel = 2 * window + 1
    pad_l = (ksize - 1) // 2
    scale = 1.0 / math.sqrt(kc)

    # masks derived from the scalar-prefetched lengths (SMEM)
    length = lens_ref[b]
    row_t = jax.lax.broadcasted_iota(jnp.int32, (T, 1), 0)
    m_col = (row_t < length).astype(jnp.float32)               # (T, 1)
    col_s = jax.lax.broadcasted_iota(jnp.int32, (1, T), 1)
    key_pad = col_s >= length                                   # (1, T) bool

    # first layer: load + entry-mask activations into the resident buffer
    @pl.when(l == 0)
    def _():
        xbuf_ref[...] = x_ref[0] * m_col

    x = xbuf_ref[...]                                           # (T, H) f32
    x_bf = x.astype(jnp.bfloat16)

    # only resident (T, T) helper: integer relative-offset map (col - row)
    rr = jax.lax.broadcasted_iota(jnp.int32, (T, T), 0)
    cc = jax.lax.broadcasted_iota(jnp.int32, (T, T), 1)
    rel = cc - rr

    rk = rk_ref[l]                                              # (2w+1, kc) f32
    rv = rv_ref[l]                                              # (2w+1, kc) f32

    # ---- multi-head self-attention ------------------------------------------
    qkv = jnp.dot(x_bf, wqkv_ref[l],
                  preferred_element_type=jnp.float32) + bqkv_ref[l]   # (T, 3H)

    head_outs = []
    for h in range(n_heads):
        qh = qkv[:, h * kc:(h + 1) * kc] * scale
        kh = qkv[:, H + h * kc:H + (h + 1) * kc]
        vh = qkv[:, 2 * H + h * kc:2 * H + (h + 1) * kc]

        # content scores (bf16 MXU inputs, f32 accumulation, trans-B)
        scores = jax.lax.dot_general(qh.astype(jnp.bfloat16),
                                     kh.astype(jnp.bfloat16),
                                     (((1,), (1,)), ((), ())),
                                     preferred_element_type=jnp.float32)
        # key-side relative logits (T, 2w+1), scattered onto the +-w diagonals:
        # compare folded into the add, no materialized band arrays.
        L = jax.lax.dot_general(qh, rk, (((1,), (1,)), ((), ())),
                                preferred_element_type=jnp.float32)
        for j in range(nrel):
            scores = scores + jnp.where(rel == (j - window), L[:, j:j + 1], 0.0)

        scores = jnp.where(key_pad, -1e4, scores)               # mask key columns
        smax = jnp.max(scores, axis=-1, keepdims=True)
        e = jnp.exp(scores - smax)
        denom = jnp.sum(e, axis=-1, keepdims=True)
        p = e * pl.reciprocal(denom, approx=True)

        outh = jnp.dot(p.astype(jnp.bfloat16), vh.astype(jnp.bfloat16),
                       preferred_element_type=jnp.float32)
        # value-side relative positions: per-band row-sums -> (T, 2w+1),
        # then ONE small matmul against rv.
        relw = jnp.concatenate(
            [jnp.sum(jnp.where(rel == (j - window), p, 0.0),
                     axis=-1, keepdims=True) for j in range(nrel)], axis=-1)
        outh = outh + jnp.dot(relw, rv, preferred_element_type=jnp.float32)
        head_outs.append(outh)

    attn_cat = head_outs[0] if n_heads == 1 else jnp.concatenate(head_outs, axis=-1)
    attn = jnp.dot(attn_cat.astype(jnp.bfloat16), ow_ref[l],
                   preferred_element_type=jnp.float32) + ob_ref[l]

    def layer_norm(y, gamma, beta):
        mu = jnp.mean(y, axis=-1, keepdims=True)
        var = jnp.mean(jnp.square(y - mu), axis=-1, keepdims=True)
        return (y - mu) * jax.lax.rsqrt(var + 1e-5) * gamma + beta

    x1 = layer_norm(x + attn, g1_ref[l], be1_ref[l])

    # ---- FFN: conv(k) -> relu -> conv(k), "same" padding, masked --------------
    # No concatenate / unaligned slices: matmul per tap on the unshifted input,
    # shift the result with pltpu.roll (XLU) and zero the wrapped boundary rows.
    def same_conv(inp_bf, w_ref, bias):
        acc = None
        for kk in range(ksize):
            z = jnp.dot(inp_bf, w_ref[l * ksize + kk],
                        preferred_element_type=jnp.float32)     # (T, Cout)
            shift = pad_l - kk
            if shift != 0:
                z = pltpu.roll(z, shift=shift % T, axis=0)
                if shift > 0:
                    z = jnp.where(row_t < shift, 0.0, z)
                else:
                    z = jnp.where(row_t >= T + shift, 0.0, z)
            acc = z if acc is None else acc + z
        return acc + bias

    y_bf = (x1 * m_col).astype(jnp.bfloat16)
    h1 = jnp.maximum(same_conv(y_bf, w1_ref, cb1_ref[l]), 0.0) * m_col
    ffn = same_conv(h1.astype(jnp.bfloat16), w2_ref, cb2_ref[l]) * m_col

    x2 = layer_norm(x1 + ffn, g2_ref[l], be2_ref[l])

    @pl.when(l < n_layers - 1)
    def _():
        xbuf_ref[...] = x2

    # final-layer epilogue: exit mask + sinusoidal positions + 1x1 projection.
    # Only the last layer touches the (lane-dense) HBM output block.
    @pl.when(l == n_layers - 1)
    def _():
        xo = x2 * m_col
        pemb = posemb_ref[...] * m_col          # positions 1..T, 0 at padding
        stats = jnp.dot((xo + pemb).astype(jnp.bfloat16), wp_ref[...],
                        preferred_element_type=jnp.float32) + bp_ref[...]
        o_ref[0] = stats * m_col


# ----------------------------------------------------------------------------
# pallas_call wrapper
# ----------------------------------------------------------------------------
def _run_encoder_stack(x, lengths, sp, proj_w, proj_b, pos_emb, *,
                       n_heads, window, ksize):
    B, T, H = x.shape
    n_layers = sp["g1"].shape[0]
    C2 = proj_w.shape[1]

    def full_spec(arr):
        nd = arr.ndim
        # whole array resident in VMEM; constant block index -> DMA'd once
        return pl.BlockSpec(arr.shape, lambda b, l, lens, nd=nd: (0,) * nd)

    in_specs = [
        pl.BlockSpec((1, T, H), lambda b, l, lens: (b, 0, 0)),   # x
        full_spec(sp["wqkv"]), full_spec(sp["bqkv"]),
        full_spec(sp["ow"]), full_spec(sp["ob"]),
        full_spec(sp["rk"]), full_spec(sp["rv"]),
        full_spec(sp["g1"]), full_spec(sp["be1"]),
        full_spec(sp["w1"]), full_spec(sp["cb1"]),
        full_spec(sp["w2"]), full_spec(sp["cb2"]),
        full_spec(sp["g2"]), full_spec(sp["be2"]),
        full_spec(pos_emb), full_spec(proj_w), full_spec(proj_b),
    ]

    kernel = functools.partial(_encoder_stack_kernel,
                               n_heads=n_heads, window=window, ksize=ksize)
    return pl.pallas_call(
        kernel,
        grid_spec=pltpu.PrefetchScalarGridSpec(
            num_scalar_prefetch=1,
            grid=(B, n_layers),
            in_specs=in_specs,
            out_specs=pl.BlockSpec((1, T, C2), lambda b, l, lens: (b, 0, 0)),
            scratch_shapes=[pltpu.VMEM((T, H), jnp.float32)],
        ),
        out_shape=jax.ShapeDtypeStruct((B, T, C2), jnp.float32),
        compiler_params=pltpu.CompilerParams(
            dimension_semantics=("parallel", "arbitrary"),
            vmem_limit_bytes=48 * 1024 * 1024),
    )(lengths, x, sp["wqkv"], sp["bqkv"], sp["ow"], sp["ob"], sp["rk"], sp["rv"],
      sp["g1"], sp["be1"], sp["w1"], sp["cb1"], sp["w2"], sp["cb2"],
      sp["g2"], sp["be2"], pos_emb, proj_w, proj_b)


# ----------------------------------------------------------------------------
# Parameter construction (deterministic, synthetic) and helpers
# ----------------------------------------------------------------------------
def _sin_pos_embed(T, dim):
    """Sinusoidal embeddings for positions 1..T (tensor2tensor layout:
    [sin | cos]); position 0 (= padding) is handled by masking in-kernel."""
    assert dim % 2 == 0
    half = dim // 2
    step = math.log(10000.0) / (half - 1)
    inv = jnp.exp(jnp.arange(half, dtype=jnp.float32) * -step)
    ang = jnp.arange(1, T + 1, dtype=jnp.float32)[:, None] * inv[None, :]
    return jnp.concatenate([jnp.sin(ang), jnp.cos(ang)], axis=1)   # (T, dim)


def init_params(key, *, out_channels, hidden, filt, n_heads, n_layers, ksize,
                window=4):
    kc = hidden // n_heads
    L = n_layers
    keys = iter(jax.random.split(key, 32))

    def nrm(shape, std, dtype=jnp.float32):
        return (std * jax.random.normal(next(keys), shape, jnp.float32)).astype(dtype)

    bf = jnp.bfloat16
    params = {
        "emb_phone": nrm((500, hidden), hidden ** -0.5),
        "emb_pitch": nrm((256, hidden), hidden ** -0.5),
        "proj_w": nrm((hidden, out_channels * 2), hidden ** -0.5, bf),
        "proj_b": nrm((1, out_channels * 2), 0.02),
        # per-layer weights stacked along a leading L axis, bf16 MXU inputs
        "stack": {
            "wqkv": nrm((L, hidden, 3 * hidden), hidden ** -0.5, bf),   # [q|k|v]
            "bqkv": nrm((L, 1, 3 * hidden), 0.02),
            "ow": nrm((L, hidden, hidden), hidden ** -0.5, bf),
            "ob": nrm((L, 1, hidden), 0.02),
            "rk": nrm((L, 2 * window + 1, kc), kc ** -0.5),
            "rv": nrm((L, 2 * window + 1, kc), kc ** -0.5),
            "g1": jnp.ones((L, 1, hidden), jnp.float32),
            "be1": jnp.zeros((L, 1, hidden), jnp.float32),
            "w1": nrm((L * ksize, hidden, filt), (hidden * ksize) ** -0.5, bf),
            "cb1": nrm((L, 1, filt), 0.02),
            "w2": nrm((L * ksize, filt, hidden), (filt * ksize) ** -0.5, bf),
            "cb2": nrm((L, 1, hidden), 0.02),
            "g2": jnp.ones((L, 1, hidden), jnp.float32),
            "be2": jnp.zeros((L, 1, hidden), jnp.float32),
        },
    }
    return params


# ----------------------------------------------------------------------------
# Forward (matches TextEncoder.forward semantics; dropout = identity / eval)
# ----------------------------------------------------------------------------
def text_encoder_forward(params, phone, pitch, lengths, *,
                         n_heads, window, ksize):
    B, T = phone.shape
    H = params["emb_phone"].shape[1]
    lengths = lengths.astype(jnp.int32)

    # embeddings + scale (gather is glue; elementwise is trivial)
    x = params["emb_phone"][phone] + params["emb_pitch"][pitch]      # (B, T, H)
    x = x * math.sqrt(H)

    # sinusoidal positions derived from lengths (valid frames are a prefix, so
    # make_positions == t+1 for t < length, 0 otherwise); table slice is static.
    pos_emb = _sin_pos_embed(T, H)                                    # (T, H)

    # one fused pallas_call: encoder stack + position add + stats projection
    stats = _run_encoder_stack(x, lengths, params["stack"],
                               params["proj_w"], params["proj_b"], pos_emb,
                               n_heads=n_heads, window=window, ksize=ksize)

    out_ch = stats.shape[-1] // 2
    m_out = jnp.transpose(stats[:, :, :out_ch], (0, 2, 1))   # (B, out, T)
    logs = jnp.transpose(stats[:, :, out_ch:], (0, 2, 1))    # (B, out, T)
    mask_row = (jnp.arange(T)[None, :] < lengths[:, None]
                ).astype(jnp.float32)[:, None, :]            # (B, 1, T)
    return m_out, logs, mask_row


# ----------------------------------------------------------------------------
if __name__ == "__main__":
    # small but lane-dense demo sizes (H, filt, 2*out are multiples of 128)
    out_channels, hidden, filt = 64, 128, 256
    n_heads, n_layers, ksize = 2, 3, 3
    window = 4                      # VITS attentions.Encoder default window_size
    B, T = 2, 64

    root = jax.random.PRNGKey(0)
    kp, kph, kpi = jax.random.split(root, 3)

    params = init_params(kp, out_channels=out_channels, hidden=hidden,
                         filt=filt, n_heads=n_heads, n_layers=n_layers,
                         ksize=ksize, window=window)

    phone = jax.random.randint(kph, (B, T), 0, 500, dtype=jnp.int32)
    pitch = jax.random.randint(kpi, (B, T), 0, 256, dtype=jnp.int32)
    lengths = jnp.array([T, 45], dtype=jnp.int32)

    m, logs, x_mask = text_encoder_forward(params, phone, pitch, lengths,
                                           n_heads=n_heads, window=window,
                                           ksize=ksize)
    jax.block_until_ready((m, logs, x_mask))
    assert m.shape == (B, out_channels, T)
    assert logs.shape == (B, out_channels, T)
    assert x_mask.shape == (B, 1, T)
    assert bool(jnp.isfinite(m).all()) and bool(jnp.isfinite(logs).all())
    print("KERNEL_OK")
</pallas_src>

<mosaic_0001>
module attributes {stable_mosaic.version = 11 : i64} {
  func.func @_encoder_stack_kernel(%arg0: i32, %arg1: i32, %arg2: memref<2xi32, #tpu.memory_space<smem>>, %arg3: memref<1x64x128xf32, #tpu.memory_space<vmem>>, %arg4: memref<3x128x384xbf16, #tpu.memory_space<vmem>>, %arg5: memref<3x1x384xf32, #tpu.memory_space<vmem>>, %arg6: memref<3x128x128xbf16, #tpu.memory_space<vmem>>, %arg7: memref<3x1x128xf32, #tpu.memory_space<vmem>>, %arg8: memref<3x9x64xf32, #tpu.memory_space<vmem>>, %arg9: memref<3x9x64xf32, #tpu.memory_space<vmem>>, %arg10: memref<3x1x128xf32, #tpu.memory_space<vmem>>, %arg11: memref<3x1x128xf32, #tpu.memory_space<vmem>>, %arg12: memref<9x128x256xbf16, #tpu.memory_space<vmem>>, %arg13: memref<3x1x256xf32, #tpu.memory_space<vmem>>, %arg14: memref<9x256x128xbf16, #tpu.memory_space<vmem>>, %arg15: memref<3x1x128xf32, #tpu.memory_space<vmem>>, %arg16: memref<3x1x128xf32, #tpu.memory_space<vmem>>, %arg17: memref<3x1x128xf32, #tpu.memory_space<vmem>>, %arg18: memref<64x128xf32, #tpu.memory_space<vmem>>, %arg19: memref<128x128xbf16, #tpu.memory_space<vmem>>, %arg20: memref<1x128xf32, #tpu.memory_space<vmem>>, %arg21: memref<1x64x128xf32, #tpu.memory_space<vmem>>, %arg22: memref<64x128xf32, #tpu.memory_space<vmem>>) attributes {dimension_semantics = [#tpu.dimension_semantics<parallel>, #tpu.dimension_semantics<arbitrary>], iteration_bounds = array<i64: 2, 3>, scalar_prefetch = 1 : i64, scratch_operands = 1 : i64, tpu.core_type = #tpu.core_type<tc>, window_params = [{transform_indices = @transform_0, window_bounds = array<i64: 1, 64, 128>}, {pipeline_mode = #tpu.pipeline_mode<synchronous>, transform_indices = @transform_1, window_bounds = array<i64: 3, 128, 384>}, {pipeline_mode = #tpu.pipeline_mode<synchronous>, transform_indices = @transform_2, window_bounds = array<i64: 3, 1, 384>}, {pipeline_mode = #tpu.pipeline_mode<synchronous>, transform_indices = @transform_3, window_bounds = array<i64: 3, 128, 128>}, {pipeline_mode = #tpu.pipeline_mode<synchronous>, transform_indices = @transform_4, window_bounds = array<i64: 3, 1, 128>}, {pipeline_mode = #tpu.pipeline_mode<synchronous>, transform_indices = @transform_5, window_bounds = array<i64: 3, 9, 64>}, {pipeline_mode = #tpu.pipeline_mode<synchronous>, transform_indices = @transform_6, window_bounds = array<i64: 3, 9, 64>}, {pipeline_mode = #tpu.pipeline_mode<synchronous>, transform_indices = @transform_7, window_bounds = array<i64: 3, 1, 128>}, {pipeline_mode = #tpu.pipeline_mode<synchronous>, transform_indices = @transform_8, window_bounds = array<i64: 3, 1, 128>}, {pipeline_mode = #tpu.pipeline_mode<synchronous>, transform_indices = @transform_9, window_bounds = array<i64: 9, 128, 256>}, {pipeline_mode = #tpu.pipeline_mode<synchronous>, transform_indices = @transform_10, window_bounds = array<i64: 3, 1, 256>}, {pipeline_mode = #tpu.pipeline_mode<synchronous>, transform_indices = @transform_11, window_bounds = array<i64: 9, 256, 128>}, {pipeline_mode = #tpu.pipeline_mode<synchronous>, transform_indices = @transform_12, window_bounds = array<i64: 3, 1, 128>}, {pipeline_mode = #tpu.pipeline_mode<synchronous>, transform_indices = @transform_13, window_bounds = array<i64: 3, 1, 128>}, {pipeline_mode = #tpu.pipeline_mode<synchronous>, transform_indices = @transform_14, window_bounds = array<i64: 3, 1, 128>}, {pipeline_mode = #tpu.pipeline_mode<synchronous>, transform_indices = @transform_15, window_bounds = array<i64: 64, 128>}, {pipeline_mode = #tpu.pipeline_mode<synchronous>, transform_indices = @transform_16, window_bounds = array<i64: 128, 128>}, {pipeline_mode = #tpu.pipeline_mode<synchronous>, transform_indices = @transform_17, window_bounds = array<i64: 1, 128>}, {transform_indices = @transform_18, window_bounds = array<i64: 1, 64, 128>}]} {
    %0 = arith.index_cast %arg0 : i32 to index
    %1 = memref.load %arg2[%0] : memref<2xi32, #tpu.memory_space<smem>>
    %2 = tpu.iota {dimensions = array<i32: 0>} : vector<64x1xi32>
    %3 = vector.broadcast %1 : i32 to vector<64x1xi32>
    %4 = arith.cmpi slt, %2, %3 : vector<64x1xi32>
    %5 = arith.extui %4 : vector<64x1xi1> to vector<64x1xi32>
    %6 = arith.sitofp %5 : vector<64x1xi32> to vector<64x1xf32>
    %7 = tpu.iota {dimensions = array<i32: 1>} : vector<1x64xi32>
    %8 = vector.broadcast %1 : i32 to vector<1x64xi32>
    %9 = arith.cmpi sge, %7, %8 : vector<1x64xi32>
    %c0_i32 = arith.constant 0 : i32
    %10 = arith.cmpi eq, %arg1, %c0_i32 : i32
    %11 = arith.extui %10 : i1 to i32
    %c0_i32_0 = arith.constant 0 : i32
    %12 = arith.cmpi ne, %11, %c0_i32_0 : i32
    scf.if %12 {
      %c0_181 = arith.constant 0 : index
      %c0_182 = arith.constant 0 : index
      %c0_183 = arith.constant 0 : index
      %506 = vector.load %arg3[%c0_181, %c0_182, %c0_183] : memref<1x64x128xf32, #tpu.memory_space<vmem>>, vector<1x64x128xf32>
      %507 = vector.shape_cast %506 : vector<1x64x128xf32> to vector<64x128xf32>
      %508 = vector.broadcast %6 : vector<64x1xf32> to vector<64x128xf32>
      %509 = arith.mulf %507, %508 : vector<64x128xf32>
      %c0_184 = arith.constant 0 : index
      %c0_185 = arith.constant 0 : index
      %510 = vector.load %arg22[%c0_184, %c0_185] : memref<64x128xf32, #tpu.memory_space<vmem>>, vector<64x128xf32>
      tpu.vector_store %arg22[%c0_184, %c0_185], %509 {strides = array<i32>} : memref<64x128xf32, #tpu.memory_space<vmem>>, vector<64x128xf32>,
    } else {
    }
    %c0 = arith.constant 0 : index
    %c0_1 = arith.constant 0 : index
    %13 = vector.load %arg22[%c0, %c0_1] : memref<64x128xf32, #tpu.memory_space<vmem>>, vector<64x128xf32>
    %14 = arith.truncf %13 : vector<64x128xf32> to vector<64x128xbf16>
    %15 = tpu.iota {dimensions = array<i32: 0>} : vector<64x64xi32>
    %16 = tpu.iota {dimensions = array<i32: 1>} : vector<64x64xi32>
    %17 = arith.subi %16, %15 : vector<64x64xi32>
    %18 = arith.index_cast %arg1 : i32 to index
    %c0_2 = arith.constant 0 : index
    %c0_3 = arith.constant 0 : index
    %19 = vector.load %arg8[%18, %c0_2, %c0_3] : memref<3x9x64xf32, #tpu.memory_space<vmem>>, vector<1x9x64xf32>
    %20 = vector.shape_cast %19 : vector<1x9x64xf32> to vector<9x64xf32>
    %21 = arith.index_cast %arg1 : i32 to index
    %c0_4 = arith.constant 0 : index
    %c0_5 = arith.constant 0 : index
    %22 = vector.load %arg9[%21, %c0_4, %c0_5] : memref<3x9x64xf32, #tpu.memory_space<vmem>>, vector<1x9x64xf32>
    %23 = vector.shape_cast %22 : vector<1x9x64xf32> to vector<9x64xf32>
    %24 = arith.index_cast %arg1 : i32 to index
    %c0_6 = arith.constant 0 : index
    %c0_7 = arith.constant 0 : index
    %25 = vector.load %arg4[%24, %c0_6, %c0_7] : memref<3x128x384xbf16, #tpu.memory_space<vmem>>, vector<1x128x384xbf16>
    %26 = vector.shape_cast %25 : vector<1x128x384xbf16> to vector<128x384xbf16>
    %cst = arith.constant dense<0.000000e+00> : vector<64x384xf32>
    %27 = tpu.matmul %14, %26, %cst {dimension_numbers = #tpu.dot_dimension_numbers<[1], [0], [0], [1], [0, 0, 1, 1], [], []>} : vector<64x128xbf16>, vector<128x384xbf16>, vector<64x384xf32> -> vector<64x384xf32>
    %28 = arith.index_cast %arg1 : i32 to index
    %c0_8 = arith.constant 0 : index
    %c0_9 = arith.constant 0 : index
    %29 = vector.load %arg5[%28, %c0_8, %c0_9] : memref<3x1x384xf32, #tpu.memory_space<vmem>>, vector<1x1x384xf32>
    %30 = vector.shape_cast %29 : vector<1x1x384xf32> to vector<1x384xf32>
    %31 = vector.broadcast %30 : vector<1x384xf32> to vector<64x384xf32>
    %32 = arith.addf %27, %31 : vector<64x384xf32>
    %33 = vector.extract_strided_slice %32 {offsets = [0, 0], sizes = [64, 64], strides = [1, 1]} : vector<64x384xf32> to vector<64x64xf32>
    %cst_10 = arith.constant 1.250000e-01 : f32
    %34 = vector.broadcast %cst_10 : f32 to vector<64x64xf32>
    %35 = arith.mulf %33, %34 : vector<64x64xf32>
    %36 = vector.extract_strided_slice %32 {offsets = [0, 128], sizes = [64, 64], strides = [1, 1]} : vector<64x384xf32> to vector<64x64xf32>
    %37 = vector.extract_strided_slice %32 {offsets = [0, 256], sizes = [64, 64], strides = [1, 1]} : vector<64x384xf32> to vector<64x64xf32>
    %38 = arith.truncf %35 : vector<64x64xf32> to vector<64x64xbf16>
    %39 = arith.truncf %36 : vector<64x64xf32> to vector<64x64xbf16>
    %cst_11 = arith.constant dense<0.000000e+00> : vector<64x64xf32>
    %40 = tpu.matmul %38, %39, %cst_11 {dimension_numbers = #tpu.dot_dimension_numbers<[1], [1], [0], [0], [0, 0, 1, 0], [], []>} : vector<64x64xbf16>, vector<64x64xbf16>, vector<64x64xf32> -> vector<64x64xf32>
    %cst_12 = arith.constant dense<0.000000e+00> : vector<64x9xf32>
    %41 = tpu.matmul %35, %20, %cst_12 {dimension_numbers = #tpu.dot_dimension_numbers<[1], [1], [0], [0], [0, 0, 1, 0], [], []>} : vector<64x64xf32>, vector<9x64xf32>, vector<64x9xf32> -> vector<64x9xf32>
    %c-4_i32 = arith.constant -4 : i32
    %42 = vector.broadcast %c-4_i32 : i32 to vector<64x64xi32>
    %43 = arith.cmpi eq, %17, %42 : vector<64x64xi32>
    %44 = vector.extract_strided_slice %41 {offsets = [0, 0], sizes = [64, 1], strides = [1, 1]} : vector<64x9xf32> to vector<64x1xf32>
    %cst_13 = arith.constant 0.000000e+00 : f32
    %45 = vector.shape_cast %44 : vector<64x1xf32> to vector<64x1xf32>
    %46 = vector.broadcast %45 : vector<64x1xf32> to vector<64x64xf32>
    %47 = vector.broadcast %cst_13 : f32 to vector<64x64xf32>
    %48 = arith.select %43, %46, %47 : vector<64x64xi1>, vector<64x64xf32>
    %49 = arith.addf %40, %48 : vector<64x64xf32>
    %c-3_i32 = arith.constant -3 : i32
    %50 = vector.broadcast %c-3_i32 : i32 to vector<64x64xi32>
    %51 = arith.cmpi eq, %17, %50 : vector<64x64xi32>
    %52 = vector.extract_strided_slice %41 {offsets = [0, 1], sizes = [64, 1], strides = [1, 1]} : vector<64x9xf32> to vector<64x1xf32>
    %cst_14 = arith.constant 0.000000e+00 : f32
    %53 = vector.shape_cast %52 : vector<64x1xf32> to vector<64x1xf32>
    %54 = vector.broadcast %53 : vector<64x1xf32> to vector<64x64xf32>
    %55 = vector.broadcast %cst_14 : f32 to vector<64x64xf32>
    %56 = arith.select %51, %54, %55 : vector<64x64xi1>, vector<64x64xf32>
    %57 = arith.addf %49, %56 : vector<64x64xf32>
    %c-2_i32 = arith.constant -2 : i32
    %58 = vector.broadcast %c-2_i32 : i32 to vector<64x64xi32>
    %59 = arith.cmpi eq, %17, %58 : vector<64x64xi32>
    %60 = vector.extract_strided_slice %41 {offsets = [0, 2], sizes = [64, 1], strides = [1, 1]} : vector<64x9xf32> to vector<64x1xf32>
    %cst_15 = arith.constant 0.000000e+00 : f32
    %61 = vector.shape_cast %60 : vector<64x1xf32> to vector<64x1xf32>
    %62 = vector.broadcast %61 : vector<64x1xf32> to vector<64x64xf32>
    %63 = vector.broadcast %cst_15 : f32 to vector<64x64xf32>
    %64 = arith.select %59, %62, %63 : vector<64x64xi1>, vector<64x64xf32>
    %65 = arith.addf %57, %64 : vector<64x64xf32>
    %c-1_i32 = arith.constant -1 : i32
    %66 = vector.broadcast %c-1_i32 : i32 to vector<64x64xi32>
    %67 = arith.cmpi eq, %17, %66 : vector<64x64xi32>
    %68 = vector.extract_strided_slice %41 {offsets = [0, 3], sizes = [64, 1], strides = [1, 1]} : vector<64x9xf32> to vector<64x1xf32>
    %cst_16 = arith.constant 0.000000e+00 : f32
    %69 = vector.shape_cast %68 : vector<64x1xf32> to vector<64x1xf32>
    %70 = vector.broadcast %69 : vector<64x1xf32> to vector<64x64xf32>
    %71 = vector.broadcast %cst_16 : f32 to vector<64x64xf32>
    %72 = arith.select %67, %70, %71 : vector<64x64xi1>, vector<64x64xf32>
    %73 = arith.addf %65, %72 : vector<64x64xf32>
    %c0_i32_17 = arith.constant 0 : i32
    %74 = vector.broadcast %c0_i32_17 : i32 to vector<64x64xi32>
    %75 = arith.cmpi eq, %17, %74 : vector<64x64xi32>
    %76 = vector.extract_strided_slice %41 {offsets = [0, 4], sizes = [64, 1], strides = [1, 1]} : vector<64x9xf32> to vector<64x1xf32>
    %cst_18 = arith.constant 0.000000e+00 : f32
    %77 = vector.shape_cast %76 : vector<64x1xf32> to vector<64x1xf32>
    %78 = vector.broadcast %77 : vector<64x1xf32> to vector<64x64xf32>
    %79 = vector.broadcast %cst_18 : f32 to vector<64x64xf32>
    %80 = arith.select %75, %78, %79 : vector<64x64xi1>, vector<64x64xf32>
    %81 = arith.addf %73, %80 : vector<64x64xf32>
    %c1_i32 = arith.constant 1 : i32
    %82 = vector.broadcast %c1_i32 : i32 to vector<64x64xi32>
    %83 = arith.cmpi eq, %17, %82 : vector<64x64xi32>
    %84 = vector.extract_strided_slice %41 {offsets = [0, 5], sizes = [64, 1], strides = [1, 1]} : vector<64x9xf32> to vector<64x1xf32>
    %cst_19 = arith.constant 0.000000e+00 : f32
    %85 = vector.shape_cast %84 : vector<64x1xf32> to vector<64x1xf32>
    %86 = vector.broadcast %85 : vector<64x1xf32> to vector<64x64xf32>
    %87 = vector.broadcast %cst_19 : f32 to vector<64x64xf32>
    %88 = arith.select %83, %86, %87 : vector<64x64xi1>, vector<64x64xf32>
    %89 = arith.addf %81, %88 : vector<64x64xf32>
    %c2_i32 = arith.constant 2 : i32
    %90 = vector.broadcast %c2_i32 : i32 to vector<64x64xi32>
    %91 = arith.cmpi eq, %17, %90 : vector<64x64xi32>
    %92 = vector.extract_strided_slice %41 {offsets = [0, 6], sizes = [64, 1], strides = [1, 1]} : vector<64x9xf32> to vector<64x1xf32>
    %cst_20 = arith.constant 0.000000e+00 : f32
    %93 = vector.shape_cast %92 : vector<64x1xf32> to vector<64x1xf32>
    %94 = vector.broadcast %93 : vector<64x1xf32> to vector<64x64xf32>
    %95 = vector.broadcast %cst_20 : f32 to vector<64x64xf32>
    %96 = arith.select %91, %94, %95 : vector<64x64xi1>, vector<64x64xf32>
    %97 = arith.addf %89, %96 : vector<64x64xf32>
    %c3_i32 = arith.constant 3 : i32
    %98 = vector.broadcast %c3_i32 : i32 to vector<64x64xi32>
    %99 = arith.cmpi eq, %17, %98 : vector<64x64xi32>
    %100 = vector.extract_strided_slice %41 {offsets = [0, 7], sizes = [64, 1], strides = [1, 1]} : vector<64x9xf32> to vector<64x1xf32>
    %cst_21 = arith.constant 0.000000e+00 : f32
    %101 = vector.shape_cast %100 : vector<64x1xf32> to vector<64x1xf32>
    %102 = vector.broadcast %101 : vector<64x1xf32> to vector<64x64xf32>
    %103 = vector.broadcast %cst_21 : f32 to vector<64x64xf32>
    %104 = arith.select %99, %102, %103 : vector<64x64xi1>, vector<64x64xf32>
    %105 = arith.addf %97, %104 : vector<64x64xf32>
    %c4_i32 = arith.constant 4 : i32
    %106 = vector.broadcast %c4_i32 : i32 to vector<64x64xi32>
    %107 = arith.cmpi eq, %17, %106 : vector<64x64xi32>
    %108 = vector.extract_strided_slice %41 {offsets = [0, 8], sizes = [64, 1], strides = [1, 1]} : vector<64x9xf32> to vector<64x1xf32>
    %cst_22 = arith.constant 0.000000e+00 : f32
    %109 = vector.shape_cast %108 : vector<64x1xf32> to vector<64x1xf32>
    %110 = vector.broadcast %109 : vector<64x1xf32> to vector<64x64xf32>
    %111 = vector.broadcast %cst_22 : f32 to vector<64x64xf32>
    %112 = arith.select %107, %110, %111 : vector<64x64xi1>, vector<64x64xf32>
    %113 = arith.addf %105, %112 : vector<64x64xf32>
    %cst_23 = arith.constant -1.000000e+04 : f32
    %114 = vector.shape_cast %9 : vector<1x64xi1> to vector<1x64xi1>
    %115 = vector.broadcast %114 : vector<1x64xi1> to vector<64x64xi1>
    %116 = vector.broadcast %cst_23 : f32 to vector<64x64xf32>
    %117 = arith.select %115, %116, %113 : vector<64x64xi1>, vector<64x64xf32>
    %cst_24 = arith.constant dense<0xFF800000> : vector<64xf32>
    %118 = vector.multi_reduction <maximumf>, %117, %cst_24 [1] : vector<64x64xf32> to vector<64xf32>
    %119 = vector.shape_cast %118 : vector<64xf32> to vector<64x1xf32>
    %120 = vector.broadcast %119 : vector<64x1xf32> to vector<64x64xf32>
    %121 = arith.subf %117, %120 : vector<64x64xf32>
    %122 = math.exp %121 : vector<64x64xf32>
    %cst_25 = arith.constant dense<0.000000e+00> : vector<64xf32>
    %123 = vector.multi_reduction <add>, %122, %cst_25 [1] : vector<64x64xf32> to vector<64xf32>
    %124 = vector.shape_cast %123 : vector<64xf32> to vector<64x1xf32>
    %125 = tpu.reciprocal %124 {approx = true} : vector<64x1xf32> -> vector<64x1xf32>
    %126 = vector.broadcast %125 : vector<64x1xf32> to vector<64x64xf32>
    %127 = arith.mulf %122, %126 : vector<64x64xf32>
    %128 = arith.truncf %127 : vector<64x64xf32> to vector<64x64xbf16>
    %129 = arith.truncf %37 : vector<64x64xf32> to vector<64x64xbf16>
    %cst_26 = arith.constant dense<0.000000e+00> : vector<64x64xf32>
    %130 = tpu.matmul %128, %129, %cst_26 {dimension_numbers = #tpu.dot_dimension_numbers<[1], [0], [0], [1], [0, 0, 1, 1], [], []>} : vector<64x64xbf16>, vector<64x64xbf16>, vector<64x64xf32> -> vector<64x64xf32>
    %c-4_i32_27 = arith.constant -4 : i32
    %131 = vector.broadcast %c-4_i32_27 : i32 to vector<64x64xi32>
    %132 = arith.cmpi eq, %17, %131 : vector<64x64xi32>
    %cst_28 = arith.constant 0.000000e+00 : f32
    %133 = vector.broadcast %cst_28 : f32 to vector<64x64xf32>
    %134 = arith.select %132, %127, %133 : vector<64x64xi1>, vector<64x64xf32>
    %cst_29 = arith.constant dense<0.000000e+00> : vector<64xf32>
    %135 = vector.multi_reduction <add>, %134, %cst_29 [1] : vector<64x64xf32> to vector<64xf32>
    %136 = vector.shape_cast %135 : vector<64xf32> to vector<64x1xf32>
    %c-3_i32_30 = arith.constant -3 : i32
    %137 = vector.broadcast %c-3_i32_30 : i32 to vector<64x64xi32>
    %138 = arith.cmpi eq, %17, %137 : vector<64x64xi32>
    %cst_31 = arith.constant 0.000000e+00 : f32
    %139 = vector.broadcast %cst_31 : f32 to vector<64x64xf32>
    %140 = arith.select %138, %127, %139 : vector<64x64xi1>, vector<64x64xf32>
    %cst_32 = arith.constant dense<0.000000e+00> : vector<64xf32>
    %141 = vector.multi_reduction <add>, %140, %cst_32 [1] : vector<64x64xf32> to vector<64xf32>
    %142 = vector.shape_cast %141 : vector<64xf32> to vector<64x1xf32>
    %c-2_i32_33 = arith.constant -2 : i32
    %143 = vector.broadcast %c-2_i32_33 : i32 to vector<64x64xi32>
    %144 = arith.cmpi eq, %17, %143 : vector<64x64xi32>
    %cst_34 = arith.constant 0.000000e+00 : f32
    %145 = vector.broadcast %cst_34 : f32 to vector<64x64xf32>
    %146 = arith.select %144, %127, %145 : vector<64x64xi1>, vector<64x64xf32>
    %cst_35 = arith.constant dense<0.000000e+00> : vector<64xf32>
    %147 = vector.multi_reduction <add>, %146, %cst_35 [1] : vector<64x64xf32> to vector<64xf32>
    %148 = vector.shape_cast %147 : vector<64xf32> to vector<64x1xf32>
    %c-1_i32_36 = arith.constant -1 : i32
    %149 = vector.broadcast %c-1_i32_36 : i32 to vector<64x64xi32>
    %150 = arith.cmpi eq, %17, %149 : vector<64x64xi32>
    %cst_37 = arith.constant 0.000000e+00 : f32
    %151 = vector.broadcast %cst_37 : f32 to vector<64x64xf32>
    %152 = arith.select %150, %127, %151 : vector<64x64xi1>, vector<64x64xf32>
    %cst_38 = arith.constant dense<0.000000e+00> : vector<64xf32>
    %153 = vector.multi_reduction <add>, %152, %cst_38 [1] : vector<64x64xf32> to vector<64xf32>
    %154 = vector.shape_cast %153 : vector<64xf32> to vector<64x1xf32>
    %c0_i32_39 = arith.constant 0 : i32
    %155 = vector.broadcast %c0_i32_39 : i32 to vector<64x64xi32>
    %156 = arith.cmpi eq, %17, %155 : vector<64x64xi32>
    %cst_40 = arith.constant 0.000000e+00 : f32
    %157 = vector.broadcast %cst_40 : f32 to vector<64x64xf32>
    %158 = arith.select %156, %127, %157 : vector<64x64xi1>, vector<64x64xf32>
    %cst_41 = arith.constant dense<0.000000e+00> : vector<64xf32>
    %159 = vector.multi_reduction <add>, %158, %cst_41 [1] : vector<64x64xf32> to vector<64xf32>
    %160 = vector.shape_cast %159 : vector<64xf32> to vector<64x1xf32>
    %c1_i32_42 = arith.constant 1 : i32
    %161 = vector.broadcast %c1_i32_42 : i32 to vector<64x64xi32>
    %162 = arith.cmpi eq, %17, %161 : vector<64x64xi32>
    %cst_43 = arith.constant 0.000000e+00 : f32
    %163 = vector.broadcast %cst_43 : f32 to vector<64x64xf32>
    %164 = arith.select %162, %127, %163 : vector<64x64xi1>, vector<64x64xf32>
    %cst_44 = arith.constant dense<0.000000e+00> : vector<64xf32>
    %165 = vector.multi_reduction <add>, %164, %cst_44 [1] : vector<64x64xf32> to vector<64xf32>
    %166 = vector.shape_cast %165 : vector<64xf32> to vector<64x1xf32>
    %c2_i32_45 = arith.constant 2 : i32
    %167 = vector.broadcast %c2_i32_45 : i32 to vector<64x64xi32>
    %168 = arith.cmpi eq, %17, %167 : vector<64x64xi32>
    %cst_46 = arith.constant 0.000000e+00 : f32
    %169 = vector.broadcast %cst_46 : f32 to vector<64x64xf32>
    %170 = arith.select %168, %127, %169 : vector<64x64xi1>, vector<64x64xf32>
    %cst_47 = arith.constant dense<0.000000e+00> : vector<64xf32>
    %171 = vector.multi_reduction <add>, %170, %cst_47 [1] : vector<64x64xf32> to vector<64xf32>
    %172 = vector.shape_cast %171 : vector<64xf32> to vector<64x1xf32>
    %c3_i32_48 = arith.constant 3 : i32
    %173 = vector.broadcast %c3_i32_48 : i32 to vector<64x64xi32>
    %174 = arith.cmpi eq, %17, %173 : vector<64x64xi32>
    %cst_49 = arith.constant 0.000000e+00 : f32
    %175 = vector.broadcast %cst_49 : f32 to vector<64x64xf32>
    %176 = arith.select %174, %127, %175 : vector<64x64xi1>, vector<64x64xf32>
    %cst_50 = arith.constant dense<0.000000e+00> : vector<64xf32>
    %177 = vector.multi_reduction <add>, %176, %cst_50 [1] : vector<64x64xf32> to vector<64xf32>
    %178 = vector.shape_cast %177 : vector<64xf32> to vector<64x1xf32>
    %c4_i32_51 = arith.constant 4 : i32
    %179 = vector.broadcast %c4_i32_51 : i32 to vector<64x64xi32>
    %180 = arith.cmpi eq, %17, %179 : vector<64x64xi32>
    %cst_52 = arith.constant 0.000000e+00 : f32
    %181 = vector.broadcast %cst_52 : f32 to vector<64x64xf32>
    %182 = arith.select %180, %127, %181 : vector<64x64xi1>, vector<64x64xf32>
    %cst_53 = arith.constant dense<0.000000e+00> : vector<64xf32>
    %183 = vector.multi_reduction <add>, %182, %cst_53 [1] : vector<64x64xf32> to vector<64xf32>
    %184 = vector.shape_cast %183 : vector<64xf32> to vector<64x1xf32>
    %185 = tpu.concatenate %136, %142, %148, %154, %160, %166, %172, %178, %184 in 1 : vector<64x1xf32>, vector<64x1xf32>, vector<64x1xf32>, vector<64x1xf32>, vector<64x1xf32>, vector<64x1xf32>, vector<64x1xf32>, vector<64x1xf32>, vector<64x1xf32> -> vector<64x9xf32>
    %cst_54 = arith.constant dense<0.000000e+00> : vector<64x64xf32>
    %186 = tpu.matmul %185, %23, %cst_54 {dimension_numbers = #tpu.dot_dimension_numbers<[1], [0], [0], [1], [0, 0, 1, 1], [], []>} : vector<64x9xf32>, vector<9x64xf32>, vector<64x64xf32> -> vector<64x64xf32>
    %187 = arith.addf %130, %186 : vector<64x64xf32>
    %188 = vector.extract_strided_slice %32 {offsets = [0, 64], sizes = [64, 64], strides = [1, 1]} : vector<64x384xf32> to vector<64x64xf32>
    %cst_55 = arith.constant 1.250000e-01 : f32
    %189 = vector.broadcast %cst_55 : f32 to vector<64x64xf32>
    %190 = arith.mulf %188, %189 : vector<64x64xf32>
    %191 = vector.extract_strided_slice %32 {offsets = [0, 192], sizes = [64, 64], strides = [1, 1]} : vector<64x384xf32> to vector<64x64xf32>
    %192 = vector.extract_strided_slice %32 {offsets = [0, 320], sizes = [64, 64], strides = [1, 1]} : vector<64x384xf32> to vector<64x64xf32>
    %193 = arith.truncf %190 : vector<64x64xf32> to vector<64x64xbf16>
    %194 = arith.truncf %191 : vector<64x64xf32> to vector<64x64xbf16>
    %cst_56 = arith.constant dense<0.000000e+00> : vector<64x64xf32>
    %195 = tpu.matmul %193, %194, %cst_56 {dimension_numbers = #tpu.dot_dimension_numbers<[1], [1], [0], [0], [0, 0, 1, 0], [], []>} : vector<64x64xbf16>, vector<64x64xbf16>, vector<64x64xf32> -> vector<64x64xf32>
    %cst_57 = arith.constant dense<0.000000e+00> : vector<64x9xf32>
    %196 = tpu.matmul %190, %20, %cst_57 {dimension_numbers = #tpu.dot_dimension_numbers<[1], [1], [0], [0], [0, 0, 1, 0], [], []>} : vector<64x64xf32>, vector<9x64xf32>, vector<64x9xf32> -> vector<64x9xf32>
    %c-4_i32_58 = arith.constant -4 : i32
    %197 = vector.broadcast %c-4_i32_58 : i32 to vector<64x64xi32>
    %198 = arith.cmpi eq, %17, %197 : vector<64x64xi32>
    %199 = vector.extract_strided_slice %196 {offsets = [0, 0], sizes = [64, 1], strides = [1, 1]} : vector<64x9xf32> to vector<64x1xf32>
    %cst_59 = arith.constant 0.000000e+00 : f32
    %200 = vector.shape_cast %199 : vector<64x1xf32> to vector<64x1xf32>
    %201 = vector.broadcast %200 : vector<64x1xf32> to vector<64x64xf32>
    %202 = vector.broadcast %cst_59 : f32 to vector<64x64xf32>
    %203 = arith.select %198, %201, %202 : vector<64x64xi1>, vector<64x64xf32>
    %204 = arith.addf %195, %203 : vector<64x64xf32>
    %c-3_i32_60 = arith.constant -3 : i32
    %205 = vector.broadcast %c-3_i32_60 : i32 to vector<64x64xi32>
    %206 = arith.cmpi eq, %17, %205 : vector<64x64xi32>
    %207 = vector.extract_strided_slice %196 {offsets = [0, 1], sizes = [64, 1], strides = [1, 1]} : vector<64x9xf32> to vector<64x1xf32>
    %cst_61 = arith.constant 0.000000e+00 : f32
    %208 = vector.shape_cast %207 : vector<64x1xf32> to vector<64x1xf32>
    %209 = vector.broadcast %208 : vector<64x1xf32> to vector<64x64xf32>
    %210 = vector.broadcast %cst_61 : f32 to vector<64x64xf32>
    %211 = arith.select %206, %209, %210 : vector<64x64xi1>, vector<64x64xf32>
    %212 = arith.addf %204, %211 : vector<64x64xf32>
    %c-2_i32_62 = arith.constant -2 : i32
    %213 = vector.broadcast %c-2_i32_62 : i32 to vector<64x64xi32>
    %214 = arith.cmpi eq, %17, %213 : vector<64x64xi32>
    %215 = vector.extract_strided_slice %196 {offsets = [0, 2], sizes = [64, 1], strides = [1, 1]} : vector<64x9xf32> to vector<64x1xf32>
    %cst_63 = arith.constant 0.000000e+00 : f32
    %216 = vector.shape_cast %215 : vector<64x1xf32> to vector<64x1xf32>
    %217 = vector.broadcast %216 : vector<64x1xf32> to vector<64x64xf32>
    %218 = vector.broadcast %cst_63 : f32 to vector<64x64xf32>
    %219 = arith.select %214, %217, %218 : vector<64x64xi1>, vector<64x64xf32>
    %220 = arith.addf %212, %219 : vector<64x64xf32>
    %c-1_i32_64 = arith.constant -1 : i32
    %221 = vector.broadcast %c-1_i32_64 : i32 to vector<64x64xi32>
    %222 = arith.cmpi eq, %17, %221 : vector<64x64xi32>
    %223 = vector.extract_strided_slice %196 {offsets = [0, 3], sizes = [64, 1], strides = [1, 1]} : vector<64x9xf32> to vector<64x1xf32>
    %cst_65 = arith.constant 0.000000e+00 : f32
    %224 = vector.shape_cast %223 : vector<64x1xf32> to vector<64x1xf32>
    %225 = vector.broadcast %224 : vector<64x1xf32> to vector<64x64xf32>
    %226 = vector.broadcast %cst_65 : f32 to vector<64x64xf32>
    %227 = arith.select %222, %225, %226 : vector<64x64xi1>, vector<64x64xf32>
    %228 = arith.addf %220, %227 : vector<64x64xf32>
    %c0_i32_66 = arith.constant 0 : i32
    %229 = vector.broadcast %c0_i32_66 : i32 to vector<64x64xi32>
    %230 = arith.cmpi eq, %17, %229 : vector<64x64xi32>
    %231 = vector.extract_strided_slice %196 {offsets = [0, 4], sizes = [64, 1], strides = [1, 1]} : vector<64x9xf32> to vector<64x1xf32>
    %cst_67 = arith.constant 0.000000e+00 : f32
    %232 = vector.shape_cast %231 : vector<64x1xf32> to vector<64x1xf32>
    %233 = vector.broadcast %232 : vector<64x1xf32> to vector<64x64xf32>
    %234 = vector.broadcast %cst_67 : f32 to vector<64x64xf32>
    %235 = arith.select %230, %233, %234 : vector<64x64xi1>, vector<64x64xf32>
    %236 = arith.addf %228, %235 : vector<64x64xf32>
    %c1_i32_68 = arith.constant 1 : i32
    %237 = vector.broadcast %c1_i32_68 : i32 to vector<64x64xi32>
    %238 = arith.cmpi eq, %17, %237 : vector<64x64xi32>
    %239 = vector.extract_strided_slice %196 {offsets = [0, 5], sizes = [64, 1], strides = [1, 1]} : vector<64x9xf32> to vector<64x1xf32>
    %cst_69 = arith.constant 0.000000e+00 : f32
    %240 = vector.shape_cast %239 : vector<64x1xf32> to vector<64x1xf32>
    %241 = vector.broadcast %240 : vector<64x1xf32> to vector<64x64xf32>
    %242 = vector.broadcast %cst_69 : f32 to vector<64x64xf32>
    %243 = arith.select %238, %241, %242 : vector<64x64xi1>, vector<64x64xf32>
    %244 = arith.addf %236, %243 : vector<64x64xf32>
    %c2_i32_70 = arith.constant 2 : i32
    %245 = vector.broadcast %c2_i32_70 : i32 to vector<64x64xi32>
    %246 = arith.cmpi eq, %17, %245 : vector<64x64xi32>
    %247 = vector.extract_strided_slice %196 {offsets = [0, 6], sizes = [64, 1], strides = [1, 1]} : vector<64x9xf32> to vector<64x1xf32>
    %cst_71 = arith.constant 0.000000e+00 : f32
    %248 = vector.shape_cast %247 : vector<64x1xf32> to vector<64x1xf32>
    %249 = vector.broadcast %248 : vector<64x1xf32> to vector<64x64xf32>
    %250 = vector.broadcast %cst_71 : f32 to vector<64x64xf32>
    %251 = arith.select %246, %249, %250 : vector<64x64xi1>, vector<64x64xf32>
    %252 = arith.addf %244, %251 : vector<64x64xf32>
    %c3_i32_72 = arith.constant 3 : i32
    %253 = vector.broadcast %c3_i32_72 : i32 to vector<64x64xi32>
    %254 = arith.cmpi eq, %17, %253 : vector<64x64xi32>
    %255 = vector.extract_strided_slice %196 {offsets = [0, 7], sizes = [64, 1], strides = [1, 1]} : vector<64x9xf32> to vector<64x1xf32>
    %cst_73 = arith.constant 0.000000e+00 : f32
    %256 = vector.shape_cast %255 : vector<64x1xf32> to vector<64x1xf32>
    %257 = vector.broadcast %256 : vector<64x1xf32> to vector<64x64xf32>
    %258 = vector.broadcast %cst_73 : f32 to vector<64x64xf32>
    %259 = arith.select %254, %257, %258 : vector<64x64xi1>, vector<64x64xf32>
    %260 = arith.addf %252, %259 : vector<64x64xf32>
    %c4_i32_74 = arith.constant 4 : i32
    %261 = vector.broadcast %c4_i32_74 : i32 to vector<64x64xi32>
    %262 = arith.cmpi eq, %17, %261 : vector<64x64xi32>
    %263 = vector.extract_strided_slice %196 {offsets = [0, 8], sizes = [64, 1], strides = [1, 1]} : vector<64x9xf32> to vector<64x1xf32>
    %cst_75 = arith.constant 0.000000e+00 : f32
    %264 = vector.shape_cast %263 : vector<64x1xf32> to vector<64x1xf32>
    %265 = vector.broadcast %264 : vector<64x1xf32> to vector<64x64xf32>
    %266 = vector.broadcast %cst_75 : f32 to vector<64x64xf32>
    %267 = arith.select %262, %265, %266 : vector<64x64xi1>, vector<64x64xf32>
    %268 = arith.addf %260, %267 : vector<64x64xf32>
    %cst_76 = arith.constant -1.000000e+04 : f32
    %269 = vector.shape_cast %9 : vector<1x64xi1> to vector<1x64xi1>
    %270 = vector.broadcast %269 : vector<1x64xi1> to vector<64x64xi1>
    %271 = vector.broadcast %cst_76 : f32 to vector<64x64xf32>
    %272 = arith.select %270, %271, %268 : vector<64x64xi1>, vector<64x64xf32>
    %cst_77 = arith.constant dense<0xFF800000> : vector<64xf32>
    %273 = vector.multi_reduction <maximumf>, %272, %cst_77 [1] : vector<64x64xf32> to vector<64xf32>
    %274 = vector.shape_cast %273 : vector<64xf32> to vector<64x1xf32>
    %275 = vector.broadcast %274 : vector<64x1xf32> to vector<64x64xf32>
    %276 = arith.subf %272, %275 : vector<64x64xf32>
    %277 = math.exp %276 : vector<64x64xf32>
    %cst_78 = arith.constant dense<0.000000e+00> : vector<64xf32>
    %278 = vector.multi_reduction <add>, %277, %cst_78 [1] : vector<64x64xf32> to vector<64xf32>
    %279 = vector.shape_cast %278 : vector<64xf32> to vector<64x1xf32>
    %280 = tpu.reciprocal %279 {approx = true} : vector<64x1xf32> -> vector<64x1xf32>
    %281 = vector.broadcast %280 : vector<64x1xf32> to vector<64x64xf32>
    %282 = arith.mulf %277, %281 : vector<64x64xf32>
    %283 = arith.truncf %282 : vector<64x64xf32> to vector<64x64xbf16>
    %284 = arith.truncf %192 : vector<64x64xf32> to vector<64x64xbf16>
    %cst_79 = arith.constant dense<0.000000e+00> : vector<64x64xf32>
    %285 = tpu.matmul %283, %284, %cst_79 {dimension_numbers = #tpu.dot_dimension_numbers<[1], [0], [0], [1], [0, 0, 1, 1], [], []>} : vector<64x64xbf16>, vector<64x64xbf16>, vector<64x64xf32> -> vector<64x64xf32>
    %c-4_i32_80 = arith.constant -4 : i32
    %286 = vector.broadcast %c-4_i32_80 : i32 to vector<64x64xi32>
    %287 = arith.cmpi eq, %17, %286 : vector<64x64xi32>
    %cst_81 = arith.constant 0.000000e+00 : f32
    %288 = vector.broadcast %cst_81 : f32 to vector<64x64xf32>
    %289 = arith.select %287, %282, %288 : vector<64x64xi1>, vector<64x64xf32>
    %cst_82 = arith.constant dense<0.000000e+00> : vector<64xf32>
    %290 = vector.multi_reduction <add>, %289, %cst_82 [1] : vector<64x64xf32> to vector<64xf32>
    %291 = vector.shape_cast %290 : vector<64xf32> to vector<64x1xf32>
    %c-3_i32_83 = arith.constant -3 : i32
    %292 = vector.broadcast %c-3_i32_83 : i32 to vector<64x64xi32>
    %293 = arith.cmpi eq, %17, %292 : vector<64x64xi32>
    %cst_84 = arith.constant 0.000000e+00 : f32
    %294 = vector.broadcast %cst_84 : f32 to vector<64x64xf32>
    %295 = arith.select %293, %282, %294 : vector<64x64xi1>, vector<64x64xf32>
    %cst_85 = arith.constant dense<0.000000e+00> : vector<64xf32>
    %296 = vector.multi_reduction <add>, %295, %cst_85 [1] : vector<64x64xf32> to vector<64xf32>
    %297 = vector.shape_cast %296 : vector<64xf32> to vector<64x1xf32>
    %c-2_i32_86 = arith.constant -2 : i32
    %298 = vector.broadcast %c-2_i32_86 : i32 to vector<64x64xi32>
    %299 = arith.cmpi eq, %17, %298 : vector<64x64xi32>
    %cst_87 = arith.constant 0.000000e+00 : f32
    %300 = vector.broadcast %cst_87 : f32 to vector<64x64xf32>
    %301 = arith.select %299, %282, %300 : vector<64x64xi1>, vector<64x64xf32>
    %cst_88 = arith.constant dense<0.000000e+00> : vector<64xf32>
    %302 = vector.multi_reduction <add>, %301, %cst_88 [1] : vector<64x64xf32> to vector<64xf32>
    %303 = vector.shape_cast %302 : vector<64xf32> to vector<64x1xf32>
    %c-1_i32_89 = arith.constant -1 : i32
    %304 = vector.broadcast %c-1_i32_89 : i32 to vector<64x64xi32>
    %305 = arith.cmpi eq, %17, %304 : vector<64x64xi32>
    %cst_90 = arith.constant 0.000000e+00 : f32
    %306 = vector.broadcast %cst_90 : f32 to vector<64x64xf32>
    %307 = arith.select %305, %282, %306 : vector<64x64xi1>, vector<64x64xf32>
    %cst_91 = arith.constant dense<0.000000e+00> : vector<64xf32>
    %308 = vector.multi_reduction <add>, %307, %cst_91 [1] : vector<64x64xf32> to vector<64xf32>
    %309 = vector.shape_cast %308 : vector<64xf32> to vector<64x1xf32>
    %c0_i32_92 = arith.constant 0 : i32
    %310 = vector.broadcast %c0_i32_92 : i32 to vector<64x64xi32>
    %311 = arith.cmpi eq, %17, %310 : vector<64x64xi32>
    %cst_93 = arith.constant 0.000000e+00 : f32
    %312 = vector.broadcast %cst_93 : f32 to vector<64x64xf32>
    %313 = arith.select %311, %282, %312 : vector<64x64xi1>, vector<64x64xf32>
    %cst_94 = arith.constant dense<0.000000e+00> : vector<64xf32>
    %314 = vector.multi_reduction <add>, %313, %cst_94 [1] : vector<64x64xf32> to vector<64xf32>
    %315 = vector.shape_cast %314 : vector<64xf32> to vector<64x1xf32>
    %c1_i32_95 = arith.constant 1 : i32
    %316 = vector.broadcast %c1_i32_95 : i32 to vector<64x64xi32>
    %317 = arith.cmpi eq, %17, %316 : vector<64x64xi32>
    %cst_96 = arith.constant 0.000000e+00 : f32
    %318 = vector.broadcast %cst_96 : f32 to vector<64x64xf32>
    %319 = arith.select %317, %282, %318 : vector<64x64xi1>, vector<64x64xf32>
    %cst_97 = arith.constant dense<0.000000e+00> : vector<64xf32>
    %320 = vector.multi_reduction <add>, %319, %cst_97 [1] : vector<64x64xf32> to vector<64xf32>
    %321 = vector.shape_cast %320 : vector<64xf32> to vector<64x1xf32>
    %c2_i32_98 = arith.constant 2 : i32
    %322 = vector.broadcast %c2_i32_98 : i32 to vector<64x64xi32>
    %323 = arith.cmpi eq, %17, %322 : vector<64x64xi32>
    %cst_99 = arith.constant 0.000000e+00 : f32
    %324 = vector.broadcast %cst_99 : f32 to vector<64x64xf32>
    %325 = arith.select %323, %282, %324 : vector<64x64xi1>, vector<64x64xf32>
    %cst_100 = arith.constant dense<0.000000e+00> : vector<64xf32>
    %326 = vector.multi_reduction <add>, %325, %cst_100 [1] : vector<64x64xf32> to vector<64xf32>
    %327 = vector.shape_cast %326 : vector<64xf32> to vector<64x1xf32>
    %c3_i32_101 = arith.constant 3 : i32
    %328 = vector.broadcast %c3_i32_101 : i32 to vector<64x64xi32>
    %329 = arith.cmpi eq, %17, %328 : vector<64x64xi32>
    %cst_102 = arith.constant 0.000000e+00 : f32
    %330 = vector.broadcast %cst_102 : f32 to vector<64x64xf32>
    %331 = arith.select %329, %282, %330 : vector<64x64xi1>, vector<64x64xf32>
    %cst_103 = arith.constant dense<0.000000e+00> : vector<64xf32>
    %332 = vector.multi_reduction <add>, %331, %cst_103 [1] : vector<64x64xf32> to vector<64xf32>
    %333 = vector.shape_cast %332 : vector<64xf32> to vector<64x1xf32>
    %c4_i32_104 = arith.constant 4 : i32
    %334 = vector.broadcast %c4_i32_104 : i32 to vector<64x64xi32>
    %335 = arith.cmpi eq, %17, %334 : vector<64x64xi32>
    %cst_105 = arith.constant 0.000000e+00 : f32
    %336 = vector.broadcast %cst_105 : f32 to vector<64x64xf32>
    %337 = arith.select %335, %282, %336 : vector<64x64xi1>, vector<64x64xf32>
    %cst_106 = arith.constant dense<0.000000e+00> : vector<64xf32>
    %338 = vector.multi_reduction <add>, %337, %cst_106 [1] : vector<64x64xf32> to vector<64xf32>
    %339 = vector.shape_cast %338 : vector<64xf32> to vector<64x1xf32>
    %340 = tpu.concatenate %291, %297, %303, %309, %315, %321, %327, %333, %339 in 1 : vector<64x1xf32>, vector<64x1xf32>, vector<64x1xf32>, vector<64x1xf32>, vector<64x1xf32>, vector<64x1xf32>, vector<64x1xf32>, vector<64x1xf32>, vector<64x1xf32> -> vector<64x9xf32>
    %cst_107 = arith.constant dense<0.000000e+00> : vector<64x64xf32>
    %341 = tpu.matmul %340, %23, %cst_107 {dimension_numbers = #tpu.dot_dimension_numbers<[1], [0], [0], [1], [0, 0, 1, 1], [], []>} : vector<64x9xf32>, vector<9x64xf32>, vector<64x64xf32> -> vector<64x64xf32>
    %342 = arith.addf %285, %341 : vector<64x64xf32>
    %343 = tpu.concatenate %187, %342 in 1 : vector<64x64xf32>, vector<64x64xf32> -> vector<64x128xf32>
    %344 = arith.truncf %343 : vector<64x128xf32> to vector<64x128xbf16>
    %345 = arith.index_cast %arg1 : i32 to index
    %c0_108 = arith.constant 0 : index
    %c0_109 = arith.constant 0 : index
    %346 = vector.load %arg6[%345, %c0_108, %c0_109] : memref<3x128x128xbf16, #tpu.memory_space<vmem>>, vector<1x128x128xbf16>
    %347 = vector.shape_cast %346 : vector<1x128x128xbf16> to vector<128x128xbf16>
    %cst_110 = arith.constant dense<0.000000e+00> : vector<64x128xf32>
    %348 = tpu.matmul %344, %347, %cst_110 {dimension_numbers = #tpu.dot_dimension_numbers<[1], [0], [0], [1], [0, 0, 1, 1], [], []>} : vector<64x128xbf16>, vector<128x128xbf16>, vector<64x128xf32> -> vector<64x128xf32>
    %349 = arith.index_cast %arg1 : i32 to index
    %c0_111 = arith.constant 0 : index
    %c0_112 = arith.constant 0 : index
    %350 = vector.load %arg7[%349, %c0_111, %c0_112] : memref<3x1x128xf32, #tpu.memory_space<vmem>>, vector<1x1x128xf32>
    %351 = vector.shape_cast %350 : vector<1x1x128xf32> to vector<1x128xf32>
    %352 = vector.broadcast %351 : vector<1x128xf32> to vector<64x128xf32>
    %353 = arith.addf %348, %352 : vector<64x128xf32>
    %354 = arith.addf %13, %353 : vector<64x128xf32>
    %355 = arith.index_cast %arg1 : i32 to index
    %c0_113 = arith.constant 0 : index
    %c0_114 = arith.constant 0 : index
    %356 = vector.load %arg10[%355, %c0_113, %c0_114] : memref<3x1x128xf32, #tpu.memory_space<vmem>>, vector<1x1x128xf32>
    %357 = vector.shape_cast %356 : vector<1x1x128xf32> to vector<1x128xf32>
    %358 = arith.index_cast %arg1 : i32 to index
    %c0_115 = arith.constant 0 : index
    %c0_116 = arith.constant 0 : index
    %359 = vector.load %arg11[%358, %c0_115, %c0_116] : memref<3x1x128xf32, #tpu.memory_space<vmem>>, vector<1x1x128xf32>
    %360 = vector.shape_cast %359 : vector<1x1x128xf32> to vector<1x128xf32>
    %cst_117 = arith.constant dense<0.000000e+00> : vector<64xf32>
    %361 = vector.multi_reduction <add>, %354, %cst_117 [1] : vector<64x128xf32> to vector<64xf32>
    %362 = vector.shape_cast %361 : vector<64xf32> to vector<64x1xf32>
    %cst_118 = arith.constant 1.280000e+02 : f32
    %363 = vector.broadcast %cst_118 : f32 to vector<64x1xf32>
    %364 = arith.divf %362, %363 : vector<64x1xf32>
    %365 = vector.broadcast %364 : vector<64x1xf32> to vector<64x128xf32>
    %366 = arith.subf %354, %365 : vector<64x128xf32>
    %367 = arith.mulf %366, %366 : vector<64x128xf32>
    %cst_119 = arith.constant dense<0.000000e+00> : vector<64xf32>
    %368 = vector.multi_reduction <add>, %367, %cst_119 [1] : vector<64x128xf32> to vector<64xf32>
    %369 = vector.shape_cast %368 : vector<64xf32> to vector<64x1xf32>
    %cst_120 = arith.constant 1.280000e+02 : f32
    %370 = vector.broadcast %cst_120 : f32 to vector<64x1xf32>
    %371 = arith.divf %369, %370 : vector<64x1xf32>
    %372 = vector.broadcast %364 : vector<64x1xf32> to vector<64x128xf32>
    %373 = arith.subf %354, %372 : vector<64x128xf32>
    %cst_121 = arith.constant 9.99999974E-6 : f32
    %374 = vector.broadcast %cst_121 : f32 to vector<64x1xf32>
    %375 = arith.addf %371, %374 : vector<64x1xf32>
    %376 = math.rsqrt %375 : vector<64x1xf32>
    %377 = vector.broadcast %376 : vector<64x1xf32> to vector<64x128xf32>
    %378 = arith.mulf %373, %377 : vector<64x128xf32>
    %379 = vector.broadcast %357 : vector<1x128xf32> to vector<64x128xf32>
    %380 = arith.mulf %378, %379 : vector<64x128xf32>
    %381 = vector.broadcast %360 : vector<1x128xf32> to vector<64x128xf32>
    %382 = arith.addf %380, %381 : vector<64x128xf32>
    %383 = vector.broadcast %6 : vector<64x1xf32> to vector<64x128xf32>
    %384 = arith.mulf %382, %383 : vector<64x128xf32>
    %385 = arith.truncf %384 : vector<64x128xf32> to vector<64x128xbf16>
    %386 = arith.index_cast %arg1 : i32 to index
    %c0_122 = arith.constant 0 : index
    %c0_123 = arith.constant 0 : index
    %387 = vector.load %arg13[%386, %c0_122, %c0_123] : memref<3x1x256xf32, #tpu.memory_space<vmem>>, vector<1x1x256xf32>
    %388 = vector.shape_cast %387 : vector<1x1x256xf32> to vector<1x256xf32>
    %c3_i32_124 = arith.constant 3 : i32
    %389 = arith.muli %arg1, %c3_i32_124 : i32
    %c0_i32_125 = arith.constant 0 : i32
    %390 = arith.addi %389, %c0_i32_125 : i32
    %391 = arith.index_cast %390 : i32 to index
    %c0_126 = arith.constant 0 : index
    %c0_127 = arith.constant 0 : index
    %392 = vector.load %arg12[%391, %c0_126, %c0_127] : memref<9x128x256xbf16, #tpu.memory_space<vmem>>, vector<1x128x256xbf16>
    %393 = vector.shape_cast %392 : vector<1x128x256xbf16> to vector<128x256xbf16>
    %cst_128 = arith.constant dense<0.000000e+00> : vector<64x256xf32>
    %394 = tpu.matmul %385, %393, %cst_128 {dimension_numbers = #tpu.dot_dimension_numbers<[1], [0], [0], [1], [0, 0, 1, 1], [], []>} : vector<64x128xbf16>, vector<128x256xbf16>, vector<64x256xf32> -> vector<64x256xf32>
    %c1_i32_129 = arith.constant 1 : i32
    %395 = tpu.dynamic_rotate %394 by %c1_i32_129 dim 0 : vector<64x256xf32>, i32 -> vector<64x256xf32>
    %c1_i32_130 = arith.constant 1 : i32
    %396 = vector.broadcast %c1_i32_130 : i32 to vector<64x1xi32>
    %397 = arith.cmpi slt, %2, %396 : vector<64x1xi32>
    %cst_131 = arith.constant 0.000000e+00 : f32
    %398 = vector.shape_cast %397 : vector<64x1xi1> to vector<64x1xi1>
    %399 = vector.broadcast %398 : vector<64x1xi1> to vector<64x256xi1>
    %400 = vector.broadcast %cst_131 : f32 to vector<64x256xf32>
    %401 = arith.select %399, %400, %395 : vector<64x256xi1>, vector<64x256xf32>
    %c3_i32_132 = arith.constant 3 : i32
    %402 = arith.muli %arg1, %c3_i32_132 : i32
    %c1_i32_133 = arith.constant 1 : i32
    %403 = arith.addi %402, %c1_i32_133 : i32
    %404 = arith.index_cast %403 : i32 to index
    %c0_134 = arith.constant 0 : index
    %c0_135 = arith.constant 0 : index
    %405 = vector.load %arg12[%404, %c0_134, %c0_135] : memref<9x128x256xbf16, #tpu.memory_space<vmem>>, vector<1x128x256xbf16>
    %406 = vector.shape_cast %405 : vector<1x128x256xbf16> to vector<128x256xbf16>
    %cst_136 = arith.constant dense<0.000000e+00> : vector<64x256xf32>
    %407 = tpu.matmul %385, %406, %cst_136 {dimension_numbers = #tpu.dot_dimension_numbers<[1], [0], [0], [1], [0, 0, 1, 1], [], []>} : vector<64x128xbf16>, vector<128x256xbf16>, vector<64x256xf32> -> vector<64x256xf32>
    %408 = arith.addf %401, %407 : vector<64x256xf32>
    %c3_i32_137 = arith.constant 3 : i32
    %409 = arith.muli %arg1, %c3_i32_137 : i32
    %c2_i32_138 = arith.constant 2 : i32
    %410 = arith.addi %409, %c2_i32_138 : i32
    %411 = arith.index_cast %410 : i32 to index
    %c0_139 = arith.constant 0 : index
    %c0_140 = arith.constant 0 : index
    %412 = vector.load %arg12[%411, %c0_139, %c0_140] : memref<9x128x256xbf16, #tpu.memory_space<vmem>>, vector<1x128x256xbf16>
    %413 = vector.shape_cast %412 : vector<1x128x256xbf16> to vector<128x256xbf16>
    %cst_141 = arith.constant dense<0.000000e+00> : vector<64x256xf32>
    %414 = tpu.matmul %385, %413, %cst_141 {dimension_numbers = #tpu.dot_dimension_numbers<[1], [0], [0], [1], [0, 0, 1, 1], [], []>} : vector<64x128xbf16>, vector<128x256xbf16>, vector<64x256xf32> -> vector<64x256xf32>
    %c63_i32 = arith.constant 63 : i32
    %415 = tpu.dynamic_rotate %414 by %c63_i32 dim 0 : vector<64x256xf32>, i32 -> vector<64x256xf32>
    %c63_i32_142 = arith.constant 63 : i32
    %416 = vector.broadcast %c63_i32_142 : i32 to vector<64x1xi32>
    %417 = arith.cmpi sge, %2, %416 : vector<64x1xi32>
    %cst_143 = arith.constant 0.000000e+00 : f32
    %418 = vector.shape_cast %417 : vector<64x1xi1> to vector<64x1xi1>
    %419 = vector.broadcast %418 : vector<64x1xi1> to vector<64x256xi1>
    %420 = vector.broadcast %cst_143 : f32 to vector<64x256xf32>
    %421 = arith.select %419, %420, %415 : vector<64x256xi1>, vector<64x256xf32>
    %422 = arith.addf %408, %421 : vector<64x256xf32>
    %423 = vector.broadcast %388 : vector<1x256xf32> to vector<64x256xf32>
    %424 = arith.addf %422, %423 : vector<64x256xf32>
    %cst_144 = arith.constant 0.000000e+00 : f32
    %425 = vector.broadcast %cst_144 : f32 to vector<64x256xf32>
    %426 = arith.maximumf %424, %425 : vector<64x256xf32>
    %427 = vector.broadcast %6 : vector<64x1xf32> to vector<64x256xf32>
    %428 = arith.mulf %426, %427 : vector<64x256xf32>
    %429 = arith.truncf %428 : vector<64x256xf32> to vector<64x256xbf16>
    %430 = arith.index_cast %arg1 : i32 to index
    %c0_145 = arith.constant 0 : index
    %c0_146 = arith.constant 0 : index
    %431 = vector.load %arg15[%430, %c0_145, %c0_146] : memref<3x1x128xf32, #tpu.memory_space<vmem>>, vector<1x1x128xf32>
    %432 = vector.shape_cast %431 : vector<1x1x128xf32> to vector<1x128xf32>
    %c3_i32_147 = arith.constant 3 : i32
    %433 = arith.muli %arg1, %c3_i32_147 : i32
    %c0_i32_148 = arith.constant 0 : i32
    %434 = arith.addi %433, %c0_i32_148 : i32
    %435 = arith.index_cast %434 : i32 to index
    %c0_149 = arith.constant 0 : index
    %c0_150 = arith.constant 0 : index
    %436 = vector.load %arg14[%435, %c0_149, %c0_150] : memref<9x256x128xbf16, #tpu.memory_space<vmem>>, vector<1x256x128xbf16>
    %437 = vector.shape_cast %436 : vector<1x256x128xbf16> to vector<256x128xbf16>
    %cst_151 = arith.constant dense<0.000000e+00> : vector<64x128xf32>
    %438 = tpu.matmul %429, %437, %cst_151 {dimension_numbers = #tpu.dot_dimension_numbers<[1], [0], [0], [1], [0, 0, 1, 1], [], []>} : vector<64x256xbf16>, vector<256x128xbf16>, vector<64x128xf32> -> vector<64x128xf32>
    %c1_i32_152 = arith.constant 1 : i32
    %439 = tpu.dynamic_rotate %438 by %c1_i32_152 dim 0 : vector<64x128xf32>, i32 -> vector<64x128xf32>
    %c1_i32_153 = arith.constant 1 : i32
    %440 = vector.broadcast %c1_i32_153 : i32 to vector<64x1xi32>
    %441 = arith.cmpi slt, %2, %440 : vector<64x1xi32>
    %cst_154 = arith.constant 0.000000e+00 : f32
    %442 = vector.shape_cast %441 : vector<64x1xi1> to vector<64x1xi1>
    %443 = vector.broadcast %442 : vector<64x1xi1> to vector<64x128xi1>
    %444 = vector.broadcast %cst_154 : f32 to vector<64x128xf32>
    %445 = arith.select %443, %444, %439 : vector<64x128xi1>, vector<64x128xf32>
    %c3_i32_155 = arith.constant 3 : i32
    %446 = arith.muli %arg1, %c3_i32_155 : i32
    %c1_i32_156 = arith.constant 1 : i32
    %447 = arith.addi %446, %c1_i32_156 : i32
    %448 = arith.index_cast %447 : i32 to index
    %c0_157 = arith.constant 0 : index
    %c0_158 = arith.constant 0 : index
    %449 = vector.load %arg14[%448, %c0_157, %c0_158] : memref<9x256x128xbf16, #tpu.memory_space<vmem>>, vector<1x256x128xbf16>
    %450 = vector.shape_cast %449 : vector<1x256x128xbf16> to vector<256x128xbf16>
    %cst_159 = arith.constant dense<0.000000e+00> : vector<64x128xf32>
    %451 = tpu.matmul %429, %450, %cst_159 {dimension_numbers = #tpu.dot_dimension_numbers<[1], [0], [0], [1], [0, 0, 1, 1], [], []>} : vector<64x256xbf16>, vector<256x128xbf16>, vector<64x128xf32> -> vector<64x128xf32>
    %452 = arith.addf %445, %451 : vector<64x128xf32>
    %c3_i32_160 = arith.constant 3 : i32
    %453 = arith.muli %arg1, %c3_i32_160 : i32
    %c2_i32_161 = arith.constant 2 : i32
    %454 = arith.addi %453, %c2_i32_161 : i32
    %455 = arith.index_cast %454 : i32 to index
    %c0_162 = arith.constant 0 : index
    %c0_163 = arith.constant 0 : index
    %456 = vector.load %arg14[%455, %c0_162, %c0_163] : memref<9x256x128xbf16, #tpu.memory_space<vmem>>, vector<1x256x128xbf16>
    %457 = vector.shape_cast %456 : vector<1x256x128xbf16> to vector<256x128xbf16>
    %cst_164 = arith.constant dense<0.000000e+00> : vector<64x128xf32>
    %458 = tpu.matmul %429, %457, %cst_164 {dimension_numbers = #tpu.dot_dimension_numbers<[1], [0], [0], [1], [0, 0, 1, 1], [], []>} : vector<64x256xbf16>, vector<256x128xbf16>, vector<64x128xf32> -> vector<64x128xf32>
    %c63_i32_165 = arith.constant 63 : i32
    %459 = tpu.dynamic_rotate %458 by %c63_i32_165 dim 0 : vector<64x128xf32>, i32 -> vector<64x128xf32>
    %c63_i32_166 = arith.constant 63 : i32
    %460 = vector.broadcast %c63_i32_166 : i32 to vector<64x1xi32>
    %461 = arith.cmpi sge, %2, %460 : vector<64x1xi32>
    %cst_167 = arith.constant 0.000000e+00 : f32
    %462 = vector.shape_cast %461 : vector<64x1xi1> to vector<64x1xi1>
    %463 = vector.broadcast %462 : vector<64x1xi1> to vector<64x128xi1>
    %464 = vector.broadcast %cst_167 : f32 to vector<64x128xf32>
    %465 = arith.select %463, %464, %459 : vector<64x128xi1>, vector<64x128xf32>
    %466 = arith.addf %452, %465 : vector<64x128xf32>
    %467 = vector.broadcast %432 : vector<1x128xf32> to vector<64x128xf32>
    %468 = arith.addf %466, %467 : vector<64x128xf32>
    %469 = vector.broadcast %6 : vector<64x1xf32> to vector<64x128xf32>
    %470 = arith.mulf %468, %469 : vector<64x128xf32>
    %471 = arith.addf %382, %470 : vector<64x128xf32>
    %472 = arith.index_cast %arg1 : i32 to index
    %c0_168 = arith.constant 0 : index
    %c0_169 = arith.constant 0 : index
    %473 = vector.load %arg16[%472, %c0_168, %c0_169] : memref<3x1x128xf32, #tpu.memory_space<vmem>>, vector<1x1x128xf32>
    %474 = vector.shape_cast %473 : vector<1x1x128xf32> to vector<1x128xf32>
    %475 = arith.index_cast %arg1 : i32 to index
    %c0_170 = arith.constant 0 : index
    %c0_171 = arith.constant 0 : index
    %476 = vector.load %arg17[%475, %c0_170, %c0_171] : memref<3x1x128xf32, #tpu.memory_space<vmem>>, vector<1x1x128xf32>
    %477 = vector.shape_cast %476 : vector<1x1x128xf32> to vector<1x128xf32>
    %cst_172 = arith.constant dense<0.000000e+00> : vector<64xf32>
    %478 = vector.multi_reduction <add>, %471, %cst_172 [1] : vector<64x128xf32> to vector<64xf32>
    %479 = vector.shape_cast %478 : vector<64xf32> to vector<64x1xf32>
    %cst_173 = arith.constant 1.280000e+02 : f32
    %480 = vector.broadcast %cst_173 : f32 to vector<64x1xf32>
    %481 = arith.divf %479, %480 : vector<64x1xf32>
    %482 = vector.broadcast %481 : vector<64x1xf32> to vector<64x128xf32>
    %483 = arith.subf %471, %482 : vector<64x128xf32>
    %484 = arith.mulf %483, %483 : vector<64x128xf32>
    %cst_174 = arith.constant dense<0.000000e+00> : vector<64xf32>
    %485 = vector.multi_reduction <add>, %484, %cst_174 [1] : vector<64x128xf32> to vector<64xf32>
    %486 = vector.shape_cast %485 : vector<64xf32> to vector<64x1xf32>
    %cst_175 = arith.constant 1.280000e+02 : f32
    %487 = vector.broadcast %cst_175 : f32 to vector<64x1xf32>
    %488 = arith.divf %486, %487 : vector<64x1xf32>
    %489 = vector.broadcast %481 : vector<64x1xf32> to vector<64x128xf32>
    %490 = arith.subf %471, %489 : vector<64x128xf32>
    %cst_176 = arith.constant 9.99999974E-6 : f32
    %491 = vector.broadcast %cst_176 : f32 to vector<64x1xf32>
    %492 = arith.addf %488, %491 : vector<64x1xf32>
    %493 = math.rsqrt %492 : vector<64x1xf32>
    %494 = vector.broadcast %493 : vector<64x1xf32> to vector<64x128xf32>
    %495 = arith.mulf %490, %494 : vector<64x128xf32>
    %496 = vector.broadcast %474 : vector<1x128xf32> to vector<64x128xf32>
    %497 = arith.mulf %495, %496 : vector<64x128xf32>
    %498 = vector.broadcast %477 : vector<1x128xf32> to vector<64x128xf32>
    %499 = arith.addf %497, %498 : vector<64x128xf32>
    %c2_i32_177 = arith.constant 2 : i32
    %500 = arith.cmpi slt, %arg1, %c2_i32_177 : i32
    %501 = arith.extui %500 : i1 to i32
    %c0_i32_178 = arith.constant 0 : i32
    %502 = arith.cmpi ne, %501, %c0_i32_178 : i32
    scf.if %502 {
      %c0_181 = arith.constant 0 : index
      %c0_182 = arith.constant 0 : index
      %506 = vector.load %arg22[%c0_181, %c0_182] : memref<64x128xf32, #tpu.memory_space<vmem>>, vector<64x128xf32>
      tpu.vector_store %arg22[%c0_181, %c0_182], %499 {strides = array<i32>} : memref<64x128xf32, #tpu.memory_space<vmem>>, vector<64x128xf32>,
    } else {
    }
    %c2_i32_179 = arith.constant 2 : i32
    %503 = arith.cmpi eq, %arg1, %c2_i32_179 : i32
    %504 = arith.extui %503 : i1 to i32
    %c0_i32_180 = arith.constant 0 : i32
    %505 = arith.cmpi ne, %504, %c0_i32_180 : i32
    scf.if %505 {
      %506 = vector.broadcast %6 : vector<64x1xf32> to vector<64x128xf32>
      %507 = arith.mulf %499, %506 : vector<64x128xf32>
      %c0_181 = arith.constant 0 : index
      %c0_182 = arith.constant 0 : index
      %508 = vector.load %arg18[%c0_181, %c0_182] : memref<64x128xf32, #tpu.memory_space<vmem>>, vector<64x128xf32>
      %509 = vector.broadcast %6 : vector<64x1xf32> to vector<64x128xf32>
      %510 = arith.mulf %508, %509 : vector<64x128xf32>
      %511 = arith.addf %507, %510 : vector<64x128xf32>
      %512 = arith.truncf %511 : vector<64x128xf32> to vector<64x128xbf16>
      %c0_183 = arith.constant 0 : index
      %c0_184 = arith.constant 0 : index
      %513 = vector.load %arg19[%c0_183, %c0_184] : memref<128x128xbf16, #tpu.memory_space<vmem>>, vector<128x128xbf16>
      %cst_185 = arith.constant dense<0.000000e+00> : vector<64x128xf32>
      %514 = tpu.matmul %512, %513, %cst_185 {dimension_numbers = #tpu.dot_dimension_numbers<[1], [0], [0], [1], [0, 0, 1, 1], [], []>} : vector<64x128xbf16>, vector<128x128xbf16>, vector<64x128xf32> -> vector<64x128xf32>
      %c0_186 = arith.constant 0 : index
      %c0_187 = arith.constant 0 : index
      %515 = vector.load %arg20[%c0_186, %c0_187] : memref<1x128xf32, #tpu.memory_space<vmem>>, vector<1x128xf32>
      %516 = vector.broadcast %515 : vector<1x128xf32> to vector<64x128xf32>
      %517 = arith.addf %514, %516 : vector<64x128xf32>
      %518 = vector.broadcast %6 : vector<64x1xf32> to vector<64x128xf32>
      %519 = arith.mulf %517, %518 : vector<64x128xf32>
      %c0_188 = arith.constant 0 : index
      %c0_189 = arith.constant 0 : index
      %c0_190 = arith.constant 0 : index
      %520 = vector.load %arg21[%c0_188, %c0_189, %c0_190] : memref<1x64x128xf32, #tpu.memory_space<vmem>>, vector<1x64x128xf32>
      %521 = vector.shape_cast %520 : vector<1x64x128xf32> to vector<64x128xf32>
      %522 = vector.shape_cast %519 : vector<64x128xf32> to vector<1x64x128xf32>
      tpu.vector_store %arg21[%c0_188, %c0_189, %c0_190], %522 {strides = array<i32>} : memref<1x64x128xf32, #tpu.memory_space<vmem>>, vector<1x64x128xf32>,
    } else {
    }
    return
  }
  func.func @transform_0(%arg0: i32, %arg1: i32, %arg2: memref<2xi32, #tpu.memory_space<smem>>) -> (i32, i32, i32) {
    %c0_i32 = arith.constant 0 : i32
    %c0_i32_0 = arith.constant 0 : i32
    %c0_i32_1 = arith.constant 0 : i32
    return %arg0, %c0_i32, %c0_i32_0 : i32, i32, i32
  }
  func.func @transform_1(%arg0: i32, %arg1: i32, %arg2: memref<2xi32, #tpu.memory_space<smem>>) -> (i32, i32, i32) {
    %c0_i32 = arith.constant 0 : i32
    %c0_i32_0 = arith.constant 0 : i32
    %c0_i32_1 = arith.constant 0 : i32
    %c0_i32_2 = arith.constant 0 : i32
    return %c0_i32, %c0_i32_0, %c0_i32_1 : i32, i32, i32
  }
  func.func @transform_2(%arg0: i32, %arg1: i32, %arg2: memref<2xi32, #tpu.memory_space<smem>>) -> (i32, i32, i32) {
    %c0_i32 = arith.constant 0 : i32
    %c0_i32_0 = arith.constant 0 : i32
    %c0_i32_1 = arith.constant 0 : i32
    %c0_i32_2 = arith.constant 0 : i32
    return %c0_i32, %c0_i32_0, %c0_i32_1 : i32, i32, i32
  }
  func.func @transform_3(%arg0: i32, %arg1: i32, %arg2: memref<2xi32, #tpu.memory_space<smem>>) -> (i32, i32, i32) {
    %c0_i32 = arith.constant 0 : i32
    %c0_i32_0 = arith.constant 0 : i32
    %c0_i32_1 = arith.constant 0 : i32
    %c0_i32_2 = arith.constant 0 : i32
    return %c0_i32, %c0_i32_0, %c0_i32_1 : i32, i32, i32
  }
  func.func @transform_4(%arg0: i32, %arg1: i32, %arg2: memref<2xi32, #tpu.memory_space<smem>>) -> (i32, i32, i32) {
    %c0_i32 = arith.constant 0 : i32
    %c0_i32_0 = arith.constant 0 : i32
    %c0_i32_1 = arith.constant 0 : i32
    %c0_i32_2 = arith.constant 0 : i32
    return %c0_i32, %c0_i32_0, %c0_i32_1 : i32, i32, i32
  }
  func.func @transform_5(%arg0: i32, %arg1: i32, %arg2: memref<2xi32, #tpu.memory_space<smem>>) -> (i32, i32, i32) {
    %c0_i32 = arith.constant 0 : i32
    %c0_i32_0 = arith.constant 0 : i32
    %c0_i32_1 = arith.constant 0 : i32
    %c0_i32_2 = arith.constant 0 : i32
    return %c0_i32, %c0_i32_0, %c0_i32_1 : i32, i32, i32
  }
  func.func @transform_6(%arg0: i32, %arg1: i32, %arg2: memref<2xi32, #tpu.memory_space<smem>>) -> (i32, i32, i32) {
    %c0_i32 = arith.constant 0 : i32
    %c0_i32_0 = arith.constant 0 : i32
    %c0_i32_1 = arith.constant 0 : i32
    %c0_i32_2 = arith.constant 0 : i32
    return %c0_i32, %c0_i32_0, %c0_i32_1 : i32, i32, i32
  }
  func.func @transform_7(%arg0: i32, %arg1: i32, %arg2: memref<2xi32, #tpu.memory_space<smem>>) -> (i32, i32, i32) {
    %c0_i32 = arith.constant 0 : i32
    %c0_i32_0 = arith.constant 0 : i32
    %c0_i32_1 = arith.constant 0 : i32
    %c0_i32_2 = arith.constant 0 : i32
    return %c0_i32, %c0_i32_0, %c0_i32_1 : i32, i32, i32
  }
  func.func @transform_8(%arg0: i32, %arg1: i32, %arg2: memref<2xi32, #tpu.memory_space<smem>>) -> (i32, i32, i32) {
    %c0_i32 = arith.constant 0 : i32
    %c0_i32_0 = arith.constant 0 : i32
    %c0_i32_1 = arith.constant 0 : i32
    %c0_i32_2 = arith.constant 0 : i32
    return %c0_i32, %c0_i32_0, %c0_i32_1 : i32, i32, i32
  }
  func.func @transform_9(%arg0: i32, %arg1: i32, %arg2: memref<2xi32, #tpu.memory_space<smem>>) -> (i32, i32, i32) {
    %c0_i32 = arith.constant 0 : i32
    %c0_i32_0 = arith.constant 0 : i32
    %c0_i32_1 = arith.constant 0 : i32
    %c0_i32_2 = arith.constant 0 : i32
    return %c0_i32, %c0_i32_0, %c0_i32_1 : i32, i32, i32
  }
  func.func @transform_10(%arg0: i32, %arg1: i32, %arg2: memref<2xi32, #tpu.memory_space<smem>>) -> (i32, i32, i32) {
    %c0_i32 = arith.constant 0 : i32
    %c0_i32_0 = arith.constant 0 : i32
    %c0_i32_1 = arith.constant 0 : i32
    %c0_i32_2 = arith.constant 0 : i32
    return %c0_i32, %c0_i32_0, %c0_i32_1 : i32, i32, i32
  }
  func.func @transform_11(%arg0: i32, %arg1: i32, %arg2: memref<2xi32, #tpu.memory_space<smem>>) -> (i32, i32, i32) {
    %c0_i32 = arith.constant 0 : i32
    %c0_i32_0 = arith.constant 0 : i32
    %c0_i32_1 = arith.constant 0 : i32
    %c0_i32_2 = arith.constant 0 : i32
    return %c0_i32, %c0_i32_0, %c0_i32_1 : i32, i32, i32
  }
  func.func @transform_12(%arg0: i32, %arg1: i32, %arg2: memref<2xi32, #tpu.memory_space<smem>>) -> (i32, i32, i32) {
    %c0_i32 = arith.constant 0 : i32
    %c0_i32_0 = arith.constant 0 : i32
    %c0_i32_1 = arith.constant 0 : i32
    %c0_i32_2 = arith.constant 0 : i32
    return %c0_i32, %c0_i32_0, %c0_i32_1 : i32, i32, i32
  }
  func.func @transform_13(%arg0: i32, %arg1: i32, %arg2: memref<2xi32, #tpu.memory_space<smem>>) -> (i32, i32, i32) {
    %c0_i32 = arith.constant 0 : i32
    %c0_i32_0 = arith.constant 0 : i32
    %c0_i32_1 = arith.constant 0 : i32
    %c0_i32_2 = arith.constant 0 : i32
    return %c0_i32, %c0_i32_0, %c0_i32_1 : i32, i32, i32
  }
  func.func @transform_14(%arg0: i32, %arg1: i32, %arg2: memref<2xi32, #tpu.memory_space<smem>>) -> (i32, i32, i32) {
    %c0_i32 = arith.constant 0 : i32
    %c0_i32_0 = arith.constant 0 : i32
    %c0_i32_1 = arith.constant 0 : i32
    %c0_i32_2 = arith.constant 0 : i32
    return %c0_i32, %c0_i32_0, %c0_i32_1 : i32, i32, i32
  }
  func.func @transform_15(%arg0: i32, %arg1: i32, %arg2: memref<2xi32, #tpu.memory_space<smem>>) -> (i32, i32) {
    %c0_i32 = arith.constant 0 : i32
    %c0_i32_0 = arith.constant 0 : i32
    %c0_i32_1 = arith.constant 0 : i32
    return %c0_i32, %c0_i32_0 : i32, i32
  }
  func.func @transform_16(%arg0: i32, %arg1: i32, %arg2: memref<2xi32, #tpu.memory_space<smem>>) -> (i32, i32) {
    %c0_i32 = arith.constant 0 : i32
    %c0_i32_0 = arith.constant 0 : i32
    %c0_i32_1 = arith.constant 0 : i32
    return %c0_i32, %c0_i32_0 : i32, i32
  }
  func.func @transform_17(%arg0: i32, %arg1: i32, %arg2: memref<2xi32, #tpu.memory_space<smem>>) -> (i32, i32) {
    %c0_i32 = arith.constant 0 : i32
    %c0_i32_0 = arith.constant 0 : i32
    %c0_i32_1 = arith.constant 0 : i32
    return %c0_i32, %c0_i32_0 : i32, i32
  }
  func.func @transform_18(%arg0: i32, %arg1: i32, %arg2: memref<2xi32, #tpu.memory_space<smem>>) -> (i32, i32, i32) {
    %c0_i32 = arith.constant 0 : i32
    %c0_i32_0 = arith.constant 0 : i32
    %c0_i32_1 = arith.constant 0 : i32
    return %arg0, %c0_i32, %c0_i32_0 : i32, i32, i32
  }
}

</mosaic_0001>

<bundles_post_ra>
// kernel: tpu_custom_call.1
= control target key start
LH: loop header
LB: loop body
LE: loop exit
PB: predicated region body
PF: predicated region fallthrough
CT: control target
= control target key end

     0   :  { %s11263_s0 = inlined_call_operand.hbm [shape: s32[2], index: 0, kind: input, shape index: {}]   ;;  %s11264_s1 = inlined_call_operand.vmem [shape: f32[2,64,128], index: 1, kind: input, shape index: {}]   ;;  %s11265_s2 = inlined_call_operand.hbm [shape: bf16[3,128,384], index: 2, kind: input, shape index: {}]   ;;  %s11266_s3 = inlined_call_operand.hbm [shape: f32[3,1,384], index: 3, kind: input, shape index: {}]   ;;  %s11267_s4 = inlined_call_operand.hbm [shape: bf16[3,128,128], index: 4, kind: input, shape index: {}]   ;;  %s11268_s5 = inlined_call_operand.hbm [shape: f32[3,1,128], index: 5, kind: input, shape index: {}]   ;;  %s11269_s6 = inlined_call_operand.vmem [shape: f32[3,9,64], index: 6, kind: input, shape index: {}]   ;;  %s11270_s7 = inlined_call_operand.vmem [shape: f32[3,9,64], index: 7, kind: input, shape index: {}]   ;;  %s11271_s8 = inlined_call_operand.hbm [shape: f32[3,1,128], index: 8, kind: input, shape index: {}]   ;;  %s11272_s9 = inlined_call_operand.vmem [shape: f32[3,1,128], index: 9, kind: input, shape index: {}]   ;;  %s11273_s10 = inlined_call_operand.hbm [shape: bf16[9,128,256], index: 10, kind: input, shape index: {}]   ;;  %s11274_s11 = inlined_call_operand.vmem [shape: f32[3,1,256], index: 11, kind: input, shape index: {}]   ;;  %s11275_s12 = inlined_call_operand.hbm [shape: bf16[9,256,128], index: 12, kind: input, shape index: {}]   ;;  %s11276_s13 = inlined_call_operand.vmem [shape: f32[3,1,128], index: 13, kind: input, shape index: {}]   ;;  %s11277_s14 = inlined_call_operand.vmem [shape: f32[3,1,128], index: 14, kind: input, shape index: {}]   ;;  %s11278_s15 = inlined_call_operand.vmem [shape: f32[3,1,128], index: 15, kind: input, shape index: {}]   ;;  %s11279_s16 = inlined_call_operand.vmem [shape: f32[64,128], index: 16, kind: input, shape index: {}]   ;;  %s11280_s17 = inlined_call_operand.hbm [shape: bf16[128,128], index: 17, kind: input, shape index: {}]   ;;  %s11281_s18 = inlined_call_operand.vmem [shape: f32[1,128], index: 18, kind: input, shape index: {}]   ;;  %s11282_s19 = inlined_call_operand.hbm [shape: f32[2,64,128], index: 19, kind: output, shape index: {}]  }
   0x1   :  { %11442 = sst [smem:[#allocation58_spill]] %s11263_s0 }
   0x2   :  { %11443 = sst [smem:[#allocation59_spill]] %s11264_s1  ;;  %s11454_s20 = sld [smem:[#allocation58_spill]] }
   0x3   :  { %11444 = sst [smem:[#allocation60_spill]] %s11265_s2 }
   0x4   :  { %11445 = sst [smem:[#allocation61_spill]] %s11266_s3 }
   0x5   :  { %11446 = sst [smem:[#allocation62_spill]] %s11268_s5 }
   0x6   :  { %11447 = sst [smem:[#allocation63_spill]] %s11274_s11 }
   0x7   :  { %11448 = sst [smem:[#allocation64_spill]] %s11276_s13 }
   0x8   :  { %11449 = sst [smem:[#allocation65_spill]] %s11277_s14  ;;  %s7637_s13 = scalar_lea.hbm %s11454_s20, 16 }
   0x9   :  { %11450 = sst [smem:[#allocation66_spill]] %s11278_s15  ;;  %p7638_p0 = scmp.ne.s32.totalorder %s11454_s20, %s7637_s13 }
   0xa   :  { %11451 = sst [smem:[#allocation67_spill]] %s11279_s16  ;;  %p7641_p1 = scmp.lt.u32.totalorder %s7637_s13, %s11454_s20 }
   0xb   :  { %11452 = sst [smem:[#allocation68_spill]] %s11281_s18 }
   0xc   :  { %11453 = sst [smem:[#allocation69_spill]] %s11282_s19  ;;  %p7643_p2 = pnand %p7641_p1, %p7638_p0 }
   0xe   :  { %7646 = shalt.err (!%p7643_p2)  }
   0xf   :  { %s7989_s23 = smov [#allocation4]  }
  0x10   :  { %25 = dma.hbm_to_smem %s11454_s20, 16, %s7989_s23, [#allocation3] }
  0x11   :  { %7931 = dma.done.wait [#allocation3], 16 }
  0x12   :  { %7932 = vsyncadd [#allocation3], 4294967280 }
  0x13   :  { %27 = sfence }
  0x14   :  { %28 = vsyncpa [#allocation6], 0 }
  0x15   :  { %29 = vsyncpa [#allocation9], 0 }
  0x16   :  { %30 = vsyncpa [#allocation12], 0 }
  0x17   :  { %31 = vsyncpa [#allocation15], 0 }
  0x18   :  { %32 = vsyncpa [#allocation18], 0 }
  0x19   :  { %33 = vsyncpa [#allocation7], 0 }
  0x1a   :  { %35 = vsyncpa [#allocation7 + $0x1], 0  ;;  %s8135_s3 = smov 0   ;;  %s8137_s13 = smov 0  }
  0x1b   :  { %s8139_s26 = smov 0   ;;  %s8141_s27 = smov 0  }
  0x1c   :  { %s8143_s28 = smov 0   ;;  %s8145_s29 = smov 0  }
  0x1d   :  { %s8147_s0 = smov 0   ;;  %s8149_s30 = smov 0  }
  0x1e LB: > { %11455 = sst [smem:[#allocation27_spill]] %s7959_s3  ;;  %s6198_s20 = sadd.s32 4294967295, %s7987_s30   ;;  %s7987_s30 = sphi %s8149_s30, %s41_s30   ;;  %s7983_s0 = sphi %s8147_s0, %s11793_s0   ;;  %s7979_s29 = sphi %s8145_s29, %s11792_s29   ;;  %s7975_s28 = sphi %s8143_s28, %s11791_s28   ;;  %s7971_s27 = sphi %s8141_s27, %s11790_s27   ;;  %s7967_s26 = sphi %s8139_s26, %s11789_s26   ;;  %s7963_s13 = sphi %s8137_s13, %s11795_s13   ;;  %s7959_s3 = sphi %s8135_s3, %s11794_s3  }
  0x1f   : > { %11456 = sst [smem:[#allocation28_spill]] %s7967_s26  ;;  %s6199_s21 = sadd.s32 4294967294, %s7987_s30  }
  0x20   : > { %11457 = sst [smem:[#allocation29_spill]] %s7979_s29  ;;  %s50_s1 = sadd.s32 1, %s7979_s29 }
  0x21   : > { %11458 = sst [smem:[#allocation30_spill]] %s7983_s0  ;;  %s53_s22 = sadd.s32 1, %s7983_s0 }
  0x22   : > { %11459 = sst [smem:[#allocation31_spill]] %s7987_s30  ;;  %p51_p3 = scmp.ge.s32.totalorder %s50_s1, 3 }
  0x23   : > { %s443_s2 = sadd.s32 1, %s7967_s26  ;;  %p453_p4 = scmp.ne.s32.totalorder %s7967_s26, %s7963_s13 }
  0x24   : > { %p454_p5 = scmp.eq.s32.totalorder %s6198_s20, 5  ;;  %s11797_s1 = smov (%p51_p3, %s50_s1), 0 }
  0x25   : > { %11460 = sst [smem:[#allocation32_spill]] %s11797_s1  ;;  %s11799_s22 = smov (!%p51_p3, %s53_s22), %s7983_s0 }
  0x26   : > { %p8185_p6 = por %p454_p5, %p453_p4  ;;  %p459_p7 = scmp.ne.s32.totalorder %s7963_s13, %s7959_s3 }
  0x27   : > { %p55_p8 = scmp.ge.s32.totalorder %s11799_s22, 2  ;;  %p460_p9 = scmp.eq.s32.totalorder %s6199_s21, 5 }
  0x28   : > { %s11461_s23 = scalar_select %p8185_p6, 1, 0 }
  0x29   : > { %p6200_p10 = scmp.ge.s32.totalorder %s7987_s30, 1  ;;  %p467_p11 = scmp.lt.s32.totalorder %s7987_s30, 7 }
  0x2a   : > { %11462 = sst [smem:[#allocation33_spill]] %s11461_s23  ;;  %s11801_s22 = smov (%p55_p8, %s11799_s22), 0 }
  0x2b   : > { %11463 = sst [smem:[#allocation34_spill]] %s11801_s22  ;;  %p8195_p12 = por %p460_p9, %p459_p7 }
  0x2c   : > { %p8199_p13 = pnand %p6200_p10, %p467_p11  ;;  %s440_s1 = ssub.s32 %s7983_s0, %s11801_s22 }
  0x2d   : > { %s11464_s24 = scalar_select %p8195_p12, 1, 0 }
  0x2e   : > { %s11466_s25 = scalar_select %p8199_p13, 1, 0 }
  0x2f   : > { %11465 = sst [smem:[#allocation35_spill]] %s11464_s24  ;;  %p441_p0 = scmp.eq.s32.totalorder %s440_s1, 0 }
  0x30   : > { %p7058_p1 = pneg %p8199_p13  ;;  %p8207_p2 = scmp.eq.s32.totalorder %s6198_s20, 0 }
  0x31   : > { %s8212_s29 = scalar_select %p441_p0, %s7967_s26, %s443_s2  }
  0x32   : > { %s11467_s21 = scalar_select %p8207_p2, 1, 0 }
  0x33   : > { %11468 = sst [smem:[#allocation36_spill]] %s8212_s29  ;;  %p8216_p3 = pnand %p8207_p2, %p7058_p1 }
  0x34   : > { %s7990_s24 = smov [#allocation8]   ;;  %s11470_s0 = sld [smem:[#allocation61_spill]] }
  0x35   : > { %s492_s30 = sshll.u32 %s7990_s24, 4  ;;  %p8228_p5 = pneg %p8216_p3  ;;  %s493_s30 = int_to_ptr.vmem [resolvable:$true] %s492_s30 }
  0x3a   : > { %s11471_s19 = smov %s11470_s0  ;;  %s7647_s23 = scalar_lea.hbm %s11470_s0, 144 }
  0x3b   : > { %p7648_p4 = scmp.ne.s32.totalorder %s11471_s19, %s7647_s23  ;;  %p7654_p9 = scmp.lt.u32.totalorder %s7647_s23, %s11471_s19 }
  0x3d   : > { %p7650_p7 = pnand %p8228_p5, %p7648_p4 }
  0x3f   : > { %p7651_p8 = pneg %p7650_p7 }
  0x41   : > { %p7656_p10 = pnand %p7654_p9, %p7651_p8 }
  0x43   : > { %7659 = shalt.err (!%p7656_p10)
}
  0x44   : > { %s7660_s0 = scalar_lea.vmem %s493_s30, 144  ;;  %s7667_s18 = scalar_lea.vmem %s493_s30, 160 }
  0x45   : > { %p7661_p11 = scmp.ne.s32.totalorder %s493_s30, %s7660_s0  ;;  %p7668_p12 = scmp.lt.s32.totalorder %s493_s30, %s493_s30 }
  0x46   : > { %p7669_p6 = scmp.lt.s32.totalorder %s7667_s18, %s7660_s0 }
  0x47   : > { %p7663_p0 = pnand %p7661_p11, %p8228_p5 }
  0x48   : > { %p7670_p2 = por %p7669_p6, %p7668_p12 }
  0x49   : > { %p7664_p1 = pneg %p7663_p0 }
  0x4b   : > { %p7671_p13 = pnand %p7670_p2, %p7664_p1 }
  0x4d   : > { %7674 = shalt.err (!%p7671_p13)
}
  0x4e   : > { %s7991_s22 = smov 48   ;;  %s7992_s1 = smov 3  }
  0x4f   : > { %7064 = dma.hbm_to_vmem [thread:$0]  (!%p8216_p3), %s11471_s19, 144, %s493_s30, [#allocation9], %s7991_s22, %s7991_s22, %s7992_s1  }
  0x50   : > { %s7993_s20 = smov [#allocation11]   ;;  %s11473_s5 = sld [smem:[#allocation62_spill]] }
  0x51   : > { %s518_s24 = sshll.u32 %s7993_s20, 4  ;;  %s519_s24 = int_to_ptr.vmem [resolvable:$true] %s518_s24 }
  0x56   : > { %s7675_s15 = scalar_lea.hbm %s11473_s5, 48 }
  0x57   : > { %p7676_p6 = scmp.ne.s32.totalorder %s11473_s5, %s7675_s15  ;;  %p7682_p2 = scmp.lt.u32.totalorder %s7675_s15, %s11473_s5 }
  0x59   : > { %p7678_p12 = pnand %p7676_p6, %p8228_p5 }
  0x5b   : > { %p7679_p13 = pneg %p7678_p12 }
  0x5d   : > { %p7684_p4 = pnand %p7682_p2, %p7679_p13 }
  0x5f   : > { %7687 = shalt.err (!%p7684_p4)
}
  0x60   : > { %s7688_s30 = scalar_lea.vmem %s519_s24, 48  ;;  %s7695_s16 = scalar_lea.vmem %s519_s24, 64 }
  0x61   : > { %p7689_p7 = scmp.ne.s32.totalorder %s519_s24, %s7688_s30  ;;  %p7696_p10 = scmp.lt.s32.totalorder %s519_s24, %s519_s24 }
  0x62   : > { %p7697_p11 = scmp.lt.s32.totalorder %s7695_s16, %s7688_s30 }
  0x63   : > { %p7691_p8 = pnand %p7689_p7, %p8228_p5 }
  0x64   : > { %p7698_p0 = por %p7697_p11, %p7696_p10 }
  0x65   : > { %p7692_p9 = pneg %p7691_p8 }
  0x67   : > { %p7699_p1 = pnand %p7698_p0, %p7692_p9 }
  0x69   : > { %7702 = shalt.err (!%p7699_p1)
}
  0x6a   : > { %s11302_s26 = smov 16   ;;  %s11303_s22 = smov 1  }
  0x6b   : > { %7070 = dma.hbm_to_vmem [thread:$0]  (!%p8216_p3), %s11473_s5, 48, %s519_s24, [#allocation12], %s11302_s26, %s11302_s26, %s11303_s22  }
  0x6c   : > { %s7996_s15 = smov [#allocation14]   ;;  %s7703_s20 = scalar_lea.hbm %s11273_s10, 18432 }
  0x6d   : > { %s553_s1 = sshll.u32 %s7996_s15, 4  ;;  %p7704_p6 = scmp.ne.s32.totalorder %s11273_s10, %s7703_s20  ;;  %s554_s1 = int_to_ptr.vmem [resolvable:$true] %s553_s1 }
  0x6e   : > { %p7710_p2 = scmp.lt.u32.totalorder %s7703_s20, %s11273_s10 }
  0x6f   : > { %p7706_p12 = pnand %p7704_p6, %p8228_p5 }
  0x71   : > { %p7707_p13 = pneg %p7706_p12 }
  0x73   : > { %p7712_p4 = pnand %p7710_p2, %p7707_p13 }
  0x75   : > { %7715 = shalt.err (!%p7712_p4)
}
  0x76   : > { %s7716_s24 = scalar_lea.vmem %s554_s1, 18432  ;;  %p7724_p10 = scmp.lt.s32.totalorder %s554_s1, %s554_s1 }
  0x77   : > { %p7717_p7 = scmp.ne.s32.totalorder %s554_s1, %s7716_s24  ;;  %p7725_p11 = scmp.lt.s32.totalorder %s7716_s24, %s7716_s24 }
  0x79   : > { %p7719_p8 = pnand %p7717_p7, %p8228_p5  ;;  %p7726_p0 = por %p7725_p11, %p7724_p10 }
  0x7b   : > { %p7720_p9 = pneg %p7719_p8 }
  0x7d   : > { %p7727_p1 = pnand %p7726_p0, %p7720_p9 }
  0x7f   : > { %7730 = shalt.err (!%p7727_p1)
}
  0x80   : > { %s7997_s11 = smov 128   ;;  %s7998_s14 = smov 8  }
  0x81   : > { %7076 = dma.hbm_to_vmem [thread:$0]  (!%p8216_p3), %s11273_s10, 18432, %s554_s1, [#allocation15], %s7997_s11, %s7997_s11, %s7998_s14  }
  0x82   : > { %s7999_s23 = smov [#allocation5]   ;;  %s11474_s30 = sld [smem:[#allocation60_spill]] }
  0x83   : > { %s479_s20 = sshll.u32 %s7999_s23, 4  ;;  %s480_s20 = int_to_ptr.vmem [resolvable:$true] %s479_s20 }
  0x88   : > { %s11475_s16 = smov %s11474_s30  ;;  %s7731_s26 = scalar_lea.hbm %s11474_s30, 9216 }
  0x89   : > { %p7732_p6 = scmp.ne.s32.totalorder %s11475_s16, %s7731_s26  ;;  %p7738_p2 = scmp.lt.u32.totalorder %s7731_s26, %s11475_s16 }
  0x8b   : > { %p7734_p12 = pnand %p7732_p6, %p8228_p5 }
  0x8d   : > { %p7735_p13 = pneg %p7734_p12 }
  0x8f   : > { %p7740_p4 = pnand %p7738_p2, %p7735_p13 }
  0x91   : > { %7743 = shalt.err (!%p7740_p4)
}
  0x92   : > { %s7744_s1 = scalar_lea.vmem %s480_s20, 9216  ;;  %p7752_p10 = scmp.lt.s32.totalorder %s480_s20, %s480_s20 }
  0x93   : > { %p7745_p7 = scmp.ne.s32.totalorder %s480_s20, %s7744_s1  ;;  %p7753_p11 = scmp.lt.s32.totalorder %s7744_s1, %s7744_s1 }
  0x95   : > { %p7747_p8 = pnand %p7745_p7, %p8228_p5  ;;  %p7754_p0 = por %p7753_p11, %p7752_p10 }
  0x97   : > { %p7748_p9 = pneg %p7747_p8 }
  0x99   : > { %p7755_p1 = pnand %p7754_p0, %p7748_p9 }
  0x9b   : > { %7758 = shalt.err (!%p7755_p1)
}
  0x9c   : > { %s8000_s22 = smov 192   ;;  %s8001_s11 = smov 12  }
  0x9d   : > { %7061 = dma.hbm_to_vmem [thread:$0]  (!%p8216_p3), %s11475_s16, 9216, %s480_s20, [#allocation6], %s8000_s22, %s8000_s22, %s8001_s11  }
  0x9e   : > { %s8002_s26 = smov [#allocation10]   ;;  %s7759_s23 = scalar_lea.hbm %s11267_s4, 3072 }
  0x9f   : > { %s505_s14 = sshll.u32 %s8002_s26, 4  ;;  %p7760_p6 = scmp.ne.s32.totalorder %s11267_s4, %s7759_s23  ;;  %s506_s14 = int_to_ptr.vmem [resolvable:$true] %s505_s14 }
  0xa0   : > { %p7766_p2 = scmp.lt.u32.totalorder %s7759_s23, %s11267_s4 }
  0xa1   : > { %p7762_p12 = pnand %p7760_p6, %p8228_p5 }
  0xa3   : > { %p7763_p13 = pneg %p7762_p12 }
  0xa5   : > { %p7768_p4 = pnand %p7766_p2, %p7763_p13 }
  0xa7   : > { %7771 = shalt.err (!%p7768_p4)
}
  0xa8   : > { %s7772_s20 = scalar_lea.vmem %s506_s14, 3072  ;;  %p7780_p10 = scmp.lt.s32.totalorder %s506_s14, %s506_s14 }
  0xa9   : > { %p7773_p7 = scmp.ne.s32.totalorder %s506_s14, %s7772_s20  ;;  %p7781_p11 = scmp.lt.s32.totalorder %s7772_s20, %s7772_s20 }
  0xab   : > { %p7775_p8 = pnand %p7773_p7, %p8228_p5  ;;  %p7782_p0 = por %p7781_p11, %p7780_p10 }
  0xad   : > { %p7776_p9 = pneg %p7775_p8 }
  0xaf   : > { %p7783_p1 = pnand %p7782_p0, %p7776_p9 }
  0xb1   : > { %7786 = shalt.err (!%p7783_p1)
}
  0xb2   : > { %s8003_s1 = smov 64   ;;  %s8004_s22 = smov 4  }
  0xb3   : > { %7067 = dma.hbm_to_vmem [thread:$0]  (!%p8216_p3), %s11267_s4, 3072, %s506_s14, [#allocation9], %s8003_s1, %s8003_s1, %s8004_s22  }
  0xb4   : > { %s8005_s19 = smov [#allocation13]   ;;  %s8006_s15 = smov [#allocation16]  }
  0xb5   : > { %s537_s26 = sshll.u32 %s8005_s19, 4  ;;  %s569_s29 = sshll.u32 %s8006_s15, 4  ;;  %s538_s26 = int_to_ptr.vmem [resolvable:$true] %s537_s26  ;;  %s8322_s29 = int_to_ptr.vmem [resolvable:$true] %s569_s29 }
  0xb6   : > { %s7787_s18 = scalar_lea.hbm %s11271_s8, 48 }
  0xb7   : > { %p7788_p6 = scmp.ne.s32.totalorder %s11271_s8, %s7787_s18  ;;  %p7794_p2 = scmp.lt.u32.totalorder %s7787_s18, %s11271_s8 }
  0xb9   : > { %p7790_p12 = pnand %p7788_p6, %p8228_p5 }
  0xbb   : > { %p7791_p13 = pneg %p7790_p12 }
  0xbd   : > { %p7796_p4 = pnand %p7794_p2, %p7791_p13 }
  0xbf   : > { %7799 = shalt.err (!%p7796_p4)
}
  0xc0   : > { %s7800_s11 = scalar_lea.vmem %s538_s26, 48  ;;  %s7807_s5 = scalar_lea.vmem %s538_s26, 64 }
  0xc1   : > { %p7801_p7 = scmp.ne.s32.totalorder %s538_s26, %s7800_s11  ;;  %p7808_p10 = scmp.lt.s32.totalorder %s538_s26, %s538_s26 }
  0xc2   : > { %p7809_p11 = scmp.lt.s32.totalorder %s7807_s5, %s7800_s11 }
  0xc3   : > { %p7803_p8 = pnand %p7801_p7, %p8228_p5 }
  0xc4   : > { %p7810_p0 = por %p7809_p11, %p7808_p10 }
  0xc5   : > { %p7804_p9 = pneg %p7803_p8 }
  0xc7   : > { %p7811_p1 = pnand %p7810_p0, %p7804_p9 }
  0xc9   : > { %7814 = shalt.err (!%p7811_p1)
}
  0xca   : > { %s11476_s19 = smov 1   ;;  %s11477_s15 = smov 16  }
  0xcb   : > { %7073 = dma.hbm_to_vmem [thread:$0]  (!%p8216_p3), %s11271_s8, 48, %s538_s26, [#allocation12], %s11477_s15, %s11477_s15, %s11476_s19  }
  0xcc   : > { %s7815_s24 = scalar_lea.hbm %s11275_s12, 18432 }
  0xcd   : > { %p7816_p6 = scmp.ne.s32.totalorder %s11275_s12, %s7815_s24  ;;  %p7822_p2 = scmp.lt.u32.totalorder %s7815_s24, %s11275_s12 }
  0xcf   : > { %p7818_p12 = pnand %p7816_p6, %p8228_p5 }
  0xd1   : > { %p7819_p13 = pneg %p7818_p12 }
  0xd3   : > { %p7824_p4 = pnand %p7822_p2, %p7819_p13 }
  0xd5   : > { %7827 = shalt.err (!%p7824_p4)
}
  0xd6   : > { %s7828_s26 = scalar_lea.vmem %s8322_s29, 18432  ;;  %p7836_p10 = scmp.lt.s32.totalorder %s8322_s29, %s8322_s29 }
  0xd7   : > { %p7829_p7 = scmp.ne.s32.totalorder %s8322_s29, %s7828_s26  ;;  %p7837_p11 = scmp.lt.s32.totalorder %s7828_s26, %s7828_s26 }
  0xd9   : > { %p7831_p8 = pnand %p7829_p7, %p8228_p5  ;;  %p7838_p0 = por %p7837_p11, %p7836_p10 }
  0xdb   : > { %p7832_p9 = pneg %p7831_p8 }
  0xdd   : > { %p7839_p1 = pnand %p7838_p0, %p7832_p9 }
  0xdf   : > { %7842 = shalt.err (!%p7839_p1)
}
  0xe0   : > { %7079 = dma.hbm_to_vmem [thread:$0]  (!%p8216_p3), %s11275_s12, 18432, %s8322_s29, [#allocation15], %s8003_s1, %s8003_s1, %s8004_s22  }
  0xe1   : > { %s8007_s23 = smov [#allocation17]   ;;  %s7843_s24 = scalar_lea.hbm %s11280_s17, 1024 }
  0xe2   : > { %s594_s0 = sshll.u32 %s8007_s23, 4  ;;  %p7844_p6 = scmp.ne.s32.totalorder %s11280_s17, %s7843_s24  ;;  %s595_s0 = int_to_ptr.vmem [resolvable:$true] %s594_s0 }
  0xe3   : > { %p7850_p2 = scmp.lt.u32.totalorder %s7843_s24, %s11280_s17 }
  0xe4   : > { %p7846_p12 = pnand %p7844_p6, %p8228_p5 }
  0xe6   : > { %p7847_p13 = pneg %p7846_p12 }
  0xe8   : > { %p7852_p4 = pnand %p7850_p2, %p7847_p13 }
  0xea   : > { %7855 = shalt.err (!%p7852_p4)
}
  0xeb   : > { %s7856_s29 = scalar_lea.vmem %s595_s0, 1024  ;;  %p7864_p10 = scmp.lt.s32.totalorder %s595_s0, %s595_s0 }
  0xec   : > { %p7857_p7 = scmp.ne.s32.totalorder %s595_s0, %s7856_s29  ;;  %p7865_p11 = scmp.lt.s32.totalorder %s7856_s29, %s7856_s29 }
  0xee   : > { %p7859_p8 = pnand %p7857_p7, %p8228_p5  ;;  %p7866_p0 = por %p7865_p11, %p7864_p10 }
  0xf0   : > { %p7860_p9 = pneg %p7859_p8 }
  0xf2   : > { %p7867_p1 = pnand %p7866_p0, %p7860_p9 }
  0xf4   : > { %7870 = shalt.err (!%p7867_p1)
}
  0xf5   : > { %7082 = dma.hbm_to_vmem [thread:$0]  (!%p8216_p3), %s11280_s17, 1024, %s595_s0, [#allocation18], %s8003_s1, %s8003_s1, %s8004_s22  }
  0xf6   : > { %p11478_p6 = scmp.ne.s32.totalorder %s11466_s25, 0 }
  0xf8   : > { %621 = sbr.rel (%p11478_p6) target bundleno = 4806 (0x12c6), region = 92 }
  0xff   : > { %p11479_p5 = scmp.ne.s32.totalorder %s11467_s21, 0 }
 0x101   : > { %7934 = dma.done.wait (%p11479_p5), [#allocation6], 9216  }
 0x102   : > { %7936 = vsyncadd (%p11479_p5), [#allocation6], 4294958080 }
 0x103   : > { %7938 = dma.done.wait (%p11479_p5), [#allocation9], 3216  }
 0x104   : > { %7940 = vsyncadd (%p11479_p5), [#allocation9], 4294964080 }
 0x105   : > { %7942 = dma.done.wait (%p11479_p5), [#allocation12], 96  }
 0x106   : > { %7944 = vsyncadd (%p11479_p5), [#allocation12], 4294967200 }
 0x107   : > { %7946 = dma.done.wait (%p11479_p5), [#allocation15], 36864  }
 0x108   : > { %7948 = vsyncadd (%p11479_p5), [#allocation15], 4294930432 }
 0x109   : > { %7950 = dma.done.wait (%p11479_p5), [#allocation18], 1024  }
 0x10a   : > { %7952 = vsyncadd (%p11479_p5), [#allocation18], 4294966272  ;;  %v710_v0 = vlaneseq  ;;  %s700_s3 = sand.u32 1, %s7963_s13   ;;  %p703_p3 = scmp.lt.s32.totalorder %s7975_s28, 1  ;;  %v8008_v11 = vmov 0.0  }
 0x10b   : > { %s709_s25 = sld [smem:[#allocation4 + %s7975_s28]]  ;;  %s8419_s2 = sshll.u32 %s700_s3, 6 }
 0x10c   : > { %v8421_v1 = vshrl.u32 %v710_v0, 7  ;;  %s704_s1 = scalar_select %p703_p3, %s7975_s28, 1  ;;  %v8450_v10 = vand.u32 127, %v710_v0 }
 0x10d   : > { %s11481_s23 = sld [smem:[#allocation59_spill]]  ;;  %s8482_s18 = scalar_lea.vmem [#allocation19], %s8419_s2 }
 0x10e   : > { %11480 = vst [vmem:[#allocation37_spill] sm:$0xff] %v8421_v1  ;;  %v8425_v2 = vadd.s32 8, %v8421_v1  ;;  %v8428_v3 = vadd.s32 16, %v8421_v1  ;;  %v8431_v4 = vadd.s32 24, %v8421_v1  ;;  %v8434_v5 = vadd.s32 32, %v8421_v1  ;;  %s6542_s21 = sshll.u32 %s704_s1, 6 }
 0x10f   : > { %v8437_v6 = vadd.s32 40, %v8421_v1  ;;  %v8440_v7 = vadd.s32 48, %v8421_v1  ;;  %v8443_v8 = vadd.s32 56, %v8421_v1  ;;  %p6230_p12 = scmp.ne.s32.totalorder %s7971_s27, 0 }
 0x111   : > { %v719_v9 = vstv %s709_s25 }
 0x112   : > { %vm720_vm0 = vcmp.lt.s32.totalorder %v8421_v1, %v719_v9  ;;  %vm721_vm1 = vcmp.lt.s32.totalorder %v8425_v2, %v719_v9  ;;  %vm722_vm2 = vcmp.lt.s32.totalorder %v8428_v3, %v719_v9  ;;  %vm723_vm3 = vcmp.lt.s32.totalorder %v8431_v4, %v719_v9  ;;  %750 = sbr.rel (%p6230_p12) target bundleno = 285 (0x11d), region = 128 }
 0x113   : > { %s8448_s0 = scalar_lea.vmem %s11481_s23, %s6542_s21  ;;  %vm724_vm4 = vcmp.lt.s32.totalorder %v8434_v5, %v719_v9  ;;  %vm725_vm5 = vcmp.lt.s32.totalorder %v8437_v6, %v719_v9  ;;  %vm726_vm6 = vcmp.lt.s32.totalorder %v8440_v7, %v719_v9  ;;  %vm727_vm7 = vcmp.lt.s32.totalorder %v8443_v8, %v719_v9 }
 0x114   : > { %v8460_v12 = vsel %vm720_vm0, 1.0, %v8008_v11  ;;  %v8462_v13 = vsel %vm721_vm1, 1.0, %v8008_v11  ;;  %v8464_v14 = vsel %vm722_vm2, 1.0, %v8008_v11  ;;  %v8466_v15 = vsel %vm723_vm3, 1.0, %v8008_v11  ;;  %v751_v21 = vld [vmem:[%s8448_s0] sm:$0xff] (!%p6230_p12)  ;;  %v752_v22 = vld [vmem:[%s8448_s0 + $0x8] sm:$0xff] (!%p6230_p12) }
 0x115   : > { %11482 = vst [vmem:[#allocation38_spill] sm:$0xff] %v8460_v12  ;;  %11483 = vst [vmem:[#allocation39_spill] sm:$0xff] %v8462_v13  ;;  %v8468_v16 = vsel %vm724_vm4, 1.0, %v8008_v11  ;;  %v8470_v17 = vsel %vm725_vm5, 1.0, %v8008_v11  ;;  %v8472_v18 = vsel %vm726_vm6, 1.0, %v8008_v11  ;;  %v8474_v19 = vsel %vm727_vm7, 1.0, %v8008_v11 }
 0x116   : > { %11484 = vst [vmem:[#allocation40_spill] sm:$0xff] %v8464_v14  ;;  %11485 = vst [vmem:[#allocation41_spill] sm:$0xff] %v8466_v15  ;;  %vm8477_vm8 = vcmp.ge.s32.totalorder %v8450_v10, %v719_v9  ;;  %v753_v23 = vld [vmem:[%s8448_s0 + $0x10] sm:$0xff] (!%p6230_p12)  ;;  %v759_v24 = vmul.f32 (!%p6230_p12), %v8460_v12, %v751_v21  ;;  %v760_v25 = vmul.f32 (!%p6230_p12), %v8462_v13, %v752_v22  ;;  %v754_v27 = vld [vmem:[%s8448_s0 + $0x18] sm:$0xff] (!%p6230_p12) }
 0x117   : > { %11486 = vst [vmem:[#allocation42_spill] sm:$0xff] %v8468_v16  ;;  %11487 = vst [vmem:[#allocation43_spill] sm:$0xff] %v8470_v17  ;;  %v761_v26 = vmul.f32 (!%p6230_p12), %v8464_v14, %v753_v23  ;;  %v755_v28 = vld [vmem:[%s8448_s0 + $0x20] sm:$0xff] (!%p6230_p12)  ;;  %v756_v29 = vld [vmem:[%s8448_s0 + $0x28] sm:$0xff] (!%p6230_p12)  ;;  %v762_v30 = vmul.f32 (!%p6230_p12), %v8466_v15, %v754_v27 }
 0x118   : > { %11488 = vst [vmem:[#allocation44_spill] sm:$0xff] %v8472_v18  ;;  %11489 = vst [vmem:[#allocation45_spill] sm:$0xff] %v8474_v19  ;;  %v763_v31 = vmul.f32 (!%p6230_p12), %v8468_v16, %v755_v28  ;;  %v764_v32 = vmul.f32 (!%p6230_p12), %v8470_v17, %v756_v29  ;;  %v757_v33 = vld [vmem:[%s8448_s0 + $0x30] sm:$0xff] (!%p6230_p12)  ;;  %v758_v34 = vld [vmem:[%s8448_s0 + $0x38] sm:$0xff] (!%p6230_p12) }
 0x119   : > { %767 = vst [vmem:[#allocation2] sm:$0xff] %v759_v24  ;;  %768 = vst [vmem:[#allocation2 + $0x8] sm:$0xff] %v760_v25  ;;  %v765_v35 = vmul.f32 %v8472_v18, %v757_v33  ;;  %v766_v36 = vmul.f32 %v8474_v19, %v758_v34 }
 0x11a   : > { %769 = vst [vmem:[#allocation2 + $0x10] sm:$0xff] %v761_v26  ;;  %770 = vst [vmem:[#allocation2 + $0x18] sm:$0xff] %v762_v30 }
 0x11b   : > { %771 = vst [vmem:[#allocation2 + $0x20] sm:$0xff] %v763_v31  ;;  %772 = vst [vmem:[#allocation2 + $0x28] sm:$0xff] %v764_v32 }
 0x11c   : > { %773 = vst [vmem:[#allocation2 + $0x30] sm:$0xff] %v765_v35  ;;  %774 = vst [vmem:[#allocation2 + $0x38] sm:$0xff] %v766_v36 }
 0x11d PF: > { %s6543_s30 = smul.u32 192, %s7971_s27  ;;  %v11309_v39 = vmov 0   ;;  %s6231_s20 = sshll.u32 %s7971_s27, 4  ;;  %vm1138_vm9 = vcmask 523264   ;;  %v11493_v25 = vmov 0  ;;  %vm2358_vm11 = vcmask 1040384  }
 0x11e   : > { %1016 = vmatprep.mubr.bf16.mxu0 %v11309_v39  ;;  %7201 = vset.pattern.permute.xlu0 %v11309_v39  ;;  %s796_s5 = scalar_lea.vmem %s11269_s6, %s6231_s20  ;;  %vm8541_vm10 = vmpackc.low %vm1138_vm9, %vm1138_vm9  ;;  %s799_s19 = scalar_lea.vmem %s11270_s7, %s6231_s20  ;;  %vm8010_vm12 = vmmov 1   ;;  %v11496_v34 = vmov 0  ;;  %v11313_v35 = vmov 1   ;;  %v11512_v18 = vmov 2  }
 0x11f   : > { %s8504_s24 = scalar_lea.vmem [#allocation5], %s6543_s30  ;;  %v797_v21 = vld [vmem:[%s796_s5] sm:$0xff]  ;;  %v798_v22 = vld [vmem:[%s796_s5 + $0x8] sm:$0x1]  ;;  %v11494_v25 = vsel %vm8541_vm10, 4294967295, %v11493_v25  ;;  %vm8558_vm13 = vmpackc.low %vm2358_vm11, %vm8010_vm12  ;;  %7202 = vset.pattern.permute.xlu1 %v11313_v35  ;;  %s837_s25 = smul.u32 3, %s7971_s27  ;;  %v8831_v14 = vsub.s32 %v8450_v10, %v8421_v1 }
 0x120   : > { %v7365_v41 = vld [vmem:[%s8504_s24 + $0x4] ss:$12 sps:$4 sm:$0xff]   ;;  %v7367_v42 = vld [vmem:[%s8504_s24] ss:$12 sps:$4 sm:$0xff]   ;;  %v7368_v43 = vld [vmem:[%s8504_s24 + $0x1c] ss:$12 sps:$4 sm:$0xff]   ;;  %v8537_v24 = vpack.c.bf16 %v798_v22, %v797_v21  ;;  %s4093_s14 = scalar_lea.vmem %s11272_s9, %s7971_s27 }
 0x121   : > { %984 = vmatprep.subr.bf16.mxu0 %v7365_v41  ;;  %v7370_v44 = vld [vmem:[%s8504_s24 + $0x18] ss:$12 sps:$4 sm:$0xff]   ;;  %v7371_v45 = vld [vmem:[%s8504_s24 + $0x34] ss:$12 sps:$4 sm:$0xff]   ;;  %v7373_v46 = vld [vmem:[%s8504_s24 + $0x30] ss:$12 sps:$4 sm:$0xff]  }
 0x122   : > { %985 = vmatpush1.bf16.msra.mxu0 %v7367_v42  ;;  %v7374_v47 = vld [vmem:[%s8504_s24 + $0x4c] ss:$12 sps:$4 sm:$0xff]   ;;  %v7376_v48 = vld [vmem:[%s8504_s24 + $0x48] ss:$12 sps:$4 sm:$0xff]   ;;  %v7377_v49 = vld [vmem:[%s8504_s24 + $0x64] ss:$12 sps:$4 sm:$0xff]  }
 0x123   : > { %986 = vmatprep.subr.bf16.mxu0 %v7368_v43  ;;  %v7389_v50 = vld [vmem:[%s8504_s24 + $0x8] ss:$12 sps:$4 sm:$0xff]   ;;  %v7390_v51 = vld [vmem:[%s8504_s24 + $0x20] ss:$12 sps:$4 sm:$0xff]   ;;  %v7391_v53 = vld [vmem:[%s8504_s24 + $0x38] ss:$12 sps:$4 sm:$0xff]  }
 0x124   : > { %v775_v37 = vld [vmem:[#allocation2] sm:$0xff]  ;;  %v776_v38 = vld [vmem:[#allocation2 + $0x8] sm:$0xff]  ;;  %6776 = vmatprep.subr.bf16.mxu1 %v7389_v50  ;;  %v7392_v56 = vld [vmem:[%s8504_s24 + $0x50] ss:$12 sps:$4 sm:$0xff]   ;;  %11492 = vst [vmem:[#allocation46_spill] sm:$0xff] %v8537_v24  ;;  %v11497_v34 = vsel %vm8558_vm13, 4294967295, %v11496_v34 }
 0x125   : > { %v783_v40 = vpack.c.bf16 %v776_v38, %v775_v37  ;;  %v7379_v52 = vld [vmem:[%s8504_s24 + $0x60] ss:$12 sps:$4 sm:$0xff]   ;;  %6777 = vmatpush3.bf16.msra.mxu1 %v7389_v50  ;;  %v7380_v54 = vld [vmem:[%s8504_s24 + $0x7c] ss:$12 sps:$4 sm:$0xff]   ;;  %v7382_v55 = vld [vmem:[%s8504_s24 + $0x78] ss:$12 sps:$4 sm:$0xff]  }
 0x126   : > { %987 = vmatpush1.bf16.msra.mxu0 %v7370_v44  ;;  %6778 = vmatprep.subr.bf16.mxu1 %v7390_v51  ;;  %v7383_v57 = vld [vmem:[%s8504_s24 + $0x94] ss:$12 sps:$4 sm:$0xff]   ;;  %v7385_v58 = vld [vmem:[%s8504_s24 + $0x90] ss:$12 sps:$4 sm:$0xff]   ;;  %v7386_v60 = vld [vmem:[%s8504_s24 + $0xac] ss:$12 sps:$4 sm:$0xff]  }
 0x127   : > { %6792 = vmatprep.mubr.bf16.mxu1 %v783_v40  ;;  %988 = vmatprep.subr.bf16.mxu0 %v7371_v45  ;;  %v7393_v59 = vld [vmem:[%s8504_s24 + $0x68] ss:$12 sps:$4 sm:$0xff]   ;;  %v7394_v62 = vld [vmem:[%s8504_s24 + $0x80] ss:$12 sps:$4 sm:$0xff]   ;;  %v7395_v63 = vld [vmem:[%s8504_s24 + $0x98] ss:$12 sps:$4 sm:$0xff]  }
 0x128   : > { %v7388_v61 = vld [vmem:[%s8504_s24 + $0xa8] ss:$12 sps:$4 sm:$0xff]   ;;  %v778_v9 = vld [vmem:[#allocation2 + $0x18] sm:$0xff]  ;;  %11495 = vst [vmem:[#allocation47_spill] sm:$0xff] %v11494_v25  ;;  %v779_v26 = vld [vmem:[#allocation2 + $0x20] sm:$0xff]  ;;  %v11305_v37 = vsub.s32 0, %v8421_v1 }
 0x129   : > { %6779 = vmatpush3.bf16.msra.mxu1 %v7390_v51  ;;  %v777_v0 = vld [vmem:[#allocation2 + $0x10] sm:$0xff]  ;;  %v780_v27 = vld [vmem:[#allocation2 + $0x28] sm:$0xff]  ;;  %v782_v30 = vld [vmem:[#allocation2 + $0x38] sm:$0xff]  ;;  %11498 = vst [vmem:[#allocation48_spill] sm:$0xff] %v11497_v34  ;;  %s838_s2 = scalar_lea.vmem [#allocation8], %s837_s25  ;;  %v11513_v15 = vmov 5  }
 0x12a   : > { %989 = vmatpush1.bf16.msra.mxu0 %v7373_v46  ;;  %6780 = vmatprep.subr.bf16.mxu1 %v7391_v53  ;;  %v7396_v11 = vld [vmem:[%s8504_s24 + $0xb0] ss:$12 sps:$4 sm:$0xff]   ;;  %v784_v23 = vpack.c.bf16 %v778_v9, %v777_v0  ;;  %v785_v28 = vpack.c.bf16 %v780_v27, %v779_v26  ;;  %v800_v32 = vld [vmem:[%s799_s19] sm:$0xff]  ;;  %v801_v33 = vld [vmem:[%s799_s19 + $0x8] sm:$0x1]  ;;  %vm11393_vm14 = vcmp.eq.s32.totalorder %v8831_v14, 4294967292 }
 0x12b   : > { %990 = vmatprep.subr.bf16.mxu0 %v7374_v47  ;;  %v781_v29 = vld [vmem:[#allocation2 + $0x30] sm:$0xff]  ;;  %v8563_v36 = vpack.c.bf16 %v801_v33, %v800_v32  ;;  %v839_v38 = vld [vmem:[%s838_s2] sm:$0x7]  ;;  %vm11397_vm15 = vcmp.eq.s32.totalorder %v8831_v14, 4294967293  ;;  %vm11391_vm0 = vcmp.eq.s32.totalorder %v8831_v14, 4294967294  ;;  %vm11379_vm1 = vcmp.eq.s32.totalorder %v8831_v14, 4294967295 }
 0x12c   : > { %v786_v31 = vpack.c.bf16 %v782_v30, %v781_v29  ;;  %v8573_v41 = vrot.slane %v839_v38, %v11305_v37  ;;  %vm11364_vm2 = vcmp.eq.s32.totalorder %v8831_v14, 0  ;;  %vm11363_vm3 = vcmp.eq.s32.totalorder %v8831_v14, 1  ;;  %s8019_s1 = smov 64   ;;  %s6544_s21 = sshll.u32 %s7971_s27, 6 }
 0x12d   : > { %6781 = vmatpush3.bf16.msra.mxu1 %v7391_v53  ;;  %11499 = vst [vmem:[#allocation49_spill] sm:$0xff] %v8563_v36  ;;  %vm11394_vm4 = vcmp.eq.s32.totalorder %v8831_v14, 2  ;;  %vm11392_vm5 = vcmp.eq.s32.totalorder %v8831_v14, 3  ;;  %vm11385_vm6 = vcmp.eq.s32.totalorder %v8831_v14, 4  ;;  %s3945_s22 = scalar_lea.vmem [#allocation10], %s6544_s21  ;;  %s3962_s15 = scalar_lea.vmem [#allocation11], %s7971_s27 }
 0x12e   : > { %991 = vmatpush1.bf16.msra.mxu0 %v7376_v48  ;;  %6782 = vmatprep.subr.bf16.mxu1 %v7392_v56  ;;  %s6545_s23 = smul.u32 384, %s7971_s27  ;;  %s4091_s11 = scalar_lea.vmem [#allocation13], %s7971_s27 }
 0x12f   : > { %992 = vmatprep.subr.bf16.mxu0 %v7377_v49  ;;  %s6323_s5 = sshll.u32 %s7971_s27, 1  ;;  %s11764_s19 = sld [smem:[#allocation63_spill]] }
 0x130   : > { %s10558_s0 = scalar_lea.vmem [#allocation14], %s6545_s23  ;;  %s10568_s30 = scalar_lea.vmem [#allocation16], %s6545_s23 }
 0x131   : > { %6783 = vmatpush3.bf16.msra.mxu1 %v7392_v56  ;;  %s11767_s21 = sld [smem:[#allocation64_spill]]  ;;  %p6526_p13 = scmp.ge.s32.totalorder %s7971_s27, 2 }
 0x132   : > { %993 = vmatpush1.bf16.msra.mxu0 %v7379_v52  ;;  %6784 = vmatprep.subr.bf16.mxu1 %v7393_v59  ;;  %v851_v52 = vsub.s32 2, %v8421_v1 }
 0x133   : > { %994 = vmatprep.subr.bf16.mxu0 %v7380_v54 }
 0x135   : > { %6785 = vmatpush3.bf16.msra.mxu1 %v7393_v59  ;;  %s4225_s25 = scalar_lea.vmem %s11764_s19, %s6323_s5 }
 0x136   : > { %995 = vmatpush1.bf16.msra.mxu0 %v7382_v55  ;;  %6786 = vmatprep.subr.bf16.mxu1 %v7394_v62 }
 0x137   : > { %996 = vmatprep.subr.bf16.mxu0 %v7383_v57 }
 0x139   : > { %6787 = vmatpush3.bf16.msra.mxu1 %v7394_v62 }
 0x13a   : > { %997 = vmatpush1.bf16.msra.mxu0 %v7385_v58  ;;  %6788 = vmatprep.subr.bf16.mxu1 %v7395_v63  ;;  %v852_v58 = vrot.slane %v839_v38, %v851_v52 }
 0x13b   : > { %998 = vmatprep.subr.bf16.mxu0 %v7386_v60 }
 0x13d   : > { %6789 = vmatpush3.bf16.msra.mxu1 %v7395_v63 }
 0x13e   : > { %999 = vmatpush1.bf16.msra.mxu0 %v7388_v61  ;;  %6790 = vmatprep.subr.bf16.mxu1 %v7396_v11 }
 0x141   : > { %1017 = vmatmul.mubr.bf16.vlgmr.msra.gmra.mrb[0].mxu0 %v783_v40  ;;  %6791 = vmatpush3.bf16.msra.mxu1 %v7396_v11  ;;  %v11306_v40 = vsub.s32 1, %v8421_v1 }
 0x142   : > { %1026 = vmatprep.mubr.bf16.mxu0 %v11309_v39  ;;  %6978 = vmatprep.subr.msk.bf16.mxu1 %vm8541_vm10, %v8537_v24 }
 0x143   : > { %v8577_v43 = vrot.slane %v839_v38, %v11306_v40 }
 0x144   : > { %6793 = vmatmul.mubr.bf16.vlgmr.msra.gmra.mrb[0].mxu1 %v784_v23 }
 0x145   : > { %6796 = vmatprep.mubr.bf16.mxu1 %v785_v28 }
 0x149   : > { %1027 = vmatmul.mubr.bf16.gmra.mrb[4].mxu0 %v784_v23 }
 0x14a   : > { %1036 = vmatprep.mubr.bf16.mxu0 %v11309_v39  ;;  %6981 = vmatpush3.bf16.xpose.msk.msra.mxu1 %vm8541_vm10, %v8537_v24 }
 0x14b   : > { %6984 = vmatprep.subr.msk.bf16.mxu1 %vm8558_vm13, %v8563_v36 }
 0x14c   : > { %6797 = vmatmul.mubr.bf16.gmra.mrb[4].mxu1 %v786_v31 }
 0x151   : > { %1037 = vmatmul.mubr.bf16.gmra.mrb[8].mxu0 %v785_v28 }
 0x152   : > { %1046 = vmatprep.mubr.bf16.mxu0 %v11309_v39 }
 0x159   : > { %1047 = vmatmul.mubr.bf16.gmra.mrb[12].mxu0 %v786_v31 }
 0x214   : > { %v1018_v42 = vpop.f32.mrb[0].mxu0 }
 0x215   : > { %v1019_v44 = vadd.f32 %v1018_v42, %v8573_v41  ;;  %v1020_v45 = vpop.f32.mrb[1].mxu0 }
 0x216   : > { %v1022_v46 = vpop.f32.mrb[2].mxu0  ;;  %v1021_v50 = vadd.f32 %v1020_v45, %v8577_v43 }
 0x217   : > { %v8580_v47 = vmul.f32 0.125, %v1019_v44  ;;  %v1023_v48 = vadd.f32 %v1022_v46, %v8573_v41  ;;  %v1024_v49 = vpop.f32.mrb[3].mxu0  ;;  %v6794_v11 = vpop.f32.mrb[0].mxu1 }
 0x218   : > { %v1025_v51 = vadd.f32 %v1024_v49, %v8577_v43  ;;  %v1100_v22 = vadd.f32 %v6794_v11, %v852_v58  ;;  %v1091_v23 = vpop.f32.mrb[1].mxu1 }
 0x219   : > { %v8586_v53 = vmul.f32 0.125, %v1023_v48  ;;  %6804 = vmatprep.mubr.msk.f32.mxu1 %vm1138_vm9, %v8580_v47  ;;  %v1092_v27 = vadd.f32 %v1091_v23, %v852_v58  ;;  %v6795_v28 = vpop.f32.mrb[2].mxu1 }
 0x21a   : > { %v8590_v54 = vpack.c.bf16 %v1025_v51, %v1021_v50  ;;  %v1103_v30 = vadd.f32 %v6795_v28, %v852_v58  ;;  %v1094_v31 = vpop.f32.mrb[3].mxu1 }
 0x21b   : > { %v8594_v55 = vpack.c.bf16 %v8586_v53, %v8580_v47  ;;  %6805 = vmatmul.mubr.msk.f32.vlgmr.msra.gmra.mrb[8].mxu1 %vm1138_vm9, %v8586_v53  ;;  %v1095_v32 = vadd.f32 %v1094_v31, %v852_v58 }
 0x21c   : > { %7016 = vmatprep.subr.msk.bf16.mxu0 %vm1138_vm9, %v8590_v54  ;;  %v1343_v56 = vsel %vm1138_vm9, %v8590_v54, 0  ;;  %v1028_v57 = vpop.f32.mrb[4].mxu0  ;;  %6987 = vmatpush3.bf16.msk.msra.mxu1 %vm8558_vm13, %v8563_v36  ;;  %v8625_v42 = vpack.c.bf16 %v1103_v30, %v1100_v22 }
 0x21d   : > { %6817 = vmatpush3.bf16.xpose.msra.mxu0 %v1343_v56  ;;  %6824 = vmatprep.mubr.msk.bf16.mxu0 %vm1138_vm9, %v8594_v55  ;;  %v1029_v59 = vadd.f32 %v1028_v57, %v8573_v41  ;;  %v1030_v60 = vpop.f32.mrb[5].mxu0  ;;  %v8628_v46 = vpack.c.bf16 %v1095_v32, %v1092_v27 }
 0x21e   : > { %v1031_v61 = vadd.f32 %v1030_v60, %v8577_v43  ;;  %v1032_v62 = vpop.f32.mrb[6].mxu0 }
 0x21f   : > { %v8609_v63 = vmul.f32 0.125, %v1029_v59  ;;  %v1033_v0 = vadd.f32 %v1032_v62, %v8573_v41  ;;  %v1034_v9 = vpop.f32.mrb[7].mxu0  ;;  %v6798_v56 = vpop.f32.mrb[4].mxu1  ;;  %6848 = vmatprep.subr.bf16.mxu1 %v8628_v46 }
 0x220   : > { %v1035_v21 = vadd.f32 %v1034_v9, %v8577_v43  ;;  %v1116_v59 = vadd.f32 %v6798_v56, %v852_v58  ;;  %v1107_v60 = vpop.f32.mrb[5].mxu1 }
 0x221   : > { %11500 = vst [vmem:[#allocation50_spill] sm:$0xff] %v8609_v63  ;;  %v8613_v26 = vmul.f32 0.125, %v1033_v0  ;;  %6807 = vmatprep.mubr.msk.f32.mxu1 %vm1138_vm9, %v8609_v63  ;;  %v1108_v62 = vadd.f32 %v1107_v60, %v852_v58  ;;  %v6799_v0 = vpop.f32.mrb[6].mxu1  ;;  %v11321_v60 = vmov 2  }
 0x222   : > { %v8617_v29 = vpack.c.bf16 %v1035_v21, %v1031_v61  ;;  %v1119_v11 = vadd.f32 %v6799_v0, %v852_v58  ;;  %v1110_v21 = vpop.f32.mrb[7].mxu1 }
 0x223   : > { %11501 = vst [vmem:[#allocation51_spill] sm:$0xff] %v8613_v26  ;;  %6808 = vmatmul.mubr.msk.f32.gmra.mrb[10].mxu1 %vm1138_vm9, %v8613_v26  ;;  %v1111_v22 = vadd.f32 %v1110_v21, %v852_v58  ;;  %v11315_v21 = vmov 5  }
 0x224   : > { %11502 = vst [vmem:[#allocation52_spill] sm:$0xff] %v8617_v29  ;;  %v1038_v33 = vpop.f32.mrb[8].mxu0  ;;  %7017 = vmatprep.subr.msk.bf16.mxu0 %vm1138_vm9, %v8617_v29  ;;  %v1346_v38 = vsel %vm1138_vm9, %v8617_v29, 0  ;;  %v8648_v28 = vpack.c.bf16 %v1119_v11, %v1116_v59  ;;  %v11514_v29 = vmov 8  }
 0x225   : > { %v1039_v44 = vadd.f32 %v1038_v33, %v8573_v41  ;;  %v1040_v45 = vpop.f32.mrb[9].mxu0  ;;  %6819 = vmatpush3.bf16.xpose.msra.mxu0 %v1346_v38  ;;  %v8651_v32 = vpack.c.bf16 %v1111_v22, %v1108_v62  ;;  %v11317_v62 = vmov 3   ;;  %v11311_v22 = vmov 4  }
 0x226   : > { %v1041_v48 = vadd.f32 %v1040_v45, %v8577_v43  ;;  %v1042_v49 = vpop.f32.mrb[10].mxu0 }
 0x227   : > { %v8631_v50 = vmul.f32 0.125, %v1039_v44  ;;  %v1043_v51 = vadd.f32 %v1042_v49, %v8573_v41  ;;  %v1044_v52 = vpop.f32.mrb[11].mxu0 }
 0x228   : > { %v1045_v57 = vadd.f32 %v1044_v52, %v8577_v43 }
 0x229   : > { %v8636_v61 = vmul.f32 0.125, %v1043_v51  ;;  %6810 = vmatprep.mubr.msk.f32.mxu1 %vm1138_vm9, %v8631_v50 }
 0x22a   : > { %v8640_v9 = vpack.c.bf16 %v1045_v57, %v1041_v48 }
 0x22b   : > { %11503 = vst [vmem:[#allocation53_spill] sm:$0xff] %v8636_v61  ;;  %6811 = vmatmul.mubr.msk.f32.gmra.mrb[12].mxu1 %vm1138_vm9, %v8636_v61 }
 0x22c   : > { %v1048_v23 = vpop.f32.mrb[12].mxu0  ;;  %7018 = vmatprep.subr.msk.bf16.mxu0 %vm1138_vm9, %v8640_v9  ;;  %v1349_v27 = vsel %vm1138_vm9, %v8640_v9, 0 }
 0x22d   : > { %v1049_v30 = vadd.f32 %v1048_v23, %v8573_v41  ;;  %v1050_v31 = vpop.f32.mrb[13].mxu0  ;;  %6821 = vmatpush3.bf16.xpose.msra.mxu0 %v1349_v27  ;;  %v11307_v23 = vmov 6   ;;  %v11319_v27 = vmov 7  }
 0x22e   : > { %v1051_v33 = vadd.f32 %v1050_v31, %v8577_v43  ;;  %v1052_v38 = vpop.f32.mrb[14].mxu0 }
 0x22f   : > { %v8654_v44 = vmul.f32 0.125, %v1049_v30  ;;  %v1053_v58 = vadd.f32 %v1052_v38, %v8573_v41  ;;  %v1054_v45 = vpop.f32.mrb[15].mxu0  ;;  %v8672_v41 = vpack.c.bf16 %v8613_v26, %v8609_v63 }
 0x230   : > { %v1055_v48 = vadd.f32 %v1054_v45, %v8577_v43  ;;  %v8676_v43 = vpack.c.bf16 %v8636_v61, %v8631_v50 }
 0x231   : > { %v8658_v49 = vmul.f32 0.125, %v1053_v58  ;;  %6813 = vmatprep.mubr.msk.f32.mxu1 %vm1138_vm9, %v8654_v44  ;;  %11506 = vst [vmem:[#allocation56_spill] sm:$0xff] %v8672_v41 }
 0x232   : > { %v8662_v51 = vpack.c.bf16 %v1055_v48, %v1051_v33  ;;  %v11326_v33 = vmov 8  }
 0x233   : > { %11504 = vst [vmem:[#allocation54_spill] sm:$0xff] %v8658_v49  ;;  %6814 = vmatmul.mubr.msk.f32.gmra.mrb[14].mxu1 %vm1138_vm9, %v8658_v49  ;;  %v8684_v56 = vpack.c.bf16 %v8658_v49, %v8654_v44 }
 0x234   : > { %11505 = vst [vmem:[#allocation55_spill] sm:$0xff] %v8662_v51  ;;  %7019 = vmatprep.subr.msk.bf16.mxu0 %vm1138_vm9, %v8662_v51  ;;  %v1352_v52 = vsel %vm1138_vm9, %v8662_v51, 0 }
 0x235   : > { %6823 = vmatpush3.bf16.xpose.msra.mxu0 %v1352_v52  ;;  %11507 = vst [vmem:[#allocation57_spill] sm:$0xff] %v8684_v56 }
 0x23c   : > { %6825 = vmatmul.mubr.msk.bf16.vlgmr.msra.gmra.mrb[16].mxu0 %vm1138_vm9, %v8672_v41 }
 0x23d   : > { %6828 = vmatprep.mubr.msk.bf16.mxu0 %vm1138_vm9, %v8676_v43 }
 0x244   : > { %6829 = vmatmul.mubr.msk.bf16.gmra.mrb[20].mxu0 %vm1138_vm9, %v8684_v56 }
 0x2ee   : > { %v6806_v57 = vpop.f32.mrb[8].mxu1 }
 0x2ef   : > { %1432 = vperm.xlu1 %7202, %v6806_v57   ;;  %1289 = vperm.xlu0 %7201, %v6806_v57   ;;  %v1235_v59 = vpop.f32.mrb[9].mxu1 }
 0x2f3   : > { %7203 = vset.pattern.permute.xlu1 %v11321_v60  ;;  %7204 = vset.pattern.permute.xlu0 %v11317_v62 }
 0x2f4   : > { %1488 = vperm.xlu1 %7203, %v6806_v57   ;;  %1544 = vperm.xlu0 %7204, %v6806_v57  }
 0x2f6   : > { %v8690_v0 = vpop.f32.mrb[10].mxu1 }
 0x2f7   : > { %v8692_v11 = vpop.f32.mrb[11].mxu1 }
 0x2f8   : > { %7206 = vset.pattern.permute.xlu1 %v11315_v21  ;;  %7205 = vset.pattern.permute.xlu0 %v11311_v22 }
 0x2f9   : > { %1656 = vperm.xlu1 %7206, %v6806_v57   ;;  %1600 = vperm.xlu0 %7205, %v6806_v57  }
 0x2fd   : > { %7207 = vset.pattern.permute.xlu1 %v11307_v23  ;;  %7208 = vset.pattern.permute.xlu0 %v11319_v27 }
 0x2fe   : > { %1712 = vperm.xlu1 %7207, %v6806_v57   ;;  %1768 = vperm.xlu0 %7208, %v6806_v57   ;;  %v8698_v30 = vpop.f32.mrb[12].mxu1 }
 0x2ff   : > { %v8700_v31 = vpop.f32.mrb[13].mxu1 }
 0x302   : > { %7209 = vset.pattern.permute.xlu1 %v11326_v33  ;;  %7210 = vset.pattern.permute.xlu0 %v11309_v39 }
 0x303   : > { %1824 = vperm.xlu1 %7209, %v6806_v57   ;;  %1284 = vperm.xlu0 %7210, %v1235_v59  }
 0x306   : > { %v8704_v38 = vpop.f32.mrb[14].mxu1 }
 0x307   : > { %7211 = vset.pattern.permute.xlu1 %v11313_v35  ;;  %7214 = vset.pattern.permute.xlu0 %v11311_v22  ;;  %v8708_v58 = vpop.f32.mrb[15].mxu1 }
 0x308   : > { %1428 = vperm.xlu1 %7211, %v1235_v59   ;;  %1596 = vperm.xlu0 %7214, %v1235_v59  }
 0x30c   : > { %7212 = vset.pattern.permute.xlu1 %v11321_v60  ;;  %7216 = vset.pattern.permute.xlu0 %v11307_v23 }
 0x30d   : > { %1484 = vperm.xlu1 %7212, %v1235_v59   ;;  %1708 = vperm.xlu0 %7216, %v1235_v59  }
 0x30f   : > { %v8712_v45 = vpop.f32.mrb[16].mxu0 }
 0x310   : > { %v8714_v48 = vpop.f32.mrb[17].mxu0 }
 0x311   : > { %7213 = vset.pattern.permute.xlu1 %v11317_v62  ;;  %7219 = vset.pattern.permute.xlu0 %v11309_v39  ;;  %v8718_v52 = vpop.f32.mrb[18].mxu0 }
 0x312   : > { %1540 = vperm.xlu1 %7213, %v1235_v59   ;;  %1299 = vperm.xlu0 %7219, %v8690_v0   ;;  %v8721_v57 = vpop.f32.mrb[19].mxu0 }
 0x316   : > { %7215 = vset.pattern.permute.xlu1 %v11315_v21  ;;  %7222 = vset.pattern.permute.xlu0 %v11317_v62 }
 0x317   : > { %1652 = vperm.xlu1 %7215, %v1235_v59   ;;  %1552 = vperm.xlu0 %7222, %v8690_v0   ;;  %v8726_v37 = vpop.f32.mrb[20].mxu0 }
 0x318   : > { %v8728_v40 = vpop.f32.mrb[21].mxu0 }
 0x319   : > { %v8730_v23 = vpop.f32.mrb[22].mxu0 }
 0x31a   : > { %v8732_v39 = vpop.f32.mrb[23].mxu0 }
 0x31b   : > { %7217 = vset.pattern.permute.xlu1 %v11319_v27  ;;  %7223 = vset.pattern.permute.xlu0 %v11311_v22  ;;  %v11508_v22 = vmov 0  }
 0x31c   : > { %1764 = vperm.xlu1 %7217, %v1235_v59   ;;  %1608 = vperm.xlu0 %7223, %v8690_v0  }
 0x320   : > { %7218 = vset.pattern.permute.xlu1 %v11326_v33  ;;  %7226 = vset.pattern.permute.xlu0 %v11319_v27 }
 0x321   : > { %1820 = vperm.xlu1 %7218, %v1235_v59   ;;  %1776 = vperm.xlu0 %7226, %v8690_v0   ;;  %v11509_v59 = vmov 6  }
 0x325   : > { %7220 = vset.pattern.permute.xlu1 %v11313_v35  ;;  %7227 = vset.pattern.permute.xlu0 %v11326_v33 }
 0x326   : > { %1440 = vperm.xlu1 %7220, %v8690_v0   ;;  %1832 = vperm.xlu0 %7227, %v8690_v0  }
 0x32a   : > { %7221 = vset.pattern.permute.xlu1 %v11321_v60  ;;  %7228 = vset.pattern.permute.xlu0 %v11508_v22 }
 0x32b   : > { %1496 = vperm.xlu1 %7221, %v8690_v0   ;;  %1294 = vperm.xlu0 %7228, %v8692_v11  }
 0x32f   : > { %7224 = vset.pattern.permute.xlu1 %v11315_v21  ;;  %7229 = vset.pattern.permute.xlu0 %v11313_v35  ;;  %v11510_v35 = vmov 4  }
 0x330   : > { %1664 = vperm.xlu1 %7224, %v8690_v0   ;;  %1436 = vperm.xlu0 %7229, %v8692_v11  }
 0x334   : > { %7225 = vset.pattern.permute.xlu1 %v11509_v59  ;;  %7231 = vset.pattern.permute.xlu0 %v11317_v62 }
 0x335   : > { %1720 = vperm.xlu1 %7225, %v8690_v0   ;;  %1548 = vperm.xlu0 %7231, %v8692_v11   ;;  %v11511_v0 = vmov 1  }
 0x339   : > { %7230 = vset.pattern.permute.xlu1 %v11321_v60  ;;  %7234 = vset.pattern.permute.xlu0 %v11509_v59 }
 0x33a   : > { %1492 = vperm.xlu1 %7230, %v8692_v11   ;;  %1716 = vperm.xlu0 %7234, %v8692_v11  }
 0x33e   : > { %7232 = vset.pattern.permute.xlu1 %v11510_v35  ;;  %7236 = vset.pattern.permute.xlu0 %v11326_v33 }
 0x33f   : > { %1604 = vperm.xlu1 %7232, %v8692_v11   ;;  %1828 = vperm.xlu0 %7236, %v8692_v11  }
 0x343   : > { %7233 = vset.pattern.permute.xlu1 %v11315_v21  ;;  %7241 = vset.pattern.permute.xlu0 %v11510_v35 }
 0x344   : > { %1660 = vperm.xlu1 %7233, %v8692_v11   ;;  %1616 = vperm.xlu0 %7241, %v8698_v30  }
 0x348   : > { %7235 = vset.pattern.permute.xlu1 %v11319_v27  ;;  %7245 = vset.pattern.permute.xlu0 %v11326_v33 }
 0x349   : > { %1772 = vperm.xlu1 %7235, %v8692_v11   ;;  %1840 = vperm.xlu0 %7245, %v8698_v30  }
 0x34d   : > { %7237 = vset.pattern.permute.xlu1 %v11508_v22  ;;  %7249 = vset.pattern.permute.xlu0 %v11317_v62 }
 0x34e   : > { %1309 = vperm.xlu1 %7237, %v8698_v30   ;;  %1556 = vperm.xlu0 %7249, %v8700_v31  }
 0x352   : > { %7238 = vset.pattern.permute.xlu1 %v11511_v0  ;;  %7253 = vset.pattern.permute.xlu0 %v11319_v27 }
 0x353   : > { %1448 = vperm.xlu1 %7238, %v8698_v30   ;;  %1780 = vperm.xlu0 %7253, %v8700_v31  }
 0x357   : > { %7239 = vset.pattern.permute.xlu1 %v11321_v60  ;;  %7256 = vset.pattern.permute.xlu0 %v11511_v0 }
 0x358   : > { %1504 = vperm.xlu1 %7239, %v8698_v30   ;;  %1456 = vperm.xlu0 %7256, %v8704_v38  }
 0x35c   : > { %7240 = vset.pattern.permute.xlu1 %v11317_v62  ;;  %7258 = vset.pattern.permute.xlu0 %v11317_v62 }
 0x35d   : > { %1560 = vperm.xlu1 %7240, %v8698_v30   ;;  %1568 = vperm.xlu0 %7258, %v8704_v38  }
 0x361   : > { %7242 = vset.pattern.permute.xlu1 %v11315_v21  ;;  %7263 = vset.pattern.permute.xlu0 %v11508_v22 }
 0x362   : > { %1672 = vperm.xlu1 %7242, %v8698_v30   ;;  %1314 = vperm.xlu0 %7263, %v8708_v58  }
 0x366   : > { %7243 = vset.pattern.permute.xlu1 %v11509_v59  ;;  %7266 = vset.pattern.permute.xlu0 %v11317_v62 }
 0x367   : > { %1728 = vperm.xlu1 %7243, %v8698_v30   ;;  %1564 = vperm.xlu0 %7266, %v8708_v58  }
 0x36b   : > { %7244 = vset.pattern.permute.xlu1 %v11319_v27  ;;  %7269 = vset.pattern.permute.xlu0 %v11509_v59 }
 0x36c   : > { %1784 = vperm.xlu1 %7244, %v8698_v30   ;;  %1732 = vperm.xlu0 %7269, %v8708_v58  }
 0x36e   : > { %v8800_v11 = vpop.permute.xlu1 %1432  ;;  %v8802_v21 = vpop.permute.xlu0 %1289 }
 0x370   : > { %7246 = vset.pattern.permute.xlu1 %v11508_v22  ;;  %7271 = vset.pattern.permute.xlu0 %v11326_v33 }
 0x371   : > { %1304 = vperm.xlu1 %7246, %v8700_v31   ;;  %1844 = vperm.xlu0 %7271, %v8708_v58  }
 0x373   : > { %v8808_v62 = vpop.permute.xlu1 %1488  ;;  %v8810_v27 = vpop.permute.xlu0 %1544 }
 0x375   : > { %7247 = vset.pattern.permute.xlu1 %v11511_v0  ;;  %7274 = vset.pattern.permute.xlu0 %v11511_v0 }
 0x376   : > { %1444 = vperm.xlu1 %7247, %v8700_v31  }
 0x378   : > { %v8815_v30 = vpop.permute.xlu1 %1656  ;;  %v8817_v60 = vpop.permute.xlu0 %1600 }
 0x37a   : > { %7248 = vset.pattern.permute.xlu1 %v11512_v18 }
 0x37b   : > { %1500 = vperm.xlu1 %7248, %v8700_v31  }
 0x37d   : > { %v8821_v33 = vpop.permute.xlu1 %1712  ;;  %v8823_v19 = vpop.permute.xlu0 %1768 }
 0x37f   : > { %7250 = vset.pattern.permute.xlu1 %v11510_v35 }
 0x380   : > { %1612 = vperm.xlu1 %7250, %v8700_v31  }
 0x382   : > { %v8827_v16 = vpop.permute.xlu1 %1824  ;;  %v1285_v17 = vpop.permute.xlu0 %1284 }
 0x383   : > { %v1322_v34 = vsel %vm11393_vm14, %v1285_v17, 0.0 }
 0x384   : > { %7251 = vset.pattern.permute.xlu1 %v11513_v15  ;;  %v1389_v41 = vadd.f32 %v8714_v48, %v1322_v34 }
 0x385   : > { %1668 = vperm.xlu1 %7251, %v8700_v31  }
 0x387   : > { %v1429_v13 = vpop.permute.xlu1 %1428  ;;  %v1597_v12 = vpop.permute.xlu0 %1596 }
 0x388   : > { %v1459_v1 = vsel %vm11397_vm15, %v1429_v13, 0.0  ;;  %v1627_v34 = vsel %vm11364_vm2, %v1597_v12, 0.0 }
 0x389   : > { %7252 = vset.pattern.permute.xlu1 %v11509_v59  ;;  %v1467_v49 = vadd.f32 %v1459_v1, %v1389_v41 }
 0x38a   : > { %1724 = vperm.xlu1 %7252, %v8700_v31  }
 0x38c   : > { %v1485_v36 = vpop.permute.xlu1 %1484  ;;  %v1709_v56 = vpop.permute.xlu0 %1708 }
 0x38d   : > { %v1515_v51 = vsel %vm11391_vm0, %v1485_v36, 0.0  ;;  %v1739_v12 = vsel %vm11394_vm4, %v1709_v56, 0.0 }
 0x38e   : > { %7254 = vset.pattern.permute.xlu1 %v11514_v29  ;;  %v1523_v17 = vadd.f32 %v1515_v51, %v1467_v49 }
 0x38f   : > { %1836 = vperm.xlu1 %7254, %v8700_v31  }
 0x391   : > { %v1541_v61 = vpop.permute.xlu1 %1540  ;;  %v1300_v26 = vpop.permute.xlu0 %1299 }
 0x392   : > { %v1571_v13 = vsel %vm11379_vm1, %v1541_v61, 0.0 }
 0x393   : > { %v1579_v63 = vadd.f32 %v1571_v13, %v1523_v17  ;;  %7255 = vset.pattern.permute.xlu1 %v11508_v22 }
 0x394   : > { %1319 = vperm.xlu1 %7255, %v8704_v38  }
 0x395   : > { %v1635_v1 = vadd.f32 %v1627_v34, %v1579_v63 }
 0x396   : > { %v1653_v36 = vpop.permute.xlu1 %1652  ;;  %v1553_v41 = vpop.permute.xlu0 %1552 }
 0x397   : > { %v1683_v49 = vsel %vm11363_vm3, %v1653_v36, 0.0 }
 0x398   : > { %v1691_v61 = vadd.f32 %v1683_v49, %v1635_v1  ;;  %7257 = vset.pattern.permute.xlu1 %v11512_v18 }
 0x399   : > { %1512 = vperm.xlu1 %7257, %v8704_v38  }
 0x39a   : > { %v1747_v63 = vadd.f32 %v1739_v12, %v1691_v61 }
 0x39b   : > { %v1765_v51 = vpop.permute.xlu1 %1764  ;;  %v1609_v31 = vpop.permute.xlu0 %1608 }
 0x39c   : > { %v1795_v48 = vsel %vm11392_vm5, %v1765_v51, 0.0  ;;  %v8888_v51 = vsub.s32 %v8450_v10, %v8431_v4 }
 0x39d   : > { %7259 = vset.pattern.permute.xlu1 %v11510_v35  ;;  %v1803_v17 = vadd.f32 %v1795_v48, %v1747_v63  ;;  %v11515_v48 = vmov 7  }
 0x39e   : > { %1624 = vperm.xlu1 %7259, %v8704_v38   ;;  %vm11375_vm7 = vcmp.eq.s32.totalorder %v8888_v51, 4294967292  ;;  %vm11370_vm11 = vcmp.eq.s32.totalorder %v8888_v51, 4294967293  ;;  %vm11372_vm12 = vcmp.eq.s32.totalorder %v8888_v51, 4294967294 }
 0x39f   : > { %v1325_v4 = vsel %vm11375_vm7, %v1300_v26, 0.0  ;;  %vm11381_vm7 = vcmp.eq.s32.totalorder %v8888_v51, 1 }
 0x3a0   : > { %v1821_v13 = vpop.permute.xlu1 %1820  ;;  %v8873_v1 = vpop.permute.xlu0 %1776 }
 0x3a1   : > { %v1851_v34 = vsel %vm11385_vm6, %v1821_v13, 0.0 }
 0x3a2   : > { %7260 = vset.pattern.permute.xlu1 %v11513_v15  ;;  %v1859_v56 = vadd.f32 %v1851_v34, %v1803_v17  ;;  %v8895_v17 = vsub.s32 %v8450_v10, %v8428_v3  ;;  %v1400_v3 = vadd.f32 %v8718_v52, %v1325_v4 }
 0x3a3   : > { %1680 = vperm.xlu1 %7260, %v8704_v38  }
 0x3a4   : > { %v8879_v36 = vsel %vm8477_vm8, -10000.0, %v1859_v56  ;;  %vm11373_vm3 = vcmp.eq.s32.totalorder %v8895_v17, 4294967292  ;;  %vm11374_vm2 = vcmp.eq.s32.totalorder %v8895_v17, 4294967293  ;;  %vm11384_vm1 = vcmp.eq.s32.totalorder %v8895_v17, 1 }
 0x3a5   : > { %v1441_v49 = vpop.permute.xlu1 %1440  ;;  %v1877_v61 = vsel %vm1138_vm9, %v8879_v36, -inf  ;;  %v8883_v12 = vpop.permute.xlu0 %1832  ;;  %vm11389_vm6 = vcmp.eq.s32.totalorder %v8895_v17, 4 }
 0x3a6   : > { %1878 = vmax.xlane.f32.xlu0 %v1877_v61  ;;  %v1462_v56 = vsel %vm11370_vm11, %v1441_v49, 0.0  ;;  %vm11376_vm11 = vcmp.eq.s32.totalorder %v8888_v51, 4294967295 }
 0x3a7   : > { %7261 = vset.pattern.permute.xlu1 %v11509_v59  ;;  %v1470_v59 = vadd.f32 %v1462_v56, %v1400_v3 }
 0x3a8   : > { %1736 = vperm.xlu1 %7261, %v8704_v38  }
 0x3aa   : > { %v1497_v63 = vpop.permute.xlu1 %1496  ;;  %v1295_v13 = vpop.permute.xlu0 %1294 }
 0x3ab   : > { %v1518_v61 = vsel %vm11372_vm12, %v1497_v63, 0.0  ;;  %v1324_v25 = vsel %vm11373_vm3, %v1295_v13, 0.0  ;;  %vm11377_vm12 = vcmp.eq.s32.totalorder %v8895_v17, 4294967294  ;;  %v1574_v63 = vsel %vm11376_vm11, %v1553_v41, 0.0 }
 0x3ac   : > { %7262 = vset.pattern.permute.xlu1 %v11515_v48  ;;  %v1526_v49 = vadd.f32 %v1518_v61, %v1470_v59  ;;  %v1397_v52 = vadd.f32 %v8712_v45, %v1324_v25  ;;  %vm11378_vm3 = vcmp.eq.s32.totalorder %v8888_v51, 0  ;;  %v8931_v25 = vsub.s32 %v8450_v10, %v8425_v2 }
 0x3ad   : > { %1792 = vperm.xlu1 %7262, %v8704_v38   ;;  %v1630_v45 = vsel %vm11378_vm3, %v1609_v31, 0.0  ;;  %vm11383_vm11 = vcmp.eq.s32.totalorder %v8895_v17, 0 }
 0x3ae   : > { %v1582_v56 = vadd.f32 %v1574_v63, %v1526_v49  ;;  %vm11438_vm3 = vcmp.eq.s32.totalorder %v8931_v25, 4294967292  ;;  %vm11426_vm5 = vcmp.eq.s32.totalorder %v8931_v25, 2 }
 0x3af   : > { %v1665_v34 = vpop.permute.xlu1 %1664  ;;  %v1437_v26 = vpop.permute.xlu0 %1436 }
 0x3b0   : > { %v1686_v49 = vsel %vm11381_vm7, %v1665_v34, 0.0  ;;  %vm11387_vm7 = vcmp.eq.s32.totalorder %v8888_v51, 3 }
 0x3b1   : > { %7264 = vset.pattern.permute.xlu1 %v11511_v0  ;;  %v1461_v0 = vsel %vm11374_vm2, %v1437_v26, 0.0  ;;  %vm11380_vm2 = vcmp.eq.s32.totalorder %v8895_v17, 4294967295 }
 0x3b2   : > { %1452 = vperm.xlu1 %7264, %v8708_v58   ;;  %v1469_v4 = vadd.f32 %v1461_v0, %v1397_v52  ;;  %v1638_v0 = vadd.f32 %v1630_v45, %v1582_v56  ;;  %v1323_v56 = vsel %vm11438_vm3, %v8802_v21, 0.0  ;;  %v1798_v45 = vsel %vm11387_vm7, %v8873_v1, 0.0 }
 0x3b3   : > { %v1392_v21 = vadd.f32 %v8721_v57, %v1323_v56  ;;  %vm11431_vm7 = vcmp.eq.s32.totalorder %v8931_v25, 4294967295 }
 0x3b4   : > { %v1721_v24 = vpop.permute.xlu1 %1720  ;;  %v1549_v3 = vpop.permute.xlu0 %1548  ;;  %v1694_v63 = vadd.f32 %v1686_v49, %v1638_v0 }
 0x3b5   : > { %v1573_v41 = vsel %vm11380_vm2, %v1549_v3, 0.0  ;;  %vm11386_vm2 = vcmp.eq.s32.totalorder %v8895_v17, 2 }
 0x3b6   : > { %7265 = vset.pattern.permute.xlu1 %v11512_v18 }
 0x3b7   : > { %1508 = vperm.xlu1 %7265, %v8708_v58  }
 0x3b9   : > { %v1493_v13 = vpop.permute.xlu1 %1492 }
 0x3ba   : > { %v1517_v59 = vsel %vm11377_vm12, %v1493_v13, 0.0  ;;  %vm11382_vm12 = vcmp.eq.s32.totalorder %v8888_v51, 2 }
 0x3bb   : > { %v1525_v61 = vadd.f32 %v1517_v59, %v1469_v4  ;;  %7267 = vset.pattern.permute.xlu1 %v11510_v35  ;;  %v1742_v31 = vsel %vm11382_vm12, %v1721_v24, 0.0  ;;  %v1717_v4 = vpop.permute.xlu0 %1716  ;;  %vm11390_vm12 = vcmp.eq.s32.totalorder %v8895_v17, 3 }
 0x3bc   : > { %1620 = vperm.xlu1 %7267, %v8708_v58   ;;  %v1750_v59 = vadd.f32 %v1742_v31, %v1694_v63 }
 0x3bd   : > { %v1581_v52 = vadd.f32 %v1573_v41, %v1525_v61  ;;  %v1741_v61 = vsel %vm11386_vm2, %v1717_v4, 0.0  ;;  %vm11432_vm2 = vcmp.eq.s32.totalorder %v8931_v25, 4294967294 }
 0x3be   : > { %v1605_v26 = vpop.permute.xlu1 %1604  ;;  %v1806_v49 = vadd.f32 %v1798_v45, %v1750_v59  ;;  %v1516_v63 = vsel %vm11432_vm2, %v8808_v62, 0.0  ;;  %v1572_v62 = vsel %vm11431_vm7, %v8810_v27, 0.0 }
 0x3bf   : > { %v1629_v2 = vsel %vm11383_vm11, %v1605_v26, 0.0  ;;  %vm11429_vm11 = vcmp.eq.s32.totalorder %v8931_v25, 4294967293  ;;  %v1829_v41 = vpop.permute.xlu0 %1828 }
 0x3c0   : > { %7268 = vset.pattern.permute.xlu1 %v11513_v15  ;;  %v1637_v34 = vadd.f32 %v1629_v2, %v1581_v52  ;;  %v1460_v57 = vsel %vm11429_vm11, %v8800_v11, 0.0  ;;  %v1853_v31 = vsel %vm11389_vm6, %v1829_v41, 0.0 }
 0x3c1   : > { %1676 = vperm.xlu1 %7268, %v8708_v58   ;;  %v1468_v1 = vadd.f32 %v1460_v57, %v1392_v21 }
 0x3c3   : > { %v1661_v13 = vpop.permute.xlu1 %1660  ;;  %v1524_v56 = vadd.f32 %v1516_v63, %v1468_v1 }
 0x3c4   : > { %v1685_v24 = vsel %vm11384_vm1, %v1661_v13, 0.0  ;;  %vm11388_vm1 = vcmp.eq.s32.totalorder %v8888_v51, 4 }
 0x3c5   : > { %v1693_v3 = vadd.f32 %v1685_v24, %v1637_v34  ;;  %7270 = vset.pattern.permute.xlu1 %v11515_v48  ;;  %v1854_v2 = vsel %vm11388_vm1, %v8883_v12, 0.0  ;;  %vm11401_vm1 = vcmp.eq.s32.totalorder %v8931_v25, 0  ;;  %v1580_v24 = vadd.f32 %v1572_v62, %v1524_v56 }
 0x3c6   : > { %1788 = vperm.xlu1 %7270, %v8708_v58   ;;  %v1862_v34 = vadd.f32 %v1854_v2, %v1806_v49  ;;  %v1628_v21 = vsel %vm11401_vm1, %v8817_v60, 0.0  ;;  %v1740_v49 = vsel %vm11426_vm5, %v8821_v33, 0.0 }
 0x3c7   : > { %v1749_v0 = vadd.f32 %v1741_v61, %v1693_v3  ;;  %v9002_v3 = vsub.s32 %v8450_v10, %v8437_v6  ;;  %v1636_v45 = vadd.f32 %v1628_v21, %v1580_v24 }
 0x3c8   : > { %v1773_v26 = vpop.permute.xlu1 %1772 }
 0x3c9   : > { %v1797_v58 = vsel %vm11390_vm12, %v1773_v26, 0.0  ;;  %vm11396_vm6 = vcmp.eq.s32.totalorder %v9002_v3, 4294967292  ;;  %vm11430_vm12 = vcmp.eq.s32.totalorder %v8931_v25, 1  ;;  %vm11395_vm0 = vcmp.eq.s32.totalorder %v9002_v3, 4294967293 }
 0x3ca   : > { %v1805_v52 = vadd.f32 %v1797_v58, %v1749_v0  ;;  %7272 = vset.pattern.permute.xlu1 %v11514_v29  ;;  %vm11398_vm14 = vcmp.eq.s32.totalorder %v9002_v3, 4294967294  ;;  %v1684_v60 = vsel %vm11430_vm12, %v8815_v30, 0.0  ;;  %vm11399_vm4 = vcmp.eq.s32.totalorder %v9002_v3, 4294967295 }
 0x3cb   : > { %1848 = vperm.xlu1 %7272, %v8704_v38   ;;  %v8994_v38 = vsel %vm8477_vm8, -10000.0, %v1862_v34  ;;  %v1692_v41 = vadd.f32 %v1684_v60, %v1636_v45  ;;  %vm11406_vm15 = vcmp.eq.s32.totalorder %v9002_v3, 0  ;;  %vm11402_vm1 = vcmp.eq.s32.totalorder %v9002_v3, 4 }
 0x3cc   : > { %v1861_v4 = vadd.f32 %v1853_v31, %v1805_v52  ;;  %v1886_v61 = vsel %vm1138_vm9, %v8994_v38, -inf }
 0x3cd   : > { %v1310_v11 = vpop.permute.xlu1 %1309  ;;  %v1748_v1 = vadd.f32 %v1740_v49, %v1692_v41 }
 0x3ce   : > { %v8986_v13 = vsel %vm8477_vm8, -10000.0, %v1861_v4  ;;  %v1327_v6 = vsel %vm11396_vm6, %v1310_v11, 0.0  ;;  %vm11416_vm6 = vcmp.eq.s32.totalorder %v8931_v25, 4  ;;  %v1617_v4 = vpop.permute.xlu0 %1616 }
 0x3cf   : > { %v1883_v12 = vsel %vm1138_vm9, %v8986_v13, -inf  ;;  %7273 = vset.pattern.permute.xlu1 %v11508_v22  ;;  %v1408_v26 = vadd.f32 %v8732_v39, %v1327_v6  ;;  %v1852_v34 = vsel %vm11416_vm6, %v8827_v16, 0.0  ;;  %v1632_v11 = vsel %vm11406_vm15, %v1617_v4, 0.0 }
 0x3d0   : > { %1884 = vmax.xlane.f32.xlu0 %v1883_v12 }
 0x3d2   : > { %v1449_v59 = vpop.permute.xlu1 %1448 }
 0x3d3   : > { %v1464_v0 = vsel %vm11395_vm0, %v1449_v59, 0.0  ;;  %vm11400_vm0 = vcmp.eq.s32.totalorder %v8931_v25, 3 }
 0x3d4   : > { %1887 = vmax.xlane.f32.xlu0 %v1886_v61  ;;  %v1472_v52 = vadd.f32 %v1464_v0, %v1408_v26  ;;  %v1796_v33 = vsel %vm11400_vm0, %v8823_v19, 0.0  ;;  %vm11403_vm0 = vcmp.eq.s32.totalorder %v9002_v3, 3 }
 0x3d5   : > { %v1804_v63 = vadd.f32 %v1796_v33, %v1748_v1 }
 0x3d7   : > { %v1505_v27 = vpop.permute.xlu1 %1504  ;;  %v1860_v59 = vadd.f32 %v1852_v34, %v1804_v63 }
 0x3d8   : > { %v1520_v58 = vsel %vm11398_vm14, %v1505_v27, 0.0  ;;  %vm11405_vm14 = vcmp.eq.s32.totalorder %v9002_v3, 1  ;;  %v1841_v27 = vpop.permute.xlu0 %1840 }
 0x3d9   : > { %v1528_v2 = vadd.f32 %v1520_v58, %v1472_v52  ;;  %v9051_v21 = vsel %vm8477_vm8, -10000.0, %v1860_v59  ;;  %v1856_v60 = vsel %vm11402_vm1, %v1841_v27, 0.0 }
 0x3da   : > { %v1880_v0 = vsel %vm1138_vm9, %v9051_v21, -inf }
 0x3dc   : > { %v1561_v57 = vpop.permute.xlu1 %1560  ;;  %v1557_v33 = vpop.permute.xlu0 %1556 }
 0x3dd   : > { %v1576_v30 = vsel %vm11399_vm4, %v1561_v57, 0.0  ;;  %vm11404_vm4 = vcmp.eq.s32.totalorder %v9002_v3, 2  ;;  %v9067_v57 = vsub.s32 %v8450_v10, %v8434_v5 }
 0x3de   : > { %v1584_v39 = vadd.f32 %v1576_v30, %v1528_v2 }
 0x3df   : > { %vm11407_vm1 = vcmp.eq.s32.totalorder %v9067_v57, 4294967292  ;;  %vm11410_vm15 = vcmp.eq.s32.totalorder %v9067_v57, 0 }
 0x3e0   : > { %v1640_v56 = vadd.f32 %v1632_v11, %v1584_v39  ;;  %v1781_v59 = vpop.permute.xlu0 %1780 }
 0x3e1   : > { %v1673_v31 = vpop.permute.xlu1 %1672 }
 0x3e2   : > { %v1688_v12 = vsel %vm11405_vm14, %v1673_v31, 0.0  ;;  %vm11415_vm14 = vcmp.eq.s32.totalorder %v9067_v57, 4294967295 }
 0x3e3   : > { %v1696_v24 = vadd.f32 %v1688_v12, %v1640_v56  ;;  %v1575_v34 = vsel %vm11415_vm14, %v1557_v33, 0.0 }
 0x3e6   : > { %v1729_v62 = vpop.permute.xlu1 %1728 }
 0x3e7   : > { %v1744_v19 = vsel %vm11404_vm4, %v1729_v62, 0.0  ;;  %vm11408_vm4 = vcmp.eq.s32.totalorder %v9067_v57, 4294967294 }
 0x3e8   : > { %v1752_v16 = vadd.f32 %v1744_v19, %v1696_v24 }
 0x3eb   : > { %v1785_v61 = vpop.permute.xlu1 %1784 }
 0x3ec   : > { %v1800_v45 = vsel %vm11403_vm0, %v1785_v61, 0.0  ;;  %vm11409_vm0 = vcmp.eq.s32.totalorder %v9067_v57, 4294967293 }
 0x3ed   : > { %v1808_v6 = vadd.f32 %v1800_v45, %v1752_v16 }
 0x3ef   : > { %1881 = vmax.xlane.f32.xlu1 %v1880_v0  ;;  %v1864_v41 = vadd.f32 %v1856_v60, %v1808_v6 }
 0x3f0   : > { %v1305_v26 = vpop.permute.xlu1 %1304 }
 0x3f1   : > { %v9061_v49 = vsel %vm8477_vm8, -10000.0, %v1864_v41  ;;  %v1326_v30 = vsel %vm11407_vm1, %v1305_v26, 0.0  ;;  %vm11414_vm1 = vcmp.eq.s32.totalorder %v9067_v57, 1 }
 0x3f2   : > { %v1892_v58 = vsel %vm1138_vm9, %v9061_v49, -inf  ;;  %v1405_v39 = vadd.f32 %v8728_v40, %v1326_v30 }
 0x3f3   : > { %1893 = vmax.xlane.f32.xlu0 %v1892_v58 }
 0x3f5   : > { %v1445_v52 = vpop.permute.xlu1 %1444 }
 0x3f6   : > { %v1463_v1 = vsel %vm11409_vm0, %v1445_v52, 0.0  ;;  %vm11412_vm0 = vcmp.eq.s32.totalorder %v9067_v57, 3  ;;  %v1457_v52 = vpop.permute.xlu0 %1456 }
 0x3f7   : > { %v1471_v31 = vadd.f32 %v1463_v1, %v1405_v39  ;;  %v1799_v45 = vsel %vm11412_vm0, %v1781_v59, 0.0 }
 0x3fa   : > { %v1501_v2 = vpop.permute.xlu1 %1500 }
 0x3fb   : > { %v1519_v5 = vsel %vm11408_vm4, %v1501_v2, 0.0  ;;  %vm11413_vm4 = vcmp.eq.s32.totalorder %v9067_v57, 2  ;;  %v1569_v2 = vpop.permute.xlu0 %1568 }
 0x3fc   : > { %v1527_v63 = vadd.f32 %v1519_v5, %v1471_v31 }
 0x3fe   : > { %v1583_v11 = vadd.f32 %v1575_v34, %v1527_v63  ;;  %v9105_v63 = vsub.s32 %v8450_v10, %v8440_v7 }
 0x3ff   : > { %v1613_v4 = vpop.permute.xlu1 %1612  ;;  %v1315_v5 = vpop.permute.xlu0 %1314 }
 0x400   : > { %v1631_v40 = vsel %vm11410_vm15, %v1613_v4, 0.0  ;;  %vm11411_vm15 = vcmp.eq.s32.totalorder %v9067_v57, 4  ;;  %v9109_v4 = vsub.s32 %v8450_v10, %v8443_v8  ;;  %vm11420_vm14 = vcmp.eq.s32.totalorder %v9105_v63, 4294967294 }
 0x401   : > { %v1639_v62 = vadd.f32 %v1631_v40, %v1583_v11 }
 0x402   : > { %vm11421_vm0 = vcmp.eq.s32.totalorder %v9109_v4, 4294967292  ;;  %vm11423_vm6 = vcmp.eq.s32.totalorder %v9109_v4, 4294967294  ;;  %vm11435_vm5 = vcmp.eq.s32.totalorder %v9109_v4, 3 }
 0x403   : > { %v1565_v33 = vpop.permute.xlu0 %1564 }
 0x404   : > { %v1669_v56 = vpop.permute.xlu1 %1668 }
 0x405   : > { %v1687_v12 = vsel %vm11414_vm1, %v1669_v56, 0.0  ;;  %vm11419_vm1 = vcmp.eq.s32.totalorder %v9109_v4, 4294967293 }
 0x406   : > { %v1695_v19 = vadd.f32 %v1687_v12, %v1639_v62 }
 0x407   : > { %v1733_v11 = vpop.permute.xlu0 %1732 }
 0x409   : > { %v1725_v24 = vpop.permute.xlu1 %1724 }
 0x40a   : > { %v1743_v16 = vsel %vm11413_vm4, %v1725_v24, 0.0  ;;  %vm11418_vm4 = vcmp.eq.s32.totalorder %v9105_v63, 4294967293 }
 0x40b   : > { %v1751_v61 = vadd.f32 %v1743_v16, %v1695_v19  ;;  %v1845_v62 = vpop.permute.xlu0 %1844  ;;  %v1466_v16 = vsel %vm11419_vm1, %v1457_v52, 0.0  ;;  %vm11425_vm1 = vcmp.eq.s32.totalorder %v9109_v4, 4294967295 }
 0x40d   : > { %v1807_v27 = vadd.f32 %v1799_v45, %v1751_v61 }
 0x40e   : > { %v1837_v6 = vpop.permute.xlu1 %1836 }
 0x40f   : > { %v1855_v60 = vsel %vm11411_vm15, %v1837_v6, 0.0  ;;  %vm11417_vm15 = vcmp.eq.s32.totalorder %v9105_v63, 4294967292 }
 0x410   : > { %v1863_v0 = vadd.f32 %v1855_v60, %v1807_v27  ;;  %v1328_v40 = vsel %vm11417_vm15, %v1315_v5, 0.0  ;;  %vm11422_vm15 = vcmp.eq.s32.totalorder %v9105_v63, 4294967295 }
 0x411   : > { %v1413_v10 = vadd.f32 %v8726_v37, %v1328_v40  ;;  %v1577_v6 = vsel %vm11422_vm15, %v1565_v33, 0.0  ;;  %vm11428_vm15 = vcmp.eq.s32.totalorder %v9105_v63, 2 }
 0x412   : > { %v9099_v41 = vsel %vm8477_vm8, -10000.0, %v1863_v0 }
 0x413   : > { %v1320_v26 = vpop.permute.xlu1 %1319  ;;  %v1889_v58 = vsel %vm1138_vm9, %v9099_v41, -inf }
 0x414   : > { %1890 = vmax.xlane.f32.xlu1 %v1889_v58  ;;  %v1329_v56 = vsel %vm11421_vm0, %v1320_v26, 0.0  ;;  %vm11433_vm0 = vcmp.eq.s32.totalorder %v9105_v63, 1 }
 0x415   : > { %v1416_v59 = vadd.f32 %v8730_v23, %v1329_v56 }
 0x417   : > { %v1474_v45 = vadd.f32 %v1466_v16, %v1416_v59 }
 0x418   : > { %v1513_v30 = vpop.permute.xlu1 %1512 }
 0x419   : > { %v1522_v23 = vsel %vm11423_vm6, %v1513_v30, 0.0  ;;  %v1578_v30 = vsel %vm11425_vm1, %v1569_v2, 0.0  ;;  %vm11437_vm6 = vcmp.eq.s32.totalorder %v9109_v4, 1  ;;  %v1745_v2 = vsel %vm11428_vm15, %v1733_v11, 0.0 }
 0x41a   : > { %v1530_v26 = vadd.f32 %v1522_v23, %v1474_v45  ;;  %vm1761_vm1 = vcmp.eq.s32.totalorder %v9105_v63, 3  ;;  %vm11434_vm15 = vcmp.eq.s32.totalorder %v9109_v4, 4 }
 0x41c   : > { %v1586_v33 = vadd.f32 %v1578_v30, %v1530_v26 }
 0x41d   : > { %v1625_v1 = vpop.permute.xlu1 %1624 }
 0x422   : > { %v1681_v39 = vpop.permute.xlu1 %1680 }
 0x427   : > { %v1737_v31 = vpop.permute.xlu1 %1736 }
 0x42c   : > { %v1793_v34 = vpop.permute.xlu1 %1792 }
 0x431   : > { %v1453_v7 = vpop.permute.xlu1 %1452 }
 0x432   : > { %v1465_v12 = vsel %vm11418_vm4, %v1453_v7, 0.0  ;;  %vm11424_vm4 = vcmp.eq.s32.totalorder %v9105_v63, 0 }
 0x433   : > { %v1473_v19 = vadd.f32 %v1465_v12, %v1413_v10  ;;  %v1879_v27 = vpop.xlane.xlu0 %1878  ;;  %v1690_v10 = vsel %vm11437_vm6, %v1681_v39, 0.0  ;;  %v1802_v39 = vsel %vm11435_vm5, %v1793_v34, 0.0 }
 0x434   : > { %v1901_v60 = vsub.f32 %v8879_v36, %v1879_v27 }
 0x436   : > { %v1509_v24 = vpop.permute.xlu1 %1508  ;;  %v1909_v5 = vmul.f32 1.442695, %v1901_v60 }
 0x437   : > { %v1521_v61 = vsel %vm11420_vm14, %v1509_v24, 0.0  ;;  %vm11427_vm14 = vcmp.eq.s32.totalorder %v9109_v4, 0 }
 0x438   : > { %v1529_v37 = vadd.f32 %v1521_v61, %v1473_v19  ;;  %v1634_v56 = vsel %vm11427_vm14, %v1625_v1, 0.0  ;;  %7525 = vpow2.f32 %v1909_v5  ;;  %vm1817_vm14 = vcmp.eq.s32.totalorder %v9105_v63, 4 }
 0x439   : > { %v1642_v59 = vadd.f32 %v1634_v56, %v1586_v33  ;;  %v1857_v45 = vsel %vm1817_vm14, %v1845_v62, 0.0 }
 0x43a   : > { %v1585_v58 = vadd.f32 %v1577_v6, %v1529_v37 }
 0x43b   : > { %v1621_v0 = vpop.permute.xlu1 %1620  ;;  %v1698_v16 = vadd.f32 %v1690_v10, %v1642_v59 }
 0x43c   : > { %v1633_v52 = vsel %vm11424_vm4, %v1621_v0, 0.0  ;;  %vm11436_vm4 = vcmp.eq.s32.totalorder %v9109_v4, 2 }
 0x43d   : > { %v1641_v36 = vadd.f32 %v1633_v52, %v1585_v58  ;;  %v1746_v1 = vsel %vm11436_vm4, %v1737_v31, 0.0 }
 0x43e   : > { %v1754_v27 = vadd.f32 %v1746_v1, %v1698_v16 }
 0x440   : > { %v1677_v40 = vpop.permute.xlu1 %1676  ;;  %v1810_v23 = vadd.f32 %v1802_v39, %v1754_v27 }
 0x441   : > { %v1689_v7 = vsel %vm11433_vm0, %v1677_v40, 0.0 }
 0x442   : > { %v1697_v12 = vadd.f32 %v1689_v7, %v1641_v36  ;;  %v9171_v34 = vpop.eup %7525 }
 0x443   : > { %v1925_v52 = vsel %vm1138_vm9, %v9171_v34, 0.0 }
 0x444   : > { %v1753_v19 = vadd.f32 %v1745_v2, %v1697_v12 }
 0x445   : > { %v1789_v24 = vpop.permute.xlu1 %1788 }
 0x446   : > { %v1801_v11 = vsel %vm1761_vm1, %v1789_v24, 0.0 }
 0x447   : > { %v1809_v61 = vadd.f32 %v1801_v11, %v1753_v19 }
 0x449   : > { %v1865_v37 = vadd.f32 %v1857_v45, %v1809_v61 }
 0x44a   : > { %v1849_v6 = vpop.permute.xlu1 %1848 }
 0x44b   : > { %v1858_v31 = vsel %vm11434_vm15, %v1849_v6, 0.0  ;;  %v1875_v60 = vsel %vm8477_vm8, -10000.0, %v1865_v37 }
 0x44c   : > { %v1895_v0 = vsel %vm1138_vm9, %v1875_v60, -inf  ;;  %v1866_v26 = vadd.f32 %v1858_v31, %v1810_v23 }
 0x44d   : > { %1896 = vmax.xlane.f32.xlu1 %v1895_v0 }
 0x44e   : > { %v1876_v62 = vsel %vm8477_vm8, -10000.0, %v1866_v26 }
 0x44f   : > { %v1898_v58 = vsel %vm1138_vm9, %v1876_v62, -inf }
 0x450   : > { %1899 = vmax.xlane.f32.xlu0 %v1898_v58 }
 0x451   : > { %1926 = vadd.xlane.f32.xlu1 %v1925_v52 }
 0x45d   : > { %v1885_v30 = vpop.xlane.xlu0 %1884 }
 0x45e   : > { %v1903_v5 = vsub.f32 %v8986_v13, %v1885_v30 }
 0x460   : > { %v1913_v33 = vmul.f32 1.442695, %v1903_v5 }
 0x461   : > { %v1888_v56 = vpop.xlane.xlu0 %1887 }
 0x462   : > { %7527 = vpow2.f32 %v1913_v33  ;;  %v1904_v7 = vsub.f32 %v8994_v38, %v1888_v56 }
 0x464   : > { %v1915_v10 = vmul.f32 1.442695, %v1904_v7 }
 0x46c   : > { %v9179_v36 = vpop.eup %7527 }
 0x46d   : > { %v1931_v40 = vsel %vm1138_vm9, %v9179_v36, 0.0 }
 0x46e   : > { %1932 = vadd.xlane.f32.xlu1 %v1931_v40 }
 0x47c   : > { %v1882_v12 = vpop.xlane.xlu1 %1881 }
 0x47d   : > { %v1902_v2 = vsub.f32 %v9051_v21, %v1882_v12 }
 0x47f   : > { %v1911_v59 = vmul.f32 1.442695, %v1902_v2 }
 0x480   : > { %v1894_v19 = vpop.xlane.xlu0 %1893 }
 0x481   : > { %7529 = vpow2.f32 %v1911_v59  ;;  %v1906_v13 = vsub.f32 %v9061_v49, %v1894_v19 }
 0x482   : > { %7531 = vpow2.f32 %v1915_v10 }
 0x483   : > { %v1919_v1 = vmul.f32 1.442695, %v1906_v13 }
 0x485   : > { %7533 = vpow2.f32 %v1919_v1 }
 0x48b   : > { %v7530_v24 = vpop.eup %7529 }
 0x48c   : > { %v1928_v16 = vsel %vm1138_vm9, %v7530_v24, 0.0  ;;  %v7532_v11 = vpop.eup %7531 }
 0x48d   : > { %1929 = vadd.xlane.f32.xlu0 %v1928_v16  ;;  %v1934_v39 = vsel %vm1138_vm9, %v7532_v11, 0.0 }
 0x48f   : > { %v9188_v38 = vpop.eup %7533 }
 0x490   : > { %v1940_v21 = vsel %vm1138_vm9, %v9188_v38, 0.0 }
 0x491   : > { %1935 = vadd.xlane.f32.xlu0 %v1934_v39 }
 0x495   : > { %1941 = vadd.xlane.f32.xlu0 %v1940_v21 }
 0x4a1   : > { %v1891_v61 = vpop.xlane.xlu1 %1890 }
 0x4a2   : > { %v1905_v49 = vsub.f32 %v9099_v41, %v1891_v61 }
 0x4a4   : > { %v1917_v45 = vmul.f32 1.442695, %v1905_v49 }
 0x4a6   : > { %7535 = vpow2.f32 %v1917_v45 }
 0x4b0   : > { %v9193_v27 = vpop.eup %7535 }
 0x4b1   : > { %v1937_v37 = vsel %vm1138_vm9, %v9193_v27, 0.0 }
 0x4b2   : > { %1938 = vadd.xlane.f32.xlu1 %v1937_v37 }
 0x4da   : > { %v1897_v23 = vpop.xlane.xlu1 %1896 }
 0x4db   : > { %v1907_v6 = vsub.f32 %v1875_v60, %v1897_v23 }
 0x4dd   : > { %v1921_v31 = vmul.f32 1.442695, %v1907_v6  ;;  %v1900_v0 = vpop.xlane.xlu0 %1899 }
 0x4de   : > { %v1908_v26 = vsub.f32 %v1876_v62, %v1900_v0  ;;  %v1927_v60 = vpop.xlane.xlu1 %1926 }
 0x4df   : > { %7537 = vpow2.f32 %v1921_v31 }
 0x4e0   : > { %v1923_v58 = vmul.f32 1.442695, %v1908_v26 }
 0x4e2   : > { %7539 = vpow2.f32 %v1923_v58 }
 0x4e9   : > { %v9197_v52 = vpop.eup %7537 }
 0x4ea   : > { %v1943_v41 = vsel %vm1138_vm9, %v9197_v52, 0.0 }
 0x4eb   : > { %1944 = vadd.xlane.f32.xlu1 %v1943_v41 }
 0x4ec   : > { %v9201_v30 = vpop.eup %7539 }
 0x4ed   : > { %v1946_v5 = vsel %vm1138_vm9, %v9201_v30, 0.0 }
 0x4ee   : > { %1947 = vadd.xlane.f32.xlu0 %v1946_v5 }
 0x4fb   : > { %v1933_v62 = vpop.xlane.xlu1 %1932 }
 0x51a   : > { %v1930_v33 = vpop.xlane.xlu0 %1929 }
 0x51b   : > { %7541 = vrcp.f32 %v1930_v33 }
 0x51c   : > { %7543 = vrcp.f32 %v1927_v60 }
 0x51e   : > { %v1936_v40 = vpop.xlane.xlu0 %1935 }
 0x51f   : > { %7545 = vrcp.f32 %v1936_v40 }
 0x520   : > { %7547 = vrcp.f32 %v1933_v62 }
 0x525   : > { %v7542_v56 = vpop.eup %7541 }
 0x526   : > { %v9205_v7 = vmul.f32 %v7542_v56, %v7530_v24  ;;  %v7544_v16 = vpop.eup %7543 }
 0x527   : > { %v9232_v23 = vmul.f32 %v7544_v16, %v9171_v34 }
 0x528   : > { %v2006_v12 = vsel %vm11429_vm11, %v9205_v7, 0.0  ;;  %v1974_v2 = vsel %vm11438_vm3, %v9205_v7, 0.0  ;;  %v2038_v19 = vsel %vm11432_vm2, %v9205_v7, 0.0  ;;  %v2134_v13 = vsel %vm11430_vm12, %v9205_v7, 0.0 }
 0x529   : > { %v2016_v10 = vsel %vm1138_vm9, %v2006_v12, 0.0  ;;  %v1984_v59 = vsel %vm1138_vm9, %v1974_v2, 0.0  ;;  %v2048_v1 = vsel %vm1138_vm9, %v2038_v19, 0.0  ;;  %v2144_v24 = vsel %vm1138_vm9, %v2134_v13, 0.0  ;;  %v7546_v61 = vpop.eup %7545 }
 0x52a   : > { %2017 = vadd.xlane.f32.xlu0 %v2016_v10  ;;  %1985 = vadd.xlane.f32.xlu1 %v1984_v59  ;;  %v2070_v39 = vsel %vm11431_vm7, %v9205_v7, 0.0  ;;  %vm11516_vm11 = vcmp.eq.s32.totalorder %v8931_v25, 2  ;;  %v7548_v49 = vpop.eup %7547  ;;  %v9234_v6 = vmul.f32 %v7546_v61, %v7532_v11  ;;  %vm11517_vm12 = vcmp.eq.s32.totalorder %v8931_v25, 0  ;;  %v1942_v10 = vpop.xlane.xlu0 %1941 }
 0x52b   : > { %v2166_v21 = vsel %vm11516_vm11, %v9205_v7, 0.0  ;;  %v2080_v45 = vsel %vm1138_vm9, %v2070_v39, 0.0  ;;  %v2102_v31 = vsel %vm11517_vm12, %v9205_v7, 0.0  ;;  %vm11518_vm11 = vcmp.eq.s32.totalorder %v8931_v25, 3 }
 0x52c   : > { %v2176_v37 = vsel %vm1138_vm9, %v2166_v21, 0.0  ;;  %v2198_v0 = vsel %vm11518_vm11, %v9205_v7, 0.0  ;;  %v9243_v26 = vmul.f32 %v7548_v49, %v9179_v36  ;;  %v2112_v58 = vsel %vm1138_vm9, %v2102_v31, 0.0 }
 0x52d   : > { %v2208_v34 = vsel %vm1138_vm9, %v2198_v0, 0.0  ;;  %vm11519_vm7 = vcmp.eq.s32.totalorder %v8831_v14, 4294967293  ;;  %vm11520_vm12 = vcmp.eq.s32.totalorder %v8931_v25, 4  ;;  %vm11521_vm11 = vcmp.eq.s32.totalorder %v8831_v14, 2 }
 0x52e   : > { %2049 = vadd.xlane.f32.xlu0 %v2048_v1  ;;  %2145 = vadd.xlane.f32.xlu1 %v2144_v24  ;;  %v2005_v11 = vsel %vm11519_vm7, %v9232_v23, 0.0  ;;  %v2230_v41 = vsel %vm11520_vm12, %v9205_v7, 0.0  ;;  %v1966_v5 = vpack.c.bf16 %v9234_v6, %v9243_v26  ;;  %v2165_v60 = vsel %vm11521_vm11, %v9232_v23, 0.0 }
 0x52f   : > { %v2013_v36 = vsel %vm1138_vm9, %v2005_v11, 0.0  ;;  %v2240_v33 = vsel %vm1138_vm9, %v2230_v41, 0.0  ;;  %vm11522_vm7 = vcmp.eq.s32.totalorder %v8831_v14, 4294967292  ;;  %v2173_v62 = vsel %vm1138_vm9, %v2165_v60, 0.0 }
 0x530   : > { %v1973_v40 = vsel %vm11522_vm7, %v9232_v23, 0.0  ;;  %vm11523_vm12 = vcmp.eq.s32.totalorder %v8831_v14, 3  ;;  %vm11524_vm2 = vcmp.eq.s32.totalorder %v8831_v14, 4294967294  ;;  %vm11525_vm11 = vcmp.eq.s32.totalorder %v8831_v14, 4 }
 0x531   : > { %v1981_v56 = vsel %vm1138_vm9, %v1973_v40, 0.0  ;;  %v2197_v12 = vsel %vm11523_vm12, %v9232_v23, 0.0  ;;  %v2037_v2 = vsel %vm11524_vm2, %v9232_v23, 0.0  ;;  %v2229_v1 = vsel %vm11525_vm11, %v9232_v23, 0.0 }
 0x532   : > { %2081 = vadd.xlane.f32.xlu0 %v2080_v45  ;;  %2177 = vadd.xlane.f32.xlu1 %v2176_v37  ;;  %v2205_v19 = vsel %vm1138_vm9, %v2197_v12, 0.0  ;;  %v2045_v13 = vsel %vm1138_vm9, %v2037_v2, 0.0  ;;  %vm11526_vm7 = vcmp.eq.s32.totalorder %v8831_v14, 4294967295  ;;  %v2237_v16 = vsel %vm1138_vm9, %v2229_v1, 0.0 }
 0x533   : > { %v2069_v24 = vsel %vm11526_vm7, %v9232_v23, 0.0  ;;  %vm11527_vm2 = vcmp.eq.s32.totalorder %v8831_v14, 0  ;;  %vm11528_vm12 = vcmp.eq.s32.totalorder %v8888_v51, 4294967292  ;;  %vm11529_vm11 = vcmp.eq.s32.totalorder %v8831_v14, 1 }
 0x534   : > { %v2077_v39 = vsel %vm1138_vm9, %v2069_v24, 0.0  ;;  %v2101_v21 = vsel %vm11527_vm2, %v9232_v23, 0.0  ;;  %v1976_v61 = vsel %vm11528_vm12, %v9234_v6, 0.0  ;;  %v2133_v31 = vsel %vm11529_vm11, %v9232_v23, 0.0 }
 0x535   : > { %v2109_v49 = vsel %vm1138_vm9, %v2101_v21, 0.0  ;;  %v1990_v45 = vsel %vm1138_vm9, %v1976_v61, 0.0  ;;  %vm11530_vm7 = vcmp.eq.s32.totalorder %v8895_v17, 4294967292  ;;  %v2141_v11 = vsel %vm1138_vm9, %v2133_v31, 0.0 }
 0x536   : > { %2113 = vadd.xlane.f32.xlu0 %v2112_v58  ;;  %2209 = vadd.xlane.f32.xlu1 %v2208_v34  ;;  %v1975_v0 = vsel %vm11530_vm7, %v9243_v26, 0.0  ;;  %vm11531_vm2 = vcmp.eq.s32.totalorder %v8888_v51, 4294967293  ;;  %vm11532_vm12 = vcmp.eq.s32.totalorder %v8895_v17, 4294967294  ;;  %vm11533_vm11 = vcmp.eq.s32.totalorder %v8888_v51, 4294967294 }
 0x537   : > { %v1987_v41 = vsel %vm1138_vm9, %v1975_v0, 0.0  ;;  %vm11534_vm7 = vcmp.eq.s32.totalorder %v8895_v17, 4294967295  ;;  %vm11439_vm3 = vcmask 72704  }
 0x538   : > { %v2071_v12 = vsel %vm11534_vm7, %v9243_v26, 0.0  ;;  %vm11538_vm7 = vcmp.eq.s32.totalorder %v8895_v17, 1 }
 0x539   : > { %v2083_v2 = vsel %vm1138_vm9, %v2071_v12, 0.0  ;;  %v2135_v24 = vsel %vm11538_vm7, %v9243_v26, 0.0  ;;  %vm11542_vm7 = vcmp.eq.s32.totalorder %v8895_v17, 3 }
 0x53a   : > { %2014 = vadd.xlane.f32.xlu0 %v2013_v36  ;;  %2241 = vadd.xlane.f32.xlu1 %v2240_v33  ;;  %v2008_v36 = vsel %vm11531_vm2, %v9234_v6, 0.0  ;;  %v2039_v33 = vsel %vm11532_vm12, %v9243_v26, 0.0  ;;  %vm11535_vm2 = vcmp.eq.s32.totalorder %v8888_v51, 4294967295  ;;  %vm11536_vm12 = vcmp.eq.s32.totalorder %v8895_v17, 0 }
 0x53b   : > { %v2051_v40 = vsel %vm1138_vm9, %v2039_v33, 0.0  ;;  %v2199_v31 = vsel %vm11542_vm7, %v9243_v26, 0.0  ;;  %vm11546_vm7 = vcmp.eq.s32.totalorder %v9002_v3, 4294967292 }
 0x53e   : > { %2174 = vadd.xlane.f32.xlu0 %v2173_v62  ;;  %1982 = vadd.xlane.f32.xlu1 %v1981_v56  ;;  %v2040_v56 = vsel %vm11533_vm11, %v9234_v6, 0.0  ;;  %vm11537_vm11 = vcmp.eq.s32.totalorder %v8888_v51, 0 }
 0x53f   : > { %v1939_v59 = vpop.xlane.xlu1 %1938  ;;  %v2104_v1 = vsel %vm11537_vm11, %v9234_v6, 0.0  ;;  %vm11541_vm11 = vcmp.eq.s32.totalorder %v8888_v51, 2 }
 0x540   : > { %7549 = vrcp.f32 %v1939_v59  ;;  %v2103_v59 = vsel %vm11536_vm12, %v9243_v26, 0.0  ;;  %vm11540_vm12 = vcmp.eq.s32.totalorder %v8895_v17, 2 }
 0x541   : > { %7551 = vrcp.f32 %v1942_v10  ;;  %v2072_v10 = vsel %vm11535_vm2, %v9234_v6, 0.0  ;;  %vm11539_vm2 = vcmp.eq.s32.totalorder %v8888_v51, 1  ;;  %v2167_v61 = vsel %vm11540_vm12, %v9243_v26, 0.0 }
 0x542   : > { %2206 = vadd.xlane.f32.xlu0 %v2205_v19  ;;  %2046 = vadd.xlane.f32.xlu1 %v2045_v13  ;;  %v2086_v19 = vsel %vm1138_vm9, %v2072_v10, 0.0  ;;  %v2115_v13 = vsel %vm1138_vm9, %v2103_v59, 0.0  ;;  %v2136_v21 = vsel %vm11539_vm2, %v9234_v6, 0.0  ;;  %vm11543_vm2 = vcmp.eq.s32.totalorder %v8888_v51, 3 }
 0x543   : > { %vm11544_vm12 = vcmp.eq.s32.totalorder %v8895_v17, 4 }
 0x546   : > { %2238 = vadd.xlane.f32.xlu0 %v2237_v16  ;;  %2078 = vadd.xlane.f32.xlu1 %v2077_v39  ;;  %v2118_v16 = vsel %vm1138_vm9, %v2104_v1, 0.0  ;;  %v2147_v39 = vsel %vm1138_vm9, %v2135_v24, 0.0 }
 0x54a   : > { %v7550_v37 = vpop.eup %7549  ;;  %2110 = vadd.xlane.f32.xlu1 %v2109_v49  ;;  %1991 = vadd.xlane.f32.xlu0 %v1990_v45  ;;  %v2150_v49 = vsel %vm1138_vm9, %v2136_v21, 0.0  ;;  %v2179_v45 = vsel %vm1138_vm9, %v2167_v61, 0.0 }
 0x54b   : > { %v7552_v58 = vpop.eup %7551  ;;  %v9296_v34 = vmul.f32 %v7550_v37, %v9193_v27  ;;  %v2022_v27 = vsel %vm1138_vm9, %v2008_v36, 0.0  ;;  %v2168_v37 = vsel %vm11541_vm11, %v9234_v6, 0.0  ;;  %vm11545_vm11 = vcmp.eq.s32.totalorder %v8888_v51, 4 }
 0x54c   : > { %v9307_v60 = vmul.f32 %v7552_v58, %v9188_v38  ;;  %v2054_v38 = vsel %vm1138_vm9, %v2040_v56, 0.0  ;;  %v2182_v0 = vsel %vm1138_vm9, %v2168_v37, 0.0  ;;  %v2211_v58 = vsel %vm1138_vm9, %v2199_v31, 0.0 }
 0x54e   : > { %2142 = vadd.xlane.f32.xlu1 %v2141_v11  ;;  %1988 = vadd.xlane.f32.xlu0 %v1987_v41  ;;  %v1967_v62 = vpack.c.bf16 %v9307_v60, %v9296_v34  ;;  %v2200_v11 = vsel %vm11543_vm2, %v9234_v6, 0.0  ;;  %v2231_v41 = vsel %vm11544_vm12, %v9243_v26, 0.0  ;;  %vm11547_vm2 = vcmp.eq.s32.totalorder %v8895_v17, 4294967293 }
 0x54f   : > { %v2214_v36 = vsel %vm1138_vm9, %v2200_v11, 0.0  ;;  %v2243_v33 = vsel %vm1138_vm9, %v2231_v41, 0.0  ;;  %vm11548_vm12 = vcmp.eq.s32.totalorder %v9067_v57, 4294967293 }
 0x552   : > { %2023 = vadd.xlane.f32.xlu1 %v2022_v27  ;;  %2052 = vadd.xlane.f32.xlu0 %v2051_v40  ;;  %v2232_v27 = vsel %vm11545_vm11, %v9234_v6, 0.0  ;;  %v1978_v40 = vsel %vm11546_vm7, %v9307_v60, 0.0  ;;  %vm11549_vm11 = vcmp.eq.s32.totalorder %v9002_v3, 4294967293  ;;  %vm11550_vm7 = vcmp.eq.s32.totalorder %v9067_v57, 4294967294 }
 0x553   : > { %v2246_v56 = vsel %vm1138_vm9, %v2232_v27, 0.0  ;;  %v1996_v12 = vsel %vm1138_vm9, %v1978_v40, 0.0 }
 0x556   : > { %2055 = vadd.xlane.f32.xlu1 %v2054_v38  ;;  %2084 = vadd.xlane.f32.xlu0 %v2083_v2  ;;  %v2007_v38 = vsel %vm11547_vm2, %v9243_v26, 0.0  ;;  %v2009_v2 = vsel %vm11548_vm12, %v9296_v34, 0.0  ;;  %vm11551_vm2 = vcmp.eq.s32.totalorder %v9002_v3, 4294967294  ;;  %vm11552_vm12 = vcmp.eq.s32.totalorder %v9067_v57, 4294967295 }
 0x557   : > { %v2019_v10 = vsel %vm1138_vm9, %v2007_v38, 0.0  ;;  %v2025_v59 = vsel %vm1138_vm9, %v2009_v2, 0.0 }
 0x55a   : > { %2087 = vadd.xlane.f32.xlu1 %v2086_v19  ;;  %2116 = vadd.xlane.f32.xlu0 %v2115_v13  ;;  %v2010_v19 = vsel %vm11549_vm11, %v9307_v60, 0.0  ;;  %v2041_v13 = vsel %vm11550_vm7, %v9296_v34, 0.0  ;;  %vm11553_vm11 = vcmp.eq.s32.totalorder %v9002_v3, 4294967295  ;;  %vm11554_vm7 = vcmp.eq.s32.totalorder %v9067_v57, 0 }
 0x55b   : > { %v2028_v1 = vsel %vm1138_vm9, %v2010_v19, 0.0  ;;  %v2057_v24 = vsel %vm1138_vm9, %v2041_v13, 0.0 }
 0x55e   : > { %2119 = vadd.xlane.f32.xlu1 %v2118_v16  ;;  %2148 = vadd.xlane.f32.xlu0 %v2147_v39  ;;  %v2042_v16 = vsel %vm11551_vm2, %v9307_v60, 0.0  ;;  %v2073_v39 = vsel %vm11552_vm12, %v9296_v34, 0.0  ;;  %vm11555_vm2 = vcmp.eq.s32.totalorder %v9002_v3, 0  ;;  %vm11556_vm12 = vcmp.eq.s32.totalorder %v9067_v57, 1 }
 0x55f   : > { %v2060_v21 = vsel %vm1138_vm9, %v2042_v16, 0.0  ;;  %v2089_v61 = vsel %vm1138_vm9, %v2073_v39, 0.0  ;;  %v2106_v11 = vsel %vm11555_vm2, %v9307_v60, 0.0  ;;  %v2137_v41 = vsel %vm11556_vm12, %v9296_v34, 0.0 }
 0x560   : > { %vm11559_vm2 = vcmp.eq.s32.totalorder %v9002_v3, 2  ;;  %vm11560_vm12 = vcmp.eq.s32.totalorder %v9067_v57, 3 }
 0x561   : > { %v2170_v38 = vsel %vm11559_vm2, %v9307_v60, 0.0  ;;  %v2201_v2 = vsel %vm11560_vm12, %v9296_v34, 0.0  ;;  %vm11563_vm2 = vcmp.eq.s32.totalorder %v9002_v3, 4  ;;  %vm11564_vm12 = vcmp.eq.s32.totalorder %v9109_v4, 4294967292 }
 0x562   : > { %2151 = vadd.xlane.f32.xlu1 %v2150_v49  ;;  %2180 = vadd.xlane.f32.xlu0 %v2179_v45  ;;  %v2074_v49 = vsel %vm11553_vm11, %v9307_v60, 0.0  ;;  %v2105_v45 = vsel %vm11554_vm7, %v9296_v34, 0.0  ;;  %vm11557_vm11 = vcmp.eq.s32.totalorder %v9002_v3, 1  ;;  %vm11558_vm7 = vcmp.eq.s32.totalorder %v9067_v57, 2 }
 0x563   : > { %v2138_v27 = vsel %vm11557_vm11, %v9307_v60, 0.0  ;;  %v2169_v40 = vsel %vm11558_vm7, %v9296_v34, 0.0  ;;  %v2188_v19 = vsel %vm1138_vm9, %v2170_v38, 0.0  ;;  %v2217_v13 = vsel %vm1138_vm9, %v2201_v2, 0.0 }
 0x564   : > { %vm11561_vm11 = vcmp.eq.s32.totalorder %v9002_v3, 3  ;;  %vm11562_vm7 = vcmp.eq.s32.totalorder %v9067_v57, 4 }
 0x565   : > { %v2233_v16 = vsel %vm11562_vm7, %v9296_v34, 0.0  ;;  %vm11566_vm7 = vcmp.eq.s32.totalorder %v9109_v4, 4294967293 }
 0x566   : > { %2183 = vadd.xlane.f32.xlu1 %v2182_v0  ;;  %2212 = vadd.xlane.f32.xlu0 %v2211_v58  ;;  %v2092_v0 = vsel %vm1138_vm9, %v2074_v49, 0.0  ;;  %v2121_v58 = vsel %vm1138_vm9, %v2105_v45, 0.0 }
 0x56a   : > { %2215 = vadd.xlane.f32.xlu1 %v2214_v36  ;;  %2244 = vadd.xlane.f32.xlu0 %v2243_v33  ;;  %v2124_v36 = vsel %vm1138_vm9, %v2106_v11, 0.0  ;;  %v2153_v33 = vsel %vm1138_vm9, %v2137_v41, 0.0 }
 0x56e   : > { %2247 = vadd.xlane.f32.xlu1 %v2246_v56  ;;  %1997 = vadd.xlane.f32.xlu0 %v1996_v12  ;;  %v2156_v56 = vsel %vm1138_vm9, %v2138_v27, 0.0  ;;  %v2185_v12 = vsel %vm1138_vm9, %v2169_v40, 0.0 }
 0x572   : > { %2020 = vadd.xlane.f32.xlu1 %v2019_v10  ;;  %2026 = vadd.xlane.f32.xlu0 %v2025_v59 }
 0x576   : > { %2029 = vadd.xlane.f32.xlu1 %v2028_v1  ;;  %2058 = vadd.xlane.f32.xlu0 %v2057_v24  ;;  %v2202_v24 = vsel %vm11561_vm11, %v9307_v60, 0.0  ;;  %vm11565_vm11 = vcmp.eq.s32.totalorder %v9067_v57, 4294967292 }
 0x578   : > { %v1945_v31 = vpop.xlane.xlu1 %1944 }
 0x57a   : > { %2061 = vadd.xlane.f32.xlu1 %v2060_v21  ;;  %2090 = vadd.xlane.f32.xlu0 %v2089_v61  ;;  %v2220_v21 = vsel %vm1138_vm9, %v2202_v24, 0.0  ;;  %v2249_v61 = vsel %vm1138_vm9, %v2233_v16, 0.0 }
 0x57b   : > { %v1948_v37 = vpop.xlane.xlu0 %1947 }
 0x57c   : > { %7553 = vrcp.f32 %v1948_v37 }
 0x57d   : > { %7555 = vrcp.f32 %v1945_v31  ;;  %v1977_v31 = vsel %vm11565_vm11, %v9296_v34, 0.0  ;;  %vm11569_vm11 = vcmp.eq.s32.totalorder %v9105_v63, 4294967293 }
 0x57e   : > { %2093 = vadd.xlane.f32.xlu1 %v2092_v0  ;;  %2122 = vadd.xlane.f32.xlu0 %v2121_v58  ;;  %v1993_v58 = vsel %vm1138_vm9, %v1977_v31, 0.0 }
 0x582   : > { %2125 = vadd.xlane.f32.xlu1 %v2124_v36  ;;  %2154 = vadd.xlane.f32.xlu0 %v2153_v33 }
 0x586   : > { %2157 = vadd.xlane.f32.xlu1 %v2156_v56  ;;  %2186 = vadd.xlane.f32.xlu0 %v2185_v12  ;;  %v7554_v10 = vpop.eup %7553 }
 0x587   : > { %v7556_v59 = vpop.eup %7555  ;;  %v9426_v1 = vmul.f32 %v7554_v10, %v9201_v30  ;;  %v2234_v30 = vsel %vm11563_vm2, %v9307_v60, 0.0  ;;  %vm11567_vm2 = vcmp.eq.s32.totalorder %v9109_v4, 4294967294 }
 0x588   : > { %v9435_v39 = vmul.f32 %v7556_v59, %v9197_v52  ;;  %v2252_v52 = vsel %vm1138_vm9, %v2234_v30, 0.0 }
 0x589   : > { %v1980_v49 = vsel %vm11564_vm12, %v9426_v1, 0.0  ;;  %v2140_v0 = vsel %vm11437_vm6, %v9426_v1, 0.0  ;;  %v2012_v41 = vsel %vm11566_vm7, %v9426_v1, 0.0  ;;  %v2172_v36 = vsel %vm11436_vm4, %v9426_v1, 0.0 }
 0x58a   : > { %2189 = vadd.xlane.f32.xlu1 %v2188_v19  ;;  %2218 = vadd.xlane.f32.xlu0 %v2217_v13  ;;  %v1968_v45 = vpack.c.bf16 %v9426_v1, %v9435_v39  ;;  %v2002_v37 = vsel %vm1138_vm9, %v1980_v49, 0.0  ;;  %v2162_v11 = vsel %vm1138_vm9, %v2140_v0, 0.0  ;;  %v2034_v33 = vsel %vm1138_vm9, %v2012_v41, 0.0 }
 0x58b   : > { %v2194_v27 = vsel %vm1138_vm9, %v2172_v36, 0.0  ;;  %v2044_v40 = vsel %vm11567_vm2, %v9426_v1, 0.0  ;;  %v2204_v56 = vsel %vm11435_vm5, %v9426_v1, 0.0  ;;  %vm11568_vm12 = vcmp.eq.s32.totalorder %v9109_v4, 4294967295 }
 0x58c   : > { %v2066_v12 = vsel %vm1138_vm9, %v2044_v40, 0.0  ;;  %v2226_v38 = vsel %vm1138_vm9, %v2204_v56, 0.0  ;;  %v2076_v2 = vsel %vm11568_vm12, %v9426_v1, 0.0  ;;  %v2011_v10 = vsel %vm11569_vm11, %v9435_v39, 0.0 }
 0x58d   : > { %v2098_v59 = vsel %vm1138_vm9, %v2076_v2, 0.0  ;;  %v2031_v19 = vsel %vm1138_vm9, %v2011_v10, 0.0  ;;  %vm11570_vm7 = vcmp.eq.s32.totalorder %v9109_v4, 0  ;;  %vm11571_vm2 = vcmp.eq.s32.totalorder %v9105_v63, 4294967294 }
 0x58e   : > { %2221 = vadd.xlane.f32.xlu1 %v2220_v21  ;;  %2250 = vadd.xlane.f32.xlu0 %v2249_v61  ;;  %v2108_v13 = vsel %vm11570_vm7, %v9426_v1, 0.0  ;;  %v2043_v24 = vsel %vm11571_vm2, %v9435_v39, 0.0  ;;  %vm11572_vm12 = vcmp.eq.s32.totalorder %v9105_v63, 4294967292  ;;  %vm11573_vm11 = vcmp.eq.s32.totalorder %v9105_v63, 4294967295 }
 0x58f   : > { %v2130_v16 = vsel %vm1138_vm9, %v2108_v13, 0.0  ;;  %v2063_v21 = vsel %vm1138_vm9, %v2043_v24, 0.0  ;;  %v1979_v61 = vsel %vm11572_vm12, %v9435_v39, 0.0  ;;  %v2075_v30 = vsel %vm11573_vm11, %v9435_v39, 0.0 }
 0x590   : > { %v1999_v49 = vsel %vm1138_vm9, %v1979_v61, 0.0  ;;  %vm11574_vm7 = vcmp.eq.s32.totalorder %v9105_v63, 0  ;;  %v2139_v0 = vsel %vm11433_vm0, %v9435_v39, 0.0  ;;  %vm2261_vm2 = vcmask 7168  }
 0x591   : > { %vm2270_vm12 = vcmask 15360   ;;  %vm2279_vm11 = vcmask 23552   ;;  %vm2297_vm0 = vcmask 39936   ;;  %vm11441_vm5 = vcmask 56320  }
 0x592   : > { %2253 = vadd.xlane.f32.xlu1 %v2252_v52  ;;  %2003 = vadd.xlane.f32.xlu0 %v2002_v37  ;;  %v2095_v52 = vsel %vm1138_vm9, %v2075_v30, 0.0  ;;  %v2107_v37 = vsel %vm11574_vm7, %v9435_v39, 0.0  ;;  %vm2288_vm7 = vcmask 31744   ;;  %vm11575_vm4 = vcmp.eq.s32.totalorder %v9105_v63, 2 }
 0x593   : > { %v2127_v31 = vsel %vm1138_vm9, %v2107_v37, 0.0  ;;  %vm11440_vm6 = vcmask 64512  }
 0x596   : > { %1994 = vadd.xlane.f32.xlu1 %v1993_v58  ;;  %2163 = vadd.xlane.f32.xlu0 %v2162_v11  ;;  %v2159_v58 = vsel %vm1138_vm9, %v2139_v0, 0.0  ;;  %v2236_v11 = vsel %vm11434_vm15, %v9426_v1, 0.0  ;;  %vm2306_vm15 = vcmask 48128  }
 0x597   : > { %v2258_v41 = vsel %vm1138_vm9, %v2236_v11, 0.0 }
 0x59a   : > { %2035 = vadd.xlane.f32.xlu1 %v2034_v33  ;;  %2195 = vadd.xlane.f32.xlu0 %v2194_v27 }
 0x59e   : > { %2067 = vadd.xlane.f32.xlu1 %v2066_v12  ;;  %2227 = vadd.xlane.f32.xlu0 %v2226_v38 }
 0x5a2   : > { %2099 = vadd.xlane.f32.xlu1 %v2098_v59  ;;  %2032 = vadd.xlane.f32.xlu0 %v2031_v19 }
 0x5a6   : > { %2131 = vadd.xlane.f32.xlu1 %v2130_v16  ;;  %2064 = vadd.xlane.f32.xlu0 %v2063_v21 }
 0x5aa   : > { %2000 = vadd.xlane.f32.xlu1 %v1999_v49  ;;  %2096 = vadd.xlane.f32.xlu0 %v2095_v52 }
 0x5ae   : > { %2128 = vadd.xlane.f32.xlu0 %v2127_v31 }
 0x5b2   : > { %2160 = vadd.xlane.f32.xlu0 %v2159_v58 }
 0x5b6   : > { %2259 = vadd.xlane.f32.xlu0 %v2258_v41 }
 0x5b7   : > { %v1986_v36 = vpop.xlane.xlu1 %1985  ;;  %v2018_v33 = vpop.xlane.xlu0 %2017 }
 0x5bb   : > { %v2146_v27 = vpop.xlane.xlu1 %2145  ;;  %2544 = vrot.lane.b32.xlu1 %v8580_v47, %s8019_s1  ;;  %v2050_v40 = vpop.xlane.xlu0 %2049  ;;  %v2263_v47 = vsel %vm2261_vm2, %v1986_v36, %v2018_v33  ;;  %v2171_v33 = vsel %vm11575_vm4, %v9435_v39, 0.0  ;;  %vm11593_vm4 = vcmp.eq.s32.totalorder %v8931_v25, 4294967294 }
 0x5bc   : > { %v2272_v21 = vsel %vm2270_vm12, %v2263_v47, %v2050_v40 }
 0x5bf   : > { %v2178_v56 = vpop.xlane.xlu1 %2177  ;;  %v2082_v12 = vpop.xlane.xlu0 %2081 }
 0x5c0   : > { %v2281_v61 = vsel %vm2279_vm11, %v2272_v21, %v2082_v12 }
 0x5c3   : > { %v2210_v38 = vpop.xlane.xlu1 %2209  ;;  %v2114_v2 = vpop.xlane.xlu0 %2113 }
 0x5c7   : > { %v2242_v10 = vpop.xlane.xlu1 %2241  ;;  %v2015_v59 = vpop.xlane.xlu0 %2014 }
 0x5cb   : > { %v1983_v19 = vpop.xlane.xlu1 %1982  ;;  %v2175_v13 = vpop.xlane.xlu0 %2174 }
 0x5cc   : > { %2546 = vrot.lane.b32.xlu0 %v8586_v53, %s8019_s1  ;;  %v2290_v53 = vsel %vm2288_vm7, %v2281_v61, %v2114_v2  ;;  %v2262_v31 = vsel %vm2261_vm2, %v1983_v19, %v2015_v59 }
 0x5cd   : > { %v2299_v52 = vsel %vm2297_vm0, %v2290_v53, %v2146_v27 }
 0x5ce   : > { %v2308_v58 = vsel %vm2306_vm15, %v2299_v52, %v2178_v56  ;;  %v2191_v56 = vsel %vm1138_vm9, %v2171_v33, 0.0  ;;  %v11579_v33 = vld [vmem:[#allocation51_spill] sm:$0xff] }
 0x5cf   : > { %v2047_v24 = vpop.xlane.xlu1 %2046  ;;  %v2207_v16 = vpop.xlane.xlu0 %2206 }
 0x5d0   : > { %2552 = vrot.lane.b32.xlu0 %v8631_v50, %s8019_s1  ;;  %v2271_v0 = vsel %vm2270_vm12, %v2262_v31, %v2047_v24  ;;  %v2203_v24 = vsel %vm1761_vm1, %v9435_v39, 0.0 }
 0x5d3   : > { %v2079_v30 = vpop.xlane.xlu1 %2078  ;;  %v2239_v49 = vpop.xlane.xlu0 %2238 }
 0x5d4   : > { %2556 = vrot.lane.b32.xlu0 %v8654_v44, %s8019_s1  ;;  %v2280_v11 = vsel %vm2279_vm11, %v2271_v0, %v2079_v30 }
 0x5d7   : > { %v2111_v37 = vpop.xlane.xlu1 %2110  ;;  %v9522_v50 = vpop.xlane.xlu0 %1991 }
 0x5d8   : > { %2745 = vrot.lane.b32.xlu0 %v8590_v54, %s8019_s1  ;;  %v2289_v44 = vsel %vm2288_vm7, %v2280_v11, %v2111_v37  ;;  %v2317_v54 = vsel %vm11441_vm5, %v2308_v58, %v2210_v38  ;;  %v2223_v38 = vsel %vm1138_vm9, %v2203_v24, 0.0  ;;  %v11578_v11 = vld [vmem:[#allocation50_spill] sm:$0xff] }
 0x5db   : > { %v2143_v41 = vpop.xlane.xlu1 %2142  ;;  %v1989_v36 = vpop.xlane.xlu0 %1988 }
 0x5dc   : > { %v2298_v27 = vsel %vm2297_vm0, %v2289_v44, %v2143_v41  ;;  %2749 = vrot.lane.b32.xlu0 %v8640_v9, %s8019_s1  ;;  %v2326_v9 = vsel %vm11440_vm6, %v2317_v54, %v2242_v10  ;;  %v2235_v10 = vsel %vm1817_vm14, %v9435_v39, 0.0 }
 0x5dd   : > { %v2307_v40 = vsel %vm2306_vm15, %v2298_v27, %v2175_v13 }
 0x5de   : > { %v2316_v12 = vsel %vm11441_vm5, %v2307_v40, %v2207_v16 }
 0x5df   : > { %v2024_v2 = vpop.xlane.xlu1 %2023  ;;  %2192 = vadd.xlane.f32.xlu1 %v2191_v56  ;;  %v2053_v59 = vpop.xlane.xlu0 %2052  ;;  %v2325_v19 = vsel %vm11440_vm6, %v2316_v12, %v2239_v49  ;;  %v11580_v56 = vld [vmem:[#allocation53_spill] sm:$0xff] }
 0x5e0   : > { %2733 = vrot.lane.b32.xlu0 %v8594_v55, %s8019_s1  ;;  %6836 = vmatprep.mubr.msk.f32.mxu1 %vm11439_vm3, %v2325_v19  ;;  %v2255_v55 = vsel %vm1138_vm9, %v2235_v10, 0.0  ;;  %v2265_v12 = vsel %vm2261_vm2, %v9522_v50, %v2024_v2 }
 0x5e1   : > { %6837 = vmatmul.mubr.msk.f32.vlgmr.msra.gmra.mrb[16].mxu1 %vm11439_vm3, %v2326_v9 }
 0x5e2   : > { %6849 = vmatpush3.bf16.msra.mxu1 %v8628_v46 }
 0x5e3   : > { %6850 = vmatprep.subr.bf16.mxu1 %v8625_v42  ;;  %v2056_v13 = vpop.xlane.xlu1 %2055  ;;  %2224 = vadd.xlane.f32.xlu1 %v2223_v38  ;;  %v2085_v16 = vpop.xlane.xlu0 %2084 }
 0x5e4   : > { %2737 = vrot.lane.b32.xlu0 %v8676_v43, %s8019_s1  ;;  %v11576_v43 = vld [vmem:[#allocation46_spill] sm:$0xff]  ;;  %v2274_v24 = vsel %vm2270_vm12, %v2265_v12, %v2056_v13 }
 0x5e6   : > { %6851 = vmatpush3.bf16.msra.mxu1 %v8625_v42 }
 0x5e7   : > { %6852 = vmatprep.subr.bf16.mxu1 %v8651_v32  ;;  %v2088_v47 = vpop.xlane.xlu1 %2087  ;;  %2256 = vadd.xlane.f32.xlu1 %v2255_v55  ;;  %v2117_v21 = vpop.xlane.xlu0 %2116 }
 0x5e8   : > { %v2283_v38 = vsel %vm2279_vm11, %v2274_v24, %v2088_v47 }
 0x5ea   : > { %6853 = vmatpush3.bf16.msra.mxu1 %v8651_v32 }
 0x5eb   : > { %6854 = vmatprep.subr.bf16.mxu1 %v8648_v28  ;;  %v2120_v61 = vpop.xlane.xlu1 %2119  ;;  %v2149_v30 = vpop.xlane.xlu0 %2148 }
 0x5ee   : > { %6855 = vmatpush3.bf16.msra.mxu1 %v8648_v28 }
 0x5ef   : > { %v2152_v49 = vpop.xlane.xlu1 %2151  ;;  %v2181_v53 = vpop.xlane.xlu0 %2180  ;;  %6990 = vmatprep.subr.msk.bf16.mxu1 %vm8541_vm10, %v11576_v43 }
 0x5f3   : > { %v2184_v37 = vpop.xlane.xlu1 %2183  ;;  %v2213_v31 = vpop.xlane.xlu0 %2212 }
 0x5f7   : > { %v2216_v0 = vpop.xlane.xlu1 %2215  ;;  %v2245_v58 = vpop.xlane.xlu0 %2244 }
 0x5f8   : > { %2548 = vrot.lane.b32.xlu1 %v11578_v11, %s8019_s1 }
 0x5fb   : > { %v2248_v44 = vpop.xlane.xlu1 %2247  ;;  %v1998_v41 = vpop.xlane.xlu0 %1997 }
 0x5fc   : > { %2550 = vrot.lane.b32.xlu1 %v11579_v33, %s8019_s1  ;;  %v11581_v33 = vld [vmem:[#allocation54_spill] sm:$0xff] }
 0x5ff   : > { %v2021_v27 = vpop.xlane.xlu1 %2020  ;;  %v2027_v54 = vpop.xlane.xlu0 %2026 }
 0x600   : > { %v2264_v40 = vsel %vm2261_vm2, %v1989_v36, %v2021_v27  ;;  %2554 = vrot.lane.b32.xlu1 %v11580_v56, %s8019_s1  ;;  %v2292_v36 = vsel %vm2288_vm7, %v2283_v38, %v2120_v61  ;;  %v11582_v56 = vld [vmem:[#allocation52_spill] sm:$0xff] }
 0x601   : > { %v2273_v19 = vsel %vm2270_vm12, %v2264_v40, %v2053_v59  ;;  %v2301_v50 = vsel %vm2297_vm0, %v2292_v36, %v2152_v49 }
 0x602   : > { %v2282_v9 = vsel %vm2279_vm11, %v2273_v19, %v2085_v16  ;;  %v2310_v59 = vsel %vm2306_vm15, %v2301_v50, %v2184_v37 }
 0x603   : > { %v2291_v10 = vsel %vm2288_vm7, %v2282_v9, %v2117_v21  ;;  %v2030_v55 = vpop.xlane.xlu1 %2029  ;;  %v2059_v11 = vpop.xlane.xlu0 %2058  ;;  %v2319_v16 = vsel %vm11441_vm5, %v2310_v59, %v2216_v0  ;;  %v11584_v0 = vld [vmem:[#allocation56_spill] sm:$0xff] }
 0x604   : > { %2558 = vrot.lane.b32.xlu1 %v11581_v33, %s8019_s1  ;;  %v2300_v27 = vsel %vm2297_vm0, %v2291_v10, %v2149_v30  ;;  %v2328_v61 = vsel %vm11440_vm6, %v2319_v16, %v2248_v44  ;;  %v11585_v44 = vld [vmem:[#allocation57_spill] sm:$0xff] }
 0x605   : > { %v2309_v2 = vsel %vm2306_vm15, %v2300_v27, %v2181_v53  ;;  %v11583_v53 = vld [vmem:[#allocation55_spill] sm:$0xff] }
 0x606   : > { %v2318_v13 = vsel %vm11441_vm5, %v2309_v2, %v2213_v31  ;;  %v2267_v2 = vsel %vm2261_vm2, %v1998_v41, %v2030_v55 }
 0x607   : > { %v2062_v47 = vpop.xlane.xlu1 %2061  ;;  %v2091_v21 = vpop.xlane.xlu0 %2090  ;;  %v2327_v40 = vsel %vm11440_vm6, %v2318_v13, %v2245_v58 }
 0x608   : > { %2747 = vrot.lane.b32.xlu1 %v11582_v56, %s8019_s1  ;;  %6839 = vmatprep.mubr.msk.f32.mxu1 %vm11439_vm3, %v2327_v40  ;;  %v2276_v13 = vsel %vm2270_vm12, %v2267_v2, %v2062_v47 }
 0x609   : > { %6840 = vmatmul.mubr.msk.f32.gmra.mrb[18].mxu1 %vm11439_vm3, %v2328_v61 }
 0x60b   : > { %v2094_v30 = vpop.xlane.xlu1 %2093  ;;  %v2123_v49 = vpop.xlane.xlu0 %2122 }
 0x60c   : > { %2751 = vrot.lane.b32.xlu1 %v11583_v53, %s8019_s1  ;;  %v2285_v40 = vsel %vm2279_vm11, %v2276_v13, %v2094_v30 }
 0x60f   : > { %v2126_v37 = vpop.xlane.xlu1 %2125  ;;  %v2155_v31 = vpop.xlane.xlu0 %2154 }
 0x610   : > { %2735 = vrot.lane.b32.xlu1 %v11584_v0, %s8019_s1  ;;  %v2294_v53 = vsel %vm2288_vm7, %v2285_v40, %v2126_v37 }
 0x613   : > { %v2158_v58 = vpop.xlane.xlu1 %2157  ;;  %v2187_v12 = vpop.xlane.xlu0 %2186 }
 0x614   : > { %2739 = vrot.lane.b32.xlu1 %v11585_v44, %s8019_s1  ;;  %v2303_v44 = vsel %vm2297_vm0, %v2294_v53, %v2158_v58 }
 0x617   : > { %v2190_v19 = vpop.xlane.xlu1 %2189  ;;  %v2219_v24 = vpop.xlane.xlu0 %2218 }
 0x618   : > { %v2312_v41 = vsel %vm2306_vm15, %v2303_v44, %v2190_v19 }
 0x61b   : > { %v2222_v9 = vpop.xlane.xlu1 %2221  ;;  %v2251_v38 = vpop.xlane.xlu0 %2250 }
 0x61f   : > { %v2254_v10 = vpop.xlane.xlu1 %2253  ;;  %v2004_v36 = vpop.xlane.xlu0 %2003 }
 0x623   : > { %v1995_v33 = vpop.xlane.xlu1 %1994  ;;  %v2164_v27 = vpop.xlane.xlu0 %2163 }
 0x624   : > { %v2266_v50 = vsel %vm2261_vm2, %v1995_v33, %v2027_v54 }
 0x625   : > { %v2275_v59 = vsel %vm2270_vm12, %v2266_v50, %v2059_v11  ;;  %v2321_v11 = vsel %vm11441_vm5, %v2312_v41, %v2222_v9 }
 0x626   : > { %v2284_v16 = vsel %vm2279_vm11, %v2275_v59, %v2091_v21  ;;  %v2330_v30 = vsel %vm11440_vm6, %v2321_v11, %v2254_v10 }
 0x627   : > { %v2293_v61 = vsel %vm2288_vm7, %v2284_v16, %v2123_v49  ;;  %v2196_v56 = vpop.xlane.xlu0 %2195  ;;  %v2036_v50 = vpop.xlane.xlu1 %2035 }
 0x628   : > { %v2302_v0 = vsel %vm2297_vm0, %v2293_v61, %v2155_v31  ;;  %v2269_v44 = vsel %vm2261_vm2, %v2004_v36, %v2036_v50 }
 0x629   : > { %v2311_v54 = vsel %vm2306_vm15, %v2302_v0, %v2187_v12 }
 0x62a   : > { %v2320_v55 = vsel %vm11441_vm5, %v2311_v54, %v2219_v24 }
 0x62b   : > { %v2228_v47 = vpop.xlane.xlu0 %2227  ;;  %v2329_v21 = vsel %vm11440_vm6, %v2320_v55, %v2251_v38  ;;  %v2068_v9 = vpop.xlane.xlu1 %2067 }
 0x62c   : > { %6842 = vmatprep.mubr.msk.f32.mxu1 %vm11439_vm3, %v2329_v21  ;;  %v2278_v54 = vsel %vm2270_vm12, %v2269_v44, %v2068_v9 }
 0x62d   : > { %6843 = vmatmul.mubr.msk.f32.gmra.mrb[20].mxu1 %vm11439_vm3, %v2330_v30 }
 0x62f   : > { %v2033_v49 = vpop.xlane.xlu0 %2032  ;;  %v2100_v10 = vpop.xlane.xlu1 %2099 }
 0x630   : > { %v2287_v41 = vsel %vm2279_vm11, %v2278_v54, %v2100_v10 }
 0x633   : > { %v2065_v37 = vpop.xlane.xlu0 %2064  ;;  %v2132_v40 = vpop.xlane.xlu1 %2131 }
 0x634   : > { %v2296_v11 = vsel %vm2288_vm7, %v2287_v41, %v2132_v40 }
 0x637   : > { %v2097_v31 = vpop.xlane.xlu0 %2096  ;;  %v2001_v61 = vpop.xlane.xlu1 %2000 }
 0x638   : > { %v2268_v53 = vsel %vm2261_vm2, %v2001_v61, %v2033_v49 }
 0x639   : > { %v2277_v55 = vsel %vm2270_vm12, %v2268_v53, %v2065_v37 }
 0x63a   : > { %v2286_v30 = vsel %vm2279_vm11, %v2277_v55, %v2097_v31 }
 0x63b   : > { %v2129_v58 = vpop.xlane.xlu0 %2128  ;;  %v2545_v0 = vpop.permute.xlu1 %2544 }
 0x63f   : > { %v2161_v12 = vpop.xlane.xlu0 %2160 }
 0x643   : > { %v2260_v33 = vpop.xlane.xlu0 %2259 }
 0x647   : > { %v2547_v19 = vpop.permute.xlu0 %2546 }
 0x64b   : > { %v2553_v24 = vpop.permute.xlu0 %2552 }
 0x64f   : > { %v2557_v2 = vpop.permute.xlu0 %2556 }
 0x653   : > { %v2746_v59 = vpop.permute.xlu0 %2745 }
 0x654   : > { %7020 = vmatprep.subr.msk.bf16.mxu0 %vm1138_vm9, %v2746_v59  ;;  %v2766_v38 = vsel %vm1138_vm9, %v2746_v59, 0  ;;  %v2305_v59 = vsel %vm2297_vm0, %v2296_v11, %v2164_v27  ;;  %v1965_v27 = vpack.c.bf16 %v9205_v7, %v9232_v23  ;;  %v11586_v7 = vld [vmem:[#allocation49_spill] sm:$0xff]  ;;  %v11589_v23 = vmov 6  }
 0x655   : > { %6881 = vmatpush3.bf16.xpose.msra.mxu0 %v2766_v38  ;;  %v2314_v36 = vsel %vm2306_vm15, %v2305_v59, %v2196_v56 }
 0x656   : > { %v2323_v37 = vsel %vm11441_vm5, %v2314_v36, %v2228_v47 }
 0x657   : > { %v2750_v13 = vpop.permute.xlu0 %2749  ;;  %v2332_v31 = vsel %vm11440_vm6, %v2323_v37, %v2260_v33 }
 0x658   : > { %v2772_v34 = vsel %vm1138_vm9, %v2750_v13, 0 }
 0x65b   : > { %v2734_v16 = vpop.permute.xlu0 %2733 }
 0x65c   : > { %6888 = vmatprep.mubr.msk.bf16.mxu0 %vm1138_vm9, %v2734_v16  ;;  %v2295_v16 = vsel %vm2288_vm7, %v2286_v30, %v2129_v58 }
 0x65d   : > { %v2304_v49 = vsel %vm2297_vm0, %v2295_v16, %v2161_v12 }
 0x65f   : > { %v2738_v39 = vpop.permute.xlu0 %2737 }
 0x66c   : > { %v2193_v21 = vpop.xlane.xlu1 %2192 }
 0x66d   : > { %v2313_v50 = vsel %vm2306_vm15, %v2304_v49, %v2193_v21 }
 0x670   : > { %v2225_v38 = vpop.xlane.xlu1 %2224 }
 0x671   : > { %v2322_v9 = vsel %vm11441_vm5, %v2313_v50, %v2225_v38  ;;  %vm11630_vm5 = vcmp.eq.s32.totalorder %v8895_v17, 4 }
 0x674   : > { %v2257_v10 = vpop.xlane.xlu1 %2256 }
 0x675   : > { %v2331_v40 = vsel %vm11440_vm6, %v2322_v9, %v2257_v10  ;;  %vm11616_vm6 = vcmp.eq.s32.totalorder %v8895_v17, 4294967294 }
 0x676   : > { %6845 = vmatprep.mubr.msk.f32.mxu1 %vm11439_vm3, %v2331_v40 }
 0x677   : > { %6846 = vmatmul.mubr.msk.f32.gmra.mrb[22].mxu1 %vm11439_vm3, %v2332_v31  ;;  %vm11597_vm3 = vcmp.eq.s32.totalorder %v8931_v25, 2 }
 0x678   : > { %v2549_v58 = vpop.permute.xlu1 %2548  ;;  %6856 = vmatprep.mubr.msk.bf16.mxu1 %vm1138_vm9, %v1965_v27 }
 0x67b   : > { %6857 = vmatmul.mubr.msk.bf16.vlgmr.msra.gmra.mrb[24].mxu1 %vm1138_vm9, %v1966_v5 }
 0x67c   : > { %v2551_v56 = vpop.permute.xlu1 %2550  ;;  %6860 = vmatprep.mubr.msk.bf16.mxu1 %vm1138_vm9, %v1967_v62  ;;  %6993 = vmatpush3.bf16.xpose.msk.msra.mxu1 %vm8541_vm10, %v11576_v43  ;;  %vm11591_vm10 = vcmp.eq.s32.totalorder %v8931_v25, 4294967292 }
 0x67d   : > { %6996 = vmatprep.subr.msk.bf16.mxu1 %vm8558_vm13, %v11586_v7 }
 0x680   : > { %v2555_v47 = vpop.permute.xlu1 %2554 }
 0x683   : > { %6861 = vmatmul.mubr.msk.bf16.gmra.mrb[28].mxu1 %vm1138_vm9, %v1968_v45 }
 0x684   : > { %v2559_v6 = vpop.permute.xlu1 %2558  ;;  %6868 = vmatprep.mubr.msk.f32.mxu1 %vm1138_vm9, %v2545_v0 }
 0x688   : > { %v2748_v26 = vpop.permute.xlu1 %2747 }
 0x689   : > { %7021 = vmatprep.subr.msk.bf16.mxu0 %vm1138_vm9, %v2748_v26  ;;  %v2769_v5 = vsel %vm1138_vm9, %v2748_v26, 0 }
 0x68a   : > { %6883 = vmatpush3.bf16.xpose.msra.mxu0 %v2769_v5  ;;  %v11590_v5 = vmov 1  }
 0x68b   : > { %6869 = vmatmul.mubr.msk.f32.vlgmr.msra.gmra.mrb[32].mxu1 %vm1138_vm9, %v2547_v19  ;;  %7022 = vmatprep.subr.msk.bf16.mxu0 %vm1138_vm9, %v2750_v13 }
 0x68c   : > { %6871 = vmatprep.mubr.msk.f32.mxu1 %vm1138_vm9, %v2549_v58  ;;  %6999 = vmatpush3.bf16.msk.msra.mxu1 %vm8558_vm13, %v11586_v7  ;;  %v2752_v60 = vpop.permute.xlu1 %2751  ;;  %v11588_v58 = vmov 3   ;;  %vm11592_vm13 = vcmp.eq.s32.totalorder %v8931_v25, 4294967293 }
 0x68d   : > { %v2775_v62 = vsel %vm1138_vm9, %v2752_v60, 0 }
 0x68f   : > { %6872 = vmatmul.mubr.msk.f32.gmra.mrb[34].mxu1 %vm1138_vm9, %v2551_v56 }
 0x690   : > { %6874 = vmatprep.mubr.msk.f32.mxu1 %vm1138_vm9, %v2553_v24  ;;  %v2736_v1 = vpop.permute.xlu1 %2735 }
 0x692   : > { %6885 = vmatpush3.bf16.xpose.msra.mxu0 %v2772_v34 }
 0x693   : > { %6875 = vmatmul.mubr.msk.f32.gmra.mrb[36].mxu1 %vm1138_vm9, %v2555_v47  ;;  %7023 = vmatprep.subr.msk.bf16.mxu0 %vm1138_vm9, %v2752_v60 }
 0x694   : > { %6877 = vmatprep.mubr.msk.f32.mxu1 %vm1138_vm9, %v2557_v2  ;;  %v2740_v45 = vpop.permute.xlu1 %2739 }
 0x697   : > { %6878 = vmatmul.mubr.msk.f32.gmra.mrb[38].mxu1 %vm1138_vm9, %v2559_v6 }
 0x69a   : > { %6887 = vmatpush3.bf16.xpose.msra.mxu0 %v2775_v62 }
 0x6a1   : > { %6889 = vmatmul.mubr.msk.bf16.vlgmr.msra.gmra.mrb[24].mxu0 %vm1138_vm9, %v2736_v1 }
 0x6a2   : > { %6892 = vmatprep.mubr.msk.bf16.mxu0 %vm1138_vm9, %v2738_v39 }
 0x6a9   : > { %6893 = vmatmul.mubr.msk.bf16.gmra.mrb[28].mxu0 %vm1138_vm9, %v2740_v45 }
 0x6b4   : > { %v6838_v43 = vpop.f32.mrb[16].mxu1 }
 0x6b5   : > { %v2428_v52 = vpop.f32.mrb[17].mxu1 }
 0x6dc   : > { %v6841_v12 = vpop.f32.mrb[18].mxu1 }
 0x6dd   : > { %v2438_v33 = vpop.f32.mrb[19].mxu1 }
 0x700   : > { %v6844_v19 = vpop.f32.mrb[20].mxu1 }
 0x701   : > { %v2448_v24 = vpop.f32.mrb[21].mxu1 }
 0x74a   : > { %v6847_v2 = vpop.f32.mrb[22].mxu1 }
 0x74b   : > { %v2458_v13 = vpop.f32.mrb[23].mxu1 }
 0x74e   : > { %v6858_v61 = vpop.f32.mrb[24].mxu1 }
 0x74f   : > { %v9682_v53 = vadd.f32 %v6858_v61, %v2438_v33  ;;  %v2513_v0 = vpop.f32.mrb[25].mxu1 }
 0x750   : > { %v9684_v44 = vadd.f32 %v2513_v0, %v2428_v52  ;;  %v6859_v54 = vpop.f32.mrb[26].mxu1 }
 0x751   : > { %v9686_v41 = vadd.f32 %v6859_v54, %v6841_v12  ;;  %v2516_v55 = vpop.f32.mrb[27].mxu1 }
 0x752   : > { %v9688_v11 = vadd.f32 %v6838_v43, %v2516_v55 }
 0x756   : > { %v6862_v21 = vpop.f32.mrb[28].mxu1 }
 0x757   : > { %v9690_v30 = vadd.f32 %v6862_v21, %v2458_v13  ;;  %v2529_v59 = vpop.f32.mrb[29].mxu1 }
 0x758   : > { %v9692_v38 = vadd.f32 %v2529_v59, %v2448_v24  ;;  %v6863_v16 = vpop.f32.mrb[30].mxu1 }
 0x759   : > { %v9694_v49 = vadd.f32 %v6863_v16, %v6847_v2  ;;  %v2532_v36 = vpop.f32.mrb[31].mxu1 }
 0x75a   : > { %v9696_v50 = vadd.f32 %v6844_v19, %v2532_v36 }
 0x75e   : > { %v6870_v9 = vpop.f32.mrb[32].mxu1 }
 0x75f   : > { %2847 = vperm.xlu0 %7274, %v6870_v9   ;;  %2688 = vperm.xlu1 %7273, %v6870_v9   ;;  %v2642_v10 = vpop.f32.mrb[33].mxu1 }
 0x762   : > { %v9698_v37 = vpop.f32.mrb[34].mxu1 }
 0x763   : > { %7277 = vset.pattern.permute.xlu0 %v11510_v35  ;;  %7275 = vset.pattern.permute.xlu1 %v11512_v18  ;;  %v9702_v40 = vpop.f32.mrb[35].mxu1 }
 0x764   : > { %2991 = vperm.xlu0 %7277, %v6870_v9   ;;  %2895 = vperm.xlu1 %7275, %v6870_v9  }
 0x766   : > { %v9704_v31 = vpop.f32.mrb[36].mxu1 }
 0x767   : > { %v9706_v27 = vpop.f32.mrb[37].mxu1 }
 0x768   : > { %7278 = vset.pattern.permute.xlu0 %v11513_v15  ;;  %7276 = vset.pattern.permute.xlu1 %v11588_v58 }
 0x769   : > { %3039 = vperm.xlu0 %7278, %v6870_v9   ;;  %2943 = vperm.xlu1 %7276, %v6870_v9  }
 0x76a   : > { %v9710_v56 = vpop.f32.mrb[38].mxu1 }
 0x76b   : > { %v9712_v7 = vpop.f32.mrb[39].mxu1 }
 0x76d   : > { %7279 = vset.pattern.permute.xlu0 %v11589_v23  ;;  %7280 = vset.pattern.permute.xlu1 %v11515_v48 }
 0x76e   : > { %3087 = vperm.xlu0 %7279, %v6870_v9   ;;  %3135 = vperm.xlu1 %7280, %v6870_v9  }
 0x772   : > { %7282 = vset.pattern.permute.xlu0 %v11508_v22  ;;  %7281 = vset.pattern.permute.xlu1 %v11514_v29 }
 0x773   : > { %3183 = vperm.xlu1 %7281, %v6870_v9   ;;  %2683 = vperm.xlu0 %7282, %v2642_v10  }
 0x774   : > { %v9718_v47 = vpop.f32.mrb[24].mxu0 }
 0x775   : > { %v9720_v6 = vpop.f32.mrb[25].mxu0 }
 0x776   : > { %v9722_v26 = vpop.f32.mrb[26].mxu0 }
 0x777   : > { %7283 = vset.pattern.permute.xlu1 %v11590_v5  ;;  %7285 = vset.pattern.permute.xlu0 %v11588_v58  ;;  %v9726_v34 = vpop.f32.mrb[27].mxu0 }
 0x778   : > { %2843 = vperm.xlu1 %7283, %v2642_v10   ;;  %2939 = vperm.xlu0 %7285, %v2642_v10  }
 0x77c   : > { %7284 = vset.pattern.permute.xlu1 %v11512_v18  ;;  %7287 = vset.pattern.permute.xlu0 %v11513_v15  ;;  %v9730_v60 = vpop.f32.mrb[28].mxu0 }
 0x77d   : > { %2891 = vperm.xlu1 %7284, %v2642_v10   ;;  %3035 = vperm.xlu0 %7287, %v2642_v10   ;;  %v9732_v62 = vpop.f32.mrb[29].mxu0 }
 0x77e   : > { %v9734_v1 = vpop.f32.mrb[30].mxu0 }
 0x77f   : > { %v9736_v39 = vpop.f32.mrb[31].mxu0 }
 0x781   : > { %7286 = vset.pattern.permute.xlu1 %v11510_v35  ;;  %7290 = vset.pattern.permute.xlu0 %v11514_v29 }
 0x782   : > { %2987 = vperm.xlu1 %7286, %v2642_v10   ;;  %3179 = vperm.xlu0 %7290, %v2642_v10  }
 0x786   : > { %7288 = vset.pattern.permute.xlu1 %v11589_v23  ;;  %7291 = vset.pattern.permute.xlu0 %v11508_v22 }
 0x787   : > { %3083 = vperm.xlu1 %7288, %v2642_v10   ;;  %2698 = vperm.xlu0 %7291, %v9698_v37  }
 0x78b   : > { %7289 = vset.pattern.permute.xlu1 %v11515_v48  ;;  %7297 = vset.pattern.permute.xlu0 %v11589_v23 }
 0x78c   : > { %3131 = vperm.xlu1 %7289, %v2642_v10   ;;  %3095 = vperm.xlu0 %7297, %v9698_v37  }
 0x790   : > { %7292 = vset.pattern.permute.xlu1 %v11590_v5  ;;  %7299 = vset.pattern.permute.xlu0 %v11514_v29 }
 0x791   : > { %2855 = vperm.xlu1 %7292, %v9698_v37   ;;  %3191 = vperm.xlu0 %7299, %v9698_v37  }
 0x795   : > { %7293 = vset.pattern.permute.xlu1 %v11512_v18  ;;  %7305 = vset.pattern.permute.xlu0 %v11513_v15 }
 0x796   : > { %2903 = vperm.xlu1 %7293, %v9698_v37   ;;  %3043 = vperm.xlu0 %7305, %v9702_v40  }
 0x79a   : > { %7294 = vset.pattern.permute.xlu1 %v11588_v58  ;;  %7309 = vset.pattern.permute.xlu0 %v11508_v22 }
 0x79b   : > { %2951 = vperm.xlu1 %7294, %v9698_v37   ;;  %2708 = vperm.xlu0 %7309, %v9704_v31  }
 0x79f   : > { %7295 = vset.pattern.permute.xlu1 %v11510_v35  ;;  %7312 = vset.pattern.permute.xlu0 %v11588_v58 }
 0x7a0   : > { %2999 = vperm.xlu1 %7295, %v9698_v37   ;;  %2959 = vperm.xlu0 %7312, %v9704_v31  }
 0x7a4   : > { %7296 = vset.pattern.permute.xlu1 %v11513_v15  ;;  %7314 = vset.pattern.permute.xlu0 %v11513_v15 }
 0x7a5   : > { %3047 = vperm.xlu1 %7296, %v9698_v37   ;;  %3055 = vperm.xlu0 %7314, %v9704_v31  }
 0x7a9   : > { %7298 = vset.pattern.permute.xlu1 %v11515_v48  ;;  %7318 = vset.pattern.permute.xlu0 %v11508_v22 }
 0x7aa   : > { %3143 = vperm.xlu1 %7298, %v9698_v37   ;;  %2703 = vperm.xlu0 %7318, %v9706_v27  }
 0x7ae   : > { %7300 = vset.pattern.permute.xlu1 %v11508_v22  ;;  %7320 = vset.pattern.permute.xlu0 %v11512_v18 }
 0x7af   : > { %2693 = vperm.xlu1 %7300, %v9702_v40   ;;  %2907 = vperm.xlu0 %7320, %v9706_v27  }
 0x7b3   : > { %7301 = vset.pattern.permute.xlu1 %v11590_v5  ;;  %7323 = vset.pattern.permute.xlu0 %v11513_v15 }
 0x7b4   : > { %2851 = vperm.xlu1 %7301, %v9702_v40   ;;  %3051 = vperm.xlu0 %7323, %v9706_v27  }
 0x7b8   : > { %7302 = vset.pattern.permute.xlu1 %v11512_v18  ;;  %7326 = vset.pattern.permute.xlu0 %v11514_v29 }
 0x7b9   : > { %2899 = vperm.xlu1 %7302, %v9702_v40   ;;  %3195 = vperm.xlu0 %7326, %v9706_v27  }
 0x7bd   : > { %7303 = vset.pattern.permute.xlu1 %v11588_v58  ;;  %7327 = vset.pattern.permute.xlu0 %v11508_v22 }
 0x7be   : > { %2947 = vperm.xlu1 %7303, %v9702_v40   ;;  %2718 = vperm.xlu0 %7327, %v9710_v56  }
 0x7c2   : > { %7304 = vset.pattern.permute.xlu1 %v11510_v35  ;;  %7331 = vset.pattern.permute.xlu0 %v11510_v35 }
 0x7c3   : > { %2995 = vperm.xlu1 %7304, %v9702_v40   ;;  %3015 = vperm.xlu0 %7331, %v9710_v56  }
 0x7c7   : > { %7306 = vset.pattern.permute.xlu1 %v11589_v23  ;;  %7332 = vset.pattern.permute.xlu0 %v11513_v15 }
 0x7c8   : > { %3091 = vperm.xlu1 %7306, %v9702_v40   ;;  %3063 = vperm.xlu0 %7332, %v9710_v56  }
 0x7cc   : > { %7307 = vset.pattern.permute.xlu1 %v11515_v48  ;;  %7337 = vset.pattern.permute.xlu0 %v11512_v18 }
 0x7cd   : > { %3139 = vperm.xlu1 %7307, %v9702_v40   ;;  %2915 = vperm.xlu0 %7337, %v9712_v7  }
 0x7d1   : > { %7308 = vset.pattern.permute.xlu1 %v11514_v29  ;;  %7339 = vset.pattern.permute.xlu0 %v11510_v35 }
 0x7d2   : > { %3187 = vperm.xlu1 %7308, %v9702_v40   ;;  %3011 = vperm.xlu0 %7339, %v9712_v7  }
 0x7d6   : > { %7310 = vset.pattern.permute.xlu1 %v11590_v5  ;;  %7342 = vset.pattern.permute.xlu0 %v11515_v48 }
 0x7d7   : > { %2863 = vperm.xlu1 %7310, %v9704_v31   ;;  %3155 = vperm.xlu0 %7342, %v9712_v7  }
 0x7db   : > { %7311 = vset.pattern.permute.xlu1 %v11512_v18  ;;  %7343 = vset.pattern.permute.xlu0 %v11514_v29 }
 0x7dc   : > { %2911 = vperm.xlu1 %7311, %v9704_v31   ;;  %3207 = vperm.xlu0 %7343, %v9710_v56  }
 0x7de   : > { %v2689_v45 = vpop.permute.xlu1 %2688  ;;  %v2848_v43 = vpop.permute.xlu0 %2847 }
 0x7df   : > { %v2722_v52 = vsel %vm11591_vm10, %v2689_v45, 0.0  ;;  %v2875_v33 = vsel %vm11592_vm13, %v2848_v43, 0.0  ;;  %vm11594_vm10 = vcmp.eq.s32.totalorder %v8931_v25, 4294967295  ;;  %vm11595_vm13 = vcmp.eq.s32.totalorder %v8931_v25, 0 }
 0x7e0   : > { %v2815_v12 = vadd.f32 %v9726_v34, %v2722_v52  ;;  %7313 = vset.pattern.permute.xlu1 %v11510_v35 }
 0x7e1   : > { %3007 = vperm.xlu1 %7313, %v9704_v31  }
 0x7e2   : > { %v2883_v2 = vadd.f32 %v2875_v33, %v2815_v12 }
 0x7e3   : > { %v2896_v19 = vpop.permute.xlu1 %2895  ;;  %v2992_v24 = vpop.permute.xlu0 %2991 }
 0x7e4   : > { %v2923_v13 = vsel %vm11593_vm4, %v2896_v19, 0.0  ;;  %v3019_v59 = vsel %vm11595_vm13, %v2992_v24, 0.0  ;;  %vm11596_vm4 = vcmp.eq.s32.totalorder %v8931_v25, 1  ;;  %vm11599_vm13 = vcmp.eq.s32.totalorder %v8931_v25, 4 }
 0x7e5   : > { %7315 = vset.pattern.permute.xlu1 %v11589_v23  ;;  %v2931_v61 = vadd.f32 %v2923_v13, %v2883_v2 }
 0x7e6   : > { %3103 = vperm.xlu1 %7315, %v9704_v31  }
 0x7e8   : > { %v2944_v0 = vpop.permute.xlu1 %2943  ;;  %v3040_v54 = vpop.permute.xlu0 %3039 }
 0x7e9   : > { %v2971_v55 = vsel %vm11594_vm10, %v2944_v0, 0.0  ;;  %v3067_v36 = vsel %vm11596_vm4, %v3040_v54, 0.0  ;;  %vm11598_vm10 = vcmp.eq.s32.totalorder %v8931_v25, 3  ;;  %vm11601_vm4 = vcmp.eq.s32.totalorder %v8888_v51, 4294967293 }
 0x7ea   : > { %v2979_v21 = vadd.f32 %v2971_v55, %v2931_v61  ;;  %7316 = vset.pattern.permute.xlu1 %v11515_v48 }
 0x7eb   : > { %3151 = vperm.xlu1 %7316, %v9704_v31  }
 0x7ec   : > { %v3027_v16 = vadd.f32 %v3019_v59, %v2979_v21 }
 0x7ed   : > { %v3136_v9 = vpop.permute.xlu1 %3135  ;;  %v3088_v10 = vpop.permute.xlu0 %3087 }
 0x7ee   : > { %v3075_v37 = vadd.f32 %v3067_v36, %v3027_v16  ;;  %v3115_v40 = vsel %vm11597_vm3, %v3088_v10, 0.0  ;;  %v3163_v45 = vsel %vm11598_vm10, %v3136_v9, 0.0  ;;  %vm11600_vm3 = vcmp.eq.s32.totalorder %v8888_v51, 4294967292 }
 0x7ef   : > { %7317 = vset.pattern.permute.xlu1 %v11514_v29  ;;  %vm11602_vm10 = vcmp.eq.s32.totalorder %v8888_v51, 4294967294 }
 0x7f0   : > { %v3123_v34 = vadd.f32 %v3115_v40, %v3075_v37  ;;  %3199 = vperm.xlu1 %7317, %v9704_v31  }
 0x7f2   : > { %v3184_v43 = vpop.permute.xlu1 %3183  ;;  %v3171_v52 = vadd.f32 %v3163_v45, %v3123_v34  ;;  %v9851_v13 = vpop.permute.xlu0 %2683 }
 0x7f3   : > { %v3211_v12 = vsel %vm11599_vm13, %v3184_v43, 0.0  ;;  %vm11603_vm13 = vcmp.eq.s32.totalorder %v8888_v51, 4294967295 }
 0x7f4   : > { %v3219_v33 = vadd.f32 %v3211_v12, %v3171_v52  ;;  %7319 = vset.pattern.permute.xlu1 %v11590_v5 }
 0x7f5   : > { %2859 = vperm.xlu1 %7319, %v9706_v27  }
 0x7f6   : > { %v9843_v24 = vsel %vm8477_vm8, -10000.0, %v3219_v33 }
 0x7f7   : > { %v9839_v19 = vpop.permute.xlu1 %2843  ;;  %v3237_v31 = vsel %vm1138_vm9, %v9843_v24, -inf  ;;  %v9858_v0 = vpop.permute.xlu0 %2939 }
 0x7f9   : > { %7321 = vset.pattern.permute.xlu1 %v11588_v58 }
 0x7fa   : > { %2955 = vperm.xlu1 %7321, %v9706_v27  }
 0x7fb   : > { %3238 = vmax.xlane.f32.xlu0 %v3237_v31 }
 0x7fc   : > { %v9849_v2 = vpop.permute.xlu1 %2891  ;;  %v9865_v55 = vpop.permute.xlu0 %3035 }
 0x7fe   : > { %7322 = vset.pattern.permute.xlu1 %v11510_v35 }
 0x7ff   : > { %3003 = vperm.xlu1 %7322, %v9706_v27  }
 0x801   : > { %v9855_v61 = vpop.permute.xlu1 %2987  ;;  %v9871_v35 = vpop.permute.xlu0 %3179 }
 0x803   : > { %7324 = vset.pattern.permute.xlu1 %v11589_v23 }
 0x804   : > { %3099 = vperm.xlu1 %7324, %v9706_v27  }
 0x806   : > { %v9861_v54 = vpop.permute.xlu1 %3083  ;;  %v2699_v36 = vpop.permute.xlu0 %2698 }
 0x808   : > { %7325 = vset.pattern.permute.xlu1 %v11515_v48 }
 0x809   : > { %3147 = vperm.xlu1 %7325, %v9706_v27   ;;  %v2724_v27 = vsel %vm11600_vm3, %v2699_v36, 0.0  ;;  %vm11604_vm3 = vcmp.eq.s32.totalorder %v8888_v51, 0 }
 0x80a   : > { %v2823_v37 = vadd.f32 %v9722_v26, %v2724_v27 }
 0x80b   : > { %v9867_v21 = vpop.permute.xlu1 %3131  ;;  %v3096_v26 = vpop.permute.xlu0 %3095 }
 0x80d   : > { %7328 = vset.pattern.permute.xlu1 %v11590_v5 }
 0x80e   : > { %2871 = vperm.xlu1 %7328, %v9710_v56  }
 0x810   : > { %v2856_v59 = vpop.permute.xlu1 %2855 }
 0x811   : > { %v2877_v10 = vsel %vm11601_vm4, %v2856_v59, 0.0  ;;  %vm11605_vm4 = vcmp.eq.s32.totalorder %v8888_v51, 1 }
 0x812   : > { %7329 = vset.pattern.permute.xlu1 %v11512_v18  ;;  %v2885_v40 = vadd.f32 %v2877_v10, %v2823_v37 }
 0x813   : > { %2919 = vperm.xlu1 %7329, %v9710_v56  }
 0x815   : > { %v2904_v16 = vpop.permute.xlu1 %2903 }
 0x816   : > { %v2925_v18 = vsel %vm11602_vm10, %v2904_v16, 0.0  ;;  %vm11606_vm10 = vcmp.eq.s32.totalorder %v8888_v51, 2 }
 0x817   : > { %7330 = vset.pattern.permute.xlu1 %v11588_v58  ;;  %v2933_v43 = vadd.f32 %v2925_v18, %v2885_v40  ;;  %v3117_v36 = vsel %vm11606_vm10, %v3096_v26, 0.0  ;;  %vm11610_vm10 = vcmp.eq.s32.totalorder %v8831_v14, 4294967293 }
 0x818   : > { %2967 = vperm.xlu1 %7330, %v9710_v56  }
 0x81a   : > { %v2952_v9 = vpop.permute.xlu1 %2951 }
 0x81b   : > { %v2973_v34 = vsel %vm11603_vm13, %v2952_v9, 0.0  ;;  %v3192_v9 = vpop.permute.xlu0 %3191  ;;  %vm11607_vm13 = vcmp.eq.s32.totalorder %v8888_v51, 3 }
 0x81c   : > { %7333 = vset.pattern.permute.xlu1 %v11589_v23  ;;  %v2981_v12 = vadd.f32 %v2973_v34, %v2933_v43 }
 0x81d   : > { %3111 = vperm.xlu1 %7333, %v9710_v56  }
 0x81f   : > { %v3000_v45 = vpop.permute.xlu1 %2999 }
 0x820   : > { %v3021_v52 = vsel %vm11604_vm3, %v3000_v45, 0.0  ;;  %vm11608_vm3 = vcmp.eq.s32.totalorder %v8888_v51, 4 }
 0x821   : > { %7334 = vset.pattern.permute.xlu1 %v11515_v48  ;;  %v3029_v33 = vadd.f32 %v3021_v52, %v2981_v12  ;;  %v3213_v37 = vsel %vm11608_vm3, %v3192_v9, 0.0  ;;  %v3044_v52 = vpop.permute.xlu0 %3043  ;;  %vm11612_vm3 = vcmp.eq.s32.totalorder %v8831_v14, 4294967295 }
 0x822   : > { %3159 = vperm.xlu1 %7334, %v9710_v56  }
 0x824   : > { %v3048_v31 = vpop.permute.xlu1 %3047 }
 0x825   : > { %v3069_v59 = vsel %vm11605_vm4, %v3048_v31, 0.0  ;;  %vm11609_vm4 = vcmp.eq.s32.totalorder %v8831_v14, 4294967292  ;;  %v2709_v26 = vpop.permute.xlu0 %2708 }
 0x826   : > { %v3077_v16 = vadd.f32 %v3069_v59, %v3029_v33  ;;  %7335 = vset.pattern.permute.xlu1 %v11508_v22 }
 0x827   : > { %2713 = vperm.xlu1 %7335, %v9712_v7  }
 0x828   : > { %v3125_v27 = vadd.f32 %v3117_v36, %v3077_v16 }
 0x829   : > { %v3144_v48 = vpop.permute.xlu1 %3143  ;;  %v2960_v59 = vpop.permute.xlu0 %2959 }
 0x82a   : > { %v3165_v56 = vsel %vm11607_vm13, %v3144_v48, 0.0  ;;  %vm11611_vm13 = vcmp.eq.s32.totalorder %v8831_v14, 4294967294 }
 0x82b   : > { %v3173_v10 = vadd.f32 %v3165_v56, %v3125_v27  ;;  %7336 = vset.pattern.permute.xlu1 %v11590_v5 }
 0x82c   : > { %2867 = vperm.xlu1 %7336, %v9712_v7  }
 0x82d   : > { %v3221_v18 = vadd.f32 %v3213_v37, %v3173_v10 }
 0x82e   : > { %v2694_v40 = vpop.permute.xlu1 %2693 }
 0x82f   : > { %v9906_v34 = vsel %vm8477_vm8, -10000.0, %v3221_v18 }
 0x830   : > { %7338 = vset.pattern.permute.xlu1 %v11588_v58  ;;  %v3243_v45 = vsel %vm1138_vm9, %v9906_v34, -inf  ;;  %v2721_v58 = vsel %vm11609_vm4, %v9851_v13, 0.0  ;;  %v2970_v13 = vsel %vm11612_vm3, %v9858_v0, 0.0  ;;  %vm11613_vm4 = vcmp.eq.s32.totalorder %v8895_v17, 4294967292 }
 0x831   : > { %2963 = vperm.xlu1 %7338, %v9712_v7   ;;  %3244 = vmax.xlane.f32.xlu0 %v3243_v45  ;;  %v2812_v33 = vadd.f32 %v9720_v6, %v2721_v58  ;;  %vm11617_vm3 = vcmp.eq.s32.totalorder %v8895_v17, 4294967295 }
 0x833   : > { %v2852_v5 = vpop.permute.xlu1 %2851 }
 0x835   : > { %7340 = vset.pattern.permute.xlu1 %v11513_v15 }
 0x836   : > { %3059 = vperm.xlu1 %7340, %v9712_v7  }
 0x838   : > { %v2900_v43 = vpop.permute.xlu1 %2899 }
 0x839   : > { %v2924_v48 = vsel %vm11616_vm6, %v2900_v43, 0.0  ;;  %vm11620_vm6 = vcmp.eq.s32.totalorder %v8831_v14, 2 }
 0x83a   : > { %7341 = vset.pattern.permute.xlu1 %v11589_v23  ;;  %v2874_v23 = vsel %vm11610_vm10, %v9839_v19, 0.0  ;;  %vm11614_vm10 = vcmp.eq.s32.totalorder %v8831_v14, 0  ;;  %v3056_v19 = vpop.permute.xlu0 %3055  ;;  %v3114_v43 = vsel %vm11620_vm6, %v9861_v54, 0.0  ;;  %vm11625_vm6 = vcmp.eq.s32.totalorder %v8895_v17, 2 }
 0x83b   : > { %3107 = vperm.xlu1 %7341, %v9712_v7   ;;  %v2882_v31 = vadd.f32 %v2874_v23, %v2812_v33  ;;  %v3018_v6 = vsel %vm11614_vm10, %v9855_v61, 0.0  ;;  %vm11619_vm10 = vcmp.eq.s32.totalorder %v8895_v17, 0 }
 0x83d   : > { %v2948_v12 = vpop.permute.xlu1 %2947 }
 0x83e   : > { %v2972_v37 = vsel %vm11617_vm3, %v2948_v12, 0.0  ;;  %vm11622_vm3 = vcmp.eq.s32.totalorder %v8831_v14, 3 }
 0x83f   : > { %3811 = vrot.lane.b32.xlu1 %v8628_v46, %s8019_s1  ;;  %v2922_v46 = vsel %vm11611_vm13, %v9849_v2, 0.0  ;;  %vm11615_vm13 = vcmp.eq.s32.totalorder %v8895_v17, 4294967293  ;;  %v3162_v33 = vsel %vm11622_vm3, %v9867_v21, 0.0  ;;  %vm11627_vm3 = vcmp.eq.s32.totalorder %v8831_v14, 4 }
 0x840   : > { %7344 = vset.pattern.permute.xlu1 %v11514_v29  ;;  %v2930_v16 = vadd.f32 %v2922_v46, %v2882_v31  ;;  %v2876_v2 = vsel %vm11615_vm13, %v2852_v5, 0.0  ;;  %vm11621_vm13 = vcmp.eq.s32.totalorder %v9002_v3, 4294967292 }
 0x841   : > { %v2726_v58 = vsel %vm11621_vm13, %v2709_v26, 0.0  ;;  %vm11626_vm13 = vcmp.eq.s32.totalorder %v9002_v3, 4294967294 }
 0x842   : > { %v2996_v15 = vpop.permute.xlu1 %2995  ;;  %v2978_v27 = vadd.f32 %v2970_v13, %v2930_v16 }
 0x843   : > { %3203 = vperm.xlu1 %7344, %v9712_v7   ;;  %v2723_v7 = vsel %vm11613_vm4, %v2694_v40, 0.0  ;;  %vm11618_vm4 = vcmp.eq.s32.totalorder %v8831_v14, 1  ;;  %v2704_v40 = vpop.permute.xlu0 %2703  ;;  %v3020_v45 = vsel %vm11619_vm10, %v2996_v15, 0.0  ;;  %v2831_v15 = vadd.f32 %v9736_v39, %v2726_v58 }
 0x844   : > { %v2820_v9 = vadd.f32 %v9718_v47, %v2723_v7  ;;  %v3026_v56 = vadd.f32 %v3018_v6, %v2978_v27  ;;  %v3066_v61 = vsel %vm11618_vm4, %v9865_v55, 0.0  ;;  %vm11623_vm4 = vcmp.eq.s32.totalorder %v9002_v3, 4294967293 }
 0x845   : > { %vm11624_vm10 = vcmp.eq.s32.totalorder %v8895_v17, 1 }
 0x846   : > { %v2884_v0 = vadd.f32 %v2876_v2, %v2820_v9  ;;  %v3074_v5 = vadd.f32 %v3066_v61, %v3026_v56  ;;  %v3068_v31 = vsel %vm11624_vm10, %v3044_v52, 0.0  ;;  %v3210_v2 = vsel %vm11627_vm3, %v9871_v35, 0.0 }
 0x847   : > { %v3092_v29 = vpop.permute.xlu1 %3091  ;;  %v2908_v16 = vpop.permute.xlu0 %2907  ;;  %vm11629_vm10 = vcmp.eq.s32.totalorder %v9002_v3, 4294967295  ;;  %vm11634_vm3 = vcmp.eq.s32.totalorder %v9002_v3, 3 }
 0x848   : > { %v2932_v18 = vadd.f32 %v2924_v48, %v2884_v0  ;;  %v3122_v46 = vadd.f32 %v3114_v43, %v3074_v5  ;;  %v3116_v27 = vsel %vm11625_vm6, %v3092_v29, 0.0  ;;  %v2975_v48 = vsel %vm11629_vm10, %v2960_v59, 0.0 }
 0x849   : > { %vm11631_vm6 = vcmp.eq.s32.totalorder %v9002_v3, 0  ;;  %vm11636_vm10 = vcmp.eq.s32.totalorder %v9067_v57, 4294967292 }
 0x84a   : > { %v2980_v47 = vadd.f32 %v2972_v37, %v2932_v18  ;;  %v3170_v54 = vadd.f32 %v3162_v33, %v3122_v46 }
 0x84b   : > { %v3052_v56 = vpop.permute.xlu0 %3051 }
 0x84c   : > { %v3140_v36 = vpop.permute.xlu1 %3139  ;;  %v3028_v12 = vadd.f32 %v3020_v45, %v2980_v47  ;;  %v3218_v9 = vadd.f32 %v3210_v2, %v3170_v54 }
 0x84e   : > { %v3076_v13 = vadd.f32 %v3068_v31, %v3028_v12  ;;  %v9980_v35 = vsel %vm8477_vm8, -10000.0, %v3218_v9 }
 0x84f   : > { %v3196_v47 = vpop.permute.xlu0 %3195  ;;  %v3234_v59 = vsel %vm1138_vm9, %v9980_v35, -inf }
 0x850   : > { %v3124_v52 = vadd.f32 %v3116_v27, %v3076_v13 }
 0x851   : > { %v3188_v10 = vpop.permute.xlu1 %3187 }
 0x852   : > { %v3212_v29 = vsel %vm11630_vm5, %v3188_v10, 0.0  ;;  %vm11632_vm5 = vcmp.eq.s32.totalorder %v9002_v3, 1 }
 0x853   : > { %v3071_v43 = vsel %vm11632_vm5, %v3056_v19, 0.0  ;;  %v2725_v19 = vsel %vm11636_vm10, %v2704_v40, 0.0  ;;  %vm11638_vm5 = vcmp.eq.s32.totalorder %v9067_v57, 4294967294  ;;  %vm11642_vm10 = vcmp.eq.s32.totalorder %v9067_v57, 2 }
 0x854   : > { %v2926_v40 = vsel %vm11638_vm5, %v2908_v16, 0.0  ;;  %vm11644_vm5 = vcmp.eq.s32.totalorder %v9067_v57, 4 }
 0x856   : > { %v2864_v23 = vpop.permute.xlu1 %2863 }
 0x857   : > { %v2879_v55 = vsel %vm11623_vm4, %v2864_v23, 0.0  ;;  %vm11628_vm4 = vcmp.eq.s32.totalorder %v8895_v17, 3 }
 0x858   : > { %v2887_v7 = vadd.f32 %v2879_v55, %v2831_v15  ;;  %v3164_v39 = vsel %vm11628_vm4, %v3140_v36, 0.0  ;;  %v2719_v55 = vpop.permute.xlu0 %2718  ;;  %vm11635_vm4 = vcmp.eq.s32.totalorder %v9002_v3, 4 }
 0x859   : > { %v3172_v37 = vadd.f32 %v3164_v39, %v3124_v52 }
 0x85b   : > { %v2912_v26 = vpop.permute.xlu1 %2911  ;;  %v3220_v45 = vadd.f32 %v3212_v29, %v3172_v37 }
 0x85c   : > { %v2927_v21 = vsel %vm11626_vm13, %v2912_v26, 0.0  ;;  %vm11633_vm13 = vcmp.eq.s32.totalorder %v9002_v3, 2  ;;  %v3016_v26 = vpop.permute.xlu0 %3015 }
 0x85d   : > { %v2935_v6 = vadd.f32 %v2927_v21, %v2887_v7  ;;  %v9986_v10 = vsel %vm8477_vm8, -10000.0, %v3220_v45  ;;  %v2828_v21 = vadd.f32 %v9732_v62, %v2725_v19 }
 0x85e   : > { %v3240_v33 = vsel %vm1138_vm9, %v9986_v10, -inf }
 0x85f   : > { %v2983_v18 = vadd.f32 %v2975_v48, %v2935_v6 }
 0x860   : > { %v3008_v0 = vpop.permute.xlu1 %3007  ;;  %v3064_v9 = vpop.permute.xlu0 %3063 }
 0x861   : > { %v3023_v61 = vsel %vm11631_vm6, %v3008_v0, 0.0  ;;  %vm11637_vm6 = vcmp.eq.s32.totalorder %v9067_v57, 4294967293 }
 0x862   : > { %v3031_v36 = vadd.f32 %v3023_v61, %v2983_v18 }
 0x864   : > { %v3079_v58 = vadd.f32 %v3071_v43, %v3031_v36  ;;  %v2916_v37 = vpop.permute.xlu0 %2915 }
 0x865   : > { %v3104_v5 = vpop.permute.xlu1 %3103 }
 0x866   : > { %v3119_v23 = vsel %vm11633_vm13, %v3104_v5, 0.0  ;;  %vm11639_vm13 = vcmp.eq.s32.totalorder %v9067_v57, 4294967295 }
 0x867   : > { %3235 = vmax.xlane.f32.xlu1 %v3234_v59  ;;  %v3127_v15 = vadd.f32 %v3119_v23, %v3079_v58 }
 0x868   : > { %v3012_v59 = vpop.permute.xlu0 %3011 }
 0x86a   : > { %v3152_v12 = vpop.permute.xlu1 %3151 }
 0x86b   : > { %3241 = vmax.xlane.f32.xlu1 %v3240_v33  ;;  %v3167_v46 = vsel %vm11634_vm3, %v3152_v12, 0.0  ;;  %vm11640_vm3 = vcmp.eq.s32.totalorder %v9067_v57, 0 }
 0x86c   : > { %v3175_v31 = vadd.f32 %v3167_v46, %v3127_v15  ;;  %v10021_v33 = vpop.permute.xlu0 %3155  ;;  %v3214_v15 = vsel %vm11644_vm5, %v3196_v47, 0.0  ;;  %vm11650_vm5 = vcmp.eq.s32.totalorder %v9109_v4, 1 }
 0x86f   : > { %v3200_v54 = vpop.permute.xlu1 %3199 }
 0x870   : > { %v3215_v13 = vsel %vm11635_vm4, %v3200_v54, 0.0  ;;  %vm11641_vm4 = vcmp.eq.s32.totalorder %v9067_v57, 1 }
 0x871   : > { %v3223_v7 = vadd.f32 %v3215_v13, %v3175_v31  ;;  %v3070_v36 = vsel %vm11641_vm4, %v3052_v56, 0.0  ;;  %vm11647_vm4 = vcmp.eq.s32.totalorder %v9109_v4, 4294967294 }
 0x873   : > { %v10002_v27 = vsel %vm8477_vm8, -10000.0, %v3223_v7  ;;  %v3208_v7 = vpop.permute.xlu0 %3207 }
 0x874   : > { %v2860_v6 = vpop.permute.xlu1 %2859  ;;  %v3249_v2 = vsel %vm1138_vm9, %v10002_v27, -inf }
 0x875   : > { %v2878_v39 = vsel %vm11637_vm6, %v2860_v6, 0.0  ;;  %3250 = vmax.xlane.f32.xlu0 %v3249_v2  ;;  %vm11643_vm6 = vcmp.eq.s32.totalorder %v9067_v57, 3 }
 0x876   : > { %v2886_v52 = vadd.f32 %v2878_v39, %v2828_v21 }
 0x878   : > { %v2934_v29 = vadd.f32 %v2926_v40, %v2886_v52 }
 0x879   : > { %v2956_v48 = vpop.permute.xlu1 %2955 }
 0x87a   : > { %v2974_v0 = vsel %vm11639_vm13, %v2956_v48, 0.0  ;;  %vm11645_vm13 = vcmp.eq.s32.totalorder %v9109_v4, 4294967292 }
 0x87b   : > { %v2982_v62 = vadd.f32 %v2974_v0, %v2934_v29  ;;  %v2728_v19 = vsel %vm11645_vm13, %v2719_v55, 0.0  ;;  %vm11651_vm13 = vcmp.eq.s32.totalorder %v9109_v4, 2 }
 0x87c   : > { %v2839_v47 = vadd.f32 %v9734_v1, %v2728_v19  ;;  %v3073_v1 = vsel %vm11650_vm5, %v3064_v9, 0.0  ;;  %vm11656_vm5 = vcmp.eq.s32.totalorder %v9105_v63, 4294967294 }
 0x87e   : > { %v3004_v18 = vpop.permute.xlu1 %3003 }
 0x87f   : > { %v3022_v61 = vsel %vm11640_vm3, %v3004_v18, 0.0  ;;  %vm11646_vm3 = vcmp.eq.s32.totalorder %v9109_v4, 4294967293 }
 0x880   : > { %v3030_v45 = vadd.f32 %v3022_v61, %v2982_v62 }
 0x882   : > { %v3078_v43 = vadd.f32 %v3070_v36, %v3030_v45 }
 0x883   : > { %v3100_v5 = vpop.permute.xlu1 %3099 }
 0x884   : > { %v3118_v16 = vsel %vm11642_vm10, %v3100_v5, 0.0  ;;  %vm11648_vm10 = vcmp.eq.s32.totalorder %v9109_v4, 4294967295 }
 0x885   : > { %v3126_v58 = vadd.f32 %v3118_v16, %v3078_v43 }
 0x888   : > { %v3148_v23 = vpop.permute.xlu1 %3147  ;;  %v3239_v2 = vpop.xlane.xlu0 %3238 }
 0x889   : > { %v3166_v12 = vsel %vm11643_vm6, %v3148_v23, 0.0  ;;  %v3259_v40 = vsub.f32 %v9843_v24, %v3239_v2  ;;  %vm11649_vm6 = vcmp.eq.s32.totalorder %v9109_v4, 0 }
 0x88a   : > { %v3174_v46 = vadd.f32 %v3166_v12, %v3126_v58  ;;  %v3025_v62 = vsel %vm11649_vm6, %v3016_v26, 0.0  ;;  %vm11655_vm6 = vcmp.eq.s32.totalorder %v9105_v63, 4294967293 }
 0x88b   : > { %v3268_v18 = vmul.f32 1.442695, %v3259_v40 }
 0x88c   : > { %v3222_v31 = vadd.f32 %v3214_v15, %v3174_v46 }
 0x88d   : > { %v2872_v54 = vpop.permute.xlu1 %2871  ;;  %7557 = vpow2.f32 %v3268_v18 }
 0x88e   : > { %v10027_v56 = vsel %vm8477_vm8, -10000.0, %v3222_v31  ;;  %v2881_v21 = vsel %vm11646_vm3, %v2872_v54, 0.0  ;;  %vm11652_vm3 = vcmp.eq.s32.totalorder %v9109_v4, 3 }
 0x88f   : > { %v3246_v13 = vsel %vm1138_vm9, %v10027_v56, -inf  ;;  %v2889_v52 = vadd.f32 %v2881_v21, %v2839_v47 }
 0x890   : > { %3247 = vmax.xlane.f32.xlu1 %v3246_v13 }
 0x892   : > { %v2920_v6 = vpop.permute.xlu1 %2919 }
 0x893   : > { %v2929_v39 = vsel %vm11647_vm4, %v2920_v6, 0.0  ;;  %vm11653_vm4 = vcmp.eq.s32.totalorder %v9109_v4, 4  ;;  %v2928_v6 = vsel %vm11656_vm5, %v2916_v37, 0.0  ;;  %vm11663_vm5 = vcmp.eq.s32.totalorder %v8931_v25, 4294967295 }
 0x894   : > { %v2937_v48 = vadd.f32 %v2929_v39, %v2889_v52  ;;  %v3217_v26 = vsel %vm11653_vm4, %v3208_v7, 0.0  ;;  %vm11659_vm4 = vcmp.eq.s32.totalorder %v9105_v63, 1 }
 0x897   : > { %v2968_v29 = vpop.permute.xlu1 %2967  ;;  %v10059_v31 = vpop.eup %7557 }
 0x898   : > { %v2977_v55 = vsel %vm11648_vm10, %v2968_v29, 0.0  ;;  %vm11654_vm10 = vcmp.eq.s32.totalorder %v9105_v63, 4294967292  ;;  %v3285_v7 = vsel %vm1138_vm9, %v10059_v31, 0.0 }
 0x899   : > { %v2985_v0 = vadd.f32 %v2977_v55, %v2937_v48 }
 0x89b   : > { %v3033_v61 = vadd.f32 %v3025_v62, %v2985_v0 }
 0x89c   : > { %v3112_v45 = vpop.permute.xlu1 %3111 }
 0x89d   : > { %v3081_v36 = vadd.f32 %v3073_v1, %v3033_v61  ;;  %v3121_v5 = vsel %vm11651_vm13, %v3112_v45, 0.0  ;;  %vm11657_vm13 = vcmp.eq.s32.totalorder %v9105_v63, 4294967295 }
 0x89f   : > { %v3129_v24 = vadd.f32 %v3121_v5, %v3081_v36 }
 0x8a1   : > { %v3160_v43 = vpop.permute.xlu1 %3159 }
 0x8a2   : > { %v3169_v16 = vsel %vm11652_vm3, %v3160_v43, 0.0  ;;  %vm11658_vm3 = vcmp.eq.s32.totalorder %v9105_v63, 0 }
 0x8a3   : > { %v3177_v58 = vadd.f32 %v3169_v16, %v3129_v24 }
 0x8a5   : > { %v3225_v23 = vadd.f32 %v3217_v26, %v3177_v58 }
 0x8a6   : > { %v2714_v12 = vpop.permute.xlu1 %2713 }
 0x8a7   : > { %v10053_v9 = vsel %vm8477_vm8, -10000.0, %v3225_v23  ;;  %v2727_v46 = vsel %vm11654_vm10, %v2714_v12, 0.0  ;;  %vm11660_vm10 = vcmp.eq.s32.totalorder %v9105_v63, 2 }
 0x8a8   : > { %v3255_v15 = vsel %vm1138_vm9, %v10053_v9, -inf  ;;  %v2836_v54 = vadd.f32 %v9730_v60, %v2727_v46  ;;  %v3024_v60 = vsel %vm11658_vm3, %v3012_v59, 0.0  ;;  %v3168_v59 = vsel %vm1761_vm1, %v10021_v33, 0.0 }
 0x8a9   : > { %3256 = vmax.xlane.f32.xlu0 %v3255_v15  ;;  %vm11665_vm3 = vcmp.eq.s32.totalorder %v8931_v25, 4294967292 }
 0x8ab   : > { %v2868_v13 = vpop.permute.xlu1 %2867 }
 0x8ac   : > { %v2880_v19 = vsel %vm11655_vm6, %v2868_v13, 0.0  ;;  %vm11662_vm6 = vcmp.eq.s32.totalorder %v8931_v25, 4294967294 }
 0x8ad   : > { %v2888_v21 = vadd.f32 %v2880_v19, %v2836_v54  ;;  %3286 = vadd.xlane.f32.xlu0 %v3285_v7 }
 0x8af   : > { %v2936_v2 = vadd.f32 %v2928_v6, %v2888_v21 }
 0x8b0   : > { %v2964_v47 = vpop.permute.xlu1 %2963 }
 0x8b1   : > { %v2976_v39 = vsel %vm11657_vm13, %v2964_v47, 0.0  ;;  %vm11664_vm13 = vcmp.eq.s32.totalorder %v8931_v25, 0 }
 0x8b2   : > { %v2984_v52 = vadd.f32 %v2976_v39, %v2936_v2 }
 0x8b4   : > { %v3032_v48 = vadd.f32 %v3024_v60, %v2984_v52 }
 0x8b5   : > { %v3060_v40 = vpop.permute.xlu1 %3059 }
 0x8b6   : > { %v3072_v29 = vsel %vm11659_vm4, %v3060_v40, 0.0  ;;  %vm11666_vm4 = vcmp.eq.s32.totalorder %v8931_v25, 1 }
 0x8b7   : > { %v3080_v62 = vadd.f32 %v3072_v29, %v3032_v48 }
 0x8ba   : > { %v3108_v55 = vpop.permute.xlu1 %3107 }
 0x8bb   : > { %v3120_v0 = vsel %vm11660_vm10, %v3108_v55, 0.0  ;;  %vm11667_vm10 = vcmp.eq.s32.totalorder %v8931_v25, 2 }
 0x8bc   : > { %v3128_v37 = vadd.f32 %v3120_v0, %v3080_v62 }
 0x8be   : > { %v10076_v18 = vpop.permute.xlu1 %3811  ;;  %v3245_v61 = vpop.xlane.xlu0 %3244  ;;  %v3176_v5 = vadd.f32 %v3168_v59, %v3128_v37 }
 0x8bf   : > { %v3261_v1 = vsub.f32 %v9906_v34, %v3245_v61  ;;  %6912 = vmatprep.subr.bf16.mxu1 %v10076_v18 }
 0x8c1   : > { %v3272_v45 = vmul.f32 1.442695, %v3261_v1 }
 0x8c2   : > { %v3204_v36 = vpop.permute.xlu1 %3203 }
 0x8c3   : > { %7559 = vpow2.f32 %v3272_v45  ;;  %v3216_v24 = vsel %vm1817_vm14, %v3204_v36, 0.0 }
 0x8c4   : > { %v3224_v43 = vadd.f32 %v3216_v24, %v3176_v5 }
 0x8c6   : > { %v3232_v16 = vsel %vm8477_vm8, -10000.0, %v3224_v43  ;;  %vm11661_vm8 = vcmp.eq.s32.totalorder %v8931_v25, 4294967293 }
 0x8c7   : > { %v3252_v58 = vsel %vm1138_vm9, %v3232_v16, -inf }
 0x8c8   : > { %3253 = vmax.xlane.f32.xlu1 %v3252_v58 }
 0x8cd   : > { %v10088_v34 = vpop.eup %7559 }
 0x8ce   : > { %v3291_v26 = vsel %vm1138_vm9, %v10088_v34, 0.0 }
 0x8cf   : > { %3292 = vadd.xlane.f32.xlu0 %v3291_v26 }
 0x8f4   : > { %v3236_v33 = vpop.xlane.xlu1 %3235 }
 0x8f5   : > { %v3258_v23 = vsub.f32 %v9980_v35, %v3236_v33 }
 0x8f7   : > { %v3266_v12 = vmul.f32 1.442695, %v3258_v23 }
 0x8f8   : > { %v3242_v46 = vpop.xlane.xlu1 %3241 }
 0x8f9   : > { %7561 = vpow2.f32 %v3266_v12  ;;  %v3260_v15 = vsub.f32 %v9986_v10, %v3242_v46 }
 0x8fb   : > { %v3270_v54 = vmul.f32 1.442695, %v3260_v15 }
 0x8fd   : > { %7563 = vpow2.f32 %v3270_v54 }
 0x902   : > { %v3251_v20 = vpop.xlane.xlu0 %3250 }
 0x903   : > { %v10094_v13 = vpop.eup %7561  ;;  %v3263_v19 = vsub.f32 %v10002_v27, %v3251_v20 }
 0x904   : > { %v3282_v7 = vsel %vm1138_vm9, %v10094_v13, 0.0 }
 0x905   : > { %v3276_v21 = vmul.f32 1.442695, %v3263_v19  ;;  %3283 = vadd.xlane.f32.xlu1 %v3282_v7 }
 0x907   : > { %v10099_v6 = vpop.eup %7563  ;;  %7565 = vpow2.f32 %v3276_v21 }
 0x908   : > { %v3288_v35 = vsel %vm1138_vm9, %v10099_v6, 0.0 }
 0x909   : > { %3289 = vadd.xlane.f32.xlu1 %v3288_v35 }
 0x911   : > { %v10103_v10 = vpop.eup %7565 }
 0x912   : > { %v3297_v47 = vsel %vm1138_vm9, %v10103_v10, 0.0 }
 0x913   : > { %3298 = vadd.xlane.f32.xlu0 %v3297_v47 }
 0x91d   : > { %v3248_v2 = vpop.xlane.xlu1 %3247 }
 0x91e   : > { %v3262_v27 = vsub.f32 %v10027_v56, %v3248_v2 }
 0x920   : > { %v3274_v39 = vmul.f32 1.442695, %v3262_v27 }
 0x922   : > { %7567 = vpow2.f32 %v3274_v39 }
 0x92c   : > { %v10108_v52 = vpop.eup %7567 }
 0x92d   : > { %v3294_v40 = vsel %vm1138_vm9, %v10108_v52, 0.0 }
 0x92e   : > { %3295 = vadd.xlane.f32.xlu1 %v3294_v40 }
 0x936   : > { %v3257_v60 = vpop.xlane.xlu0 %3256 }
 0x937   : > { %v3265_v48 = vsub.f32 %v10053_v9, %v3257_v60 }
 0x939   : > { %v3280_v29 = vmul.f32 1.442695, %v3265_v48 }
 0x93a   : > { %v3287_v55 = vpop.xlane.xlu0 %3286 }
 0x93b   : > { %7569 = vpow2.f32 %v3280_v29 }
 0x93c   : > { %7571 = vrcp.f32 %v3287_v55 }
 0x945   : > { %v10113_v0 = vpop.eup %7569 }
 0x946   : > { %v7572_v62 = vpop.eup %7571  ;;  %v3303_v56 = vsel %vm1138_vm9, %v10113_v0, 0.0 }
 0x947   : > { %v10118_v37 = vmul.f32 %v7572_v62, %v10059_v31  ;;  %3304 = vadd.xlane.f32.xlu0 %v3303_v56 }
 0x949   : > { %v3359_v61 = vsel %vm11661_vm8, %v10118_v37, 0.0  ;;  %v3391_v1 = vsel %vm11662_vm6, %v10118_v37, 0.0  ;;  %v3423_v31 = vsel %vm11663_vm5, %v10118_v37, 0.0  ;;  %v3455_v36 = vsel %vm11664_vm13, %v10118_v37, 0.0 }
 0x94a   : > { %v3369_v9 = vsel %vm1138_vm9, %v3359_v61, 0.0  ;;  %v3401_v59 = vsel %vm1138_vm9, %v3391_v1, 0.0  ;;  %v3433_v45 = vsel %vm1138_vm9, %v3423_v31, 0.0  ;;  %v3465_v43 = vsel %vm1138_vm9, %v3455_v36, 0.0 }
 0x94b   : > { %3370 = vadd.xlane.f32.xlu0 %v3369_v9  ;;  %v3327_v23 = vsel %vm11665_vm3, %v10118_v37, 0.0  ;;  %v3519_v15 = vsel %vm11667_vm10, %v10118_v37, 0.0  ;;  %vm11668_vm8 = vcmp.eq.s32.totalorder %v8931_v25, 3  ;;  %vm11669_vm6 = vcmp.eq.s32.totalorder %v8931_v25, 4 }
 0x94c   : > { %v3337_v12 = vsel %vm1138_vm9, %v3327_v23, 0.0  ;;  %v3529_v54 = vsel %vm1138_vm9, %v3519_v15, 0.0  ;;  %v3551_v20 = vsel %vm11668_vm8, %v10118_v37, 0.0  ;;  %v3583_v7 = vsel %vm11669_vm6, %v10118_v37, 0.0 }
 0x94d   : > { %v3561_v19 = vsel %vm1138_vm9, %v3551_v20, 0.0  ;;  %v3593_v21 = vsel %vm1138_vm9, %v3583_v7, 0.0  ;;  %vm11670_vm5 = vcmp.eq.s32.totalorder %v8831_v14, 4294967293  ;;  %vm11671_vm13 = vcmp.eq.s32.totalorder %v8831_v14, 4294967292 }
 0x94e   : > { %vm11672_vm3 = vcmp.eq.s32.totalorder %v8831_v14, 2  ;;  %vm11674_vm10 = vcmp.eq.s32.totalorder %v8831_v14, 3  ;;  %vm11675_vm8 = vcmp.eq.s32.totalorder %v8831_v14, 4294967295  ;;  %vm11676_vm6 = vcmp.eq.s32.totalorder %v8831_v14, 4 }
 0x94f   : > { %3402 = vadd.xlane.f32.xlu0 %v3401_v59 }
 0x953   : > { %3434 = vadd.xlane.f32.xlu0 %v3433_v45 }
 0x955   : > { %v3254_v5 = vpop.xlane.xlu1 %3253 }
 0x956   : > { %v3264_v24 = vsub.f32 %v3232_v16, %v3254_v5  ;;  %v3487_v16 = vsel %vm11666_vm4, %v10118_v37, 0.0  ;;  %vm11673_vm4 = vcmp.eq.s32.totalorder %v8831_v14, 4294967294 }
 0x957   : > { %3466 = vadd.xlane.f32.xlu0 %v3465_v43  ;;  %v3497_v46 = vsel %vm1138_vm9, %v3487_v16, 0.0 }
 0x958   : > { %v3278_v58 = vmul.f32 1.442695, %v3264_v24 }
 0x95a   : > { %7573 = vpow2.f32 %v3278_v58 }
 0x95c   : > { %v3293_v2 = vpop.xlane.xlu0 %3292 }
 0x964   : > { %v10136_v26 = vpop.eup %7573 }
 0x965   : > { %v3300_v33 = vsel %vm1138_vm9, %v10136_v26, 0.0 }
 0x966   : > { %3301 = vadd.xlane.f32.xlu1 %v3300_v33 }
 0x96a   : > { %3338 = vadd.xlane.f32.xlu1 %v3337_v12 }
 0x96e   : > { %3498 = vadd.xlane.f32.xlu1 %v3497_v46 }
 0x972   : > { %3530 = vadd.xlane.f32.xlu1 %v3529_v54 }
 0x976   : > { %3562 = vadd.xlane.f32.xlu1 %v3561_v19 }
 0x97a   : > { %3594 = vadd.xlane.f32.xlu1 %v3593_v21 }
 0x992   : > { %v3284_v35 = vpop.xlane.xlu1 %3283 }
 0x993   : > { %7575 = vrcp.f32 %v3284_v35 }
 0x996   : > { %v3290_v47 = vpop.xlane.xlu1 %3289 }
 0x997   : > { %7577 = vrcp.f32 %v3290_v47 }
 0x998   : > { %7579 = vrcp.f32 %v3293_v2 }
 0x99d   : > { %v7576_v27 = vpop.eup %7575 }
 0x99e   : > { %v10161_v39 = vmul.f32 %v7576_v27, %v10094_v13 }
 0x9a0   : > { %v3358_v40 = vsel %vm11670_vm5, %v10161_v39, 0.0  ;;  %v3326_v25 = vsel %vm11671_vm13, %v10161_v39, 0.0  ;;  %v3518_v13 = vsel %vm11672_vm3, %v10161_v39, 0.0  ;;  %v3390_v55 = vsel %vm11673_vm4, %v10161_v39, 0.0  ;;  %v3299_v47 = vpop.xlane.xlu0 %3298 }
 0x9a1   : > { %v3366_v60 = vsel %vm1138_vm9, %v3358_v40, 0.0  ;;  %v3334_v48 = vsel %vm1138_vm9, %v3326_v25, 0.0  ;;  %v7578_v29 = vpop.eup %7577  ;;  %v3526_v61 = vsel %vm1138_vm9, %v3518_v13, 0.0  ;;  %v3398_v9 = vsel %vm1138_vm9, %v3390_v55, 0.0 }
 0x9a2   : > { %3367 = vadd.xlane.f32.xlu0 %v3366_v60  ;;  %3335 = vadd.xlane.f32.xlu1 %v3334_v48  ;;  %v7580_v62 = vpop.eup %7579  ;;  %v10178_v56 = vmul.f32 %v7578_v29, %v10099_v6  ;;  %v3550_v1 = vsel %vm11674_vm10, %v10161_v39, 0.0  ;;  %v3422_v59 = vsel %vm11675_vm8, %v10161_v39, 0.0  ;;  %v3582_v5 = vsel %vm11676_vm6, %v10161_v39, 0.0 }
 0x9a3   : > { %v10189_v31 = vmul.f32 %v7580_v62, %v10088_v34  ;;  %v3558_v6 = vsel %vm1138_vm9, %v3550_v1, 0.0  ;;  %v3430_v45 = vsel %vm1138_vm9, %v3422_v59, 0.0  ;;  %vm11677_vm5 = vcmp.eq.s32.totalorder %v8831_v14, 0 }
 0x9a4   : > { %v3454_v24 = vsel %vm11677_vm5, %v10161_v39, 0.0  ;;  %v3590_v34 = vsel %vm1138_vm9, %v3582_v5, 0.0  ;;  %vm11678_vm13 = vcmp.eq.s32.totalorder %v8831_v14, 1  ;;  %vm11679_vm3 = vcmp.eq.s32.totalorder %v8888_v51, 4294967292 }
 0x9a5   : > { %v3323_v36 = vpack.c.bf16 %v10189_v31, %v10178_v56  ;;  %v3462_v43 = vsel %vm1138_vm9, %v3454_v24, 0.0  ;;  %v3486_v58 = vsel %vm11678_vm13, %v10161_v39, 0.0  ;;  %v3329_v33 = vsel %vm11679_vm3, %v10189_v31, 0.0 }
 0x9a6   : > { %3527 = vadd.xlane.f32.xlu0 %v3526_v61  ;;  %3399 = vadd.xlane.f32.xlu1 %v3398_v9  ;;  %v3494_v23 = vsel %vm1138_vm9, %v3486_v58, 0.0  ;;  %v3343_v12 = vsel %vm1138_vm9, %v3329_v33, 0.0  ;;  %vm11680_vm4 = vcmp.eq.s32.totalorder %v8888_v51, 4294967293  ;;  %vm11681_vm10 = vcmp.eq.s32.totalorder %v8895_v17, 4294967292 }
 0x9a7   : > { %v3361_v16 = vsel %vm11680_vm4, %v10189_v31, 0.0  ;;  %v3328_v46 = vsel %vm11681_vm10, %v10178_v56, 0.0  ;;  %vm11682_vm8 = vcmp.eq.s32.totalorder %v8888_v51, 4294967294  ;;  %vm11683_vm6 = vcmp.eq.s32.totalorder %v8895_v17, 4294967294 }
 0x9a8   : > { %v3375_v14 = vsel %vm1138_vm9, %v3361_v16, 0.0  ;;  %v3340_v15 = vsel %vm1138_vm9, %v3328_v46, 0.0  ;;  %v3393_v54 = vsel %vm11682_vm8, %v10189_v31, 0.0  ;;  %v3392_v20 = vsel %vm11683_vm6, %v10178_v56, 0.0 }
 0x9a9   : > { %v3407_v19 = vsel %vm1138_vm9, %v3393_v54, 0.0  ;;  %v3404_v7 = vsel %vm1138_vm9, %v3392_v20, 0.0  ;;  %vm11684_vm5 = vcmp.eq.s32.totalorder %v8888_v51, 4294967295  ;;  %vm11685_vm13 = vcmp.eq.s32.totalorder %v8895_v17, 4294967295 }
 0x9aa   : > { %3559 = vadd.xlane.f32.xlu0 %v3558_v6  ;;  %3431 = vadd.xlane.f32.xlu1 %v3430_v45  ;;  %v3425_v21 = vsel %vm11684_vm5, %v10189_v31, 0.0  ;;  %v3424_v35 = vsel %vm11685_vm13, %v10178_v56, 0.0  ;;  %vm11686_vm3 = vcmp.eq.s32.totalorder %v8888_v51, 0  ;;  %vm11687_vm4 = vcmp.eq.s32.totalorder %v8895_v17, 0 }
 0x9ab   : > { %v3439_v27 = vsel %vm1138_vm9, %v3425_v21, 0.0  ;;  %v3436_v40 = vsel %vm1138_vm9, %v3424_v35, 0.0  ;;  %v3457_v25 = vsel %vm11686_vm3, %v10189_v31, 0.0  ;;  %v3456_v60 = vsel %vm11687_vm4, %v10178_v56, 0.0 }
 0x9ac   : > { %v3471_v48 = vsel %vm1138_vm9, %v3457_v25, 0.0  ;;  %v3468_v29 = vsel %vm1138_vm9, %v3456_v60, 0.0  ;;  %vm11688_vm10 = vcmp.eq.s32.totalorder %v8888_v51, 1  ;;  %vm11689_vm8 = vcmp.eq.s32.totalorder %v8895_v17, 1 }
 0x9ad   : > { %v3489_v13 = vsel %vm11688_vm10, %v10189_v31, 0.0  ;;  %v3488_v55 = vsel %vm11689_vm8, %v10178_v56, 0.0  ;;  %vm11690_vm6 = vcmp.eq.s32.totalorder %v8888_v51, 2  ;;  %vm11691_vm5 = vcmp.eq.s32.totalorder %v8895_v17, 2 }
 0x9ae   : > { %3591 = vadd.xlane.f32.xlu0 %v3590_v34  ;;  %3463 = vadd.xlane.f32.xlu1 %v3462_v43  ;;  %v3503_v62 = vsel %vm1138_vm9, %v3489_v13, 0.0  ;;  %v3500_v61 = vsel %vm1138_vm9, %v3488_v55, 0.0  ;;  %v3521_v1 = vsel %vm11690_vm6, %v10189_v31, 0.0  ;;  %v3520_v59 = vsel %vm11691_vm5, %v10178_v56, 0.0 }
 0x9af   : > { %v3535_v5 = vsel %vm1138_vm9, %v3521_v1, 0.0  ;;  %v3532_v24 = vsel %vm1138_vm9, %v3520_v59, 0.0  ;;  %vm11692_vm13 = vcmp.eq.s32.totalorder %v8888_v51, 3  ;;  %vm11693_vm3 = vcmp.eq.s32.totalorder %v8895_v17, 3 }
 0x9b0   : > { %v3553_v34 = vsel %vm11692_vm13, %v10189_v31, 0.0  ;;  %v3552_v43 = vsel %vm11693_vm3, %v10178_v56, 0.0  ;;  %vm11694_vm4 = vcmp.eq.s32.totalorder %v8888_v51, 4  ;;  %vm11695_vm10 = vcmp.eq.s32.totalorder %v8895_v17, 4 }
 0x9b1   : > { %v3564_v33 = vsel %vm1138_vm9, %v3552_v43, 0.0  ;;  %v3584_v16 = vsel %vm11695_vm10, %v10178_v56, 0.0  ;;  %vm11696_vm8 = vcmp.eq.s32.totalorder %v8895_v17, 4294967293  ;;  %vm11697_vm6 = vcmp.eq.s32.totalorder %v9002_v3, 4294967292 }
 0x9b2   : > { %3495 = vadd.xlane.f32.xlu1 %v3494_v23  ;;  %3344 = vadd.xlane.f32.xlu0 %v3343_v12  ;;  %v3585_v12 = vsel %vm11694_vm4, %v10189_v31, 0.0  ;;  %v3596_v46 = vsel %vm1138_vm9, %v3584_v16, 0.0  ;;  %vm11698_vm5 = vcmp.eq.s32.totalorder %v9002_v3, 4294967293  ;;  %vm11699_vm13 = vcmp.eq.s32.totalorder %v9067_v57, 4294967293  ;;  %v7398_v31 = vld [vmem:[%s3945_s22 + $0x8] sm:$0xff]  }
 0x9b3   : > { %vm11700_vm3 = vcmp.eq.s32.totalorder %v9002_v3, 4294967294  ;;  %vm11701_vm4 = vcmp.eq.s32.totalorder %v9067_v57, 4294967294  ;;  %vm11702_vm10 = vcmp.eq.s32.totalorder %v9002_v3, 4294967295 }
 0x9b6   : > { %3376 = vadd.xlane.f32.xlu1 %v3375_v14  ;;  %3341 = vadd.xlane.f32.xlu0 %v3340_v15  ;;  %v3360_v14 = vsel %vm11696_vm8, %v10178_v56, 0.0  ;;  %vm11703_vm8 = vcmp.eq.s32.totalorder %v9067_v57, 4294967295  ;;  %v7397_v56 = vld [vmem:[%s3945_s22] sm:$0xff]  }
 0x9b7   : > { %v3372_v51 = vsel %vm1138_vm9, %v3360_v14, 0.0  ;;  %6928 = vmatprep.subr.bf16.mxu0 %v7397_v56 }
 0x9b8   : > { %6929 = vmatpush3.bf16.msra.mxu0 %v7397_v56 }
 0x9b9   : > { %6930 = vmatprep.subr.bf16.mxu0 %v7398_v31 }
 0x9ba   : > { %3408 = vadd.xlane.f32.xlu1 %v3407_v19  ;;  %3405 = vadd.xlane.f32.xlu0 %v3404_v7 }
 0x9bb   : > { %v3296_v2 = vpop.xlane.xlu1 %3295 }
 0x9bc   : > { %7581 = vrcp.f32 %v3296_v2  ;;  %6931 = vmatpush3.bf16.msra.mxu0 %v7398_v31 }
 0x9bd   : > { %7583 = vrcp.f32 %v3299_v47 }
 0x9be   : > { %3440 = vadd.xlane.f32.xlu1 %v3439_v27  ;;  %3437 = vadd.xlane.f32.xlu0 %v3436_v40 }
 0x9c2   : > { %3472 = vadd.xlane.f32.xlu1 %v3471_v48  ;;  %3469 = vadd.xlane.f32.xlu0 %v3468_v29 }
 0x9c6   : > { %v7582_v9 = vpop.eup %7581  ;;  %3504 = vadd.xlane.f32.xlu1 %v3503_v62  ;;  %3501 = vadd.xlane.f32.xlu0 %v3500_v61 }
 0x9c7   : > { %v7584_v6 = vpop.eup %7583  ;;  %v10258_v45 = vmul.f32 %v7582_v9, %v10108_v52  ;;  %v3567_v52 = vsel %vm1138_vm9, %v3553_v34, 0.0 }
 0x9c8   : > { %v10269_v58 = vmul.f32 %v7584_v6, %v10103_v10  ;;  %v3599_v10 = vsel %vm1138_vm9, %v3585_v12, 0.0 }
 0x9c9   : > { %v3362_v19 = vsel %vm11699_vm13, %v10258_v45, 0.0  ;;  %v3394_v35 = vsel %vm11701_vm4, %v10258_v45, 0.0  ;;  %v3426_v40 = vsel %vm11703_vm8, %v10258_v45, 0.0  ;;  %vm11706_vm13 = vcmp.eq.s32.totalorder %v9002_v3, 1 }
 0x9ca   : > { %3536 = vadd.xlane.f32.xlu1 %v3535_v5  ;;  %3533 = vadd.xlane.f32.xlu0 %v3532_v24  ;;  %v3324_v23 = vpack.c.bf16 %v10269_v58, %v10258_v45  ;;  %v3331_v15 = vsel %vm11697_vm6, %v10269_v58, 0.0  ;;  %v3363_v20 = vsel %vm11698_vm5, %v10269_v58, 0.0  ;;  %v3378_v7 = vsel %vm1138_vm9, %v3362_v19, 0.0 }
 0x9cb   : > { %v3349_v54 = vsel %vm1138_vm9, %v3331_v15, 0.0  ;;  %v3381_v17 = vsel %vm1138_vm9, %v3363_v20, 0.0  ;;  %v3395_v21 = vsel %vm11700_vm3, %v10269_v58, 0.0  ;;  %v3410_v2 = vsel %vm1138_vm9, %v3394_v35, 0.0 }
 0x9cc   : > { %v3413_v47 = vsel %vm1138_vm9, %v3395_v21, 0.0  ;;  %v3427_v27 = vsel %vm11702_vm10, %v10269_v58, 0.0  ;;  %v3442_v60 = vsel %vm1138_vm9, %v3426_v40, 0.0  ;;  %vm11704_vm6 = vcmp.eq.s32.totalorder %v9002_v3, 0 }
 0x9cd   : > { %v3445_v25 = vsel %vm1138_vm9, %v3427_v27, 0.0  ;;  %v3459_v29 = vsel %vm11704_vm6, %v10269_v58, 0.0  ;;  %vm11705_vm5 = vcmp.eq.s32.totalorder %v9067_v57, 0  ;;  %v3491_v61 = vsel %vm11706_vm13, %v10269_v58, 0.0 }
 0x9ce   : > { %3568 = vadd.xlane.f32.xlu1 %v3567_v52  ;;  %3565 = vadd.xlane.f32.xlu0 %v3564_v33  ;;  %v3458_v13 = vsel %vm11705_vm5, %v10258_v45, 0.0  ;;  %v3477_v55 = vsel %vm1138_vm9, %v3459_v29, 0.0  ;;  %vm11707_vm3 = vcmp.eq.s32.totalorder %v9067_v57, 1  ;;  %v3509_v1 = vsel %vm1138_vm9, %v3491_v61, 0.0 }
 0x9cf   : > { %v3474_v62 = vsel %vm1138_vm9, %v3458_v13, 0.0  ;;  %v3490_v9 = vsel %vm11707_vm3, %v10258_v45, 0.0  ;;  %vm11708_vm4 = vcmp.eq.s32.totalorder %v9002_v3, 2  ;;  %vm11709_vm10 = vcmp.eq.s32.totalorder %v9067_v57, 2 }
 0x9d0   : > { %v3506_v59 = vsel %vm1138_vm9, %v3490_v9, 0.0  ;;  %v3523_v6 = vsel %vm11708_vm4, %v10269_v58, 0.0  ;;  %v3522_v5 = vsel %vm11709_vm10, %v10258_v45, 0.0  ;;  %vm11710_vm8 = vcmp.eq.s32.totalorder %v9002_v3, 3 }
 0x9d1   : > { %v3541_v24 = vsel %vm1138_vm9, %v3523_v6, 0.0  ;;  %v3538_v34 = vsel %vm1138_vm9, %v3522_v5, 0.0  ;;  %v3555_v43 = vsel %vm11710_vm8, %v10269_v58, 0.0  ;;  %vm11711_vm6 = vcmp.eq.s32.totalorder %v9067_v57, 3 }
 0x9d2   : > { %3600 = vadd.xlane.f32.xlu1 %v3599_v10  ;;  %3597 = vadd.xlane.f32.xlu0 %v3596_v46  ;;  %v3554_v52 = vsel %vm11711_vm6, %v10258_v45, 0.0  ;;  %v3573_v12 = vsel %vm1138_vm9, %v3555_v43, 0.0  ;;  %vm11712_vm5 = vcmp.eq.s32.totalorder %v9002_v3, 4  ;;  %vm11713_vm13 = vcmp.eq.s32.totalorder %v9067_v57, 4 }
 0x9d3   : > { %v3570_v16 = vsel %vm1138_vm9, %v3554_v52, 0.0  ;;  %v3587_v46 = vsel %vm11712_vm5, %v10269_v58, 0.0  ;;  %v3586_v14 = vsel %vm11713_vm13, %v10258_v45, 0.0  ;;  %vm11714_vm3 = vcmp.eq.s32.totalorder %v9067_v57, 4294967292  ;;  %v7401_v58 = vld [vmem:[%s3945_s22 + $0x20] sm:$0xff]  }
 0x9d4   : > { %v3305_v48 = vpop.xlane.xlu0 %3304  ;;  %vm11715_vm4 = vcmp.eq.s32.totalorder %v9109_v4, 4294967292  ;;  %vm11716_vm10 = vcmp.eq.s32.totalorder %v9109_v4, 4294967293  ;;  %vm11717_vm8 = vcmp.eq.s32.totalorder %v9109_v4, 1  ;;  %vm11718_vm6 = vcmp.eq.s32.totalorder %v9109_v4, 4294967294 }
 0x9d5   : > { %7585 = vrcp.f32 %v3305_v48  ;;  %vm11719_vm5 = vcmp.eq.s32.totalorder %v9109_v4, 2  ;;  %vm11720_vm13 = vcmp.eq.s32.totalorder %v9109_v4, 4294967295 }
 0x9d6   : > { %3373 = vadd.xlane.f32.xlu1 %v3372_v51  ;;  %3350 = vadd.xlane.f32.xlu0 %v3349_v54  ;;  %v3605_v51 = vsel %vm1138_vm9, %v3587_v46, 0.0  ;;  %v3602_v54 = vsel %vm1138_vm9, %v3586_v14, 0.0 }
 0x9da   : > { %3382 = vadd.xlane.f32.xlu1 %v3381_v17  ;;  %3379 = vadd.xlane.f32.xlu0 %v3378_v7 }
 0x9de   : > { %3414 = vadd.xlane.f32.xlu1 %v3413_v47  ;;  %3411 = vadd.xlane.f32.xlu0 %v3410_v2 }
 0x9df   : > { %v7586_v33 = vpop.eup %7585 }
 0x9e0   : > { %v10348_v10 = vmul.f32 %v7586_v33, %v10113_v0  ;;  %v3330_v0 = vsel %vm11714_vm3, %v10258_v45, 0.0  ;;  %vm11721_vm3 = vcmp.eq.s32.totalorder %v9109_v4, 3  ;;  %v7400_v45 = vld [vmem:[%s3945_s22 + $0x18] sm:$0xff]  }
 0x9e1   : > { %v3346_v20 = vsel %vm1138_vm9, %v3330_v0, 0.0 }
 0x9e2   : > { %3446 = vadd.xlane.f32.xlu1 %v3445_v25  ;;  %3443 = vadd.xlane.f32.xlu0 %v3442_v60  ;;  %v3333_v3 = vsel %vm11715_vm4, %v10348_v10, 0.0  ;;  %v3365_v17 = vsel %vm11716_vm10, %v10348_v10, 0.0  ;;  %v3493_v7 = vsel %vm11717_vm8, %v10348_v10, 0.0  ;;  %v3397_v47 = vsel %vm11718_vm6, %v10348_v10, 0.0 }
 0x9e3   : > { %v3355_v19 = vsel %vm1138_vm9, %v3333_v3, 0.0  ;;  %v3387_v57 = vsel %vm1138_vm9, %v3365_v17, 0.0  ;;  %v3515_v21 = vsel %vm1138_vm9, %v3493_v7, 0.0  ;;  %v3525_v2 = vsel %vm11719_vm5, %v10348_v10, 0.0 }
 0x9e4   : > { %v3419_v40 = vsel %vm1138_vm9, %v3397_v47, 0.0  ;;  %v3547_v25 = vsel %vm1138_vm9, %v3525_v2, 0.0  ;;  %v3429_v60 = vsel %vm11720_vm13, %v10348_v10, 0.0  ;;  %v3557_v48 = vsel %vm11721_vm3, %v10348_v10, 0.0 }
 0x9e5   : > { %v3451_v29 = vsel %vm1138_vm9, %v3429_v60, 0.0  ;;  %v3579_v13 = vsel %vm1138_vm9, %v3557_v48, 0.0  ;;  %vm11722_vm4 = vcmp.eq.s32.totalorder %v9109_v4, 0  ;;  %vm11723_vm10 = vcmp.eq.s32.totalorder %v9109_v4, 4 }
 0x9e6   : > { %3478 = vadd.xlane.f32.xlu1 %v3477_v55  ;;  %3475 = vadd.xlane.f32.xlu0 %v3474_v62  ;;  %v3461_v55 = vsel %vm11722_vm4, %v10348_v10, 0.0  ;;  %v3589_v62 = vsel %vm11723_vm10, %v10348_v10, 0.0  ;;  %vm11724_vm8 = vcmp.eq.s32.totalorder %v9105_v63, 4294967292  ;;  %vm11725_vm6 = vcmp.eq.s32.totalorder %v9105_v63, 4294967293 }
 0x9e7   : > { %v3483_v61 = vsel %vm1138_vm9, %v3461_v55, 0.0  ;;  %v3611_v9 = vsel %vm1138_vm9, %v3589_v62, 0.0  ;;  %vm11726_vm5 = vcmp.eq.s32.totalorder %v9105_v63, 4294967294  ;;  %vm11727_vm13 = vcmp.eq.s32.totalorder %v9105_v63, 4294967295 }
 0x9e8   : > { %vm11728_vm3 = vcmp.eq.s32.totalorder %v9105_v63, 0  ;;  %vm11729_vm4 = vcmp.eq.s32.totalorder %v9105_v63, 1  ;;  %vm11730_vm10 = vcmp.eq.s32.totalorder %v9105_v63, 2 }
 0x9ea   : > { %3510 = vadd.xlane.f32.xlu1 %v3509_v1  ;;  %3507 = vadd.xlane.f32.xlu0 %v3506_v59 }
 0x9ee   : > { %3542 = vadd.xlane.f32.xlu1 %v3541_v24  ;;  %3539 = vadd.xlane.f32.xlu0 %v3538_v34 }
 0x9f2   : > { %3574 = vadd.xlane.f32.xlu1 %v3573_v12  ;;  %3571 = vadd.xlane.f32.xlu0 %v3570_v16  ;;  %v3371_v12 = vpop.xlane.xlu0 %3370 }
 0x9f3   : > { %v3302_v15 = vpop.xlane.xlu1 %3301 }
 0x9f4   : > { %7587 = vrcp.f32 %v3302_v15 }
 0x9f6   : > { %3606 = vadd.xlane.f32.xlu1 %v3605_v51  ;;  %3603 = vadd.xlane.f32.xlu0 %v3602_v54  ;;  %v3403_v51 = vpop.xlane.xlu0 %3402 }
 0x9f7   : > { %v3339_v43 = vpop.xlane.xlu1 %3338 }
 0x9fa   : > { %3347 = vadd.xlane.f32.xlu1 %v3346_v20  ;;  %3356 = vadd.xlane.f32.xlu0 %v3355_v19  ;;  %v3435_v0 = vpop.xlane.xlu0 %3434 }
 0x9fb   : > { %v3499_v16 = vpop.xlane.xlu1 %3498 }
 0x9fe   : > { %v7588_v35 = vpop.eup %7587  ;;  %3388 = vadd.xlane.f32.xlu1 %v3387_v57  ;;  %3516 = vadd.xlane.f32.xlu0 %v3515_v21  ;;  %v3467_v20 = vpop.xlane.xlu0 %3466 }
 0x9ff   : > { %v10381_v27 = vmul.f32 %v7588_v35, %v10136_v26  ;;  %v3531_v54 = vpop.xlane.xlu1 %3530  ;;  %v3615_v35 = vsel %vm2261_vm2, %v3339_v43, %v3371_v12 }
 0xa01   : > { %v3325_v26 = vpack.c.bf16 %v10348_v10, %v10381_v27  ;;  %v3332_v1 = vsel %vm11724_vm8, %v10381_v27, 0.0  ;;  %v3364_v59 = vsel %vm11725_vm6, %v10381_v27, 0.0  ;;  %v3396_v4 = vsel %vm11726_vm5, %v10381_v27, 0.0  ;;  %v7403_v10 = vld [vmem:[%s3945_s22 + $0x30] sm:$0xff]  }
 0xa02   : > { %3420 = vadd.xlane.f32.xlu1 %v3419_v40  ;;  %3548 = vadd.xlane.f32.xlu0 %v3547_v25  ;;  %v3352_v6 = vsel %vm1138_vm9, %v3332_v1, 0.0  ;;  %v3384_v5 = vsel %vm1138_vm9, %v3364_v59, 0.0  ;;  %v3416_v24 = vsel %vm1138_vm9, %v3396_v4, 0.0  ;;  %v3428_v34 = vsel %vm11727_vm13, %v10381_v27, 0.0 }
 0xa03   : > { %v3448_v52 = vsel %vm1138_vm9, %v3428_v34, 0.0  ;;  %v3460_v33 = vsel %vm11728_vm3, %v10381_v27, 0.0  ;;  %v3492_v14 = vsel %vm11729_vm4, %v10381_v27, 0.0  ;;  %v3563_v3 = vpop.xlane.xlu1 %3562  ;;  %v3623_v40 = vsel %vm2270_vm12, %v3615_v35, %v3403_v51 }
 0xa04   : > { %v3480_v46 = vsel %vm1138_vm9, %v3460_v33, 0.0  ;;  %v3512_v15 = vsel %vm1138_vm9, %v3492_v14, 0.0  ;;  %v3631_v25 = vsel %vm2279_vm11, %v3623_v40, %v3435_v0  ;;  %vm11731_vm8 = vcmask 56320  }
 0xa05   : > { %vm11732_vm6 = vmmov %vm11731_vm8  ;;  %vm11733_vm5 = vcmask 64512   ;;  %v3556_v12 = vsel %vm1761_vm1, %v10381_v27, 0.0  ;;  %vm11735_vm3 = vcmask 72704   ;;  %v3588_v51 = vsel %vm1817_vm14, %v10381_v27, 0.0 }
 0xa06   : > { %3452 = vadd.xlane.f32.xlu1 %v3451_v29  ;;  %3580 = vadd.xlane.f32.xlu0 %v3579_v13  ;;  %v3639_v13 = vsel %vm2288_vm7, %v3631_v25, %v3467_v20  ;;  %vm11734_vm13 = vmmov %vm11733_vm5 }
 0xa07   : > { %v3595_v19 = vpop.xlane.xlu1 %3594  ;;  %v3647_v59 = vsel %vm2297_vm0, %v3639_v13, %v3499_v16  ;;  %vm11736_vm4 = vmmov %vm11735_vm3 }
 0xa08   : > { %vm11737_vm14 = vmmov %vm11732_vm6 }
 0xa09   : > { %vm11738_vm1 = vmmov %vm11732_vm6 }
 0xa0a   : > { %3484 = vadd.xlane.f32.xlu1 %v3483_v61  ;;  %3612 = vadd.xlane.f32.xlu0 %v3611_v9  ;;  %v3524_v9 = vsel %vm11730_vm10, %v10381_v27, 0.0  ;;  %vm11739_vm10 = vmmov %vm11733_vm5 }
 0xa0b   : > { %v3544_v4 = vsel %vm1138_vm9, %v3524_v9, 0.0 }
 0xa0e   : > { %3353 = vadd.xlane.f32.xlu1 %v3352_v6  ;;  %3385 = vadd.xlane.f32.xlu0 %v3384_v5  ;;  %v3655_v5 = vsel %vm2306_vm15, %v3647_v59, %v3531_v54  ;;  %v3608_v54 = vsel %vm1138_vm9, %v3588_v51, 0.0 }
 0xa0f   : > { %v3663_v34 = vsel %vm11732_vm6, %v3655_v5, %v3563_v3  ;;  %vm11741_vm6 = vmmov %vm11735_vm3 }
 0xa10   : > { %v3671_v16 = vsel %vm11734_vm13, %v3663_v34, %v3595_v19  ;;  %vm11743_vm13 = vmmov %vm11738_vm1 }
 0xa12   : > { %3417 = vadd.xlane.f32.xlu0 %v3416_v24 }
 0xa16   : > { %3449 = vadd.xlane.f32.xlu0 %v3448_v52 }
 0xa1a   : > { %3481 = vadd.xlane.f32.xlu0 %v3480_v46  ;;  %v3576_v46 = vsel %vm1138_vm9, %v3556_v12, 0.0 }
 0xa1e   : > { %3513 = vadd.xlane.f32.xlu0 %v3512_v15 }
 0xa1f   : > { %3815 = vrot.lane.b32.xlu1 %v8651_v32, %s8019_s1 }
 0xa2f   : > { %v3336_v17 = vpop.xlane.xlu1 %3335  ;;  %v3368_v7 = vpop.xlane.xlu0 %3367 }
 0xa30   : > { %v3614_v48 = vsel %vm2261_vm2, %v3336_v17, %v3368_v7 }
 0xa33   : > { %v3400_v57 = vpop.xlane.xlu1 %3399  ;;  %v3528_v21 = vpop.xlane.xlu0 %3527 }
 0xa34   : > { %3813 = vrot.lane.b32.xlu0 %v8625_v42, %s8019_s1  ;;  %v3622_v29 = vsel %vm2270_vm12, %v3614_v48, %v3400_v57 }
 0xa37   : > { %v3432_v47 = vpop.xlane.xlu1 %3431  ;;  %v3560_v2 = vpop.xlane.xlu0 %3559 }
 0xa38   : > { %v3630_v55 = vsel %vm2279_vm11, %v3622_v29, %v3432_v47 }
 0xa3b   : > { %v3464_v32 = vpop.xlane.xlu1 %3463  ;;  %v3592_v60 = vpop.xlane.xlu0 %3591 }
 0xa3c   : > { %v3638_v42 = vsel %vm2288_vm7, %v3630_v55, %v3464_v32 }
 0xa3f   : > { %v3496_v62 = vpop.xlane.xlu1 %3495  ;;  %v3345_v61 = vpop.xlane.xlu0 %3344 }
 0xa40   : > { %v3646_v1 = vsel %vm2297_vm0, %v3638_v42, %v3496_v62 }
 0xa41   : > { %v3654_v6 = vsel %vm2306_vm15, %v3646_v1, %v3528_v21 }
 0xa42   : > { %v3662_v24 = vsel %vm11731_vm8, %v3654_v6, %v3560_v2  ;;  %vm11740_vm8 = vmmov %vm11733_vm5 }
 0xa43   : > { %v3377_v43 = vpop.xlane.xlu1 %3376  ;;  %3545 = vadd.xlane.f32.xlu1 %v3544_v4  ;;  %v3342_v52 = vpop.xlane.xlu0 %3341  ;;  %v3670_v33 = vsel %vm11733_vm5, %v3662_v24, %v3592_v60  ;;  %vm11742_vm5 = vmmov %vm11735_vm3 }
 0xa44   : > { %6900 = vmatprep.mubr.msk.f32.mxu1 %vm11735_vm3, %v3670_v33  ;;  %v3617_v32 = vsel %vm2261_vm2, %v3345_v61, %v3377_v43  ;;  %vm11744_vm3 = vmmov %vm11738_vm1 }
 0xa45   : > { %6901 = vmatmul.mubr.msk.f32.vlgmr.msra.gmra.mrb[40].mxu1 %vm11736_vm4, %v3671_v16  ;;  %vm11745_vm4 = vmmov %vm11740_vm8 }
 0xa46   : > { %6913 = vmatpush3.bf16.msra.mxu1 %v10076_v18 }
 0xa47   : > { %v3409_v14 = vpop.xlane.xlu1 %3408  ;;  %3577 = vadd.xlane.f32.xlu1 %v3576_v46  ;;  %v3406_v15 = vpop.xlane.xlu0 %3405 }
 0xa48   : > { %v3625_v48 = vsel %vm2270_vm12, %v3617_v32, %v3409_v14 }
 0xa4b   : > { %v3441_v0 = vpop.xlane.xlu1 %3440  ;;  %3609 = vadd.xlane.f32.xlu1 %v3608_v54  ;;  %v3438_v3 = vpop.xlane.xlu0 %3437 }
 0xa4c   : > { %v3633_v13 = vsel %vm2279_vm11, %v3625_v48, %v3441_v0 }
 0xa4f   : > { %v3473_v20 = vpop.xlane.xlu1 %3472  ;;  %v3470_v19 = vpop.xlane.xlu0 %3469 }
 0xa50   : > { %v3641_v62 = vsel %vm2288_vm7, %v3633_v13, %v3473_v20 }
 0xa53   : > { %v3505_v17 = vpop.xlane.xlu1 %3504  ;;  %v3502_v7 = vpop.xlane.xlu0 %3501 }
 0xa54   : > { %v3649_v1 = vsel %vm2297_vm0, %v3641_v62, %v3505_v17 }
 0xa57   : > { %v3537_v57 = vpop.xlane.xlu1 %3536  ;;  %v3534_v18 = vpop.xlane.xlu0 %3533 }
 0xa58   : > { %v3657_v59 = vsel %vm2306_vm15, %v3649_v1, %v3537_v57 }
 0xa5b   : > { %v3569_v21 = vpop.xlane.xlu1 %3568  ;;  %v3566_v35 = vpop.xlane.xlu0 %3565 }
 0xa5c   : > { %3817 = vrot.lane.b32.xlu1 %v8648_v28, %s8019_s1  ;;  %v3665_v5 = vsel %vm11738_vm1, %v3657_v59, %v3569_v21  ;;  %vm11747_vm1 = vmmov %vm11742_vm5 }
 0xa5f   : > { %v3601_v47 = vpop.xlane.xlu1 %3600  ;;  %v3598_v2 = vpop.xlane.xlu0 %3597 }
 0xa60   : > { %v3673_v43 = vsel %vm11740_vm8, %v3665_v5, %v3601_v47  ;;  %vm11749_vm8 = vmmov %vm11744_vm3 }
 0xa63   : > { %v3374_v63 = vpop.xlane.xlu1 %3373  ;;  %v3351_v40 = vpop.xlane.xlu0 %3350 }
 0xa64   : > { %v3616_v25 = vsel %vm2261_vm2, %v3342_v52, %v3374_v63 }
 0xa65   : > { %v3624_v60 = vsel %vm2270_vm12, %v3616_v25, %v3406_v15 }
 0xa66   : > { %v3632_v29 = vsel %vm2279_vm11, %v3624_v60, %v3438_v3 }
 0xa67   : > { %v3640_v55 = vsel %vm2288_vm7, %v3632_v29, %v3470_v19  ;;  %v3383_v42 = vpop.xlane.xlu1 %3382  ;;  %v3380_v28 = vpop.xlane.xlu0 %3379 }
 0xa68   : > { %v3648_v9 = vsel %vm2297_vm0, %v3640_v55, %v3502_v7  ;;  %v3619_v57 = vsel %vm2261_vm2, %v3351_v40, %v3383_v42 }
 0xa69   : > { %v3656_v61 = vsel %vm2306_vm15, %v3648_v9, %v3534_v18 }
 0xa6a   : > { %v3664_v6 = vsel %vm11737_vm14, %v3656_v61, %v3566_v35  ;;  %vm11746_vm14 = vmmov %vm11745_vm4 }
 0xa6b   : > { %v3415_v4 = vpop.xlane.xlu1 %3414  ;;  %v3412_v24 = vpop.xlane.xlu0 %3411  ;;  %v3672_v34 = vsel %vm11739_vm10, %v3664_v6, %v3598_v2  ;;  %vm11748_vm10 = vmmov %vm11747_vm1 }
 0xa6c   : > { %6903 = vmatprep.mubr.msk.f32.mxu1 %vm11741_vm6, %v3672_v34  ;;  %v3627_v21 = vsel %vm2270_vm12, %v3619_v57, %v3415_v4  ;;  %vm11750_vm6 = vmmov %vm11745_vm4 }
 0xa6d   : > { %6904 = vmatmul.mubr.msk.f32.gmra.mrb[42].mxu1 %vm11742_vm5, %v3673_v43  ;;  %vm11751_vm5 = vmmov %vm11744_vm3 }
 0xa6f   : > { %v3447_v52 = vpop.xlane.xlu1 %3446  ;;  %v3444_v33 = vpop.xlane.xlu0 %3443 }
 0xa70   : > { %v3635_v47 = vsel %vm2279_vm11, %v3627_v21, %v3447_v52 }
 0xa73   : > { %v3479_v12 = vpop.xlane.xlu1 %3478  ;;  %v3476_v16 = vpop.xlane.xlu0 %3475 }
 0xa74   : > { %v3643_v32 = vsel %vm2288_vm7, %v3635_v47, %v3479_v12 }
 0xa77   : > { %v3511_v46 = vpop.xlane.xlu1 %3510  ;;  %v3508_v14 = vpop.xlane.xlu0 %3507 }
 0xa78   : > { %v3651_v48 = vsel %vm2297_vm0, %v3643_v32, %v3511_v46 }
 0xa7b   : > { %v3543_v15 = vpop.xlane.xlu1 %3542  ;;  %v3540_v51 = vpop.xlane.xlu0 %3539 }
 0xa7c   : > { %v3659_v29 = vsel %vm2306_vm15, %v3651_v48, %v3543_v15 }
 0xa7f   : > { %v3575_v54 = vpop.xlane.xlu1 %3574  ;;  %v3572_v0 = vpop.xlane.xlu0 %3571 }
 0xa80   : > { %v3667_v55 = vsel %vm11744_vm3, %v3659_v29, %v3575_v54  ;;  %vm11753_vm3 = vmmov %vm11747_vm1 }
 0xa83   : > { %v3607_v3 = vpop.xlane.xlu1 %3606  ;;  %v3604_v20 = vpop.xlane.xlu0 %3603 }
 0xa84   : > { %v3675_v9 = vsel %vm11746_vm14, %v3667_v55, %v3607_v3 }
 0xa87   : > { %v3348_v19 = vpop.xlane.xlu1 %3347  ;;  %v3357_v17 = vpop.xlane.xlu0 %3356 }
 0xa88   : > { %v3618_v7 = vsel %vm2261_vm2, %v3348_v19, %v3380_v28 }
 0xa89   : > { %v3626_v18 = vsel %vm2270_vm12, %v3618_v7, %v3412_v24 }
 0xa8a   : > { %v3634_v35 = vsel %vm2279_vm11, %v3626_v18, %v3444_v33 }
 0xa8b   : > { %v3642_v2 = vsel %vm2288_vm7, %v3634_v35, %v3476_v16  ;;  %v3389_v63 = vpop.xlane.xlu1 %3388  ;;  %v3517_v25 = vpop.xlane.xlu0 %3516 }
 0xa8c   : > { %v3650_v60 = vsel %vm2297_vm0, %v3642_v2, %v3508_v14  ;;  %v3621_v59 = vsel %vm2261_vm2, %v3357_v17, %v3389_v63 }
 0xa8d   : > { %v3658_v40 = vsel %vm2306_vm15, %v3650_v60, %v3540_v51 }
 0xa8e   : > { %v3666_v13 = vsel %vm11743_vm13, %v3658_v40, %v3572_v0  ;;  %vm11752_vm13 = vmmov %vm11745_vm4 }
 0xa8f   : > { %v3421_v42 = vpop.xlane.xlu1 %3420  ;;  %v3549_v28 = vpop.xlane.xlu0 %3548  ;;  %v3674_v62 = vsel %vm11745_vm4, %v3666_v13, %v3604_v20  ;;  %v7404_v13 = vld [vmem:[%s3945_s22 + $0x38] sm:$0xff]  }
 0xa90   : > { %6906 = vmatprep.mubr.msk.f32.mxu1 %vm11747_vm1, %v3674_v62  ;;  %v3629_v6 = vsel %vm2270_vm12, %v3621_v59, %v3421_v42 }
 0xa91   : > { %6907 = vmatmul.mubr.msk.f32.gmra.mrb[44].mxu1 %vm11748_vm10, %v3675_v9 }
 0xa93   : > { %v3453_v1 = vpop.xlane.xlu1 %3452  ;;  %v3581_v61 = vpop.xlane.xlu0 %3580 }
 0xa94   : > { %v3637_v5 = vsel %vm2279_vm11, %v3629_v6, %v3453_v1 }
 0xa97   : > { %v3485_v4 = vpop.xlane.xlu1 %3484  ;;  %v3613_v24 = vpop.xlane.xlu0 %3612 }
 0xa98   : > { %v3645_v34 = vsel %vm2288_vm7, %v3637_v5, %v3485_v4 }
 0xa99   : > { %v3653_v43 = vsel %vm2297_vm0, %v3645_v34, %v3517_v25  ;;  %v3322_v25 = vpack.c.bf16 %v10118_v37, %v10161_v39 }
 0xa9a   : > { %v3661_v52 = vsel %vm2306_vm15, %v3653_v43, %v3549_v28 }
 0xa9b   : > { %v3669_v33 = vsel %vm11749_vm8, %v3661_v52, %v3581_v61  ;;  %v3386_v12 = vpop.xlane.xlu0 %3385  ;;  %v3354_v51 = vpop.xlane.xlu1 %3353 }
 0xa9c   : > { %v3677_v16 = vsel %vm11750_vm6, %v3669_v33, %v3613_v24  ;;  %v3620_v19 = vsel %vm2261_vm2, %v3354_v51, %v3386_v12  ;;  %vm11754_vm2 = vmmov %vm11747_vm1 }
 0xa9f   : > { %v3418_v46 = vpop.xlane.xlu0 %3417  ;;  %v3816_v3 = vpop.permute.xlu1 %3815 }
 0xaa0   : > { %v3628_v17 = vsel %vm2270_vm12, %v3620_v19, %v3418_v46 }
 0xaa3   : > { %v3450_v14 = vpop.xlane.xlu0 %3449 }
 0xaa4   : > { %v3636_v7 = vsel %vm2279_vm11, %v3628_v17, %v3450_v14 }
 0xaa7   : > { %v3482_v15 = vpop.xlane.xlu0 %3481 }
 0xaa8   : > { %v3644_v18 = vsel %vm2288_vm7, %v3636_v7, %v3482_v15 }
 0xaab   : > { %v3514_v54 = vpop.xlane.xlu0 %3513 }
 0xaac   : > { %v3652_v21 = vsel %vm2297_vm0, %v3644_v18, %v3514_v54  ;;  %vm4873_vm0 = vcmp.ge.s32.totalorder %v8443_v8, 63 }
 0xaaf   : > { %v3814_v0 = vpop.permute.xlu0 %3813 }
 0xab0   : > { %6914 = vmatprep.subr.bf16.mxu1 %v3814_v0 }
 0xab1   : > { %6915 = vmatpush3.bf16.msra.mxu1 %v3814_v0 }
 0xab2   : > { %6916 = vmatprep.subr.bf16.mxu1 %v3816_v3 }
 0xab5   : > { %6917 = vmatpush3.bf16.msra.mxu1 %v3816_v3 }
 0xad0   : > { %v3546_v20 = vpop.xlane.xlu1 %3545 }
 0xad1   : > { %v3660_v35 = vsel %vm2306_vm15, %v3652_v21, %v3546_v20 }
 0xad4   : > { %v3578_v57 = vpop.xlane.xlu1 %3577 }
 0xad5   : > { %v3668_v47 = vsel %vm11751_vm5, %v3660_v35, %v3578_v57 }
 0xad8   : > { %v3610_v2 = vpop.xlane.xlu1 %3609 }
 0xad9   : > { %v3676_v63 = vsel %vm11752_vm13, %v3668_v47, %v3610_v2 }
 0xada   : > { %6909 = vmatprep.mubr.msk.f32.mxu1 %vm11753_vm3, %v3676_v63 }
 0xadb   : > { %6910 = vmatmul.mubr.msk.f32.gmra.mrb[46].mxu1 %vm11754_vm2, %v3677_v16 }
 0xadc   : > { %v3818_v32 = vpop.permute.xlu1 %3817  ;;  %6920 = vmatprep.mubr.msk.bf16.mxu1 %vm1138_vm9, %v3322_v25 }
 0xadd   : > { %6918 = vmatprep.subr.bf16.mxu1 %v3818_v32 }
 0xade   : > { %6919 = vmatpush3.bf16.msra.mxu1 %v3818_v32 }
 0xae1   : > { %6921 = vmatmul.mubr.msk.bf16.vlgmr.msra.gmra.mrb[48].mxu1 %vm1138_vm9, %v3323_v36  ;;  %v7399_v36 = vld [vmem:[%s3945_s22 + $0x10] sm:$0xff]  }
 0xae2   : > { %6924 = vmatprep.mubr.msk.bf16.mxu1 %vm1138_vm9, %v3324_v23  ;;  %6932 = vmatprep.subr.bf16.mxu0 %v7399_v36  ;;  %v7402_v23 = vld [vmem:[%s3945_s22 + $0x28] sm:$0xff]   ;;  %s4989_s22 = scalar_lea.vmem %s11767_s21, %s7971_s27 }
 0xae3   : > { %6933 = vmatpush3.bf16.msra.mxu0 %v7399_v36 }
 0xae4   : > { %6934 = vmatprep.subr.bf16.mxu0 %v7400_v45 }
 0xae7   : > { %6935 = vmatpush3.bf16.msra.mxu0 %v7400_v45  ;;  %v7621_v45 = vld [vmem:[#allocation2] sm:$0xff] }
 0xae8   : > { %6936 = vmatprep.subr.bf16.mxu0 %v7401_v58 }
 0xae9   : > { %6925 = vmatmul.mubr.msk.bf16.gmra.mrb[52].mxu1 %vm1138_vm9, %v3325_v26 }
 0xaea   : > { %4358 = vmatprep.mubr.bf16.mxu1 %v11508_v22 }
 0xaeb   : > { %6937 = vmatpush3.bf16.msra.mxu0 %v7401_v58 }
 0xaec   : > { %6938 = vmatprep.subr.bf16.mxu0 %v7402_v23 }
 0xaef   : > { %6939 = vmatpush3.bf16.msra.mxu0 %v7402_v23  ;;  %v7622_v23 = vld [vmem:[#allocation2 + $0x8] sm:$0xff] }
 0xaf0   : > { %6940 = vmatprep.subr.bf16.mxu0 %v7403_v10 }
 0xaf3   : > { %6941 = vmatpush3.bf16.msra.mxu0 %v7403_v10 }
 0xaf4   : > { %6942 = vmatprep.subr.bf16.mxu0 %v7404_v13 }
 0xaf7   : > { %6943 = vmatpush3.bf16.msra.mxu0 %v7404_v13 }
 0xb18   : > { %v6902_v37 = vpop.f32.mrb[40].mxu1 }
 0xb19   : > { %v3768_v39 = vpop.f32.mrb[41].mxu1 }
 0xb40   : > { %v6905_v60 = vpop.f32.mrb[42].mxu1 }
 0xb41   : > { %v3778_v48 = vpop.f32.mrb[43].mxu1 }
 0xb64   : > { %v6908_v27 = vpop.f32.mrb[44].mxu1 }
 0xb65   : > { %v3788_v26 = vpop.f32.mrb[45].mxu1 }
 0xbae   : > { %v6911_v40 = vpop.f32.mrb[46].mxu1 }
 0xbaf   : > { %v3798_v29 = vpop.f32.mrb[47].mxu1 }
 0xbb4   : > { %v6922_v55 = vpop.f32.mrb[48].mxu1 }
 0xbb5   : > { %v3878_v42 = vadd.f32 %v6922_v55, %v3778_v48  ;;  %v3869_v28 = vpop.f32.mrb[49].mxu1 }
 0xbb6   : > { %v3870_v62 = vadd.f32 %v3869_v28, %v3768_v39  ;;  %v6923_v9 = vpop.f32.mrb[50].mxu1  ;;  %v7624_v28 = vld [vmem:[#allocation2 + $0x18] sm:$0xff] }
 0xbb7   : > { %v3881_v1 = vadd.f32 %v6923_v9, %v6905_v60  ;;  %v3872_v61 = vpop.f32.mrb[51].mxu1  ;;  %v6312_v60 = vld [vmem:[%s3962_s15] ss:$0 sm:$0xff] }
 0xbb8   : > { %v3873_v59 = vadd.f32 %v6902_v37, %v3872_v61 }
 0xbb9   : > { %v7350_v6 = vpack.i.bf16 %v3881_v1, %v3878_v42  ;;  %v7625_v1 = vld [vmem:[#allocation2 + $0x20] sm:$0xff] }
 0xbba   : > { %v7345_v5 = vpack.i.bf16 %v3873_v59, %v3870_v62 }
 0xbbb   : > { %7351 = vrot.lane.b32.xlu1 %v7350_v6, %s8019_s1  ;;  %v7626_v6 = vld [vmem:[#allocation2 + $0x30] sm:$0xff] }
 0xbbc   : > { %v6926_v4 = vpop.f32.mrb[52].mxu1  ;;  %7346 = vrot.lane.b32.xlu0 %v7345_v5, %s8019_s1 }
 0xbbd   : > { %v3894_v24 = vadd.f32 %v6926_v4, %v3798_v29  ;;  %v3885_v34 = vpop.f32.mrb[53].mxu1 }
 0xbbe   : > { %v3886_v43 = vadd.f32 %v3885_v34, %v3788_v26  ;;  %v6927_v52 = vpop.f32.mrb[54].mxu1 }
 0xbbf   : > { %v3897_v33 = vadd.f32 %v6927_v52, %v6911_v40  ;;  %v3888_v12 = vpop.f32.mrb[55].mxu1 }
 0xbc0   : > { %v3889_v16 = vadd.f32 %v6908_v27, %v3888_v12  ;;  %v7407_v12 = vld [vmem:[%s10558_s0 + $0x4] ss:$8 sps:$4 sm:$0xff]  }
 0xbc1   : > { %v7360_v46 = vpack.i.bf16 %v3897_v33, %v3894_v24  ;;  %v7627_v24 = vld [vmem:[#allocation2 + $0x28] sm:$0xff]  ;;  %4326 = vmatprep.subr.bf16.mxu1 %v7407_v12  ;;  %v7450_v12 = vld [vmem:[%s10558_s0 + $0xf0] ss:$8 sps:$4 sm:$0xff]  }
 0xbc2   : > { %v7355_v14 = vpack.i.bf16 %v3889_v16, %v3886_v43  ;;  %v7628_v43 = vld [vmem:[#allocation2 + $0x38] sm:$0xff]  ;;  %v7405_v33 = vld [vmem:[%s10558_s0] ss:$8 sps:$4 sm:$0xff]  }
 0xbc3   : > { %7361 = vrot.lane.b32.xlu1 %v7360_v46, %s8019_s1  ;;  %v7408_v16 = vld [vmem:[%s10558_s0 + $0x80] ss:$8 sps:$4 sm:$0xff]   ;;  %v7410_v46 = vld [vmem:[%s10558_s0 + $0x84] ss:$8 sps:$4 sm:$0xff]   ;;  %4327 = vmatpush1.bf16.msra.mxu1 %v7405_v33  ;;  %v7447_v33 = vld [vmem:[%s10558_s0 + $0x70] ss:$8 sps:$4 sm:$0xff]  }
 0xbc4   : > { %7356 = vrot.lane.b32.xlu0 %v7355_v14, %s8019_s1  ;;  %v7411_v14 = vld [vmem:[%s10558_s0 + $0x10] ss:$8 sps:$4 sm:$0xff]   ;;  %4571 = vmatprep.subr.bf16.mxu0 %v7410_v46 }
 0xc2d   : > { %v7352_v15 = vpop.permute.xlu1 %7351 }
 0xc2e   : > { %v7354_v51 = vunpack.i.h.bf16 %v7352_v15  ;;  %v7353_v54 = vunpack.i.l.bf16 %v7352_v15  ;;  %v7347_v0 = vpop.permute.xlu0 %7346  ;;  %v7413_v15 = vld [vmem:[%s10558_s0 + $0x14] ss:$8 sps:$4 sm:$0xff]  }
 0xc2f   : > { %v7349_v3 = vunpack.i.h.bf16 %v7347_v0  ;;  %v7348_v20 = vunpack.i.l.bf16 %v7347_v0  ;;  %4328 = vmatprep.subr.bf16.mxu1 %v7413_v15 }
 0xc30   : > { %v3935_v19 = vsel %vm1138_vm9, %v9686_v41, %v7354_v51  ;;  %v3934_v17 = vsel %vm1138_vm9, %v9682_v53, %v7353_v54  ;;  %v7414_v51 = vld [vmem:[%s10558_s0 + $0x90] ss:$8 sps:$4 sm:$0xff]   ;;  %v7416_v54 = vld [vmem:[%s10558_s0 + $0x94] ss:$8 sps:$4 sm:$0xff]   ;;  %4329 = vmatpush1.bf16.msra.mxu1 %v7411_v14 }
 0xc31   : > { %v3941_v7 = vpack.c.bf16 %v3935_v19, %v3934_v17  ;;  %v3932_v57 = vsel %vm1138_vm9, %v9684_v44, %v7348_v20  ;;  %v3933_v18 = vsel %vm1138_vm9, %v9688_v11, %v7349_v3 }
 0xc32   : > { %v3940_v21 = vpack.c.bf16 %v3933_v18, %v3932_v57 }
 0xc34   : > { %6944 = vmatprep.mubr.bf16.mxu0 %v3940_v21 }
 0xc35   : > { %v7362_v35 = vpop.permute.xlu1 %7361  ;;  %6945 = vmatmul.mubr.bf16.vlgmr.msra.gmra.mrb[32].mxu0 %v3941_v7 }
 0xc36   : > { %v7364_v47 = vunpack.i.h.bf16 %v7362_v35  ;;  %v7363_v2 = vunpack.i.l.bf16 %v7362_v35  ;;  %v7357_v63 = vpop.permute.xlu0 %7356  ;;  %4572 = vmatpush1.bf16.msra.mxu0 %v7408_v16  ;;  %v7455_v16 = vld [vmem:[%s10558_s0 + $0x104] ss:$8 sps:$4 sm:$0xff]  }
 0xc37   : > { %v7359_v25 = vunpack.i.h.bf16 %v7357_v63  ;;  %v7358_v41 = vunpack.i.l.bf16 %v7357_v63  ;;  %4573 = vmatprep.subr.bf16.mxu0 %v7416_v54 }
 0xc38   : > { %v3938_v53 = vsel %vm1138_vm9, %v9690_v30, %v7363_v2  ;;  %v3939_v32 = vsel %vm1138_vm9, %v9694_v49, %v7364_v47 }
 0xc39   : > { %v3936_v44 = vsel %vm1138_vm9, %v9692_v38, %v7358_v41  ;;  %v3937_v11 = vsel %vm1138_vm9, %v9696_v50, %v7359_v25  ;;  %v3943_v37 = vpack.c.bf16 %v3939_v32, %v3938_v53  ;;  %v7623_v50 = vld [vmem:[#allocation2 + $0x10] sm:$0xff] }
 0xc3a   : > { %v3942_v39 = vpack.c.bf16 %v3937_v11, %v3936_v44  ;;  %4574 = vmatpush1.bf16.msra.mxu0 %v7414_v51 }
 0xc3c   : > { %6948 = vmatprep.mubr.bf16.mxu0 %v3942_v39 }
 0xc3d   : > { %6949 = vmatmul.mubr.bf16.gmra.mrb[36].mxu0 %v3943_v37 }
 0xc3e   : > { %4603 = vmatprep.mubr.bf16.mxu0 %v11508_v22 }
 0xd08   : > { %v6946_v48 = vpop.f32.mrb[32].mxu0 }
 0xd09   : > { %v4052_v56 = vpop.f32.mrb[33].mxu0  ;;  %v4061_v49 = vadd.f32 %v6946_v48, %v6312_v60 }
 0xd0a   : > { %v4053_v30 = vadd.f32 %v6312_v60, %v4052_v56  ;;  %v6947_v31 = vpop.f32.mrb[34].mxu0 }
 0xd0b   : > { %v4055_v36 = vpop.f32.mrb[35].mxu0  ;;  %v4085_v27 = vadd.f32 %v7623_v50, %v4061_v49  ;;  %v4064_v26 = vadd.f32 %v6947_v31, %v6312_v60  ;;  %v7422_v50 = vld [vmem:[%s10558_s0 + $0xa4] ss:$8 sps:$4 sm:$0xff]  }
 0xd0c   : > { %v4083_v58 = vadd.f32 %v7621_v45, %v4053_v30  ;;  %v4056_v38 = vadd.f32 %v6312_v60, %v4055_v36  ;;  %4575 = vmatprep.subr.bf16.mxu0 %v7422_v50 }
 0xd0d   : > { %v4086_v62 = vadd.f32 %v7624_v28, %v4064_v26  ;;  %v7420_v26 = vld [vmem:[%s10558_s0 + $0xa0] ss:$8 sps:$4 sm:$0xff]   ;;  %v7434_v28 = vld [vmem:[%s10558_s0 + $0xc4] ss:$8 sps:$4 sm:$0xff]  }
 0xd0e   : > { %v4084_v10 = vadd.f32 %v7622_v23, %v4056_v38  ;;  %4095 = vadd.xlane.f32.xlu0 %v4083_v58  ;;  %4576 = vmatpush1.bf16.msra.mxu0 %v7420_v26 }
 0xd10   : > { %v6950_v40 = vpop.f32.mrb[36].mxu0  ;;  %4097 = vadd.xlane.f32.xlu1 %v4084_v10 }
 0xd11   : > { %v4068_v29 = vpop.f32.mrb[37].mxu0  ;;  %v4077_v9 = vadd.f32 %v6950_v40, %v6312_v60  ;;  %v7425_v40 = vld [vmem:[%s10558_s0 + $0x34] ss:$8 sps:$4 sm:$0xff]  }
 0xd12   : > { %v4069_v13 = vadd.f32 %v6312_v60, %v4068_v29  ;;  %v6951_v55 = vpop.f32.mrb[38].mxu0  ;;  %4099 = vadd.xlane.f32.xlu0 %v4085_v27  ;;  %v7428_v29 = vld [vmem:[%s10558_s0 + $0xb4] ss:$8 sps:$4 sm:$0xff]  }
 0xd13   : > { %v4071_v42 = vpop.f32.mrb[39].mxu0  ;;  %v4089_v5 = vadd.f32 %v7626_v6, %v4077_v9  ;;  %v4080_v4 = vadd.f32 %v6951_v55, %v6312_v60  ;;  %v7426_v55 = vld [vmem:[%s10558_s0 + $0xb0] ss:$8 sps:$4 sm:$0xff]   ;;  %4577 = vmatprep.subr.bf16.mxu0 %v7428_v29  ;;  %v7432_v9 = vld [vmem:[%s10558_s0 + $0xc0] ss:$8 sps:$4 sm:$0xff]  }
 0xd14   : > { %v4087_v61 = vadd.f32 %v7625_v1, %v4069_v13  ;;  %v4072_v59 = vadd.f32 %v6312_v60, %v4071_v42  ;;  %v7423_v13 = vld [vmem:[%s10558_s0 + $0x30] ss:$8 sps:$4 sm:$0xff]   ;;  %v7431_v42 = vld [vmem:[%s10558_s0 + $0x44] ss:$8 sps:$4 sm:$0xff]   ;;  %4578 = vmatpush1.bf16.msra.mxu0 %v7426_v55  ;;  %v7437_v1 = vld [vmem:[%s10558_s0 + $0x54] ss:$8 sps:$4 sm:$0xff]  }
 0xd15   : > { %v4090_v52 = vadd.f32 %v7628_v43, %v4080_v4  ;;  %4579 = vmatprep.subr.bf16.mxu0 %v7434_v28  ;;  %v7438_v6 = vld [vmem:[%s10558_s0 + $0xd0] ss:$8 sps:$4 sm:$0xff]   ;;  %v7446_v4 = vld [vmem:[%s10558_s0 + $0xe4] ss:$8 sps:$4 sm:$0xff]   ;;  %v7449_v43 = vld [vmem:[%s10558_s0 + $0x74] ss:$8 sps:$4 sm:$0xff]  }
 0xd16   : > { %4103 = vadd.xlane.f32.xlu1 %v4087_v61  ;;  %4101 = vadd.xlane.f32.xlu0 %v4086_v62  ;;  %v4088_v34 = vadd.f32 %v7627_v24, %v4072_v59  ;;  %v7435_v59 = vld [vmem:[%s10558_s0 + $0x50] ss:$8 sps:$4 sm:$0xff]   ;;  %v7441_v24 = vld [vmem:[%s10558_s0 + $0x60] ss:$8 sps:$4 sm:$0xff]  }
 0xd18   : > { %4580 = vmatpush1.bf16.msra.mxu0 %v7432_v9 }
 0xd1a   : > { %4107 = vadd.xlane.f32.xlu1 %v4089_v5  ;;  %4105 = vadd.xlane.f32.xlu0 %v4088_v34 }
 0xd1e   : > { %4109 = vadd.xlane.f32.xlu0 %v4090_v52 }
 0xd9b   : > { %v4096_v0 = vpop.xlane.xlu0 %4095 }
 0xd9c   : > { %v4112_v3 = vmul.f32 0.0078125, %v4096_v0 }
 0xd9d   : > { %v4098_v20 = vpop.xlane.xlu1 %4097 }
 0xd9e   : > { %v10570_v19 = vsub.f32 %v4083_v58, %v4112_v3  ;;  %v4113_v17 = vmul.f32 0.0078125, %v4098_v20 }
 0xd9f   : > { %v4100_v7 = vpop.xlane.xlu0 %4099 }
 0xda0   : > { %v10572_v57 = vsub.f32 %v4084_v10, %v4113_v17  ;;  %v4114_v18 = vmul.f32 0.0078125, %v4100_v7  ;;  %v4128_v21 = vmul.f32 %v10570_v19, %v10570_v19  ;;  %v7419_v10 = vld [vmem:[%s10558_s0 + $0x24] ss:$8 sps:$4 sm:$0xff]  }
 0xda1   : > { %4330 = vmatprep.subr.bf16.mxu1 %v7419_v10 }
 0xda2   : > { %v10576_v35 = vsub.f32 %v4085_v27, %v4114_v18  ;;  %4136 = vadd.xlane.f32.xlu1 %v4128_v21  ;;  %v4129_v47 = vmul.f32 %v10572_v57, %v10572_v57  ;;  %v7417_v27 = vld [vmem:[%s10558_s0 + $0x20] ss:$8 sps:$4 sm:$0xff]  }
 0xda3   : > { %v4104_v2 = vpop.xlane.xlu1 %4103  ;;  %v4102_v63 = vpop.xlane.xlu0 %4101  ;;  %4331 = vmatpush1.bf16.msra.mxu1 %v7417_v27 }
 0xda4   : > { %v4116_v25 = vmul.f32 0.0078125, %v4104_v2  ;;  %v4115_v41 = vmul.f32 0.0078125, %v4102_v63  ;;  %4138 = vadd.xlane.f32.xlu0 %v4129_v47  ;;  %v4130_v53 = vmul.f32 %v10576_v35, %v10576_v35  ;;  %4332 = vmatprep.subr.bf16.mxu1 %v7425_v40 }
 0xda6   : > { %v10582_v32 = vsub.f32 %v4087_v61, %v4116_v25  ;;  %v10584_v44 = vsub.f32 %v4086_v62, %v4115_v41  ;;  %4140 = vadd.xlane.f32.xlu1 %v4130_v53  ;;  %v7429_v62 = vld [vmem:[%s10558_s0 + $0x40] ss:$8 sps:$4 sm:$0xff]   ;;  %v7440_v61 = vld [vmem:[%s10558_s0 + $0xd4] ss:$8 sps:$4 sm:$0xff]  }
 0xda7   : > { %v4108_v11 = vpop.xlane.xlu1 %4107  ;;  %v4106_v37 = vpop.xlane.xlu0 %4105  ;;  %4333 = vmatpush1.bf16.msra.mxu1 %v7423_v13  ;;  %4581 = vmatprep.subr.bf16.mxu0 %v7440_v61 }
 0xda8   : > { %v4118_v39 = vmul.f32 0.0078125, %v4108_v11  ;;  %v4117_v60 = vmul.f32 0.0078125, %v4106_v37  ;;  %v4132_v48 = vmul.f32 %v10582_v32, %v10582_v32  ;;  %v4131_v56 = vmul.f32 %v10584_v44, %v10584_v44  ;;  %4334 = vmatprep.subr.bf16.mxu1 %v7431_v42  ;;  %4582 = vmatpush1.bf16.msra.mxu0 %v7438_v6  ;;  %v10632_v37 = vld [vmem:[%s4091_s11] ss:$0 sm:$0xff]  ;;  %v11756_v42 = vld [vmem:[#allocation39_spill] sm:$0xff] }
 0xda9   : > { %4583 = vmatprep.subr.bf16.mxu0 %v7446_v4 }
 0xdaa   : > { %v10590_v30 = vsub.f32 %v4089_v5, %v4118_v39  ;;  %v10592_v31 = vsub.f32 %v4088_v34, %v4117_v60  ;;  %4144 = vadd.xlane.f32.xlu1 %v4132_v48  ;;  %4142 = vadd.xlane.f32.xlu0 %v4131_v56  ;;  %v7443_v5 = vld [vmem:[%s10558_s0 + $0x64] ss:$8 sps:$4 sm:$0xff]   ;;  %v7444_v34 = vld [vmem:[%s10558_s0 + $0xe0] ss:$8 sps:$4 sm:$0xff]  }
 0xdab   : > { %v4110_v36 = vpop.xlane.xlu0 %4109  ;;  %4335 = vmatpush1.bf16.msra.mxu1 %v7429_v62 }
 0xdac   : > { %v4119_v49 = vmul.f32 0.0078125, %v4110_v36  ;;  %v4134_v45 = vmul.f32 %v10590_v30, %v10590_v30  ;;  %v4133_v58 = vmul.f32 %v10592_v31, %v10592_v31  ;;  %4336 = vmatprep.subr.bf16.mxu1 %v7437_v1  ;;  %4584 = vmatpush1.bf16.msra.mxu0 %v7444_v34  ;;  %v7453_v1 = vld [vmem:[%s10558_s0 + $0x100] ss:$8 sps:$4 sm:$0xff]   ;;  %v7456_v34 = vld [vmem:[%s10558_s0 + $0x110] ss:$8 sps:$4 sm:$0xff]  }
 0xdae   : > { %v10598_v38 = vsub.f32 %v4090_v52, %v4119_v49  ;;  %4148 = vadd.xlane.f32.xlu1 %v4134_v45  ;;  %4146 = vadd.xlane.f32.xlu0 %v4133_v58  ;;  %v7452_v52 = vld [vmem:[%s10558_s0 + $0xf4] ss:$8 sps:$4 sm:$0xff]   ;;  %v10635_v45 = vld [vmem:[%s4093_s14] ss:$0 sm:$0xff]  ;;  %s11769_s14 = sld [smem:[#allocation66_spill]] }
 0xdaf   : > { %4337 = vmatpush1.bf16.msra.mxu1 %v7435_v59  ;;  %4585 = vmatprep.subr.bf16.mxu0 %v7452_v52  ;;  %v7458_v59 = vld [vmem:[%s10558_s0 + $0x114] ss:$8 sps:$4 sm:$0xff]   ;;  %v7461_v52 = vld [vmem:[%s10558_s0 + $0x124] ss:$8 sps:$4 sm:$0xff]  }
 0xdb0   : > { %v4135_v23 = vmul.f32 %v10598_v38, %v10598_v38  ;;  %4338 = vmatprep.subr.bf16.mxu1 %v7443_v5  ;;  %4586 = vmatpush1.bf16.msra.mxu0 %v7450_v12  ;;  %v11757_v12 = vld [vmem:[#allocation41_spill] sm:$0xff] }
 0xdb2   : > { %4150 = vadd.xlane.f32.xlu0 %v4135_v23 }
 0xdb3   : > { %4339 = vmatpush1.bf16.msra.mxu1 %v7441_v24 }
 0xdb4   : > { %4340 = vmatprep.subr.bf16.mxu1 %v7449_v43  ;;  %s5672_s11 = scalar_lea.vmem %s11769_s14, %s7971_s27 }
 0xdb7   : > { %4341 = vmatpush1.bf16.msra.mxu1 %v7447_v33 }
 0xdb8   : > { %4760 = vmatprep.subr.bf16.mxu1 %v7455_v16 }
 0xe2f   : > { %v4137_v46 = vpop.xlane.xlu1 %4136 }
 0xe30   : > { %v4152_v14 = vmul.f32 0.0078125, %v4137_v46  ;;  %v11758_v46 = vld [vmem:[#allocation40_spill] sm:$0xff] }
 0xe31   : > { %v4139_v15 = vpop.xlane.xlu0 %4138 }
 0xe32   : > { %v4160_v51 = vadd.f32 1e-05, %v4152_v14  ;;  %v4153_v54 = vmul.f32 0.0078125, %v4139_v15 }
 0xe33   : > { %v4141_v0 = vpop.xlane.xlu1 %4140 }
 0xe34   : > { %7589 = vrsqrt.f32 %v4160_v51  ;;  %v4161_v3 = vadd.f32 1e-05, %v4153_v54  ;;  %v4154_v20 = vmul.f32 0.0078125, %v4141_v0  ;;  %v7459_v54 = vld [vmem:[%s10558_s0 + $0x120] ss:$8 sps:$4 sm:$0xff]  }
 0xe35   : > { %v7464_v0 = vld [vmem:[%s10558_s0 + $0x134] ss:$8 sps:$4 sm:$0xff]  }
 0xe36   : > { %7591 = vrsqrt.f32 %v4161_v3  ;;  %v4162_v17 = vadd.f32 1e-05, %v4154_v20 }
 0xe37   : > { %v4145_v7 = vpop.xlane.xlu1 %4144  ;;  %v4143_v18 = vpop.xlane.xlu0 %4142 }
 0xe38   : > { %7593 = vrsqrt.f32 %v4162_v17  ;;  %v4156_v21 = vmul.f32 0.0078125, %v4145_v7  ;;  %v4155_v47 = vmul.f32 0.0078125, %v4143_v18  ;;  %v7462_v18 = vld [vmem:[%s10558_s0 + $0x130] ss:$8 sps:$4 sm:$0xff]  }
 0xe3a   : > { %v4164_v2 = vadd.f32 1e-05, %v4156_v21  ;;  %v4163_v63 = vadd.f32 1e-05, %v4155_v47  ;;  %v11759_v21 = vld [vmem:[#allocation43_spill] sm:$0xff] }
 0xe3b   : > { %v4149_v25 = vpop.xlane.xlu1 %4148  ;;  %v4147_v41 = vpop.xlane.xlu0 %4146  ;;  %v7467_v47 = vld [vmem:[%s10558_s0 + $0x144] ss:$8 sps:$4 sm:$0xff]  }
 0xe3c   : > { %v4157_v53 = vmul.f32 0.0078125, %v4147_v41  ;;  %7595 = vrsqrt.f32 %v4163_v63  ;;  %v4158_v39 = vmul.f32 0.0078125, %v4149_v25  ;;  %v11760_v63 = vld [vmem:[#allocation42_spill] sm:$0xff] }
 0xe3d   : > { %7597 = vrsqrt.f32 %v4164_v2 }
 0xe3e   : > { %v7590_v11 = vpop.eup %7589  ;;  %v4165_v60 = vadd.f32 1e-05, %v4157_v53  ;;  %v4166_v50 = vadd.f32 1e-05, %v4158_v39 }
 0xe3f   : > { %v4176_v48 = vmul.f32 %v7590_v11, %v10570_v19  ;;  %v4151_v56 = vpop.xlane.xlu0 %4150  ;;  %v7470_v11 = vld [vmem:[%s10558_s0 + $0x154] ss:$8 sps:$4 sm:$0xff]  }
 0xe40   : > { %v7592_v36 = vpop.eup %7591  ;;  %v4159_v49 = vmul.f32 0.0078125, %v4151_v56  ;;  %7599 = vrsqrt.f32 %v4165_v60 }
 0xe41   : > { %v4190_v58 = vmul.f32 %v10632_v37, %v4176_v48  ;;  %v4177_v23 = vmul.f32 %v7592_v36, %v10572_v57  ;;  %v11755_v57 = vld [vmem:[#allocation38_spill] sm:$0xff]  ;;  %v7473_v36 = vld [vmem:[%s10558_s0 + $0x164] ss:$8 sps:$4 sm:$0xff]  }
 0xe42   : > { %v7594_v10 = vpop.eup %7593  ;;  %v4167_v27 = vadd.f32 1e-05, %v4159_v49  ;;  %v7468_v48 = vld [vmem:[%s10558_s0 + $0x150] ss:$8 sps:$4 sm:$0xff]  }
 0xe43   : > { %v4191_v26 = vmul.f32 %v10632_v37, %v4177_v23  ;;  %v10641_v40 = vadd.f32 %v10635_v45, %v4190_v58  ;;  %v4178_v19 = vmul.f32 %v7594_v10, %v10576_v35  ;;  %v11762_v49 = vld [vmem:[#allocation44_spill] sm:$0xff] }
 0xe44   : > { %7601 = vrsqrt.f32 %v4167_v27  ;;  %v7471_v23 = vld [vmem:[%s10558_s0 + $0x160] ss:$8 sps:$4 sm:$0xff]  }
 0xe45   : > { %v10645_v29 = vadd.f32 %v10635_v45, %v4191_v26  ;;  %7603 = vrsqrt.f32 %v4166_v50  ;;  %v4212_v55 = vmul.f32 %v11755_v57, %v10641_v40  ;;  %v4192_v62 = vmul.f32 %v10632_v37, %v4178_v19  ;;  %v7474_v50 = vld [vmem:[%s10558_s0 + $0x170] ss:$8 sps:$4 sm:$0xff]   ;;  %v7477_v27 = vld [vmem:[%s10568_s30 + $0x40] sm:$0xff]  }
 0xe46   : > { %v7596_v13 = vpop.eup %7595  ;;  %v7478_v26 = vld [vmem:[%s10568_s30 + $0xc0] sm:$0xff]   ;;  %6644 = vmatprep.subr.bf16.mxu0 %v7477_v27 }
 0xe47   : > { %v4213_v28 = vmul.f32 %v11756_v42, %v10645_v29  ;;  %v7598_v9 = vpop.eup %7597  ;;  %v4179_v61 = vmul.f32 %v7596_v13, %v10584_v44  ;;  %v10661_v4 = vadd.f32 %v10635_v45, %v4192_v62  ;;  %v7479_v19 = vld [vmem:[%s10568_s30] sm:$0xff]   ;;  %v7483_v62 = vld [vmem:[%s10568_s30 + $0x8] sm:$0xff]  }
 0xe48   : > { %v4180_v24 = vmul.f32 %v7598_v9, %v10582_v32  ;;  %v7480_v13 = vld [vmem:[%s10568_s30 + $0x80] sm:$0xff]   ;;  %v7484_v9 = vld [vmem:[%s10568_s30 + $0x88] sm:$0xff]  }
 0xe49   : > { %v10654_v35 = vpack.c.bf16 %v4213_v28, %v4212_v55  ;;  %v4193_v6 = vmul.f32 %v10632_v37, %v4179_v61  ;;  %v4214_v14 = vmul.f32 %v11758_v46, %v10661_v4  ;;  %v7481_v55 = vld [vmem:[%s10568_s30 + $0x48] sm:$0xff]   ;;  %v7487_v61 = vld [vmem:[%s10568_s30 + $0x10] sm:$0xff]  }
 0xe4a   : > { %v7600_v5 = vpop.eup %7599  ;;  %v4194_v15 = vmul.f32 %v10632_v37, %v4180_v24  ;;  %v7482_v28 = vld [vmem:[%s10568_s30 + $0xc8] sm:$0xff]   ;;  %v7492_v24 = vld [vmem:[%s10568_s30 + $0x98] sm:$0xff]  }
 0xe4b   : > { %4359 = vmatmul.mubr.bf16.vlgmr.msra.gmra.mrb[56].mxu1 %v10654_v35  ;;  %4604 = vmatmul.mubr.bf16.vlgmr.msra.gmra.mrb[40].mxu0 %v10654_v35  ;;  %v10667_v44 = vadd.f32 %v10635_v45, %v4193_v6  ;;  %v4181_v43 = vmul.f32 %v7600_v5, %v10592_v31  ;;  %v7490_v6 = vld [vmem:[%s10568_s30 + $0xd8] sm:$0xff]  }
 0xe4c   : > { %4761 = vmatpush1.bf16.msra.mxu1 %v7453_v1  ;;  %4368 = vmatprep.mubr.bf16.mxu1 %v11508_v22  ;;  %v10685_v17 = vadd.f32 %v10635_v45, %v4194_v15  ;;  %v7486_v1 = vld [vmem:[%s10568_s30 + $0xd0] sm:$0xff]   ;;  %v7491_v5 = vld [vmem:[%s10568_s30 + $0x18] sm:$0xff]   ;;  %v7500_v15 = vld [vmem:[%s10568_s30 + $0xa8] sm:$0xff]  }
 0xe4d   : > { %4762 = vmatprep.subr.bf16.mxu1 %v7458_v59  ;;  %4613 = vmatprep.mubr.bf16.mxu0 %v11508_v22  ;;  %v4215_v16 = vmul.f32 %v11757_v12, %v10667_v44  ;;  %v4195_v32 = vmul.f32 %v10632_v37, %v4181_v43  ;;  %v7489_v59 = vld [vmem:[%s10568_s30 + $0x58] sm:$0xff]   ;;  %v7494_v43 = vld [vmem:[%s10568_s30 + $0xe0] sm:$0xff]  }
 0xe4e   : > { %v7602_v33 = vpop.eup %7601  ;;  %v4216_v25 = vmul.f32 %v11760_v63, %v10685_v17  ;;  %6645 = vmatpush3.bf16.msra.mxu0 %v7479_v19 }
 0xe4f   : > { %v7604_v51 = vpop.eup %7603  ;;  %v4221_v31 = vpack.c.bf16 %v4215_v16, %v4214_v14  ;;  %v10681_v3 = vadd.f32 %v10635_v45, %v4195_v32  ;;  %v4183_v20 = vmul.f32 %v7602_v33, %v10598_v38  ;;  %6646 = vmatprep.subr.bf16.mxu0 %v7481_v55  ;;  %v7496_v33 = vld [vmem:[%s10568_s30 + $0xa0] sm:$0xff]   ;;  %v7497_v16 = vld [vmem:[%s10568_s30 + $0x68] sm:$0xff]  }
 0xe50   : > { %4763 = vmatpush1.bf16.msra.mxu1 %v7456_v34  ;;  %v4182_v7 = vmul.f32 %v7604_v51, %v10590_v30  ;;  %v7465_v30 = vld [vmem:[%s10558_s0 + $0x140] ss:$8 sps:$4 sm:$0xff]   ;;  %v7501_v51 = vld [vmem:[%s10568_s30 + $0x70] sm:$0xff]  }
 0xe51   : > { %4764 = vmatprep.subr.bf16.mxu1 %v7461_v52  ;;  %v4217_v38 = vmul.f32 %v11759_v21, %v10681_v3  ;;  %v4197_v2 = vmul.f32 %v10632_v37, %v4183_v20  ;;  %v7493_v34 = vld [vmem:[%s10568_s30 + $0x60] sm:$0xff]   ;;  %v7498_v32 = vld [vmem:[%s10568_s30 + $0xe8] sm:$0xff]   ;;  %v7505_v20 = vld [vmem:[%s10568_s30 + $0x78] sm:$0xff]  }
 0xe52   : > { %v4196_v41 = vmul.f32 %v10632_v37, %v4182_v7  ;;  %v11761_v37 = vld [vmem:[#allocation45_spill] sm:$0xff]  ;;  %6647 = vmatpush3.bf16.msra.mxu0 %v7483_v62  ;;  %v7495_v52 = vld [vmem:[%s10568_s30 + $0x20] sm:$0xff]   ;;  %v7499_v14 = vld [vmem:[%s10568_s30 + $0x28] sm:$0xff]  }
 0xe53   : > { %4369 = vmatmul.mubr.bf16.gmra.mrb[60].mxu1 %v4221_v31  ;;  %4614 = vmatmul.mubr.bf16.gmra.mrb[44].mxu0 %v4221_v31  ;;  %v4222_v53 = vpack.c.bf16 %v4217_v38, %v4216_v25  ;;  %v10701_v39 = vadd.f32 %v10635_v45, %v4197_v2  ;;  %v7506_v7 = vld [vmem:[%s10568_s30 + $0xf8] sm:$0xff]  }
 0xe54   : > { %4765 = vmatpush1.bf16.msra.mxu1 %v7459_v54  ;;  %4378 = vmatprep.mubr.bf16.mxu1 %v11508_v22  ;;  %v10704_v60 = vadd.f32 %v10635_v45, %v4196_v41  ;;  %v7476_v45 = vld [vmem:[%s10558_s0 + $0x174] ss:$8 sps:$4 sm:$0xff]   ;;  %s11768_s0 = sld [smem:[#allocation65_spill]] }
 0xe55   : > { %4766 = vmatprep.subr.bf16.mxu1 %v7464_v0  ;;  %4623 = vmatprep.mubr.bf16.mxu0 %v11508_v22  ;;  %v4219_v56 = vmul.f32 %v11761_v37, %v10701_v39  ;;  %v7502_v54 = vld [vmem:[%s10568_s30 + $0xf0] sm:$0xff]   ;;  %v7508_v38 = vld [vmem:[%s10568_s30 + $0xb8] sm:$0xff]  }
 0xe56   : > { %v4218_v58 = vmul.f32 %v11762_v49, %v10704_v60  ;;  %v7504_v0 = vld [vmem:[%s10568_s30 + $0xb0] sm:$0xff]  }
 0xe58   : > { %4767 = vmatpush1.bf16.msra.mxu1 %v7462_v18  ;;  %v4223_v10 = vpack.c.bf16 %v4219_v56, %v4218_v58  ;;  %v7507_v18 = vld [vmem:[%s10568_s30 + $0x38] sm:$0xff]  }
 0xe59   : > { %4768 = vmatprep.subr.bf16.mxu1 %v7467_v47  ;;  %v7509_v47 = vld [vmem:[%s10568_s30 + $0x140] sm:$0xff]  }
 0xe5b   : > { %4379 = vmatmul.mubr.bf16.gmra.mrb[64].mxu1 %v4222_v53  ;;  %4624 = vmatmul.mubr.bf16.gmra.mrb[48].mxu0 %v4222_v53 }
 0xe5c   : > { %4769 = vmatpush1.bf16.msra.mxu1 %v7465_v30  ;;  %4388 = vmatprep.mubr.bf16.mxu1 %v11508_v22 }
 0xe5d   : > { %4770 = vmatprep.subr.bf16.mxu1 %v7470_v11  ;;  %4633 = vmatprep.mubr.bf16.mxu0 %v11508_v22  ;;  %v11763_v11 = vld [vmem:[#allocation37_spill] sm:$0xff] }
 0xe5e   : > { %vm4415_vm9 = vcmp.lt.s32.totalorder %v11763_v11, 1  ;;  %vm4849_vm15 = vcmp.lt.s32.totalorder %v11763_v11, 7 }
 0xe60   : > { %4771 = vmatpush1.bf16.msra.mxu1 %v7468_v48 }
 0xe61   : > { %4772 = vmatprep.subr.bf16.mxu1 %v7473_v36 }
 0xe63   : > { %4389 = vmatmul.mubr.bf16.gmra.mrb[68].mxu1 %v4223_v10  ;;  %4634 = vmatmul.mubr.bf16.gmra.mrb[52].mxu0 %v4223_v10 }
 0xe64   : > { %4773 = vmatpush1.bf16.msra.mxu1 %v7471_v23  ;;  %4792 = vmatprep.mubr.bf16.mxu1 %v11508_v22 }
 0xe65   : > { %4774 = vmatprep.subr.bf16.mxu1 %v7476_v45 }
 0xe68   : > { %4775 = vmatpush1.bf16.msra.mxu1 %v7474_v50 }
 0xe69   : > { %6684 = vmatprep.subr.bf16.mxu1 %v7478_v26 }
 0xe6b   : > { %4793 = vmatmul.mubr.bf16.vlgmr.msra.gmra.mrb[72].mxu1 %v10654_v35  ;;  %v7488_v35 = vld [vmem:[%s10568_s30 + $0x90] sm:$0xff]  }
 0xe6c   : > { %4802 = vmatprep.mubr.bf16.mxu1 %v11508_v22  ;;  %6685 = vmatpush3.bf16.msra.mxu1 %v7480_v13 }
 0xe6d   : > { %6686 = vmatprep.subr.bf16.mxu1 %v7482_v28 }
 0xe70   : > { %6687 = vmatpush3.bf16.msra.mxu1 %v7484_v9 }
 0xe71   : > { %6688 = vmatprep.subr.bf16.mxu1 %v7486_v1 }
 0xe73   : > { %4803 = vmatmul.mubr.bf16.gmra.mrb[76].mxu1 %v4221_v31  ;;  %v7503_v31 = vld [vmem:[%s10568_s30 + $0x30] sm:$0xff]  }
 0xe74   : > { %4812 = vmatprep.mubr.bf16.mxu1 %v11508_v22  ;;  %6689 = vmatpush3.bf16.msra.mxu1 %v7488_v35 }
 0xe75   : > { %6690 = vmatprep.subr.bf16.mxu1 %v7490_v6 }
 0xe78   : > { %6691 = vmatpush3.bf16.msra.mxu1 %v7492_v24 }
 0xe79   : > { %6692 = vmatprep.subr.bf16.mxu1 %v7494_v43 }
 0xe7b   : > { %4813 = vmatmul.mubr.bf16.gmra.mrb[80].mxu1 %v4222_v53 }
 0xe7c   : > { %4822 = vmatprep.mubr.bf16.mxu1 %v11508_v22  ;;  %v7485_v22 = vld [vmem:[%s10568_s30 + $0x50] sm:$0xff]   ;;  %6693 = vmatpush3.bf16.msra.mxu1 %v7496_v33 }
 0xe7d   : > { %6648 = vmatprep.subr.bf16.mxu0 %v7485_v22  ;;  %6694 = vmatprep.subr.bf16.mxu1 %v7498_v32 }
 0xe7e   : > { %6649 = vmatpush3.bf16.msra.mxu0 %v7487_v61 }
 0xe7f   : > { %6650 = vmatprep.subr.bf16.mxu0 %v7489_v59 }
 0xe80   : > { %6695 = vmatpush3.bf16.msra.mxu1 %v7500_v15 }
 0xe81   : > { %6696 = vmatprep.subr.bf16.mxu1 %v7502_v54 }
 0xe82   : > { %6651 = vmatpush3.bf16.msra.mxu0 %v7491_v5 }
 0xe83   : > { %4823 = vmatmul.mubr.bf16.gmra.mrb[84].mxu1 %v4223_v10  ;;  %6652 = vmatprep.subr.bf16.mxu0 %v7493_v34 }
 0xe84   : > { %6697 = vmatpush3.bf16.msra.mxu1 %v7504_v0 }
 0xe85   : > { %6698 = vmatprep.subr.bf16.mxu1 %v7506_v7 }
 0xe86   : > { %6653 = vmatpush3.bf16.msra.mxu0 %v7495_v52 }
 0xe87   : > { %6654 = vmatprep.subr.bf16.mxu0 %v7497_v16 }
 0xe88   : > { %6699 = vmatpush3.bf16.msra.mxu1 %v7508_v38 }
 0xe8a   : > { %6655 = vmatpush3.bf16.msra.mxu0 %v7499_v14 }
 0xe8b   : > { %6656 = vmatprep.subr.bf16.mxu0 %v7501_v51 }
 0xe8e   : > { %6657 = vmatpush3.bf16.msra.mxu0 %v7503_v31 }
 0xe8f   : > { %6658 = vmatprep.subr.bf16.mxu0 %v7505_v20 }
 0xe92   : > { %6659 = vmatpush3.bf16.msra.mxu0 %v7507_v18 }
 0xe93   : > { %6724 = vmatprep.subr.bf16.mxu0 %v7509_v47 }
 0xf1e   : > { %v10755_v2 = vpop.f32.mrb[56].mxu1  ;;  %v10757_v25 = vpop.f32.mrb[40].mxu0 }
 0xf1f   : > { %v10759_v41 = vpop.f32.mrb[57].mxu1  ;;  %v10761_v30 = vpop.f32.mrb[41].mxu0  ;;  %v4399_v56 = vrot.slane %v10755_v2, 7 }
 0xf20   : > { %v4364_v53 = vpop.f32.mrb[58].mxu1  ;;  %v4609_v48 = vpop.f32.mrb[42].mxu0  ;;  %v4400_v10 = vrot.slane %v10759_v41, 7 }
 0xf21   : > { %v4401_v36 = vrot.slane %v4364_v53, 7  ;;  %v4366_v58 = vpop.f32.mrb[59].mxu1  ;;  %v4611_v23 = vpop.f32.mrb[43].mxu0 }
 0xf22   : > { %v4402_v45 = vrot.slane %v4366_v58, 7 }
 0xf23   : > { %v4428_v50 = vsel %vm4415_vm9, %v4399_v56, %v4401_v36 }
 0xf24   : > { %v10770_v27 = vadd.f32 %v4609_v48, %v4428_v50  ;;  %v4429_v26 = vsel %vm4415_vm9, %v4400_v10, %v4402_v45 }
 0xf25   : > { %v10776_v19 = vadd.f32 %v4611_v23, %v4429_v26 }
 0xf26   : > { %v4370_v13 = vpop.f32.mrb[60].mxu1  ;;  %v4615_v55 = vpop.f32.mrb[44].mxu0 }
 0xf27   : > { %v4403_v28 = vrot.slane %v4370_v13, 7  ;;  %v4372_v62 = vpop.f32.mrb[61].mxu1  ;;  %v4617_v9 = vpop.f32.mrb[45].mxu0 }
 0xf28   : > { %v4404_v22 = vrot.slane %v4372_v62, 7  ;;  %v4374_v1 = vpop.f32.mrb[62].mxu1  ;;  %v4619_v61 = vpop.f32.mrb[46].mxu0 }
 0xf29   : > { %v4426_v35 = vsel %vm4415_vm9, %v4401_v36, %v4403_v28  ;;  %v4405_v59 = vrot.slane %v4374_v1, 7  ;;  %v4376_v6 = vpop.f32.mrb[63].mxu1  ;;  %v4621_v5 = vpop.f32.mrb[47].mxu0 }
 0xf2a   : > { %v10780_v24 = vadd.f32 %v4615_v55, %v4426_v35  ;;  %v4427_v34 = vsel %vm4415_vm9, %v4402_v45, %v4404_v22  ;;  %v4406_v43 = vrot.slane %v4376_v6, 7 }
 0xf2b   : > { %v10784_v52 = vadd.f32 %v4617_v9, %v4427_v34  ;;  %v4424_v33 = vsel %vm4415_vm9, %v4403_v28, %v4405_v59 }
 0xf2c   : > { %v10788_v16 = vadd.f32 %v4619_v61, %v4424_v33  ;;  %v4425_v32 = vsel %vm4415_vm9, %v4404_v22, %v4406_v43 }
 0xf2d   : > { %v10792_v14 = vadd.f32 %v4621_v5, %v4425_v32 }
 0xf2e   : > { %v4380_v15 = vpop.f32.mrb[64].mxu1  ;;  %v4625_v51 = vpop.f32.mrb[48].mxu0 }
 0xf2f   : > { %v4407_v54 = vrot.slane %v4380_v15, 7  ;;  %v4382_v31 = vpop.f32.mrb[65].mxu1  ;;  %v4627_v0 = vpop.f32.mrb[49].mxu0 }
 0xf30   : > { %v4408_v20 = vrot.slane %v4382_v31, 7  ;;  %v4384_v7 = vpop.f32.mrb[66].mxu1  ;;  %v4629_v18 = vpop.f32.mrb[50].mxu0 }
 0xf31   : > { %v4422_v38 = vsel %vm4415_vm9, %v4405_v59, %v4407_v54  ;;  %v4409_v47 = vrot.slane %v4384_v7, 7  ;;  %v4386_v53 = vpop.f32.mrb[67].mxu1  ;;  %v4631_v48 = vpop.f32.mrb[51].mxu0 }
 0xf32   : > { %v10796_v36 = vadd.f32 %v4625_v51, %v4422_v38  ;;  %v4423_v58 = vsel %vm4415_vm9, %v4406_v43, %v4408_v20  ;;  %v4410_v23 = vrot.slane %v4386_v53, 7 }
 0xf33   : > { %v10800_v45 = vadd.f32 %v4627_v0, %v4423_v58  ;;  %v4420_v50 = vsel %vm4415_vm9, %v4407_v54, %v4409_v47 }
 0xf34   : > { %v10804_v26 = vadd.f32 %v4629_v18, %v4420_v50  ;;  %v4421_v13 = vsel %vm4415_vm9, %v4408_v20, %v4410_v23 }
 0xf35   : > { %v10808_v55 = vadd.f32 %v4631_v48, %v4421_v13 }
 0xf36   : > { %v4390_v28 = vpop.f32.mrb[68].mxu1  ;;  %v4635_v62 = vpop.f32.mrb[52].mxu0 }
 0xf37   : > { %v4411_v9 = vrot.slane %v4390_v28, 7  ;;  %v4392_v22 = vpop.f32.mrb[69].mxu1  ;;  %v4637_v1 = vpop.f32.mrb[53].mxu0  ;;  %v11765_v28 = vsub.s32 1, %v11763_v11 }
 0xf38   : > { %v4412_v61 = vrot.slane %v4392_v22, 7  ;;  %v4394_v35 = vpop.f32.mrb[70].mxu1  ;;  %v4639_v59 = vpop.f32.mrb[54].mxu0 }
 0xf39   : > { %v4418_v6 = vsel %vm4415_vm9, %v4409_v47, %v4411_v9  ;;  %v4413_v5 = vrot.slane %v4394_v35, 7  ;;  %v4396_v34 = vpop.f32.mrb[71].mxu1  ;;  %v4641_v43 = vpop.f32.mrb[55].mxu0 }
 0xf3a   : > { %v10813_v33 = vadd.f32 %v4635_v62, %v4418_v6  ;;  %v4419_v32 = vsel %vm4415_vm9, %v4410_v23, %v4412_v61  ;;  %v4414_v15 = vrot.slane %v4396_v34, 7 }
 0xf3b   : > { %v10817_v51 = vadd.f32 %v4637_v1, %v4419_v32  ;;  %v4430_v54 = vsel %vm4415_vm9, %v4413_v5, %v4399_v56  ;;  %v4416_v31 = vsel %vm4415_vm9, %v4411_v9, %v4413_v5  ;;  %v11766_v9 = vsub.s32 0, %v11763_v11 }
 0xf3c   : > { %v4455_v0 = vsel %vm4415_vm9, 0.0, %v4430_v54  ;;  %v10827_v20 = vadd.f32 %v4639_v59, %v4416_v31  ;;  %v4431_v7 = vsel %vm4415_vm9, %v4414_v15, %v4400_v10  ;;  %v4417_v18 = vsel %vm4415_vm9, %v4412_v61, %v4414_v15  ;;  %v4226_v10 = vld [vmem:[%s4225_s25] sm:$0x3] }
 0xf3d   : > { %v4644_v2 = vadd.f32 %v10757_v25, %v4455_v0  ;;  %v4456_v56 = vsel %vm4415_vm9, 0.0, %v4431_v7  ;;  %v10841_v38 = vadd.f32 %v4641_v43, %v4417_v18  ;;  %v10853_v62 = vrot.slane %v4226_v10, %v11765_v28 }
 0xf3e   : > { %v4645_v47 = vadd.f32 %v10761_v30, %v4456_v56  ;;  %v10844_v41 = vpop.f32.mrb[72].mxu1  ;;  %v10861_v22 = vrot.slane %v4226_v10, %v11766_v9 }
 0xf3f   : > { %v10846_v53 = vpop.f32.mrb[73].mxu1  ;;  %v4833_v58 = vrot.slane %v10844_v41, 1 }
 0xf40   : > { %v4798_v48 = vpop.f32.mrb[74].mxu1  ;;  %v4834_v25 = vrot.slane %v10846_v53, 1 }
 0xf41   : > { %v4835_v23 = vrot.slane %v4798_v48, 1  ;;  %v4800_v50 = vpop.f32.mrb[75].mxu1 }
 0xf42   : > { %v4836_v13 = vrot.slane %v4800_v50, 1 }
 0xf43   : > { %v4862_v30 = vsel %vm4849_vm15, %v4833_v58, %v4835_v23 }
 0xf44   : > { %v4906_v1 = vadd.f32 %v4862_v30, %v4644_v2  ;;  %v4863_v61 = vsel %vm4849_vm15, %v4834_v25, %v4836_v13 }
 0xf45   : > { %v4907_v35 = vadd.f32 %v4863_v61, %v4645_v47 }
 0xf46   : > { %v4804_v59 = vpop.f32.mrb[76].mxu1  ;;  %v4933_v43 = vadd.f32 %v10861_v22, %v4906_v1 }
 0xf47   : > { %v4837_v6 = vrot.slane %v4804_v59, 1  ;;  %v4806_v5 = vpop.f32.mrb[77].mxu1  ;;  %v4934_v34 = vadd.f32 %v10853_v62, %v4907_v35 }
 0xf48   : > { %v4838_v32 = vrot.slane %v4806_v5, 1  ;;  %v4808_v15 = vpop.f32.mrb[78].mxu1  ;;  %v4949_v10 = vmax.f32 %v4933_v43, 0.0 }
 0xf49   : > { %v4860_v54 = vsel %vm4849_vm15, %v4835_v23, %v4837_v6  ;;  %v4839_v31 = vrot.slane %v4808_v15, 1  ;;  %v4810_v0 = vpop.f32.mrb[79].mxu1  ;;  %v4950_v30 = vmax.f32 %v4934_v34, 0.0 }
 0xf4a   : > { %v4908_v7 = vadd.f32 %v4860_v54, %v10770_v27  ;;  %v4861_v18 = vsel %vm4849_vm15, %v4836_v13, %v4838_v32  ;;  %v4840_v2 = vrot.slane %v4810_v0, 1  ;;  %v4965_v59 = vmul.f32 %v11755_v57, %v4949_v10 }
 0xf4b   : > { %v4909_v56 = vadd.f32 %v4861_v18, %v10776_v19  ;;  %v4858_v47 = vsel %vm4849_vm15, %v4837_v6, %v4839_v31  ;;  %v4966_v15 = vmul.f32 %v11755_v57, %v4950_v30 }
 0xf4c   : > { %v4935_v48 = vadd.f32 %v10861_v22, %v4908_v7  ;;  %v4910_v50 = vadd.f32 %v4858_v47, %v10780_v24  ;;  %v4859_v23 = vsel %vm4849_vm15, %v4838_v32, %v4840_v2 }
 0xf4d   : > { %v4911_v28 = vadd.f32 %v4859_v23, %v10784_v52  ;;  %v4936_v27 = vadd.f32 %v10853_v62, %v4909_v56 }
 0xf4e   : > { %v4951_v13 = vmax.f32 %v4935_v48, 0.0  ;;  %v4814_v9 = vpop.f32.mrb[80].mxu1  ;;  %v4937_v43 = vadd.f32 %v10861_v22, %v4910_v50  ;;  %v7510_v48 = vld [vmem:[%s10568_s30 + $0x100] sm:$0xff]  }
 0xf4f   : > { %v4841_v1 = vrot.slane %v4814_v9, 1  ;;  %v4816_v19 = vpop.f32.mrb[81].mxu1  ;;  %v4952_v61 = vmax.f32 %v4936_v27, 0.0  ;;  %v4938_v35 = vadd.f32 %v10853_v62, %v4911_v28 }
 0xf50   : > { %v4967_v6 = vmul.f32 %v11756_v42, %v4951_v13  ;;  %v4842_v24 = vrot.slane %v4816_v19, 1  ;;  %v4818_v5 = vpop.f32.mrb[82].mxu1  ;;  %v7512_v19 = vld [vmem:[%s10568_s30 + $0x108] sm:$0xff]  }
 0xf51   : > { %v4856_v52 = vsel %vm4849_vm15, %v4839_v31, %v4841_v1  ;;  %v4843_v34 = vrot.slane %v4818_v5, 1  ;;  %v4820_v32 = vpop.f32.mrb[83].mxu1  ;;  %v4968_v54 = vmul.f32 %v11756_v42, %v4952_v61  ;;  %v4954_v50 = vmax.f32 %v4938_v35, 0.0 }
 0xf52   : > { %v10891_v0 = vpack.c.bf16 %v4967_v6, %v4965_v59  ;;  %v4912_v7 = vadd.f32 %v4856_v52, %v10788_v16  ;;  %v4857_v18 = vsel %vm4849_vm15, %v4840_v2, %v4842_v24  ;;  %v4844_v56 = vrot.slane %v4820_v32, 1  ;;  %v7511_v16 = vld [vmem:[%s10568_s30 + $0x148] sm:$0xff]  }
 0xf53   : > { %v4913_v47 = vadd.f32 %v4857_v18, %v10792_v14  ;;  %v4854_v31 = vsel %vm4849_vm15, %v4841_v1, %v4843_v34  ;;  %v10899_v10 = vpack.c.bf16 %v4968_v54, %v4966_v15  ;;  %v4953_v2 = vmax.f32 %v4937_v43, 0.0  ;;  %v7513_v43 = vld [vmem:[%s10568_s30 + $0x150] sm:$0xff]  }
 0xf54   : > { %v4914_v23 = vadd.f32 %v4854_v31, %v10796_v36  ;;  %v4855_v28 = vsel %vm4849_vm15, %v4842_v24, %v4844_v56  ;;  %v4939_v27 = vadd.f32 %v10861_v22, %v4912_v7  ;;  %v4970_v61 = vmul.f32 %v11758_v46, %v4954_v50 }
 0xf55   : > { %v4915_v30 = vadd.f32 %v4855_v28, %v10800_v45  ;;  %5153 = vmatprep.mubr.bf16.mxu0 %v10899_v10  ;;  %5372 = vmatprep.mubr.bf16.mxu1 %v10899_v10  ;;  %v4940_v14 = vadd.f32 %v10853_v62, %v4913_v47  ;;  %v4969_v24 = vmul.f32 %v11758_v46, %v4953_v2 }
 0xf56   : > { %v4824_v13 = vpop.f32.mrb[84].mxu1  ;;  %5154 = vmatmul.mubr.bf16.vlgmr.msra.gmra.mrb[56].mxu0 %v10891_v0  ;;  %5373 = vmatmul.mubr.bf16.vlgmr.msra.gmra.mrb[88].mxu1 %v10891_v0  ;;  %v4955_v36 = vmax.f32 %v4939_v27, 0.0  ;;  %v4941_v52 = vadd.f32 %v10861_v22, %v4914_v23 }
 0xf57   : > { %v4845_v9 = vrot.slane %v4824_v13, 1  ;;  %v4826_v1 = vpop.f32.mrb[85].mxu1  ;;  %6725 = vmatpush3.bf16.msra.mxu0 %v7510_v48  ;;  %v4956_v45 = vmax.f32 %v4940_v14, 0.0  ;;  %v4942_v35 = vadd.f32 %v10853_v62, %v4915_v30  ;;  %v7516_v13 = vld [vmem:[%s10568_s30 + $0x118] sm:$0xff]  }
 0xf58   : > { %v4846_v59 = vrot.slane %v4826_v1, 1  ;;  %v4828_v6 = vpop.f32.mrb[86].mxu1  ;;  %6726 = vmatprep.subr.bf16.mxu0 %v7511_v16  ;;  %v4971_v5 = vmul.f32 %v11757_v12, %v4955_v36 }
 0xf59   : > { %v4852_v32 = vsel %vm4849_vm15, %v4843_v34, %v4845_v9  ;;  %v4847_v15 = vrot.slane %v4828_v6, 1  ;;  %v4830_v54 = vpop.f32.mrb[87].mxu1  ;;  %v4972_v7 = vmul.f32 %v11757_v12, %v4956_v45  ;;  %v4958_v18 = vmax.f32 %v4942_v35, 0.0 }
 0xf5a   : > { %v4916_v47 = vadd.f32 %v4852_v32, %v10804_v26  ;;  %v4853_v31 = vsel %vm4849_vm15, %v4844_v56, %v4846_v59  ;;  %v4848_v48 = vrot.slane %v4830_v54, 1  ;;  %v10927_v50 = vpack.c.bf16 %v4971_v5, %v4969_v24  ;;  %v7514_v26 = vld [vmem:[%s10568_s30 + $0x110] sm:$0xff]  }
 0xf5b   : > { %v4917_v28 = vadd.f32 %v4853_v31, %v10808_v55  ;;  %v4850_v23 = vsel %vm4849_vm15, %v4845_v9, %v4847_v15  ;;  %v4864_v34 = vsel %vm4849_vm15, %v4847_v15, %v4833_v58  ;;  %6727 = vmatpush3.bf16.msra.mxu0 %v7512_v19  ;;  %v10936_v16 = vpack.c.bf16 %v4972_v7, %v4970_v61  ;;  %v7515_v58 = vld [vmem:[%s10568_s30 + $0x158] sm:$0xff]   ;;  %v7517_v19 = vld [vmem:[%s10568_s30 + $0x160] sm:$0xff]  }
 0xf5c   : > { %v4904_v56 = vsel %vm4873_vm0, 0.0, %v4864_v34  ;;  %v4918_v27 = vadd.f32 %v4850_v23, %v10813_v33  ;;  %v4851_v55 = vsel %vm4849_vm15, %v4846_v59, %v4848_v48  ;;  %v4865_v41 = vsel %vm4849_vm15, %v4848_v48, %v4834_v25  ;;  %6728 = vmatprep.subr.bf16.mxu0 %v7513_v43  ;;  %v7518_v15 = vld [vmem:[%s10568_s30 + $0x120] sm:$0xff]   ;;  %v7521_v23 = vld [vmem:[%s10568_s30 + $0x170] sm:$0xff]  }
 0xf5d   : > { %v4920_v2 = vadd.f32 %v4904_v56, %v10827_v20  ;;  %v4905_v30 = vsel %vm4873_vm0, 0.0, %v4865_v41  ;;  %v4919_v14 = vadd.f32 %v4851_v55, %v10817_v51  ;;  %5161 = vmatprep.mubr.bf16.mxu0 %v10936_v16  ;;  %5380 = vmatprep.mubr.bf16.mxu1 %v10936_v16  ;;  %v4944_v33 = vadd.f32 %v10853_v62, %v4917_v28  ;;  %v7520_v28 = vld [vmem:[%s10568_s30 + $0x128] sm:$0xff]   ;;  %v7522_v34 = vld [vmem:[%s10568_s30 + $0x130] sm:$0xff]   ;;  %v7524_v56 = vld [vmem:[%s10568_s30 + $0x138] sm:$0xff]  }
 0xf5e   : > { %v4921_v53 = vadd.f32 %v4905_v30, %v10841_v38  ;;  %5162 = vmatmul.mubr.bf16.gmra.mrb[60].mxu0 %v10927_v50  ;;  %5381 = vmatmul.mubr.bf16.gmra.mrb[92].mxu1 %v10927_v50  ;;  %v4943_v20 = vadd.f32 %v10861_v22, %v4916_v47  ;;  %v4957_v25 = vmax.f32 %v4941_v52, 0.0  ;;  %v4945_v9 = vadd.f32 %v10861_v22, %v4918_v27  ;;  %v7519_v47 = vld [vmem:[%s10568_s30 + $0x168] sm:$0xff]  }
 0xf5f   : > { %6729 = vmatpush3.bf16.msra.mxu0 %v7514_v26  ;;  %v4960_v36 = vmax.f32 %v4944_v33, 0.0  ;;  %v4946_v51 = vadd.f32 %v10853_v62, %v4919_v14  ;;  %v4947_v45 = vadd.f32 %v10861_v22, %v4920_v2  ;;  %v4974_v61 = vmul.f32 %v11760_v63, %v4958_v18  ;;  %v7523_v26 = vld [vmem:[%s10568_s30 + $0x178] sm:$0xff]   ;;  %s5670_s30 = scalar_lea.vmem %s11768_s0, %s7971_s27 }
 0xf60   : > { %6730 = vmatprep.subr.bf16.mxu0 %v7515_v58  ;;  %v4959_v1 = vmax.f32 %v4943_v20, 0.0  ;;  %v4948_v38 = vadd.f32 %v10853_v62, %v4921_v53  ;;  %v4961_v6 = vmax.f32 %v4945_v9, 0.0  ;;  %v4973_v24 = vmul.f32 %v11760_v63, %v4957_v25 }
 0xf61   : > { %v4976_v35 = vmul.f32 %v11759_v21, %v4960_v36  ;;  %v4962_v59 = vmax.f32 %v4946_v51, 0.0  ;;  %v4963_v52 = vmax.f32 %v4947_v45, 0.0 }
 0xf62   : > { %v4975_v5 = vmul.f32 %v11759_v21, %v4959_v1  ;;  %v4964_v43 = vmax.f32 %v4948_v38, 0.0  ;;  %v4977_v22 = vmul.f32 %v11762_v49, %v4961_v6 }
 0xf63   : > { %6731 = vmatpush3.bf16.msra.mxu0 %v7516_v13  ;;  %v4986_v32 = vpack.c.bf16 %v4976_v35, %v4974_v61  ;;  %v4978_v62 = vmul.f32 %v11762_v49, %v4962_v59  ;;  %v4979_v18 = vmul.f32 %v11761_v37, %v4963_v52 }
 0xf64   : > { %v4985_v54 = vpack.c.bf16 %v4975_v5, %v4973_v24  ;;  %6732 = vmatprep.subr.bf16.mxu0 %v7517_v19  ;;  %v4980_v7 = vmul.f32 %v11761_v37, %v4964_v43 }
 0xf65   : > { %5169 = vmatprep.mubr.bf16.mxu0 %v4986_v32  ;;  %5388 = vmatprep.mubr.bf16.mxu1 %v4986_v32  ;;  %v4987_v48 = vpack.c.bf16 %v4979_v18, %v4977_v22 }
 0xf66   : > { %5170 = vmatmul.mubr.bf16.gmra.mrb[64].mxu0 %v4985_v54  ;;  %5389 = vmatmul.mubr.bf16.gmra.mrb[96].mxu1 %v4985_v54  ;;  %v4988_v31 = vpack.c.bf16 %v4980_v7, %v4978_v62 }
 0xf67   : > { %6733 = vmatpush3.bf16.msra.mxu0 %v7518_v15 }
 0xf68   : > { %5177 = vmatprep.mubr.bf16.mxu0 %v4988_v31  ;;  %5396 = vmatprep.mubr.bf16.mxu1 %v4988_v31 }
 0xf69   : > { %6734 = vmatprep.subr.bf16.mxu0 %v7519_v47 }
 0xf6b   : > { %6735 = vmatpush3.bf16.msra.mxu0 %v7520_v28 }
 0xf6c   : > { %6736 = vmatprep.subr.bf16.mxu0 %v7521_v23 }
 0xf6e   : > { %5178 = vmatmul.mubr.bf16.gmra.mrb[68].mxu0 %v4987_v48  ;;  %5397 = vmatmul.mubr.bf16.gmra.mrb[100].mxu1 %v4987_v48 }
 0xf6f   : > { %6737 = vmatpush3.bf16.msra.mxu0 %v7522_v34  ;;  %5575 = vmatprep.mubr.bf16.mxu0 %v10899_v10 }
 0xf70   : > { %6738 = vmatprep.subr.bf16.mxu0 %v7523_v26 }
 0xf73   : > { %6739 = vmatpush3.bf16.msra.mxu0 %v7524_v56 }
 0xf76   : > { %5576 = vmatmul.mubr.bf16.vlgmr.msra.gmra.mrb[72].mxu0 %v10891_v0 }
 0xf77   : > { %5583 = vmatprep.mubr.bf16.mxu0 %v10936_v16 }
 0xf7e   : > { %5584 = vmatmul.mubr.bf16.gmra.mrb[76].mxu0 %v10927_v50 }
 0xf7f   : > { %5591 = vmatprep.mubr.bf16.mxu0 %v4986_v32 }
 0xf86   : > { %5592 = vmatmul.mubr.bf16.gmra.mrb[80].mxu0 %v4985_v54 }
 0xf87   : > { %5599 = vmatprep.mubr.bf16.mxu0 %v4988_v31 }
 0xf8e   : > { %5600 = vmatmul.mubr.bf16.gmra.mrb[84].mxu0 %v4987_v48 }
0x1029   : > { %v6660_v27 = vpop.f32.mrb[56].mxu0  ;;  %v6700_v55 = vpop.f32.mrb[88].mxu1 }
0x102a   : > { %v6661_v41 = vpop.f32.mrb[57].mxu0  ;;  %v6701_v58 = vpop.f32.mrb[89].mxu1 }
0x102b   : > { %v10985_v2 = vadd.f32 %v6661_v41, %v6660_v27  ;;  %v10987_v10 = vadd.f32 %v6701_v58, %v6700_v55  ;;  %v6663_v30 = vpop.f32.mrb[58].mxu0  ;;  %v6703_v14 = vpop.f32.mrb[90].mxu1 }
0x102c   : > { %v6664_v33 = vpop.f32.mrb[59].mxu0  ;;  %v6704_v0 = vpop.f32.mrb[91].mxu1 }
0x102d   : > { %v6665_v53 = vadd.f32 %v6664_v33, %v6663_v30  ;;  %v6705_v16 = vadd.f32 %v6704_v0, %v6703_v14  ;;  %v5186_v50 = vrot.slane %v10985_v2, 7 }
0x102f   : > { %v5187_v20 = vrot.slane %v6665_v53, 7 }
0x1031   : > { %v5200_v25 = vsel %vm4415_vm9, %v5186_v50, %v5187_v20  ;;  %v6666_v13 = vpop.f32.mrb[60].mxu0  ;;  %v6706_v36 = vpop.f32.mrb[92].mxu1 }
0x1032   : > { %v10992_v51 = vadd.f32 %v6705_v16, %v5200_v25  ;;  %v6667_v9 = vpop.f32.mrb[61].mxu0  ;;  %v6707_v1 = vpop.f32.mrb[93].mxu1 }
0x1033   : > { %v6668_v19 = vadd.f32 %v6667_v9, %v6666_v13  ;;  %v6708_v38 = vadd.f32 %v6707_v1, %v6706_v36  ;;  %v6669_v45 = vpop.f32.mrb[62].mxu0  ;;  %v6709_v61 = vpop.f32.mrb[94].mxu1 }
0x1034   : > { %v6670_v35 = vpop.f32.mrb[63].mxu0  ;;  %v6710_v59 = vpop.f32.mrb[95].mxu1 }
0x1035   : > { %v5188_v6 = vrot.slane %v6668_v19, 7  ;;  %v6671_v24 = vadd.f32 %v6670_v35, %v6669_v45  ;;  %v6711_v5 = vadd.f32 %v6710_v59, %v6709_v61 }
0x1037   : > { %v5199_v43 = vsel %vm4415_vm9, %v5187_v20, %v5188_v6  ;;  %v5189_v52 = vrot.slane %v6671_v24, 7 }
0x1038   : > { %v10996_v32 = vadd.f32 %v6708_v38, %v5199_v43 }
0x1039   : > { %v5198_v15 = vsel %vm4415_vm9, %v5188_v6, %v5189_v52  ;;  %v6672_v62 = vpop.f32.mrb[64].mxu0  ;;  %v6712_v22 = vpop.f32.mrb[96].mxu1 }
0x103a   : > { %v11000_v54 = vadd.f32 %v6711_v5, %v5198_v15  ;;  %v6673_v7 = vpop.f32.mrb[65].mxu0  ;;  %v6713_v18 = vpop.f32.mrb[97].mxu1 }
0x103b   : > { %v6674_v47 = vadd.f32 %v6673_v7, %v6672_v62  ;;  %v6714_v31 = vadd.f32 %v6713_v18, %v6712_v22  ;;  %v6675_v48 = vpop.f32.mrb[66].mxu0  ;;  %v6715_v28 = vpop.f32.mrb[98].mxu1 }
0x103c   : > { %v6676_v23 = vpop.f32.mrb[67].mxu0  ;;  %v6716_v34 = vpop.f32.mrb[99].mxu1 }
0x103d   : > { %v5190_v26 = vrot.slane %v6674_v47, 7  ;;  %v6677_v56 = vadd.f32 %v6676_v23, %v6675_v48  ;;  %v6717_v27 = vadd.f32 %v6716_v34, %v6715_v28  ;;  %v11032_v28 = vld [vmem:[%s4989_s22] ss:$0 sm:$0xff] }
0x103f   : > { %v5197_v55 = vsel %vm4415_vm9, %v5189_v52, %v5190_v26  ;;  %v5191_v41 = vrot.slane %v6677_v56, 7 }
0x1040   : > { %v11004_v58 = vadd.f32 %v6714_v31, %v5197_v55 }
0x1041   : > { %v5196_v2 = vsel %vm4415_vm9, %v5190_v26, %v5191_v41  ;;  %v6678_v30 = vpop.f32.mrb[68].mxu0  ;;  %v6718_v14 = vpop.f32.mrb[100].mxu1 }
0x1042   : > { %v11008_v33 = vadd.f32 %v6717_v27, %v5196_v2  ;;  %v6679_v0 = vpop.f32.mrb[69].mxu0  ;;  %v6719_v53 = vpop.f32.mrb[101].mxu1 }
0x1043   : > { %v6680_v16 = vadd.f32 %v6679_v0, %v6678_v30  ;;  %v6720_v20 = vadd.f32 %v6719_v53, %v6718_v14  ;;  %v6681_v25 = vpop.f32.mrb[70].mxu0  ;;  %v6721_v13 = vpop.f32.mrb[102].mxu1 }
0x1044   : > { %v6682_v36 = vpop.f32.mrb[71].mxu0  ;;  %v6722_v9 = vpop.f32.mrb[103].mxu1 }
0x1045   : > { %v5192_v1 = vrot.slane %v6680_v16, 7  ;;  %v6683_v19 = vadd.f32 %v6682_v36, %v6681_v25  ;;  %v6723_v38 = vadd.f32 %v6722_v9, %v6721_v13 }
0x1047   : > { %v5195_v45 = vsel %vm4415_vm9, %v5191_v41, %v5192_v1  ;;  %v5193_v61 = vrot.slane %v6683_v19, 7 }
0x1048   : > { %v11012_v35 = vadd.f32 %v6720_v20, %v5195_v45 }
0x1049   : > { %v5201_v59 = vsel %vm4415_vm9, %v5193_v61, %v5186_v50  ;;  %v5194_v6 = vsel %vm4415_vm9, %v5192_v1, %v5193_v61  ;;  %v6740_v24 = vpop.f32.mrb[72].mxu0 }
0x104a   : > { %v5202_v5 = vsel %vm4415_vm9, 0.0, %v5201_v59  ;;  %v11020_v43 = vadd.f32 %v6723_v38, %v5194_v6  ;;  %v6741_v52 = vpop.f32.mrb[73].mxu0 }
0x104b   : > { %v5405_v15 = vadd.f32 %v10987_v10, %v5202_v5  ;;  %v11023_v62 = vadd.f32 %v6741_v52, %v6740_v24  ;;  %v6743_v22 = vpop.f32.mrb[74].mxu0 }
0x104c   : > { %v6744_v7 = vpop.f32.mrb[75].mxu0 }
0x104d   : > { %v6745_v18 = vadd.f32 %v6744_v7, %v6743_v22  ;;  %v5608_v50 = vrot.slane %v11023_v62, 1 }
0x104f   : > { %v5609_v47 = vrot.slane %v6745_v18, 1 }
0x1051   : > { %v5622_v31 = vsel %vm4849_vm15, %v5608_v50, %v5609_v47  ;;  %v6746_v48 = vpop.f32.mrb[76].mxu0 }
0x1052   : > { %v5632_v23 = vadd.f32 %v5622_v31, %v5405_v15  ;;  %v6747_v10 = vpop.f32.mrb[77].mxu0 }
0x1053   : > { %v6748_v34 = vadd.f32 %v6747_v10, %v6746_v48  ;;  %v6749_v26 = vpop.f32.mrb[78].mxu0 }
0x1054   : > { %v6750_v56 = vpop.f32.mrb[79].mxu0  ;;  %v5646_v27 = vadd.f32 %v11032_v28, %v5632_v23 }
0x1055   : > { %v5610_v55 = vrot.slane %v6748_v34, 1  ;;  %v6751_v41 = vadd.f32 %v6750_v56, %v6749_v26 }
0x1056   : > { %v5654_v2 = vmul.f32 %v11755_v57, %v5646_v27 }
0x1057   : > { %v5621_v30 = vsel %vm4849_vm15, %v5609_v47, %v5610_v55  ;;  %v5611_v14 = vrot.slane %v6751_v41, 1 }
0x1058   : > { %v5633_v0 = vadd.f32 %v5621_v30, %v10992_v51  ;;  %v5662_v53 = vadd.f32 %v5654_v2, %v10641_v40 }
0x1059   : > { %v5620_v16 = vsel %vm4849_vm15, %v5610_v55, %v5611_v14  ;;  %v6752_v20 = vpop.f32.mrb[80].mxu0 }
0x105a   : > { %v5634_v25 = vadd.f32 %v5620_v16, %v10996_v32  ;;  %v6753_v13 = vpop.f32.mrb[81].mxu0  ;;  %5674 = vadd.xlane.f32.xlu1 %v5662_v53  ;;  %v5647_v36 = vadd.f32 %v11032_v28, %v5633_v0 }
0x105b   : > { %v6754_v9 = vadd.f32 %v6753_v13, %v6752_v20  ;;  %v6755_v57 = vpop.f32.mrb[82].mxu0 }
0x105c   : > { %v6756_v1 = vpop.f32.mrb[83].mxu0  ;;  %v5655_v19 = vmul.f32 %v11756_v42, %v5647_v36  ;;  %v5648_v38 = vadd.f32 %v11032_v28, %v5634_v25 }
0x105d   : > { %v5612_v51 = vrot.slane %v6754_v9, 1  ;;  %v6757_v45 = vadd.f32 %v6756_v1, %v6755_v57 }
0x105e   : > { %v5663_v40 = vadd.f32 %v5655_v19, %v10645_v29  ;;  %v5656_v61 = vmul.f32 %v11758_v46, %v5648_v38 }
0x105f   : > { %v5619_v32 = vsel %vm4849_vm15, %v5611_v14, %v5612_v51  ;;  %v5613_v59 = vrot.slane %v6757_v45, 1 }
0x1060   : > { %v5635_v6 = vadd.f32 %v5619_v32, %v11000_v54  ;;  %5676 = vadd.xlane.f32.xlu0 %v5663_v40  ;;  %v5664_v24 = vadd.f32 %v5656_v61, %v10661_v4 }
0x1061   : > { %v5618_v42 = vsel %vm4849_vm15, %v5612_v51, %v5613_v59  ;;  %v6758_v5 = vpop.f32.mrb[84].mxu0 }
0x1062   : > { %v5636_v52 = vadd.f32 %v5618_v42, %v11004_v58  ;;  %v6759_v15 = vpop.f32.mrb[85].mxu0  ;;  %5678 = vadd.xlane.f32.xlu1 %v5664_v24  ;;  %v5649_v29 = vadd.f32 %v11032_v28, %v5635_v6 }
0x1063   : > { %v6760_v46 = vadd.f32 %v6759_v15, %v6758_v5  ;;  %v6761_v62 = vpop.f32.mrb[86].mxu0 }
0x1064   : > { %v6762_v22 = vpop.f32.mrb[87].mxu0  ;;  %v5657_v7 = vmul.f32 %v11757_v12, %v5649_v29  ;;  %v5650_v54 = vadd.f32 %v11032_v28, %v5636_v52 }
0x1065   : > { %v5614_v18 = vrot.slane %v6760_v46, 1  ;;  %v6763_v47 = vadd.f32 %v6762_v22, %v6761_v62 }
0x1066   : > { %v5665_v4 = vadd.f32 %v5657_v7, %v10667_v44  ;;  %v5658_v31 = vmul.f32 %v11760_v63, %v5650_v54 }
0x1067   : > { %v5617_v58 = vsel %vm4849_vm15, %v5613_v59, %v5614_v18  ;;  %v5615_v48 = vrot.slane %v6763_v47, 1  ;;  %v6524_v47 = vld [vmem:[%s5670_s30] ss:$0 sm:$0xff] }
0x1068   : > { %v5637_v23 = vadd.f32 %v5617_v58, %v11008_v33  ;;  %5680 = vadd.xlane.f32.xlu0 %v5665_v4  ;;  %v5666_v10 = vadd.f32 %v5658_v31, %v10685_v17 }
0x1069   : > { %v5616_v12 = vsel %vm4849_vm15, %v5614_v18, %v5615_v48  ;;  %v5623_v34 = vsel %vm4849_vm15, %v5615_v48, %v5608_v50  ;;  %v6525_v48 = vld [vmem:[%s5672_s11] ss:$0 sm:$0xff] }
0x106a   : > { %v5631_v44 = vsel %vm4873_vm0, 0.0, %v5623_v34  ;;  %v5638_v63 = vadd.f32 %v5616_v12, %v11012_v35  ;;  %5682 = vadd.xlane.f32.xlu1 %v5666_v10  ;;  %v5651_v26 = vadd.f32 %v11032_v28, %v5637_v23 }
0x106b   : > { %v5639_v56 = vadd.f32 %v5631_v44, %v11020_v43 }
0x106c   : > { %v5659_v33 = vmul.f32 %v11759_v21, %v5651_v26  ;;  %v5652_v17 = vadd.f32 %v11032_v28, %v5638_v63 }
0x106d   : > { %v5653_v27 = vadd.f32 %v11032_v28, %v5639_v56 }
0x106e   : > { %v5667_v55 = vadd.f32 %v5659_v33, %v10681_v3  ;;  %v5660_v11 = vmul.f32 %v11762_v49, %v5652_v17 }
0x106f   : > { %v5661_v8 = vmul.f32 %v11761_v37, %v5653_v27 }
0x1070   : > { %5684 = vadd.xlane.f32.xlu0 %v5667_v55  ;;  %v5668_v35 = vadd.f32 %v5660_v11, %v10704_v60 }
0x1071   : > { %v5669_v50 = vadd.f32 %v5661_v8, %v10701_v39 }
0x1072   : > { %5686 = vadd.xlane.f32.xlu1 %v5668_v35 }
0x1074   : > { %5688 = vadd.xlane.f32.xlu0 %v5669_v50 }
0x10e7   : > { %v5675_v43 = vpop.xlane.xlu1 %5674 }
0x10e8   : > { %v5690_v41 = vmul.f32 0.0078125, %v5675_v43 }
0x10ea   : > { %v5698_v21 = vsub.f32 %v5662_v53, %v5690_v41 }
0x10ec   : > { %v5706_v2 = vmul.f32 %v5698_v21, %v5698_v21 }
0x10ed   : > { %v5677_v30 = vpop.xlane.xlu0 %5676 }
0x10ee   : > { %v5691_v14 = vmul.f32 0.0078125, %v5677_v30  ;;  %5714 = vadd.xlane.f32.xlu1 %v5706_v2 }
0x10ef   : > { %v5679_v28 = vpop.xlane.xlu1 %5678 }
0x10f0   : > { %v5699_v3 = vsub.f32 %v5663_v40, %v5691_v14  ;;  %v5692_v0 = vmul.f32 0.0078125, %v5679_v28 }
0x10f2   : > { %v11081_v49 = vsub.f32 %v5664_v24, %v5692_v0  ;;  %v5707_v37 = vmul.f32 %v5699_v3, %v5699_v3 }
0x10f4   : > { %5716 = vadd.xlane.f32.xlu0 %v5707_v37  ;;  %v5708_v60 = vmul.f32 %v11081_v49, %v11081_v49 }
0x10f5   : > { %v5681_v39 = vpop.xlane.xlu0 %5680 }
0x10f6   : > { %v5693_v16 = vmul.f32 0.0078125, %v5681_v39  ;;  %5718 = vadd.xlane.f32.xlu1 %v5708_v60 }
0x10f7   : > { %v5683_v20 = vpop.xlane.xlu1 %5682 }
0x10f8   : > { %v11085_v25 = vsub.f32 %v5665_v4, %v5693_v16  ;;  %v5694_v53 = vmul.f32 0.0078125, %v5683_v20 }
0x10fa   : > { %v11087_v13 = vsub.f32 %v5666_v10, %v5694_v53  ;;  %v5709_v36 = vmul.f32 %v11085_v25, %v11085_v25 }
0x10fc   : > { %5720 = vadd.xlane.f32.xlu0 %v5709_v36  ;;  %v5710_v9 = vmul.f32 %v11087_v13, %v11087_v13 }
0x10fd   : > { %v5685_v57 = vpop.xlane.xlu0 %5684 }
0x10fe   : > { %v5695_v1 = vmul.f32 0.0078125, %v5685_v57  ;;  %5722 = vadd.xlane.f32.xlu1 %v5710_v9 }
0x10ff   : > { %v5687_v19 = vpop.xlane.xlu1 %5686 }
0x1100   : > { %v11093_v38 = vsub.f32 %v5667_v55, %v5695_v1  ;;  %v5696_v51 = vmul.f32 0.0078125, %v5687_v19 }
0x1101   : > { %v5689_v45 = vpop.xlane.xlu0 %5688 }
0x1102   : > { %v11095_v40 = vsub.f32 %v5668_v35, %v5696_v51  ;;  %v5697_v61 = vmul.f32 0.0078125, %v5689_v45  ;;  %v5711_v32 = vmul.f32 %v11093_v38, %v11093_v38 }
0x1104   : > { %v11099_v59 = vsub.f32 %v5669_v50, %v5697_v61  ;;  %5724 = vadd.xlane.f32.xlu0 %v5711_v32  ;;  %v5712_v6 = vmul.f32 %v11095_v40, %v11095_v40 }
0x1106   : > { %5726 = vadd.xlane.f32.xlu1 %v5712_v6  ;;  %v5713_v24 = vmul.f32 %v11099_v59, %v11099_v59 }
0x1108   : > { %5728 = vadd.xlane.f32.xlu0 %v5713_v24 }
0x117b   : > { %v5715_v42 = vpop.xlane.xlu1 %5714 }
0x117c   : > { %v5730_v5 = vmul.f32 0.0078125, %v5715_v42 }
0x117e   : > { %v5738_v52 = vadd.f32 1e-05, %v5730_v5 }
0x1180   : > { %7605 = vrsqrt.f32 %v5738_v52 }
0x1181   : > { %v5717_v15 = vpop.xlane.xlu0 %5716 }
0x1182   : > { %v5731_v29 = vmul.f32 0.0078125, %v5717_v15 }
0x1183   : > { %v5719_v46 = vpop.xlane.xlu1 %5718 }
0x1184   : > { %v5739_v62 = vadd.f32 1e-05, %v5731_v29  ;;  %v5732_v22 = vmul.f32 0.0078125, %v5719_v46 }
0x1186   : > { %7607 = vrsqrt.f32 %v5739_v62  ;;  %v5740_v7 = vadd.f32 1e-05, %v5732_v22 }
0x1188   : > { %7609 = vrsqrt.f32 %v5740_v7 }
0x1189   : > { %v5721_v54 = vpop.xlane.xlu0 %5720 }
0x118a   : > { %v7606_v18 = vpop.eup %7605  ;;  %v5733_v4 = vmul.f32 0.0078125, %v5721_v54 }
0x118b   : > { %v5754_v31 = vmul.f32 %v7606_v18, %v5698_v21  ;;  %v5723_v58 = vpop.xlane.xlu1 %5722 }
0x118c   : > { %v5741_v23 = vadd.f32 1e-05, %v5733_v4  ;;  %v5734_v10 = vmul.f32 0.0078125, %v5723_v58 }
0x118d   : > { %v5768_v12 = vmul.f32 %v6524_v47, %v5754_v31 }
0x118e   : > { %7611 = vrsqrt.f32 %v5741_v23  ;;  %v5742_v34 = vadd.f32 1e-05, %v5734_v10 }
0x118f   : > { %v11113_v44 = vadd.f32 %v6525_v48, %v5768_v12 }
0x1190   : > { %v7608_v63 = vpop.eup %7607  ;;  %7613 = vrsqrt.f32 %v5742_v34 }
0x1191   : > { %v5755_v26 = vmul.f32 %v7608_v63, %v5699_v3  ;;  %v5725_v56 = vpop.xlane.xlu0 %5724  ;;  %5794 = vst [vmem:[#allocation2] sm:$0xff] (!%p6526_p13), %v11113_v44 }
0x1192   : > { %v7610_v33 = vpop.eup %7609  ;;  %v5735_v17 = vmul.f32 0.0078125, %v5725_v56 }
0x1193   : > { %v5769_v27 = vmul.f32 %v6524_v47, %v5755_v26  ;;  %v5756_v55 = vmul.f32 %v7610_v33, %v11081_v49  ;;  %v5727_v11 = vpop.xlane.xlu1 %5726 }
0x1194   : > { %v5743_v8 = vadd.f32 1e-05, %v5735_v17  ;;  %v5736_v35 = vmul.f32 0.0078125, %v5727_v11 }
0x1195   : > { %v5783_v50 = vadd.f32 %v6525_v48, %v5769_v27  ;;  %v5770_v43 = vmul.f32 %v6524_v47, %v5756_v55  ;;  %v5729_v41 = vpop.xlane.xlu0 %5728 }
0x1196   : > { %7615 = vrsqrt.f32 %v5743_v8  ;;  %v5744_v21 = vadd.f32 1e-05, %v5736_v35  ;;  %v5737_v2 = vmul.f32 0.0078125, %v5729_v41 }
0x1197   : > { %v11116_v30 = vadd.f32 %v6525_v48, %v5770_v43  ;;  %5795 = vst [vmem:[#allocation2 + $0x8] sm:$0xff] (!%p6526_p13), %v5783_v50 }
0x1198   : > { %v7612_v14 = vpop.eup %7611  ;;  %7617 = vrsqrt.f32 %v5744_v21  ;;  %v5745_v28 = vadd.f32 1e-05, %v5737_v2 }
0x1199   : > { %v5757_v3 = vmul.f32 %v7612_v14, %v11085_v25  ;;  %5796 = vst [vmem:[#allocation2 + $0x10] sm:$0xff] (!%p6526_p13), %v11116_v30 }
0x119a   : > { %v7614_v0 = vpop.eup %7613  ;;  %7619 = vrsqrt.f32 %v5745_v28 }
0x119b   : > { %v5771_v37 = vmul.f32 %v6524_v47, %v5757_v3  ;;  %v5758_v49 = vmul.f32 %v7614_v0, %v11087_v13 }
0x119d   : > { %v11120_v60 = vadd.f32 %v6525_v48, %v5771_v37  ;;  %v5772_v39 = vmul.f32 %v6524_v47, %v5758_v49 }
0x119f   : > { %v5786_v16 = vadd.f32 %v6525_v48, %v5772_v39  ;;  %5797 = vst [vmem:[#allocation2 + $0x18] sm:$0xff] (!%p6526_p13), %v11120_v60 }
0x11a0   : > { %v7616_v20 = vpop.eup %7615 }
0x11a1   : > { %v5759_v53 = vmul.f32 %v7616_v20, %v11093_v38  ;;  %5798 = vst [vmem:[#allocation2 + $0x20] sm:$0xff] (!%p6526_p13), %v5786_v16 }
0x11a2   : > { %v7618_v36 = vpop.eup %7617 }
0x11a3   : > { %v5773_v9 = vmul.f32 %v6524_v47, %v5759_v53  ;;  %v5760_v57 = vmul.f32 %v7618_v36, %v11095_v40  ;;  %5793 = sbr.rel (%p6526_p13) target bundleno = 4524 (0x11ac), region = 132 }
0x11a4   : > { %v7620_v1 = vpop.eup %7619 }
0x11a5   : > { %v5787_v19 = vadd.f32 %v6525_v48, %v5773_v9  ;;  %v5774_v51 = vmul.f32 %v6524_v47, %v5760_v57  ;;  %v5761_v25 = vmul.f32 %v7620_v1, %v11099_v59 }
0x11a7   : > { %v11125_v45 = vadd.f32 %v6525_v48, %v5774_v51  ;;  %v5775_v61 = vmul.f32 %v6524_v47, %v5761_v25  ;;  %5799 = vst [vmem:[#allocation2 + $0x28] sm:$0xff] (!%p6526_p13), %v5787_v19 }
0x11a9   : > { %v11127_v13 = vadd.f32 %v6525_v48, %v5775_v61  ;;  %5800 = vst [vmem:[#allocation2 + $0x30] sm:$0xff] (!%p6526_p13), %v11125_v45 }
0x11ab   : > { %5801 = vst [vmem:[#allocation2 + $0x38] sm:$0xff] %v11127_v13 }
0x11ac PF: > { %p6527_p2 = scmp.ne.s32.totalorder %s7971_s27, 2 }
0x11ad   : > { %v7629_v38 = vld [vmem:[#allocation17] sm:$0xff] (!%p6527_p2)   ;;  %v7630_v40 = vld [vmem:[#allocation17 + $0x8] sm:$0xff] (!%p6527_p2)   ;;  %v7631_v32 = vld [vmem:[#allocation17 + $0x10] sm:$0xff] (!%p6527_p2)   ;;  %s11773_s29 = sld [smem:[#allocation67_spill]] (!%p6527_p2) }
0x11ae   : > { %5805 = sbr.rel (%p6527_p2) target bundleno = 4778 (0x12aa), region = 136  ;;  %6952 = vmatprep.subr.bf16.mxu0 (!%p6527_p2), %v7629_v38  ;;  %7000 = vmatprep.subr.bf16.mxu1 (!%p6527_p2), %v7629_v38  ;;  %v7632_v59 = vld [vmem:[#allocation17 + $0x18] sm:$0xff] (!%p6527_p2)   ;;  %v11770_v6 = vld [vmem:[#allocation38_spill] sm:$0xff] (!%p6527_p2)  ;;  %v11771_v42 = vld [vmem:[#allocation39_spill] sm:$0xff] (!%p6527_p2) }
0x11af   : > { %6953 = vmatpush3.bf16.msra.mxu0 (!%p6527_p2), %v7629_v38  ;;  %7008 = vmatpush3.bf16.msra.mxu1 (!%p6527_p2), %v7629_v38  ;;  %v5806_v24 = vmul.f32 (!%p6527_p2), %v11770_v6, %v11113_v44  ;;  %v5807_v5 = vmul.f32 (!%p6527_p2), %v11771_v42, %v5783_v50  ;;  %v11772_v52 = vld [vmem:[#allocation42_spill] sm:$0xff] (!%p6527_p2)  ;;  %v11775_v62 = vld [vmem:[#allocation43_spill] sm:$0xff] (!%p6527_p2)  ;;  %v7633_v10 = vld [vmem:[#allocation17 + $0x20] sm:$0xff] (!%p6527_p2)  }
0x11b0   : > { %6954 = vmatprep.subr.bf16.mxu0 (!%p6527_p2), %v7630_v40  ;;  %7001 = vmatprep.subr.bf16.mxu1 (!%p6527_p2), %v7630_v40  ;;  %v5810_v15 = vmul.f32 (!%p6527_p2), %v11772_v52, %v5786_v16  ;;  %v5811_v22 = vmul.f32 (!%p6527_p2), %v11775_v62, %v5787_v19  ;;  %v7634_v63 = vld [vmem:[#allocation17 + $0x28] sm:$0xff] (!%p6527_p2)   ;;  %v7635_v27 = vld [vmem:[#allocation17 + $0x30] sm:$0xff] (!%p6527_p2)   ;;  %v11776_v55 = vld [vmem:[#allocation40_spill] sm:$0xff] (!%p6527_p2) }
0x11b1   : > { %v5808_v11 = vmul.f32 (!%p6527_p2), %v11776_v55, %v11116_v30  ;;  %v11777_v8 = vld [vmem:[#allocation41_spill] sm:$0xff] (!%p6527_p2)  ;;  %v11778_v50 = vld [vmem:[#allocation44_spill] sm:$0xff] (!%p6527_p2) }
0x11b2   : > { %v5809_v35 = vmul.f32 (!%p6527_p2), %v11777_v8, %v11120_v60  ;;  %v5812_v43 = vmul.f32 (!%p6527_p2), %v11778_v50, %v11125_v45  ;;  %v11779_v41 = vld [vmem:[#allocation45_spill] sm:$0xff] (!%p6527_p2)  ;;  %v7636_v30 = vld [vmem:[#allocation17 + $0x38] sm:$0xff] (!%p6527_p2)  }
0x11b3   : > { %6955 = vmatpush3.bf16.msra.mxu0 (!%p6527_p2), %v7630_v40  ;;  %7009 = vmatpush3.bf16.msra.mxu1 (!%p6527_p2), %v7630_v40  ;;  %s11774_s19 = smov (!%p6527_p2), %s11773_s29  ;;  %v5814_v29 = vld [vmem:[%s11773_s29] sm:$0xff] (!%p6527_p2)  ;;  %v5813_v21 = vmul.f32 (!%p6527_p2), %v11779_v41, %v11127_v13  ;;  %s11780_s29 = sld [smem:[#allocation68_spill]] (!%p6527_p2) }
0x11b4   : > { %6956 = vmatprep.subr.bf16.mxu0 (!%p6527_p2), %v7631_v32  ;;  %7002 = vmatprep.subr.bf16.mxu1 (!%p6527_p2), %v7631_v32  ;;  %v5815_v46 = vld [vmem:[%s11774_s19 + $0x8] sm:$0xff] (!%p6527_p2)  ;;  %v5818_v7 = vld [vmem:[%s11774_s19 + $0x20] sm:$0xff] (!%p6527_p2)  ;;  %v5822_v54 = vmul.f32 (!%p6527_p2), %v11770_v6, %v5814_v29  ;;  %v5816_v26 = vld [vmem:[%s11774_s19 + $0x10] sm:$0xff] (!%p6527_p2) }
0x11b5   : > { %v5823_v18 = vmul.f32 %v11771_v42, %v5815_v46  ;;  %v5819_v47 = vld [vmem:[%s11774_s19 + $0x28] sm:$0xff]  ;;  %v5826_v4 = vmul.f32 %v11772_v52, %v5818_v7  ;;  %v5817_v56 = vld [vmem:[%s11774_s19 + $0x18] sm:$0xff]  ;;  %v5820_v33 = vld [vmem:[%s11774_s19 + $0x30] sm:$0xff]  ;;  %v5824_v2 = vmul.f32 %v11776_v55, %v5816_v26 }
0x11b6   : > { %v5827_v31 = vmul.f32 %v11775_v62, %v5819_v47  ;;  %v5830_v58 = vadd.f32 %v5822_v54, %v5806_v24  ;;  %v5821_v17 = vld [vmem:[%s11774_s19 + $0x38] sm:$0xff]  ;;  %v5825_v14 = vmul.f32 %v11777_v8, %v5817_v56  ;;  %v5828_v28 = vmul.f32 %v11778_v50, %v5820_v33 }
0x11b7   : > { %6957 = vmatpush3.bf16.msra.mxu0 %v7631_v32  ;;  %7010 = vmatpush3.bf16.msra.mxu1 %v7631_v32  ;;  %v5831_v48 = vadd.f32 %v5823_v18, %v5807_v5  ;;  %v5834_v23 = vadd.f32 %v5826_v4, %v5810_v15  ;;  %v5829_v3 = vmul.f32 %v11779_v41, %v5821_v17 }
0x11b8   : > { %6958 = vmatprep.subr.bf16.mxu0 %v7632_v59  ;;  %7003 = vmatprep.subr.bf16.mxu1 %v7632_v59  ;;  %v5835_v12 = vadd.f32 %v5827_v31, %v5811_v22  ;;  %v5832_v0 = vadd.f32 %v5824_v2, %v5808_v11  ;;  %v5833_v37 = vadd.f32 %v5825_v14, %v5809_v35 }
0x11b9   : > { %v5838_v34 = vpack.c.bf16 %v5831_v48, %v5830_v58  ;;  %v5836_v49 = vadd.f32 %v5828_v28, %v5812_v43  ;;  %v5837_v60 = vadd.f32 %v5829_v3, %v5813_v21  ;;  %v6528_v20 = vld [vmem:[%s11780_s29] ss:$0 sm:$0xff] }
0x11ba   : > { %v5840_v44 = vpack.c.bf16 %v5835_v12, %v5834_v23  ;;  %v5839_v39 = vpack.c.bf16 %v5833_v37, %v5832_v0 }
0x11bb   : > { %6959 = vmatpush3.bf16.msra.mxu0 %v7632_v59  ;;  %7011 = vmatpush3.bf16.msra.mxu1 %v7632_v59  ;;  %v5841_v16 = vpack.c.bf16 %v5837_v60, %v5836_v49 }
0x11bc   : > { %6960 = vmatprep.subr.bf16.mxu0 %v7633_v10  ;;  %7004 = vmatprep.subr.bf16.mxu1 %v7633_v10 }
0x11bd   : > { %6968 = vmatprep.mubr.bf16.mxu0 %v5838_v34  ;;  %6972 = vmatprep.mubr.bf16.mxu1 %v5840_v44 }
0x11bf   : > { %6961 = vmatpush3.bf16.msra.mxu0 %v7633_v10  ;;  %7012 = vmatpush3.bf16.msra.mxu1 %v7633_v10 }
0x11c0   : > { %6962 = vmatprep.subr.bf16.mxu0 %v7634_v63  ;;  %7005 = vmatprep.subr.bf16.mxu1 %v7634_v63 }
0x11c3   : > { %6963 = vmatpush3.bf16.msra.mxu0 %v7634_v63  ;;  %7013 = vmatpush3.bf16.msra.mxu1 %v7634_v63 }
0x11c4   : > { %6964 = vmatprep.subr.bf16.mxu0 %v7635_v27  ;;  %7006 = vmatprep.subr.bf16.mxu1 %v7635_v27 }
0x11c7   : > { %6965 = vmatpush3.bf16.msra.mxu0 %v7635_v27  ;;  %7014 = vmatpush3.bf16.msra.mxu1 %v7635_v27 }
0x11c8   : > { %6966 = vmatprep.subr.bf16.mxu0 %v7636_v30  ;;  %7007 = vmatprep.subr.bf16.mxu1 %v7636_v30 }
0x11cb   : > { %6967 = vmatpush3.bf16.msra.mxu0 %v7636_v30  ;;  %7015 = vmatpush3.bf16.msra.mxu1 %v7636_v30 }
0x11ce   : > { %6969 = vmatmul.mubr.bf16.vlgmr.msra.gmra.mrb[0].mxu0 %v5839_v39  ;;  %6973 = vmatmul.mubr.bf16.vlgmr.msra.gmra.mrb[0].mxu1 %v5841_v16 }
0x12a1   : > { %v6970_v53 = vpop.f32.mrb[0].mxu0  ;;  %v6974_v36 = vpop.f32.mrb[0].mxu1 }
0x12a2   : > { %v5956_v9 = vadd.f32 %v6970_v53, %v6528_v20  ;;  %v5972_v57 = vadd.f32 %v6974_v36, %v6528_v20  ;;  %v5947_v1 = vpop.f32.mrb[1].mxu0  ;;  %v5963_v19 = vpop.f32.mrb[1].mxu1 }
0x12a3   : > { %v5948_v51 = vadd.f32 %v6528_v20, %v5947_v1  ;;  %v5964_v25 = vadd.f32 %v6528_v20, %v5963_v19  ;;  %v6971_v45 = vpop.f32.mrb[2].mxu0  ;;  %v6975_v61 = vpop.f32.mrb[2].mxu1 }
0x12a4   : > { %v5980_v13 = vmul.f32 %v11776_v55, %v5956_v9  ;;  %v5984_v38 = vmul.f32 %v11778_v50, %v5972_v57  ;;  %v5959_v40 = vadd.f32 %v6971_v45, %v6528_v20  ;;  %v5975_v32 = vadd.f32 %v6975_v61, %v6528_v20  ;;  %v5950_v59 = vpop.f32.mrb[3].mxu0  ;;  %v5966_v24 = vpop.f32.mrb[3].mxu1 }
0x12a5   : > { %v5978_v5 = vmul.f32 %v11770_v6, %v5948_v51  ;;  %v5982_v15 = vmul.f32 %v11772_v52, %v5964_v25  ;;  %v5951_v29 = vadd.f32 %v6528_v20, %v5950_v59  ;;  %v5967_v46 = vadd.f32 %v6528_v20, %v5966_v24 }
0x12a6   : > { %5988 = vst [vmem:[%s8482_s18 + $0x10] sm:$0xff] %v5980_v13  ;;  %5992 = vst [vmem:[%s8482_s18 + $0x30] sm:$0xff] %v5984_v38  ;;  %v5981_v22 = vmul.f32 %v11777_v8, %v5959_v40  ;;  %v5985_v7 = vmul.f32 %v11779_v41, %v5975_v32 }
0x12a7   : > { %5986 = vst [vmem:[%s8482_s18] sm:$0xff] %v5978_v5  ;;  %5990 = vst [vmem:[%s8482_s18 + $0x20] sm:$0xff] %v5982_v15  ;;  %v5979_v54 = vmul.f32 %v11771_v42, %v5951_v29  ;;  %v5983_v18 = vmul.f32 %v11775_v62, %v5967_v46 }
0x12a8   : > { %5989 = vst [vmem:[%s8482_s18 + $0x18] sm:$0xff] %v5981_v22  ;;  %5993 = vst [vmem:[%s8482_s18 + $0x38] sm:$0xff] %v5985_v7 }
0x12a9   : > { %5987 = vst [vmem:[%s8482_s18 + $0x8] sm:$0xff] %v5979_v54  ;;  %5991 = vst [vmem:[%s8482_s18 + $0x28] sm:$0xff] %v5983_v18 }
0x12aa PF: > { %s11781_s26 = sld [smem:[#allocation33_spill]]  ;;  %s6547_s25 = sshll.u32 %s7975_s28, 10 }
0x12ab   : > { %s11782_s21 = sld [smem:[#allocation69_spill]]  ;;  %s6008_s15 = sshll.u32 %s8482_s18, 4  ;;  %s11207_s15 = int_to_ptr.vmem [resolvable:$true] %s6008_s15 }
0x12ac   : > { %s11211_s23 = scalar_lea.sflag [#allocation7], %s700_s3  ;;  %s7871_s0 = scalar_lea.vmem %s11207_s15, 1024 }
0x12ad   : > { %p7872_p4 = scmp.ne.s32.totalorder %s11207_s15, %s7871_s0  ;;  %s8020_s28 = smov [#allocation19]  }
0x12ae   : > { %s7875_s30 = sshll.u32 %s8020_s28, 4  ;;  %s7876_s30 = int_to_ptr.vmem [resolvable:$false] %s7875_s30 }
0x12af   : > { %s7877_s24 = scalar_lea.vmem %s7876_s30, 2048  ;;  %p7878_p10 = scmp.lt.s32.totalorder %s11207_s15, %s7876_s30 }
0x12b0   : > { %p11783_p7 = scmp.ne.s32.totalorder %s11781_s26, 0  ;;  %p7879_p11 = scmp.lt.s32.totalorder %s7877_s24, %s7871_s0 }
0x12b1   : > { %s11204_s22 = scalar_lea.hbm %s11782_s21, %s6547_s25 }
0x12b2   : > { %p7873_p8 = pnand %p7872_p4, %p11783_p7  ;;  %p7880_p0 = por %p7879_p11, %p7878_p10 }
0x12b4   : > { %p7874_p9 = pneg %p7873_p8 }
0x12b6   : > { %p7881_p1 = pnand %p7880_p0, %p7874_p9 }
0x12b8   : > { %7884 = shalt.err (!%p7881_p1)
}
0x12b9   : > { %s7885_s3 = scalar_lea.hbm %s11204_s22, 1024  ;;  %s7889_s14 = scalar_lea.hbm %s11782_s21, 2048 }
0x12ba   : > { %p7886_p6 = scmp.ne.s32.totalorder %s11204_s22, %s7885_s3  ;;  %p7890_p12 = scmp.lt.u32.totalorder %s11204_s22, %s11782_s21 }
0x12bb   : > { %p7891_p13 = scmp.lt.u32.totalorder %s7889_s14, %s7885_s3  ;;  %p7893_p4 = scmp.lt.u32.totalorder %s7885_s3, %s11204_s22 }
0x12bc   : > { %p7887_p5 = pnand %p7886_p6, %p11783_p7 }
0x12bd   : > { %p7892_p2 = por %p7891_p13, %p7890_p12 }
0x12be   : > { %p7888_p3 = pneg %p7887_p5 }
0x12bf   : > { %p7894_p8 = por %p7893_p4, %p7892_p2 }
0x12c1   : > { %p7895_p9 = pnand %p7894_p8, %p7888_p3 }
0x12c3   : > { %7898 = shalt.err (!%p7895_p9)
}
0x12c4   : > { %s8021_s5 = smov 128   ;;  %s8022_s29 = smov 8  }
0x12c5   : > { %7056 = dma.vmem_to_hbm [thread:$0]  (%p11783_p7), %s11207_s15, 1024, %s11204_s22, %s11211_s23, %s8021_s5, %s8021_s5, %s8022_s29  }
0x12c6 PF: > { %s11784_s25 = sld [smem:[#allocation31_spill]]  ;;  %s11785_s2 = sld [smem:[#allocation27_spill]] }
0x12c7   : > { %s11786_s1 = sld [smem:[#allocation35_spill]] }
0x12cc   : > { %p7103_p10 = scmp.ge.s32.totalorder %s11784_s25, 2  ;;  %s6023_s0 = sand.u32 1, %s11785_s2  }
0x12cd   : > { %p11787_p11 = scmp.ne.s32.totalorder %s11786_s1, 0  ;;  %s6024_s28 = scalar_lea.sflag [#allocation7], %s6023_s0 }
0x12cf   : > { %p7084_p0 = pnand %p7103_p10, %p11787_p11 }
0x12d1   : > { %7954 = dma.done.wait (!%p7084_p0), %s6024_s28, 1024  }
0x12d2   : > { %7956 = vsyncadd (!%p7084_p0), %s6024_s28, 4294966272  ;;  %s41_s30 = sadd.s32 1, %s11784_s25   ;;  %s11788_s24 = sld [smem:[#allocation28_spill]] }
0x12d3   : > { %p38_p1 = scmp.ge.s32.totalorder %s41_s30, 8   ;;  %s11789_s26 = sld [smem:[#allocation36_spill]] }
0x12d4   : > { %s11790_s27 = sld [smem:[#allocation29_spill]]  ;;  %s11791_s28 = sld [smem:[#allocation30_spill]] }
0x12d5   : > { %s11792_s29 = sld [smem:[#allocation32_spill]]  ;;  %s11793_s0 = sld [smem:[#allocation34_spill]] }
0x12d6   : > { %s11794_s3 = smov %s7963_s13  ;;  %40 = sbr.rel (!%p38_p1) target bundleno = 30 (0x1e), region = 190 }
0x12d8   : > { %s11795_s13 = smov %s11788_s24 }
0x12dd   :  { %6029 = vsyncpa [#allocation6], 1 }
0x12de   :  { %6031 = vsyncpa [#allocation6 + $0x1], 1 }
0x12df   :  { %6032 = vsyncpa [#allocation9], 1 }
0x12e0   :  { %6033 = vsyncpa [#allocation12], 1 }
0x12e1   :  { %6034 = vsyncpa [#allocation15], 1 }
0x12e2   :  { %6035 = vsyncpa [#allocation18], 1 }
0x12e3   :  { %6036 = vsyncpa [#allocation7], 1 }
0x12e4   :  { %6038 = vsyncpa [#allocation7 + $0x1], 1 }

</bundles_post_ra>
